<compile_context>
chip_gen: v7x
topology: tpu7x:2x2x1
jax: 0.10.0
libtpu: 0.0.40
codegen_flags: <defaults>
</compile_context>

<pallas_src>
import numpy as np
import jax
import jax.numpy as jnp
from jax.experimental import pallas as pl
from jax.experimental.pallas import tpu as pltpu

# ----- configuration (mirrors quant_arc_interface.args) -----
SECOND_QUBITS = 4          # qubits in the second circuit
Q_DEPTH = 3                # variational depth (args.q_depth)
TARGET_CLASS = 4           # output width (args.target_class) == measured qubits
Q_DELTA = 0.01             # args.q_delta
BATCH = 256                # example batch
DIM = 2 ** SECOND_QUBITS   # statevector dimension (16)
NUM_W = Q_DEPTH * SECOND_QUBITS
MAX_TILE = 2048            # single grid step up to this batch size


# ----- host-side constant gate matrices (row-vector convention, plain numpy) -----
def _ry_generators(n):
    """A[q] = (I ⊗ [[0,-1],[1,0]] ⊗ I)^T for qubit q (qubit 0 = MSB)."""
    G = np.array([[0.0, -1.0], [1.0, 0.0]], dtype=np.float64)
    mats = []
    for q in range(n):
        m = np.kron(np.kron(np.eye(2 ** q), G), np.eye(2 ** (n - 1 - q)))
        mats.append(m.T)
    return np.stack(mats).astype(np.float32)          # (n, D, D)


def _cnot(n, c, t):
    D = 2 ** n
    m = np.zeros((D, D), dtype=np.float64)
    for i in range(D):
        bc = (i >> (n - 1 - c)) & 1
        j = i ^ ((1 << (n - 1 - t)) if bc else 0)
        m[j, i] = 1.0
    return m


def _entangler(n):
    """PennyLane-style entangling layer, transposed for row-vector right-mult."""
    U = np.eye(2 ** n)
    for i in range(0, n - 1, 2):
        U = _cnot(n, i, i + 1) @ U
    for i in range(1, n - 1, 2):
        U = _cnot(n, i, i + 1) @ U
    return U.T.astype(np.float32)                     # (D, D)


def _zsign(n, n_meas):
    """Z[i, q] = +1 if bit q of basis state i is 0 else -1."""
    D = 2 ** n
    z = np.zeros((D, n_meas), dtype=np.float32)
    for i in range(D):
        for q in range(n_meas):
            z[i, q] = 1.0 - 2.0 * ((i >> (n - 1 - q)) & 1)
    return z


_A_T = _ry_generators(SECOND_QUBITS)          # (n, D, D) transposed RY generators
_ENT_T = _entangler(SECOND_QUBITS)            # (D, D)    transposed entangler
_Z = _zsign(SECOND_QUBITS, TARGET_CLASS)      # (D, n_meas)


def _pack_gates():
    """One packed constant tensor for the kernel:
       [0]=I, [1]=entangler^T, [2..2+n-1]=RY generators^T, [2+n]=Z padded to (D,D)."""
    z_pad = np.zeros((DIM, DIM), dtype=np.float32)
    z_pad[:, :TARGET_CLASS] = _Z
    return np.stack([np.eye(DIM, dtype=np.float32), _ENT_T, *_A_T, z_pad])


_GATES = _pack_gates()                        # (3 + SECOND_QUBITS, D, D) = (7, 16, 16)


# ----- Pallas kernel -----
def qnet2_kernel(x_ref, cs_ref, g_ref, o_ref, u_ref):
    # x_ref : (tb, n)       input features (batch on sublanes)
    # cs_ref: (2, NUM_W)    [cos(w/2); sin(w/2)] of the variational weights
    # g_ref : (7, D, D)     packed constant gates (eye, entangler, RY gens, Z)
    # o_ref : (tb, n_meas)  PauliZ expectation values
    # u_ref : (D, D)        persistent VMEM scratch holding the folded unitary
    tb, n = x_ref.shape
    d = u_ref.shape[0]
    n_meas = o_ref.shape[1]

    # Fold the whole variational section (3 entanglers + 12 weight-RYs) into ONE
    # (D, D) row-convention matrix, once, on the otherwise idle MXU.
    @pl.when(pl.program_id(0) == 0)
    def _():
        eye = g_ref[0]
        ent = g_ref[1]
        u = eye
        for k in range(Q_DEPTH):
            u = jnp.dot(u, ent, preferred_element_type=jnp.float32)
            for q in range(n):
                idx = k * n + q
                wc = cs_ref[0:1, idx:idx + 1]          # (1,1) broadcasts over (D,D)
                ws = cs_ref[1:2, idx:idx + 1]
                r = wc * eye + ws * g_ref[2 + q]
                u = jnp.dot(u, r, preferred_element_type=jnp.float32)
        u_ref[...] = u

    # q_in = tanh(x) * pi/2 ; RY uses half-angles -> tanh(x) * pi/4
    half = jnp.tanh(x_ref[...]) * np.float32(np.pi / 4.0)   # (tb, n)
    c = jnp.cos(half)
    s = jnp.sin(half)
    inv_sqrt2 = np.float32(1.0 / np.sqrt(2.0))
    amp0 = (c - s) * inv_sqrt2        # per-qubit |0> amplitude after H + RY(q_in)
    amp1 = (c + s) * inv_sqrt2        # per-qubit |1> amplitude

    # H|0..0> followed by per-qubit RY(input) is a product state:
    #   state[b, i] = prod_q amp_{bit_q(i)}[b, q]   (pure VPU broadcast + FMA)
    basis = jax.lax.broadcasted_iota(jnp.int32, (1, d), 1)          # (1, D)
    state = jnp.ones((tb, d), dtype=jnp.float32)
    for q in range(n):
        bit = ((basis >> (n - 1 - q)) & 1).astype(jnp.float32)      # (1, D) 0/1
        a0 = amp0[:, q:q + 1]                                       # (tb, 1)
        a1 = amp1[:, q:q + 1]
        state = state * (a0 + bit * (a1 - a0))                      # (tb, D)

    # Entire variational circuit: one matmul against the folded unitary.
    state = jnp.dot(state, u_ref[...], preferred_element_type=jnp.float32)

    # PauliZ readout: <Z_m> = sum_i |psi_i|^2 * (1 - 2*bit_m(i)); the Z sign
    # table is lane-padded to (D, D) inside the packed constant tensor.
    probs = state * state
    o_full = jnp.dot(probs, g_ref[2 + n], preferred_element_type=jnp.float32)
    o_ref[...] = o_full[:, :n_meas]


def _pick_tile(b):
    """Largest lane-friendly batch tile; one un-tiled block for small batches."""
    if b <= MAX_TILE:
        return b
    for tb in (2048, 1024, 512, 256, 128):
        if b % tb == 0:
            return tb
    return b   # ragged large batch: fall back to a single block


@jax.jit
def qnet2_forward(x, q_params):
    b, n = x.shape
    d = DIM
    n_meas = TARGET_CLASS
    n_gates = _GATES.shape[0]

    # cos/sin of the RY half-angles: one tiny fused HLO op (the 15-dot U_var
    # fold now happens inside the kernel).
    w_half = 0.5 * q_params.astype(jnp.float32)
    cs = jnp.stack([jnp.cos(w_half), jnp.sin(w_half)])     # (2, NUM_W)
    gates = jnp.asarray(_GATES)                            # (7, D, D) constant

    tb = _pick_tile(b)
    grid = (b // tb,)

    cost = pl.CostEstimate(
        flops=int(b * (6 * n * d + 4 * d * d + d)
                  + Q_DEPTH * (1 + n) * 2 * d ** 3),
        transcendentals=int(3 * b * n),
        bytes_accessed=int(4 * (b * n + b * n_meas + gates.size + cs.size)),
    )

    return pl.pallas_call(
        qnet2_kernel,
        out_shape=jax.ShapeDtypeStruct((b, n_meas), jnp.float32),
        grid_spec=pltpu.PrefetchScalarGridSpec(
            num_scalar_prefetch=0,
            grid=grid,
            in_specs=[
                pl.BlockSpec((tb, n), lambda i: (i, 0)),             # x tile
                pl.BlockSpec((2, NUM_W), lambda i: (0, 0)),          # cos/sin
                pl.BlockSpec((n_gates, d, d), lambda i: (0, 0, 0)),  # gate table
            ],
            out_specs=pl.BlockSpec((tb, n_meas), lambda i: (i, 0)),
            scratch_shapes=[pltpu.VMEM((d, d), jnp.float32)],
        ),
        compiler_params=pltpu.CompilerParams(
            dimension_semantics=("arbitrary",)),
        cost_estimate=cost,
    )(x, cs, gates)


# ----- pure-JAX reference (full statevector simulation, unfused) -----
def qnet2_reference(x, q_params):
    w = q_params.reshape(Q_DEPTH, SECOND_QUBITS)
    a_t = jnp.asarray(_A_T)
    ent = jnp.asarray(_ENT_T)
    z = jnp.asarray(_Z)
    half = jnp.tanh(x) * np.float32(np.pi / 4.0)
    c, s = jnp.cos(half), jnp.sin(half)
    b, n = x.shape
    dd = ent.shape[0]
    state = jnp.full((b, dd), 1.0 / np.sqrt(dd), jnp.float32)
    for q in range(n):
        state = c[:, q:q + 1] * state + s[:, q:q + 1] * (state @ a_t[q])
    wc, ws = jnp.cos(0.5 * w), jnp.sin(0.5 * w)
    for k in range(Q_DEPTH):
        state = state @ ent
        for q in range(n):
            state = wc[k, q] * state + ws[k, q] * (state @ a_t[q])
    return (state * state) @ z


if __name__ == "__main__":
    key = jax.random.PRNGKey(0)
    kx, kp = jax.random.split(key)

    # deterministic inputs + parameters (q_params = q_delta * randn(q_depth * second_qubits))
    x = jax.random.normal(kx, (BATCH, SECOND_QUBITS), dtype=jnp.float32)
    q_params = Q_DELTA * jax.random.normal(kp, (NUM_W,), dtype=jnp.float32)

    out = qnet2_forward(x, q_params)
    out = jax.block_until_ready(out)

    assert out.shape == (BATCH, TARGET_CLASS) and out.dtype == jnp.float32
    ref = qnet2_reference(x, q_params)
    np.testing.assert_allclose(np.asarray(out), np.asarray(ref), atol=2e-3, rtol=2e-3)

    print("KERNEL_OK")
</pallas_src>

<mosaic_0001>
module attributes {stable_mosaic.version = 11 : i64} {
  func.func @qnet2_kernel(%arg0: i32, %arg1: memref<256x4xf32, #tpu.memory_space<vmem>>, %arg2: memref<2x12xf32, #tpu.memory_space<vmem>>, %arg3: memref<7x16x16xf32, #tpu.memory_space<vmem>>, %arg4: memref<256x4xf32, #tpu.memory_space<vmem>>, %arg5: memref<16x16xf32, #tpu.memory_space<vmem>>) attributes {dimension_semantics = [#tpu.dimension_semantics<arbitrary>], iteration_bounds = array<i64: 1>, scalar_prefetch = 0 : i64, scratch_operands = 1 : i64, tpu.core_type = #tpu.core_type<tc>, window_params = [{transform_indices = @transform_0, window_bounds = array<i64: 256, 4>}, {pipeline_mode = #tpu.pipeline_mode<synchronous>, transform_indices = @transform_1, window_bounds = array<i64: 2, 12>}, {pipeline_mode = #tpu.pipeline_mode<synchronous>, transform_indices = @transform_2, window_bounds = array<i64: 7, 16, 16>}, {transform_indices = @transform_3, window_bounds = array<i64: 256, 4>}]} {
    %c0_i32 = arith.constant 0 : i32
    %0 = arith.cmpi eq, %arg0, %c0_i32 : i32
    %1 = arith.extui %0 : i1 to i32
    %c0_i32_0 = arith.constant 0 : i32
    %2 = arith.cmpi ne, %1, %c0_i32_0 : i32
    scf.if %2 {
      %c0_18 = arith.constant 0 : index
      %c0_19 = arith.constant 0 : index
      %c0_20 = arith.constant 0 : index
      %81 = vector.load %arg3[%c0_18, %c0_19, %c0_20] : memref<7x16x16xf32, #tpu.memory_space<vmem>>, vector<1x16x16xf32>
      %82 = vector.shape_cast %81 : vector<1x16x16xf32> to vector<16x16xf32>
      %c1 = arith.constant 1 : index
      %c0_21 = arith.constant 0 : index
      %c0_22 = arith.constant 0 : index
      %83 = vector.load %arg3[%c1, %c0_21, %c0_22] : memref<7x16x16xf32, #tpu.memory_space<vmem>>, vector<1x16x16xf32>
      %84 = vector.shape_cast %83 : vector<1x16x16xf32> to vector<16x16xf32>
      %cst_23 = arith.constant dense<0.000000e+00> : vector<16x16xf32>
      %85 = tpu.matmul %82, %84, %cst_23 {dimension_numbers = #tpu.dot_dimension_numbers<[1], [0], [0], [1], [0, 0, 1, 1], [], []>} : vector<16x16xf32>, vector<16x16xf32>, vector<16x16xf32> -> vector<16x16xf32>
      %c0_24 = arith.constant 0 : index
      %c0_25 = arith.constant 0 : index
      %86 = vector.load %arg2[%c0_24, %c0_25] : memref<2x12xf32, #tpu.memory_space<vmem>>, vector<1x1xf32>
      %c1_26 = arith.constant 1 : index
      %c0_27 = arith.constant 0 : index
      %87 = vector.load %arg2[%c1_26, %c0_27] : memref<2x12xf32, #tpu.memory_space<vmem>>, vector<1x1xf32>
      %88 = vector.broadcast %86 : vector<1x1xf32> to vector<16x16xf32>
      %89 = arith.mulf %88, %82 : vector<16x16xf32>
      %c2 = arith.constant 2 : index
      %c0_28 = arith.constant 0 : index
      %c0_29 = arith.constant 0 : index
      %90 = vector.load %arg3[%c2, %c0_28, %c0_29] : memref<7x16x16xf32, #tpu.memory_space<vmem>>, vector<1x16x16xf32>
      %91 = vector.shape_cast %90 : vector<1x16x16xf32> to vector<16x16xf32>
      %92 = vector.broadcast %87 : vector<1x1xf32> to vector<16x16xf32>
      %93 = arith.mulf %92, %91 : vector<16x16xf32>
      %94 = arith.addf %89, %93 : vector<16x16xf32>
      %cst_30 = arith.constant dense<0.000000e+00> : vector<16x16xf32>
      %95 = tpu.matmul %85, %94, %cst_30 {dimension_numbers = #tpu.dot_dimension_numbers<[1], [0], [0], [1], [0, 0, 1, 1], [], []>} : vector<16x16xf32>, vector<16x16xf32>, vector<16x16xf32> -> vector<16x16xf32>
      %c0_31 = arith.constant 0 : index
      %c1_32 = arith.constant 1 : index
      %96 = vector.load %arg2[%c0_31, %c1_32] : memref<2x12xf32, #tpu.memory_space<vmem>>, vector<1x1xf32>
      %c1_33 = arith.constant 1 : index
      %c1_34 = arith.constant 1 : index
      %97 = vector.load %arg2[%c1_33, %c1_34] : memref<2x12xf32, #tpu.memory_space<vmem>>, vector<1x1xf32>
      %98 = vector.broadcast %96 : vector<1x1xf32> to vector<16x16xf32>
      %99 = arith.mulf %98, %82 : vector<16x16xf32>
      %c3 = arith.constant 3 : index
      %c0_35 = arith.constant 0 : index
      %c0_36 = arith.constant 0 : index
      %100 = vector.load %arg3[%c3, %c0_35, %c0_36] : memref<7x16x16xf32, #tpu.memory_space<vmem>>, vector<1x16x16xf32>
      %101 = vector.shape_cast %100 : vector<1x16x16xf32> to vector<16x16xf32>
      %102 = vector.broadcast %97 : vector<1x1xf32> to vector<16x16xf32>
      %103 = arith.mulf %102, %101 : vector<16x16xf32>
      %104 = arith.addf %99, %103 : vector<16x16xf32>
      %cst_37 = arith.constant dense<0.000000e+00> : vector<16x16xf32>
      %105 = tpu.matmul %95, %104, %cst_37 {dimension_numbers = #tpu.dot_dimension_numbers<[1], [0], [0], [1], [0, 0, 1, 1], [], []>} : vector<16x16xf32>, vector<16x16xf32>, vector<16x16xf32> -> vector<16x16xf32>
      %c0_38 = arith.constant 0 : index
      %c2_39 = arith.constant 2 : index
      %106 = vector.load %arg2[%c0_38, %c2_39] : memref<2x12xf32, #tpu.memory_space<vmem>>, vector<1x1xf32>
      %c1_40 = arith.constant 1 : index
      %c2_41 = arith.constant 2 : index
      %107 = vector.load %arg2[%c1_40, %c2_41] : memref<2x12xf32, #tpu.memory_space<vmem>>, vector<1x1xf32>
      %108 = vector.broadcast %106 : vector<1x1xf32> to vector<16x16xf32>
      %109 = arith.mulf %108, %82 : vector<16x16xf32>
      %c4 = arith.constant 4 : index
      %c0_42 = arith.constant 0 : index
      %c0_43 = arith.constant 0 : index
      %110 = vector.load %arg3[%c4, %c0_42, %c0_43] : memref<7x16x16xf32, #tpu.memory_space<vmem>>, vector<1x16x16xf32>
      %111 = vector.shape_cast %110 : vector<1x16x16xf32> to vector<16x16xf32>
      %112 = vector.broadcast %107 : vector<1x1xf32> to vector<16x16xf32>
      %113 = arith.mulf %112, %111 : vector<16x16xf32>
      %114 = arith.addf %109, %113 : vector<16x16xf32>
      %cst_44 = arith.constant dense<0.000000e+00> : vector<16x16xf32>
      %115 = tpu.matmul %105, %114, %cst_44 {dimension_numbers = #tpu.dot_dimension_numbers<[1], [0], [0], [1], [0, 0, 1, 1], [], []>} : vector<16x16xf32>, vector<16x16xf32>, vector<16x16xf32> -> vector<16x16xf32>
      %c0_45 = arith.constant 0 : index
      %c3_46 = arith.constant 3 : index
      %116 = vector.load %arg2[%c0_45, %c3_46] : memref<2x12xf32, #tpu.memory_space<vmem>>, vector<1x1xf32>
      %c1_47 = arith.constant 1 : index
      %c3_48 = arith.constant 3 : index
      %117 = vector.load %arg2[%c1_47, %c3_48] : memref<2x12xf32, #tpu.memory_space<vmem>>, vector<1x1xf32>
      %118 = vector.broadcast %116 : vector<1x1xf32> to vector<16x16xf32>
      %119 = arith.mulf %118, %82 : vector<16x16xf32>
      %c5 = arith.constant 5 : index
      %c0_49 = arith.constant 0 : index
      %c0_50 = arith.constant 0 : index
      %120 = vector.load %arg3[%c5, %c0_49, %c0_50] : memref<7x16x16xf32, #tpu.memory_space<vmem>>, vector<1x16x16xf32>
      %121 = vector.shape_cast %120 : vector<1x16x16xf32> to vector<16x16xf32>
      %122 = vector.broadcast %117 : vector<1x1xf32> to vector<16x16xf32>
      %123 = arith.mulf %122, %121 : vector<16x16xf32>
      %124 = arith.addf %119, %123 : vector<16x16xf32>
      %cst_51 = arith.constant dense<0.000000e+00> : vector<16x16xf32>
      %125 = tpu.matmul %115, %124, %cst_51 {dimension_numbers = #tpu.dot_dimension_numbers<[1], [0], [0], [1], [0, 0, 1, 1], [], []>} : vector<16x16xf32>, vector<16x16xf32>, vector<16x16xf32> -> vector<16x16xf32>
      %cst_52 = arith.constant dense<0.000000e+00> : vector<16x16xf32>
      %126 = tpu.matmul %125, %84, %cst_52 {dimension_numbers = #tpu.dot_dimension_numbers<[1], [0], [0], [1], [0, 0, 1, 1], [], []>} : vector<16x16xf32>, vector<16x16xf32>, vector<16x16xf32> -> vector<16x16xf32>
      %c0_53 = arith.constant 0 : index
      %c4_54 = arith.constant 4 : index
      %127 = vector.load %arg2[%c0_53, %c4_54] : memref<2x12xf32, #tpu.memory_space<vmem>>, vector<1x1xf32>
      %c1_55 = arith.constant 1 : index
      %c4_56 = arith.constant 4 : index
      %128 = vector.load %arg2[%c1_55, %c4_56] : memref<2x12xf32, #tpu.memory_space<vmem>>, vector<1x1xf32>
      %129 = vector.broadcast %127 : vector<1x1xf32> to vector<16x16xf32>
      %130 = arith.mulf %129, %82 : vector<16x16xf32>
      %c2_57 = arith.constant 2 : index
      %c0_58 = arith.constant 0 : index
      %c0_59 = arith.constant 0 : index
      %131 = vector.load %arg3[%c2_57, %c0_58, %c0_59] : memref<7x16x16xf32, #tpu.memory_space<vmem>>, vector<1x16x16xf32>
      %132 = vector.shape_cast %131 : vector<1x16x16xf32> to vector<16x16xf32>
      %133 = vector.broadcast %128 : vector<1x1xf32> to vector<16x16xf32>
      %134 = arith.mulf %133, %132 : vector<16x16xf32>
      %135 = arith.addf %130, %134 : vector<16x16xf32>
      %cst_60 = arith.constant dense<0.000000e+00> : vector<16x16xf32>
      %136 = tpu.matmul %126, %135, %cst_60 {dimension_numbers = #tpu.dot_dimension_numbers<[1], [0], [0], [1], [0, 0, 1, 1], [], []>} : vector<16x16xf32>, vector<16x16xf32>, vector<16x16xf32> -> vector<16x16xf32>
      %c0_61 = arith.constant 0 : index
      %c5_62 = arith.constant 5 : index
      %137 = vector.load %arg2[%c0_61, %c5_62] : memref<2x12xf32, #tpu.memory_space<vmem>>, vector<1x1xf32>
      %c1_63 = arith.constant 1 : index
      %c5_64 = arith.constant 5 : index
      %138 = vector.load %arg2[%c1_63, %c5_64] : memref<2x12xf32, #tpu.memory_space<vmem>>, vector<1x1xf32>
      %139 = vector.broadcast %137 : vector<1x1xf32> to vector<16x16xf32>
      %140 = arith.mulf %139, %82 : vector<16x16xf32>
      %c3_65 = arith.constant 3 : index
      %c0_66 = arith.constant 0 : index
      %c0_67 = arith.constant 0 : index
      %141 = vector.load %arg3[%c3_65, %c0_66, %c0_67] : memref<7x16x16xf32, #tpu.memory_space<vmem>>, vector<1x16x16xf32>
      %142 = vector.shape_cast %141 : vector<1x16x16xf32> to vector<16x16xf32>
      %143 = vector.broadcast %138 : vector<1x1xf32> to vector<16x16xf32>
      %144 = arith.mulf %143, %142 : vector<16x16xf32>
      %145 = arith.addf %140, %144 : vector<16x16xf32>
      %cst_68 = arith.constant dense<0.000000e+00> : vector<16x16xf32>
      %146 = tpu.matmul %136, %145, %cst_68 {dimension_numbers = #tpu.dot_dimension_numbers<[1], [0], [0], [1], [0, 0, 1, 1], [], []>} : vector<16x16xf32>, vector<16x16xf32>, vector<16x16xf32> -> vector<16x16xf32>
      %c0_69 = arith.constant 0 : index
      %c6_70 = arith.constant 6 : index
      %147 = vector.load %arg2[%c0_69, %c6_70] : memref<2x12xf32, #tpu.memory_space<vmem>>, vector<1x1xf32>
      %c1_71 = arith.constant 1 : index
      %c6_72 = arith.constant 6 : index
      %148 = vector.load %arg2[%c1_71, %c6_72] : memref<2x12xf32, #tpu.memory_space<vmem>>, vector<1x1xf32>
      %149 = vector.broadcast %147 : vector<1x1xf32> to vector<16x16xf32>
      %150 = arith.mulf %149, %82 : vector<16x16xf32>
      %c4_73 = arith.constant 4 : index
      %c0_74 = arith.constant 0 : index
      %c0_75 = arith.constant 0 : index
      %151 = vector.load %arg3[%c4_73, %c0_74, %c0_75] : memref<7x16x16xf32, #tpu.memory_space<vmem>>, vector<1x16x16xf32>
      %152 = vector.shape_cast %151 : vector<1x16x16xf32> to vector<16x16xf32>
      %153 = vector.broadcast %148 : vector<1x1xf32> to vector<16x16xf32>
      %154 = arith.mulf %153, %152 : vector<16x16xf32>
      %155 = arith.addf %150, %154 : vector<16x16xf32>
      %cst_76 = arith.constant dense<0.000000e+00> : vector<16x16xf32>
      %156 = tpu.matmul %146, %155, %cst_76 {dimension_numbers = #tpu.dot_dimension_numbers<[1], [0], [0], [1], [0, 0, 1, 1], [], []>} : vector<16x16xf32>, vector<16x16xf32>, vector<16x16xf32> -> vector<16x16xf32>
      %c0_77 = arith.constant 0 : index
      %c7 = arith.constant 7 : index
      %157 = vector.load %arg2[%c0_77, %c7] : memref<2x12xf32, #tpu.memory_space<vmem>>, vector<1x1xf32>
      %c1_78 = arith.constant 1 : index
      %c7_79 = arith.constant 7 : index
      %158 = vector.load %arg2[%c1_78, %c7_79] : memref<2x12xf32, #tpu.memory_space<vmem>>, vector<1x1xf32>
      %159 = vector.broadcast %157 : vector<1x1xf32> to vector<16x16xf32>
      %160 = arith.mulf %159, %82 : vector<16x16xf32>
      %c5_80 = arith.constant 5 : index
      %c0_81 = arith.constant 0 : index
      %c0_82 = arith.constant 0 : index
      %161 = vector.load %arg3[%c5_80, %c0_81, %c0_82] : memref<7x16x16xf32, #tpu.memory_space<vmem>>, vector<1x16x16xf32>
      %162 = vector.shape_cast %161 : vector<1x16x16xf32> to vector<16x16xf32>
      %163 = vector.broadcast %158 : vector<1x1xf32> to vector<16x16xf32>
      %164 = arith.mulf %163, %162 : vector<16x16xf32>
      %165 = arith.addf %160, %164 : vector<16x16xf32>
      %cst_83 = arith.constant dense<0.000000e+00> : vector<16x16xf32>
      %166 = tpu.matmul %156, %165, %cst_83 {dimension_numbers = #tpu.dot_dimension_numbers<[1], [0], [0], [1], [0, 0, 1, 1], [], []>} : vector<16x16xf32>, vector<16x16xf32>, vector<16x16xf32> -> vector<16x16xf32>
      %cst_84 = arith.constant dense<0.000000e+00> : vector<16x16xf32>
      %167 = tpu.matmul %166, %84, %cst_84 {dimension_numbers = #tpu.dot_dimension_numbers<[1], [0], [0], [1], [0, 0, 1, 1], [], []>} : vector<16x16xf32>, vector<16x16xf32>, vector<16x16xf32> -> vector<16x16xf32>
      %c0_85 = arith.constant 0 : index
      %c8 = arith.constant 8 : index
      %168 = vector.load %arg2[%c0_85, %c8] : memref<2x12xf32, #tpu.memory_space<vmem>>, vector<1x1xf32>
      %c1_86 = arith.constant 1 : index
      %c8_87 = arith.constant 8 : index
      %169 = vector.load %arg2[%c1_86, %c8_87] : memref<2x12xf32, #tpu.memory_space<vmem>>, vector<1x1xf32>
      %170 = vector.broadcast %168 : vector<1x1xf32> to vector<16x16xf32>
      %171 = arith.mulf %170, %82 : vector<16x16xf32>
      %c2_88 = arith.constant 2 : index
      %c0_89 = arith.constant 0 : index
      %c0_90 = arith.constant 0 : index
      %172 = vector.load %arg3[%c2_88, %c0_89, %c0_90] : memref<7x16x16xf32, #tpu.memory_space<vmem>>, vector<1x16x16xf32>
      %173 = vector.shape_cast %172 : vector<1x16x16xf32> to vector<16x16xf32>
      %174 = vector.broadcast %169 : vector<1x1xf32> to vector<16x16xf32>
      %175 = arith.mulf %174, %173 : vector<16x16xf32>
      %176 = arith.addf %171, %175 : vector<16x16xf32>
      %cst_91 = arith.constant dense<0.000000e+00> : vector<16x16xf32>
      %177 = tpu.matmul %167, %176, %cst_91 {dimension_numbers = #tpu.dot_dimension_numbers<[1], [0], [0], [1], [0, 0, 1, 1], [], []>} : vector<16x16xf32>, vector<16x16xf32>, vector<16x16xf32> -> vector<16x16xf32>
      %c0_92 = arith.constant 0 : index
      %c9 = arith.constant 9 : index
      %178 = vector.load %arg2[%c0_92, %c9] : memref<2x12xf32, #tpu.memory_space<vmem>>, vector<1x1xf32>
      %c1_93 = arith.constant 1 : index
      %c9_94 = arith.constant 9 : index
      %179 = vector.load %arg2[%c1_93, %c9_94] : memref<2x12xf32, #tpu.memory_space<vmem>>, vector<1x1xf32>
      %180 = vector.broadcast %178 : vector<1x1xf32> to vector<16x16xf32>
      %181 = arith.mulf %180, %82 : vector<16x16xf32>
      %c3_95 = arith.constant 3 : index
      %c0_96 = arith.constant 0 : index
      %c0_97 = arith.constant 0 : index
      %182 = vector.load %arg3[%c3_95, %c0_96, %c0_97] : memref<7x16x16xf32, #tpu.memory_space<vmem>>, vector<1x16x16xf32>
      %183 = vector.shape_cast %182 : vector<1x16x16xf32> to vector<16x16xf32>
      %184 = vector.broadcast %179 : vector<1x1xf32> to vector<16x16xf32>
      %185 = arith.mulf %184, %183 : vector<16x16xf32>
      %186 = arith.addf %181, %185 : vector<16x16xf32>
      %cst_98 = arith.constant dense<0.000000e+00> : vector<16x16xf32>
      %187 = tpu.matmul %177, %186, %cst_98 {dimension_numbers = #tpu.dot_dimension_numbers<[1], [0], [0], [1], [0, 0, 1, 1], [], []>} : vector<16x16xf32>, vector<16x16xf32>, vector<16x16xf32> -> vector<16x16xf32>
      %c0_99 = arith.constant 0 : index
      %c10 = arith.constant 10 : index
      %188 = vector.load %arg2[%c0_99, %c10] : memref<2x12xf32, #tpu.memory_space<vmem>>, vector<1x1xf32>
      %c1_100 = arith.constant 1 : index
      %c10_101 = arith.constant 10 : index
      %189 = vector.load %arg2[%c1_100, %c10_101] : memref<2x12xf32, #tpu.memory_space<vmem>>, vector<1x1xf32>
      %190 = vector.broadcast %188 : vector<1x1xf32> to vector<16x16xf32>
      %191 = arith.mulf %190, %82 : vector<16x16xf32>
      %c4_102 = arith.constant 4 : index
      %c0_103 = arith.constant 0 : index
      %c0_104 = arith.constant 0 : index
      %192 = vector.load %arg3[%c4_102, %c0_103, %c0_104] : memref<7x16x16xf32, #tpu.memory_space<vmem>>, vector<1x16x16xf32>
      %193 = vector.shape_cast %192 : vector<1x16x16xf32> to vector<16x16xf32>
      %194 = vector.broadcast %189 : vector<1x1xf32> to vector<16x16xf32>
      %195 = arith.mulf %194, %193 : vector<16x16xf32>
      %196 = arith.addf %191, %195 : vector<16x16xf32>
      %cst_105 = arith.constant dense<0.000000e+00> : vector<16x16xf32>
      %197 = tpu.matmul %187, %196, %cst_105 {dimension_numbers = #tpu.dot_dimension_numbers<[1], [0], [0], [1], [0, 0, 1, 1], [], []>} : vector<16x16xf32>, vector<16x16xf32>, vector<16x16xf32> -> vector<16x16xf32>
      %c0_106 = arith.constant 0 : index
      %c11 = arith.constant 11 : index
      %198 = vector.load %arg2[%c0_106, %c11] : memref<2x12xf32, #tpu.memory_space<vmem>>, vector<1x1xf32>
      %c1_107 = arith.constant 1 : index
      %c11_108 = arith.constant 11 : index
      %199 = vector.load %arg2[%c1_107, %c11_108] : memref<2x12xf32, #tpu.memory_space<vmem>>, vector<1x1xf32>
      %200 = vector.broadcast %198 : vector<1x1xf32> to vector<16x16xf32>
      %201 = arith.mulf %200, %82 : vector<16x16xf32>
      %c5_109 = arith.constant 5 : index
      %c0_110 = arith.constant 0 : index
      %c0_111 = arith.constant 0 : index
      %202 = vector.load %arg3[%c5_109, %c0_110, %c0_111] : memref<7x16x16xf32, #tpu.memory_space<vmem>>, vector<1x16x16xf32>
      %203 = vector.shape_cast %202 : vector<1x16x16xf32> to vector<16x16xf32>
      %204 = vector.broadcast %199 : vector<1x1xf32> to vector<16x16xf32>
      %205 = arith.mulf %204, %203 : vector<16x16xf32>
      %206 = arith.addf %201, %205 : vector<16x16xf32>
      %cst_112 = arith.constant dense<0.000000e+00> : vector<16x16xf32>
      %207 = tpu.matmul %197, %206, %cst_112 {dimension_numbers = #tpu.dot_dimension_numbers<[1], [0], [0], [1], [0, 0, 1, 1], [], []>} : vector<16x16xf32>, vector<16x16xf32>, vector<16x16xf32> -> vector<16x16xf32>
      %c0_113 = arith.constant 0 : index
      %c0_114 = arith.constant 0 : index
      %208 = vector.load %arg5[%c0_113, %c0_114] : memref<16x16xf32, #tpu.memory_space<vmem>>, vector<16x16xf32>
      tpu.vector_store %arg5[%c0_113, %c0_114], %207 {strides = array<i32>} : memref<16x16xf32, #tpu.memory_space<vmem>>, vector<16x16xf32>,
    } else {
    }
    %c0 = arith.constant 0 : index
    %c0_1 = arith.constant 0 : index
    %3 = vector.load %arg1[%c0, %c0_1] : memref<256x4xf32, #tpu.memory_space<vmem>>, vector<256x4xf32>
    %4 = math.tanh %3 : vector<256x4xf32>
    %cst = arith.constant 0.785398185 : f32
    %5 = vector.broadcast %cst : f32 to vector<256x4xf32>
    %6 = arith.mulf %4, %5 : vector<256x4xf32>
    %7 = math.cos %6 : vector<256x4xf32>
    %8 = math.sin %6 : vector<256x4xf32>
    %9 = arith.subf %7, %8 : vector<256x4xf32>
    %cst_2 = arith.constant 0.707106769 : f32
    %10 = vector.broadcast %cst_2 : f32 to vector<256x4xf32>
    %11 = arith.mulf %9, %10 : vector<256x4xf32>
    %12 = arith.addf %7, %8 : vector<256x4xf32>
    %cst_3 = arith.constant 0.707106769 : f32
    %13 = vector.broadcast %cst_3 : f32 to vector<256x4xf32>
    %14 = arith.mulf %12, %13 : vector<256x4xf32>
    %15 = tpu.iota {dimensions = array<i32: 1>} : vector<1x16xi32>
    %cst_4 = arith.constant 1.000000e+00 : f32
    %16 = vector.broadcast %cst_4 : f32 to vector<256x16xf32>
    %c3_i32 = arith.constant 3 : i32
    %17 = vector.broadcast %c3_i32 : i32 to vector<1x16xi32>
    %18 = arith.shrsi %15, %17 : vector<1x16xi32>
    %c1_i32 = arith.constant 1 : i32
    %19 = vector.broadcast %c1_i32 : i32 to vector<1x16xi32>
    %20 = arith.andi %18, %19 : vector<1x16xi32>
    %21 = arith.sitofp %20 : vector<1x16xi32> to vector<1x16xf32>
    %22 = vector.extract_strided_slice %11 {offsets = [0, 0], sizes = [256, 1], strides = [1, 1]} : vector<256x4xf32> to vector<256x1xf32>
    %23 = vector.extract_strided_slice %14 {offsets = [0, 0], sizes = [256, 1], strides = [1, 1]} : vector<256x4xf32> to vector<256x1xf32>
    %24 = arith.subf %23, %22 : vector<256x1xf32>
    %25 = vector.broadcast %21 : vector<1x16xf32> to vector<256x16xf32>
    %26 = vector.broadcast %24 : vector<256x1xf32> to vector<256x16xf32>
    %27 = arith.mulf %25, %26 : vector<256x16xf32>
    %28 = vector.broadcast %22 : vector<256x1xf32> to vector<256x16xf32>
    %29 = arith.addf %28, %27 : vector<256x16xf32>
    %30 = arith.mulf %16, %29 : vector<256x16xf32>
    %c2_i32 = arith.constant 2 : i32
    %31 = vector.broadcast %c2_i32 : i32 to vector<1x16xi32>
    %32 = arith.shrsi %15, %31 : vector<1x16xi32>
    %c1_i32_5 = arith.constant 1 : i32
    %33 = vector.broadcast %c1_i32_5 : i32 to vector<1x16xi32>
    %34 = arith.andi %32, %33 : vector<1x16xi32>
    %35 = arith.sitofp %34 : vector<1x16xi32> to vector<1x16xf32>
    %36 = vector.extract_strided_slice %11 {offsets = [0, 1], sizes = [256, 1], strides = [1, 1]} : vector<256x4xf32> to vector<256x1xf32>
    %37 = vector.extract_strided_slice %14 {offsets = [0, 1], sizes = [256, 1], strides = [1, 1]} : vector<256x4xf32> to vector<256x1xf32>
    %38 = arith.subf %37, %36 : vector<256x1xf32>
    %39 = vector.broadcast %35 : vector<1x16xf32> to vector<256x16xf32>
    %40 = vector.broadcast %38 : vector<256x1xf32> to vector<256x16xf32>
    %41 = arith.mulf %39, %40 : vector<256x16xf32>
    %42 = vector.broadcast %36 : vector<256x1xf32> to vector<256x16xf32>
    %43 = arith.addf %42, %41 : vector<256x16xf32>
    %44 = arith.mulf %30, %43 : vector<256x16xf32>
    %c1_i32_6 = arith.constant 1 : i32
    %45 = vector.broadcast %c1_i32_6 : i32 to vector<1x16xi32>
    %46 = arith.shrsi %15, %45 : vector<1x16xi32>
    %c1_i32_7 = arith.constant 1 : i32
    %47 = vector.broadcast %c1_i32_7 : i32 to vector<1x16xi32>
    %48 = arith.andi %46, %47 : vector<1x16xi32>
    %49 = arith.sitofp %48 : vector<1x16xi32> to vector<1x16xf32>
    %50 = vector.extract_strided_slice %11 {offsets = [0, 2], sizes = [256, 1], strides = [1, 1]} : vector<256x4xf32> to vector<256x1xf32>
    %51 = vector.extract_strided_slice %14 {offsets = [0, 2], sizes = [256, 1], strides = [1, 1]} : vector<256x4xf32> to vector<256x1xf32>
    %52 = arith.subf %51, %50 : vector<256x1xf32>
    %53 = vector.broadcast %49 : vector<1x16xf32> to vector<256x16xf32>
    %54 = vector.broadcast %52 : vector<256x1xf32> to vector<256x16xf32>
    %55 = arith.mulf %53, %54 : vector<256x16xf32>
    %56 = vector.broadcast %50 : vector<256x1xf32> to vector<256x16xf32>
    %57 = arith.addf %56, %55 : vector<256x16xf32>
    %58 = arith.mulf %44, %57 : vector<256x16xf32>
    %c0_i32_8 = arith.constant 0 : i32
    %59 = vector.broadcast %c0_i32_8 : i32 to vector<1x16xi32>
    %60 = arith.shrsi %15, %59 : vector<1x16xi32>
    %c1_i32_9 = arith.constant 1 : i32
    %61 = vector.broadcast %c1_i32_9 : i32 to vector<1x16xi32>
    %62 = arith.andi %60, %61 : vector<1x16xi32>
    %63 = arith.sitofp %62 : vector<1x16xi32> to vector<1x16xf32>
    %64 = vector.extract_strided_slice %11 {offsets = [0, 3], sizes = [256, 1], strides = [1, 1]} : vector<256x4xf32> to vector<256x1xf32>
    %65 = vector.extract_strided_slice %14 {offsets = [0, 3], sizes = [256, 1], strides = [1, 1]} : vector<256x4xf32> to vector<256x1xf32>
    %66 = arith.subf %65, %64 : vector<256x1xf32>
    %67 = vector.broadcast %63 : vector<1x16xf32> to vector<256x16xf32>
    %68 = vector.broadcast %66 : vector<256x1xf32> to vector<256x16xf32>
    %69 = arith.mulf %67, %68 : vector<256x16xf32>
    %70 = vector.broadcast %64 : vector<256x1xf32> to vector<256x16xf32>
    %71 = arith.addf %70, %69 : vector<256x16xf32>
    %72 = arith.mulf %58, %71 : vector<256x16xf32>
    %c0_10 = arith.constant 0 : index
    %c0_11 = arith.constant 0 : index
    %73 = vector.load %arg5[%c0_10, %c0_11] : memref<16x16xf32, #tpu.memory_space<vmem>>, vector<16x16xf32>
    %cst_12 = arith.constant dense<0.000000e+00> : vector<256x16xf32>
    %74 = tpu.matmul %72, %73, %cst_12 {dimension_numbers = #tpu.dot_dimension_numbers<[1], [0], [0], [1], [0, 0, 1, 1], [], []>} : vector<256x16xf32>, vector<16x16xf32>, vector<256x16xf32> -> vector<256x16xf32>
    %75 = arith.mulf %74, %74 : vector<256x16xf32>
    %c6 = arith.constant 6 : index
    %c0_13 = arith.constant 0 : index
    %c0_14 = arith.constant 0 : index
    %76 = vector.load %arg3[%c6, %c0_13, %c0_14] : memref<7x16x16xf32, #tpu.memory_space<vmem>>, vector<1x16x16xf32>
    %77 = vector.shape_cast %76 : vector<1x16x16xf32> to vector<16x16xf32>
    %cst_15 = arith.constant dense<0.000000e+00> : vector<256x16xf32>
    %78 = tpu.matmul %75, %77, %cst_15 {dimension_numbers = #tpu.dot_dimension_numbers<[1], [0], [0], [1], [0, 0, 1, 1], [], []>} : vector<256x16xf32>, vector<16x16xf32>, vector<256x16xf32> -> vector<256x16xf32>
    %79 = vector.extract_strided_slice %78 {offsets = [0, 0], sizes = [256, 4], strides = [1, 1]} : vector<256x16xf32> to vector<256x4xf32>
    %c0_16 = arith.constant 0 : index
    %c0_17 = arith.constant 0 : index
    %80 = vector.load %arg4[%c0_16, %c0_17] : memref<256x4xf32, #tpu.memory_space<vmem>>, vector<256x4xf32>
    tpu.vector_store %arg4[%c0_16, %c0_17], %79 {strides = array<i32>} : memref<256x4xf32, #tpu.memory_space<vmem>>, vector<256x4xf32>,
    return
  }
  func.func @transform_0(%arg0: i32) -> (i32, i32) {
    %c0_i32 = arith.constant 0 : i32
    %c0_i32_0 = arith.constant 0 : i32
    return %arg0, %c0_i32 : i32, i32
  }
  func.func @transform_1(%arg0: i32) -> (i32, i32) {
    %c0_i32 = arith.constant 0 : i32
    %c0_i32_0 = arith.constant 0 : i32
    %c0_i32_1 = arith.constant 0 : i32
    return %c0_i32, %c0_i32_0 : i32, i32
  }
  func.func @transform_2(%arg0: i32) -> (i32, i32, i32) {
    %c0_i32 = arith.constant 0 : i32
    %c0_i32_0 = arith.constant 0 : i32
    %c0_i32_1 = arith.constant 0 : i32
    %c0_i32_2 = arith.constant 0 : i32
    return %c0_i32, %c0_i32_0, %c0_i32_1 : i32, i32, i32
  }
  func.func @transform_3(%arg0: i32) -> (i32, i32) {
    %c0_i32 = arith.constant 0 : i32
    %c0_i32_0 = arith.constant 0 : i32
    return %arg0, %c0_i32 : i32, i32
  }
}

</mosaic_0001>

<bundles_post_ra>
// kernel: qnet2_forward.1
= control target key start
LH: loop header
LB: loop body
LE: loop exit
PB: predicated region body
PF: predicated region fallthrough
CT: control target
= control target key end

     0   :  { %vm23_vm0 = vcmask 130048   ;;  %s11727_s29 = smov 127   ;;  %s11728_s9 = smov 126   ;;  %s16821_s2 = inlined_call_operand.vmem [shape: f32[7,16,16], index: 2, kind: input, shape index: {}]   ;;  %s16822_s1 = inlined_call_operand.vmem [shape: f32[2,12], index: 1, kind: input, shape index: {}]   ;;  %s16823_s0 = inlined_call_operand.vmem [shape: f32[256,4], index: 0, kind: input, shape index: {}]   ;;  %s16824_s3 = inlined_call_operand.vmem [shape: f32[256,4], index: 3, kind: output, shape index: {}]  }
   0x1   :  { %v10495_v0 = vld [vmem:[%s16821_s2 + $0x10] sm:$0xff]  ;;  %v10496_v1 = vld [vmem:[%s16821_s2 + $0x18] sm:$0xff]  ;;  %v11777_v2 = vld [vmem:[%s16821_s2] sm:$0xff]  ;;  %s11729_s16 = smov 125   ;;  %s11730_s23 = smov 124  }
   0x2   :  { %v11779_v3 = vpack.c.bf16 %v10496_v1, %v10495_v0  ;;  %10989 = vmatprep.mubr.msk.f32.mxu0 %vm23_vm0, %v11777_v2  ;;  %v11786_v4 = vld [vmem:[%s16822_s1] sm:$0x1]  ;;  %v11791_v5 = vld [vmem:[%s16822_s1 + $0x1] sm:$0x1]  ;;  %v11800_v6 = vld [vmem:[%s16821_s2 + $0x8] sm:$0xff]  ;;  %s11731_s1 = smov 123  }
   0x3   :  { %11262 = vpush %v11786_v4  ;;  %v11807_v7 = vld [vmem:[%s16821_s2 + $0x20] sm:$0xff]  ;;  %v11812_v8 = vld [vmem:[%s16821_s2 + $0x28] sm:$0xff]  ;;  %205 = vrot.lane.b32.xlu0 %v11786_v4, %s11727_s29  ;;  %v11825_v23 = vld [vmem:[%s16821_s2 + $0x30] sm:$0xff]  ;;  %s11733_s4 = smov 121   ;;  %s11735_s11 = smov 120  }
   0x4   :  { %11195 = vmatprep.subr.bf16.mxu0 %v11779_v3  ;;  %11264 = vpush %v11791_v5  ;;  %v11830_v24 = vld [vmem:[%s16821_s2 + $0x38] sm:$0xff]  ;;  %305 = vrot.lane.b32.xlu1 %v11786_v4, %s11728_s9  ;;  %v11843_v38 = vld [vmem:[%s16821_s2 + $0x40] sm:$0xff]  ;;  %v11848_v39 = vld [vmem:[%s16821_s2 + $0x48] sm:$0xff]  ;;  %s11736_s12 = smov 119   ;;  %s11737_s13 = smov 118  }
   0x5   :  { %11197 = vmatpush3.bf16.msra.mxu0 %v11779_v3  ;;  %v10511_v52 = vld [vmem:[%s16821_s2 + $0x50] sm:$0xff]  ;;  %v10512_v53 = vld [vmem:[%s16821_s2 + $0x58] sm:$0xff]  ;;  %s11738_s14 = smov 117  }
   0x7   :  { %215 = vrot.lane.b32.xlu0 %v11791_v5, %s11727_s29 }
   0x8   :  { %10990 = vmatmul.mubr.msk.f32.vlgmr.msra.gmra.mrb[0].mxu0 %vm23_vm0, %v11800_v6  ;;  %315 = vrot.lane.b32.xlu1 %v11791_v5, %s11728_s9 }
   0xb   :  { %405 = vrot.lane.b32.xlu0 %v11786_v4, %s11729_s16 }
   0xc   :  { %415 = vrot.lane.b32.xlu1 %v11791_v5, %s11729_s16 }
   0xf   :  { %586 = vrot.lane.b32.xlu0 %v11786_v4, %s11730_s23 }
  0x10   :  { %593 = vrot.lane.b32.xlu1 %v11791_v5, %s11730_s23 }
  0x13   :  { %683 = vrot.lane.b32.xlu0 %v11786_v4, %s11731_s1 }
  0x14   :  { %690 = vrot.lane.b32.xlu1 %v11791_v5, %s11731_s1 }
  0x34   :  { %s11263_s24 = spop %11262 }
  0x35   :  { %v109_v9 = vstv %s11263_s24  ;;  %s11265_s28 = spop %11264 }
  0x36   :  { %v111_v10 = vmul.f32 %v109_v9, %v11777_v2  ;;  %v112_v11 = vmul.f32 %v109_v9, %v11800_v6  ;;  %v118_v12 = vstv %s11265_s28  ;;  %s11732_s28 = smov 122  }
  0x37   :  { %v120_v13 = vmul.f32 %v11807_v7, %v118_v12  ;;  %v121_v14 = vmul.f32 %v11812_v8, %v118_v12  ;;  %787 = vrot.lane.b32.xlu1 %v11791_v5, %s11732_s28  ;;  %780 = vrot.lane.b32.xlu0 %v11786_v4, %s11732_s28 }
  0x39   :  { %v122_v15 = vadd.f32 %v120_v13, %v111_v10  ;;  %v123_v16 = vadd.f32 %v121_v14, %v112_v11 }
  0x3b   :  { %v11198_v17 = vpack.c.bf16 %v123_v16, %v122_v15  ;;  %884 = vrot.lane.b32.xlu1 %v11791_v5, %s11733_s4  ;;  %877 = vrot.lane.b32.xlu0 %v11786_v4, %s11733_s4 }
  0x3d   :  { %11199 = vmatprep.subr.bf16.mxu1 %v11198_v17 }
  0x3e   :  { %11201 = vmatpush3.bf16.msra.mxu1 %v11198_v17 }
  0x3f   :  { %1062 = vrot.lane.b32.xlu1 %v11791_v5, %s11735_s11  ;;  %1055 = vrot.lane.b32.xlu0 %v11786_v4, %s11735_s11 }
  0x43   :  { %1159 = vrot.lane.b32.xlu1 %v11791_v5, %s11736_s12  ;;  %1152 = vrot.lane.b32.xlu0 %v11786_v4, %s11736_s12 }
  0x47   :  { %1256 = vrot.lane.b32.xlu1 %v11791_v5, %s11737_s13  ;;  %1249 = vrot.lane.b32.xlu0 %v11786_v4, %s11737_s13 }
  0x4b   :  { %1353 = vrot.lane.b32.xlu1 %v11791_v5, %s11738_s14  ;;  %1346 = vrot.lane.b32.xlu0 %v11786_v4, %s11738_s14  ;;  %v1451_v5 = vld [vmem:[%s16823_s0 + $0x30] sm:$0xff] }
  0x75   :  { %v206_v18 = vpop.permute.xlu0 %205 }
  0x76   :  { %11266 = vpush %v206_v18  ;;  %v306_v33 = vpop.permute.xlu1 %305 }
  0x79   :  { %v216_v19 = vpop.permute.xlu0 %215 }
  0x7a   :  { %11268 = vpush %v216_v19  ;;  %v316_v34 = vpop.permute.xlu1 %315 }
  0x7b   :  { %11270 = vpush %v306_v33 }
  0x7c   :  { %11272 = vpush %v316_v34 }
  0x7d   :  { %v406_v49 = vpop.permute.xlu0 %405 }
  0x7e   :  { %v416_v48 = vpop.permute.xlu1 %415  ;;  %11274 = vpush %v406_v49 }
  0x7f   :  { %11276 = vpush %v416_v48 }
  0x81   :  { %v587_v9 = vpop.permute.xlu0 %586 }
  0x82   :  { %v594_v1 = vpop.permute.xlu1 %593  ;;  %11278 = vpush %v587_v9 }
  0x83   :  { %11280 = vpush %v594_v1 }
  0xa7   :  { %s11267_s30 = spop %11266 }
  0xa8   :  { %v208_v22 = vstv %s11267_s30 }
  0xa9   :  { %v210_v25 = vmul.f32 %v208_v22, %v11777_v2  ;;  %v211_v26 = vmul.f32 %v208_v22, %v11800_v6  ;;  %v684_v22 = vpop.permute.xlu0 %683 }
  0xaa   :  { %11282 = vpush %v684_v22 }
  0xab   :  { %s11269_s8 = spop %11268 }
  0xac   :  { %v218_v27 = vstv %s11269_s8  ;;  %s11271_s10 = spop %11270 }
  0xad   :  { %v220_v28 = vmul.f32 %v11825_v23, %v218_v27  ;;  %v221_v29 = vmul.f32 %v11830_v24, %v218_v27  ;;  %v308_v37 = vstv %s11271_s10  ;;  %s11273_s15 = spop %11272 }
  0xae   :  { %v310_v40 = vmul.f32 %v308_v37, %v11777_v2  ;;  %v311_v41 = vmul.f32 %v308_v37, %v11800_v6  ;;  %v318_v42 = vstv %s11273_s15 }
  0xaf   :  { %v222_v30 = vadd.f32 %v220_v28, %v210_v25  ;;  %v223_v31 = vadd.f32 %v221_v29, %v211_v26  ;;  %v320_v43 = vmul.f32 %v11843_v38, %v318_v42  ;;  %v321_v44 = vmul.f32 %v11848_v39, %v318_v42  ;;  %s11275_s17 = spop %11274 }
  0xb0   :  { %v408_v54 = vstv %s11275_s17  ;;  %s11277_s22 = spop %11276 }
  0xb1   :  { %v11202_v32 = vpack.c.bf16 %v223_v31, %v222_v30  ;;  %v322_v45 = vadd.f32 %v320_v43, %v310_v40  ;;  %v323_v46 = vadd.f32 %v321_v44, %v311_v41  ;;  %v410_v55 = vmul.f32 %v408_v54, %v11777_v2 }
  0xb2   :  { %v411_v56 = vmul.f32 %v408_v54, %v11800_v6  ;;  %v418_v57 = vstv %s11277_s22 }
  0xb3   :  { %11203 = vmatprep.subr.bf16.mxu0 %v11202_v32  ;;  %v11206_v47 = vpack.c.bf16 %v323_v46, %v322_v45  ;;  %v420_v58 = vmul.f32 %v10511_v52, %v418_v57  ;;  %v421_v59 = vmul.f32 %v10512_v53, %v418_v57  ;;  %s11279_s24 = spop %11278 }
  0xb4   :  { %11205 = vmatpush3.bf16.msra.mxu0 %v11202_v32  ;;  %v589_v12 = vstv %s11279_s24  ;;  %s11281_s25 = spop %11280 }
  0xb5   :  { %11207 = vmatprep.subr.bf16.mxu1 %v11206_v47  ;;  %v422_v60 = vadd.f32 %v420_v58, %v410_v55  ;;  %v423_v61 = vadd.f32 %v421_v59, %v411_v56  ;;  %v591_v13 = vmul.f32 %v589_v12, %v11777_v2  ;;  %v592_v14 = vmul.f32 %v589_v12, %v11800_v6 }
  0xb6   :  { %v596_v15 = vstv %s11281_s25 }
  0xb7   :  { %v11210_v62 = vpack.c.bf16 %v423_v61, %v422_v60  ;;  %v598_v16 = vmul.f32 %v11807_v7, %v596_v15  ;;  %v599_v17 = vmul.f32 %v11812_v8, %v596_v15 }
  0xb9   :  { %11211 = vmatprep.subr.bf16.mxu0 %v11210_v62  ;;  %v600_v18 = vadd.f32 %v598_v16, %v591_v13  ;;  %v601_v19 = vadd.f32 %v599_v17, %v592_v14 }
  0xdb   :  { %v10991_v20 = vpop.f32.mrb[0].mxu0  ;;  %s11283_s26 = spop %11282 }
  0xdc   :  { %v96_v21 = vpop.f32.mrb[1].mxu0  ;;  %v686_v7 = vstv %s11283_s26 }
  0xdd   :  { %10996 = vmatprep.mubr.msk.f32.mxu1 %vm23_vm0, %v96_v21  ;;  %v691_v21 = vpop.permute.xlu1 %690  ;;  %v688_v8 = vmul.f32 %v686_v7, %v11777_v2  ;;  %v689_v27 = vmul.f32 %v686_v7, %v11800_v6  ;;  %v16832_v7 = vmov 2131351028  }
  0xde   :  { %10997 = vmatmul.mubr.msk.f32.vlgmr.msra.gmra.mrb[0].mxu1 %vm23_vm0, %v10991_v20  ;;  %v11218_v20 = vpack.c.bf16 %v601_v19, %v600_v18  ;;  %11284 = vpush %v691_v21  ;;  %v16841_v21 = vmov 683565275  }
  0xdf   :  { %11209 = vmatpush3.bf16.msra.mxu1 %v11206_v47 }
  0xe0   :  { %11215 = vmatprep.subr.bf16.mxu1 %v11779_v3 }
  0xe1   :  { %v788_v34 = vpop.permute.xlu1 %787 }
 0x10f   :  { %s11285_s27 = spop %11284 }
 0x110   :  { %v693_v28 = vstv %s11285_s27 }
 0x111   :  { %v695_v29 = vmul.f32 %v11825_v23, %v693_v28  ;;  %v696_v30 = vmul.f32 %v11830_v24, %v693_v28 }
 0x113   :  { %v697_v31 = vadd.f32 %v695_v29, %v688_v8  ;;  %v698_v32 = vadd.f32 %v696_v30, %v689_v27  ;;  %v16827_v27 = vmov 2102212464   ;;  %v16839_v29 = vmov 920167782  }
 0x115   :  { %v11222_v33 = vpack.c.bf16 %v698_v32, %v697_v31 }
 0x1b1   :  { %v10998_v35 = vpop.f32.mrb[0].mxu1 }
 0x1b2   :  { %v196_v36 = vpop.f32.mrb[1].mxu1 }
 0x1b3   :  { %11003 = vmatprep.mubr.msk.f32.mxu0 %vm23_vm0, %v196_v36 }
 0x1b4   :  { %11004 = vmatmul.mubr.msk.f32.vlgmr.msra.gmra.mrb[2].mxu0 %vm23_vm0, %v10998_v35  ;;  %v781_v35 = vpop.permute.xlu0 %780 }
 0x1b5   :  { %11213 = vmatpush3.bf16.msra.mxu0 %v11210_v62  ;;  %11286 = vpush %v781_v35 }
 0x1b6   :  { %11219 = vmatprep.subr.bf16.mxu0 %v11218_v20  ;;  %11288 = vpush %v788_v34 }
 0x1e6   :  { %s11287_s29 = spop %11286 }
 0x1e7   :  { %v783_v23 = vstv %s11287_s29  ;;  %s11289_s30 = spop %11288 }
 0x1e8   :  { %v785_v24 = vmul.f32 %v783_v23, %v11777_v2  ;;  %v786_v40 = vmul.f32 %v783_v23, %v11800_v6  ;;  %v790_v41 = vstv %s11289_s30  ;;  %v1446_v2 = vld [vmem:[%s16823_s0 + $0x8] sm:$0xff]  ;;  %v1447_v6 = vld [vmem:[%s16823_s0 + $0x10] sm:$0xff] }
 0x1e9   :  { %v792_v42 = vmul.f32 %v11843_v38, %v790_v41  ;;  %v793_v43 = vmul.f32 %v11848_v39, %v790_v41  ;;  %v11734_v38 = vmov 0   ;;  %11521 = vtanh.f32 %v1446_v2  ;;  %v1449_v39 = vld [vmem:[%s16823_s0 + $0x20] sm:$0xff] }
 0x1ea   :  { %11460 = vset.pattern.permute.xlu1 %v11734_v38  ;;  %11459 = vset.pattern.permute.xlu0 %v11734_v38  ;;  %11523 = vtanh.f32 %v1447_v6 }
 0x1eb   :  { %v794_v44 = vadd.f32 %v792_v42, %v785_v24  ;;  %v795_v45 = vadd.f32 %v793_v43, %v786_v40  ;;  %11525 = vtanh.f32 %v1449_v39 }
 0x1ec   :  { %11527 = vtanh.f32 %v1451_v5 }
 0x1ed   :  { %v11226_v46 = vpack.c.bf16 %v795_v45, %v794_v44 }
 0x1f3   :  { %v11522_v47 = vpop.eup %11521 }
 0x1f4   :  { %v11524_v48 = vpop.eup %11523  ;;  %v11911_v49 = vmul.f32 0.7853982, %v11522_v47 }
 0x1f5   :  { %v11526_v53 = vpop.eup %11525 }
 0x1f6   :  { %v1647_v52 = vand.u32 2139095040, %v11911_v49  ;;  %v11926_v61 = vmul.f32 0.7853982, %v11526_v53  ;;  %v11957_v39 = vpop.eup %11527  ;;  %vm1646_vm14 = vcmp.lt.s32.totalorder %v11911_v49, 0 }
 0x1f8   :  { %v1648_v56 = vshrl.u32 %v1647_v52, 23  ;;  %v1953_v19 = vand.u32 2147483647, %v11926_v61 }
 0x1fa   :  { %v10539_v60 = vadd.s32 4294967169, %v1648_v56 }
 0x287   :  { %v11005_v50 = vpop.f32.mrb[2].mxu0 }
 0x288   :  { %v296_v51 = vpop.f32.mrb[3].mxu0 }
 0x289   :  { %11010 = vmatprep.mubr.msk.f32.mxu1 %vm23_vm0, %v296_v51  ;;  %v1644_v51 = vand.u32 2147483647, %v11911_v49 }
 0x28a   :  { %11011 = vmatmul.mubr.msk.f32.vlgmr.msra.gmra.mrb[2].mxu1 %vm23_vm0, %v11005_v50  ;;  %v11914_v50 = vmul.f32 0.7853982, %v11524_v48 }
 0x28b   :  { %11217 = vmatpush3.bf16.msra.mxu1 %v11779_v3  ;;  %v1651_v57 = vand.u32 8388607, %v1644_v51 }
 0x28c   :  { %11223 = vmatprep.subr.bf16.mxu1 %v11222_v33  ;;  %v1747_v54 = vand.u32 2147483647, %v11914_v50  ;;  %v1750_v55 = vand.u32 2139095040, %v11914_v50 }
 0x28e   :  { %v1751_v58 = vshrl.u32 %v1750_v55, 23  ;;  %v1754_v59 = vand.u32 8388607, %v1747_v54 }
 0x290   :  { %v10543_v62 = vadd.s32 4294967169, %v1751_v58  ;;  %v1755_v1 = vor.u32 8388608, %v1754_v59 }
 0x292   :  { %v1757_v9 = vadd.s32 1, %v10543_v62  ;;  %v11936_v18 = vshll.u32 %v1755_v1, 8 }
 0x294   :  { %vm1758_vm2 = vcmp.gt.s32.totalorder %v1757_v9, 0 }
 0x295   :  { %v1759_v15 = vsel %vm1758_vm2, %v1757_v9, 0 }
 0x296   :  { %v11934_v16 = vshrl.u32 %v1759_v15, 5  ;;  %v1761_v17 = vand.u32 31, %v1759_v15 }
 0x298   :  { %v1762_v42 = vsub.s32 32, %v1761_v17  ;;  %v1764_v45 = vshll.u32 %v16841_v21, %v1761_v17  ;;  %v1773_v15 = vshll.u32 %v16827_v27, %v1761_v17  ;;  %vm1779_vm7 = vcmp.lt.s32.totalorder %v11934_v16, 1 }
 0x299   :  { %vm1780_vm8 = vcmp.lt.s32.totalorder %v11934_v16, 2  ;;  %vm1781_vm10 = vcmp.lt.s32.totalorder %v11934_v16, 3  ;;  %vm1782_vm11 = vcmp.lt.s32.totalorder %v11934_v16, 4  ;;  %v1960_v16 = vand.u32 8388607, %v1953_v19 }
 0x35d   :  { %v11012_v63 = vpop.f32.mrb[2].mxu1 }
 0x35e   :  { %v396_v0 = vpop.f32.mrb[3].mxu1 }
 0x35f   :  { %11017 = vmatprep.mubr.msk.f32.mxu0 %vm23_vm0, %v396_v0  ;;  %v1654_v0 = vadd.s32 1, %v10539_v60 }
 0x360   :  { %11018 = vmatmul.mubr.msk.f32.vlgmr.msra.gmra.mrb[4].mxu0 %vm23_vm0, %v11012_v63  ;;  %v1652_v63 = vor.u32 8388608, %v1651_v57  ;;  %v1763_v57 = vshrl.u32 %v16841_v21, %v1762_v42 }
 0x361   :  { %11221 = vmatpush3.bf16.msra.mxu0 %v11218_v20  ;;  %vm1655_vm1 = vcmp.gt.s32.totalorder %v1654_v0, 0 }
 0x362   :  { %11227 = vmatprep.subr.bf16.mxu0 %v11226_v46  ;;  %v1656_v4 = vsel %vm1655_vm1, %v1654_v0, 0  ;;  %v11932_v14 = vshll.u32 %v1652_v63, 8  ;;  %v1768_v63 = vshrl.u32 %v16832_v7, %v1762_v42 }
 0x363   :  { %v1657_v12 = vshrl.u32 %v1656_v4, 5  ;;  %v1658_v13 = vand.u32 31, %v1656_v4 }
 0x365   :  { %v1659_v20 = vsub.s32 32, %v1658_v13  ;;  %v1661_v22 = vshll.u32 %v16841_v21, %v1658_v13  ;;  %v1667_v8 = vshll.u32 %v16832_v7, %v1658_v13  ;;  %v1670_v28 = vshll.u32 %v16827_v27, %v1658_v13 }
 0x366   :  { %v1673_v30 = vshll.u32 %v16839_v29, %v1658_v13  ;;  %vm1676_vm3 = vcmp.lt.s32.totalorder %v1657_v12, 1  ;;  %vm1677_vm4 = vcmp.lt.s32.totalorder %v1657_v12, 2  ;;  %vm1679_vm5 = vcmp.lt.s32.totalorder %v1657_v12, 4 }
 0x367   :  { %v1660_v32 = vshrl.u32 %v16841_v21, %v1659_v20  ;;  %v1665_v34 = vshrl.u32 %v16832_v7, %v1659_v20  ;;  %v1668_v35 = vshrl.u32 %v16827_v27, %v1659_v20  ;;  %vm1678_vm6 = vcmp.lt.s32.totalorder %v1657_v12, 3 }
 0x368   :  { %v1774_v12 = vshrl.u32 %v16839_v29, %v1762_v42 }
 0x369   :  { %v1669_v41 = vor.u32 %v1668_v35, %v1667_v8 }
 0x36b   :  { %v1681_v2 = vsel %vm1679_vm5, %v1669_v41, 2102212464 }
 0x433   :  { %v11019_v10 = vpop.f32.mrb[4].mxu0 }
 0x434   :  { %v496_v11 = vpop.f32.mrb[5].mxu0 }
 0x435   :  { %11024 = vmatprep.mubr.msk.f32.mxu1 %vm23_vm0, %v496_v11 }
 0x436   :  { %11025 = vmatmul.mubr.msk.f32.vlgmr.msra.gmra.mrb[4].mxu1 %vm23_vm0, %v11019_v10  ;;  %v1956_v10 = vand.u32 2139095040, %v11926_v61 }
 0x437   :  { %11225 = vmatpush3.bf16.msra.mxu1 %v11222_v33 }
 0x438   :  { %v1957_v11 = vshrl.u32 %v1956_v10, 23 }
 0x43a   :  { %v11944_v31 = vadd.s32 4294967169, %v1957_v11  ;;  %v1770_v11 = vshll.u32 %v16832_v7, %v1761_v17 }
 0x509   :  { %v11026_v25 = vpop.f32.mrb[4].mxu1 }
 0x50a   :  { %v577_v26 = vpop.f32.mrb[5].mxu1 }
 0x50b   :  { %11031 = vmatprep.mubr.msk.f32.mxu0 %vm23_vm0, %v577_v26 }
 0x50c   :  { %11032 = vmatmul.mubr.msk.f32.vlgmr.msra.gmra.mrb[6].mxu0 %vm23_vm0, %v11026_v25  ;;  %v16830_v25 = vmov 2475754826  }
 0x50d   :  { %11229 = vmatpush3.bf16.msra.mxu0 %v11226_v46  ;;  %v1664_v26 = vshll.u32 %v16830_v25, %v1658_v13  ;;  %v1662_v33 = vshrl.u32 %v16830_v25, %v1659_v20  ;;  %v1767_v53 = vshll.u32 %v16830_v25, %v1761_v17  ;;  %v1765_v58 = vshrl.u32 %v16830_v25, %v1762_v42 }
 0x50e   :  { %11235 = vmatprep.subr.bf16.mxu0 %v11779_v3  ;;  %v1771_v13 = vshrl.u32 %v16827_v27, %v1762_v42 }
 0x50f   :  { %v1663_v24 = vor.u32 %v1662_v33, %v1661_v22  ;;  %v1666_v40 = vor.u32 %v1665_v34, %v1664_v26  ;;  %v1766_v10 = vor.u32 %v1765_v58, %v1764_v45  ;;  %v1769_v4 = vor.u32 %v1768_v63, %v1767_v53 }
 0x510   :  { %v1772_v8 = vor.u32 %v1771_v13, %v1770_v11  ;;  %v1963_v45 = vadd.s32 1, %v11944_v31  ;;  %v1961_v63 = vor.u32 8388608, %v1960_v16 }
 0x511   :  { %v1680_v46 = vsel %vm1676_vm3, %v1660_v32, %v1663_v24  ;;  %v1684_v6 = vsel %vm1676_vm3, %v1663_v24, %v1666_v40  ;;  %v1688_v38 = vsel %vm1676_vm3, %v1666_v40, %v1669_v41  ;;  %v1682_v47 = vsel %vm1678_vm6, %v1666_v40, %v1681_v2 }
 0x512   :  { %v1683_v59 = vsel %vm1677_vm4, %v1680_v46, %v1682_v47  ;;  %v1787_v33 = vsel %vm1779_vm7, %v1766_v10, %v1769_v4  ;;  %vm1964_vm12 = vcmp.gt.s32.totalorder %v1963_v45, 0 }
 0x513   :  { %v1699_v26 = vmul.u32 %v11932_v14, %v1683_v59 }
 0x5df   :  { %v11033_v36 = vpop.f32.mrb[6].mxu0 }
 0x5e0   :  { %v674_v37 = vpop.f32.mrb[7].mxu0 }
 0x5e1   :  { %11038 = vmatprep.mubr.msk.f32.mxu1 %vm23_vm0, %v674_v37  ;;  %v16834_v37 = vmov 1326507024  }
 0x5e2   :  { %11039 = vmatmul.mubr.msk.f32.vlgmr.msra.gmra.mrb[6].mxu1 %vm23_vm0, %v11033_v36  ;;  %v1671_v36 = vshrl.u32 %v16839_v29, %v1659_v20  ;;  %v1674_v23 = vshrl.u32 %v16834_v37, %v1659_v20  ;;  %v1776_v20 = vshll.u32 %v16839_v29, %v1761_v17  ;;  %v1777_v22 = vshrl.u32 %v16834_v37, %v1762_v42 }
 0x5e3   :  { %v1783_v17 = vsel %vm1779_vm7, %v1763_v57, %v1766_v10 }
 0x5e4   :  { %v1672_v43 = vor.u32 %v1671_v36, %v1670_v28  ;;  %v1675_v44 = vor.u32 %v1674_v23, %v1673_v30  ;;  %v1775_v30 = vor.u32 %v1774_v12, %v1773_v15  ;;  %v1778_v32 = vor.u32 %v1777_v22, %v1776_v20 }
 0x5e5   :  { %v1791_v36 = vsel %vm1779_vm7, %v1769_v4, %v1772_v8  ;;  %v12015_v15 = vshll.u32 %v1961_v63, 8 }
 0x5e6   :  { %v1685_v48 = vsel %vm1679_vm5, %v1672_v43, 920167782  ;;  %v1689_v52 = vsel %vm1679_vm5, %v1675_v44, 1326507024  ;;  %v1788_v35 = vsel %vm1782_vm11, %v1775_v30, 920167782 }
 0x5e7   :  { %v1686_v55 = vsel %vm1678_vm6, %v1669_v41, %v1685_v48  ;;  %v1690_v56 = vsel %vm1678_vm6, %v1672_v43, %v1689_v52  ;;  %v1789_v40 = vsel %vm1781_vm10, %v1772_v8, %v1788_v35  ;;  %v1792_v41 = vsel %vm1782_vm11, %v1778_v32, 1326507024 }
 0x5e8   :  { %v1687_v60 = vsel %vm1677_vm4, %v1684_v6, %v1686_v55  ;;  %v1691_v62 = vsel %vm1677_vm4, %v1688_v38, %v1690_v56  ;;  %v1790_v43 = vsel %vm1780_vm8, %v1787_v33, %v1789_v40  ;;  %v1793_v44 = vsel %vm1781_vm10, %v1775_v30, %v1792_v41 }
 0x5e9   :  { %v11969_v0 = vmul.u32.u64.low %v11932_v14, %v1691_v62  ;;  %v11970_v5 = vmul.u32.u64.high %v11932_v14, %v1691_v62, %v11969_v0  ;;  %v11973_v1 = vmul.u32.u64.low %v11932_v14, %v1687_v60  ;;  %v11974_v9 = vmul.u32.u64.high %v11932_v14, %v1687_v60, %v11973_v1 }
 0x5ea   :  { %v1784_v14 = vsel %vm1782_vm11, %v1772_v8, 2102212464  ;;  %v1794_v2 = vsel %vm1780_vm8, %v1791_v36, %v1793_v44  ;;  %v11998_v6 = vmul.u32.u64.low %v11936_v18, %v1790_v43  ;;  %v11999_v38 = vmul.u32.u64.high %v11936_v18, %v1790_v43, %v11998_v6 }
 0x5eb   :  { %vm1701_vm9 = vc.u32 %v11970_v5, %v11973_v1  ;;  %v1702_v28 = vadd.s32 1, %v11974_v9  ;;  %v1785_v24 = vsel %vm1781_vm10, %v1769_v4, %v1784_v14  ;;  %v1965_v55 = vsel %vm1964_vm12, %v1963_v45, 0 }
 0x5ec   :  { %v1786_v42 = vsel %vm1780_vm8, %v1783_v17, %v1785_v24  ;;  %v12002_v47 = vmul.u32.u64.low %v11936_v18, %v1794_v2  ;;  %v12003_v48 = vmul.u32.u64.high %v11936_v18, %v1794_v2, %v12002_v47  ;;  %v1805_v31 = vadd.s32 1, %v11999_v38 }
 0x5ed   :  { %v1703_v34 = vsel %vm1701_vm9, %v1702_v28, %v11974_v9  ;;  %v1802_v53 = vmul.u32 %v11936_v18, %v1786_v42  ;;  %v1967_v59 = vand.u32 31, %v1965_v55  ;;  %v1700_v4 = vadd.s32 %v11973_v1, %v11970_v5 }
 0x5ee   :  { %v1704_v23 = vadd.s32 %v1703_v34, %v1699_v26  ;;  %vm1804_vm13 = vc.u32 %v12003_v48, %v11998_v6  ;;  %v12018_v12 = vadd.s32 %v11998_v6, %v12003_v48  ;;  %v12021_v22 = vshrl.u32 %v1965_v55, 5 }
 0x5ef   :  { %v1806_v58 = vsel %vm1804_vm13, %v1805_v31, %v11999_v38  ;;  %v1968_v10 = vsub.s32 32, %v1967_v59  ;;  %v12024_v26 = vmul.f32 0.7853982, %v11957_v39  ;;  %v1970_v28 = vshll.u32 %v16841_v21, %v1967_v59 }
 0x5f0   :  { %v1705_v46 = vadd.s32 536870912, %v1704_v23  ;;  %v1807_v60 = vadd.s32 %v1806_v58, %v1802_v53  ;;  %v1979_v30 = vshll.u32 %v16827_v27, %v1967_v59  ;;  %v1973_v17 = vshll.u32 %v16830_v25, %v1967_v59 }
 0x5f1   :  { %v1980_v5 = vshrl.u32 %v16839_v29, %v1968_v10  ;;  %v1971_v32 = vshrl.u32 %v16830_v25, %v1968_v10  ;;  %v1974_v33 = vshrl.u32 %v16832_v7, %v1968_v10  ;;  %v1976_v34 = vshll.u32 %v16832_v7, %v1967_v59 }
 0x5f2   :  { %v1706_v52 = vshrl.u32 %v1705_v46, 30  ;;  %v1808_v0 = vadd.s32 536870912, %v1807_v60  ;;  %v1977_v14 = vshrl.u32 %v16827_v27, %v1968_v10  ;;  %v1983_v24 = vshrl.u32 %v16834_v37, %v1968_v10 }
 0x5f3   :  { %v1981_v43 = vor.u32 %v1980_v5, %v1979_v30  ;;  %v1972_v45 = vor.u32 %v1971_v32, %v1970_v28  ;;  %v1975_v46 = vor.u32 %v1974_v33, %v1973_v17  ;;  %vm1988_vm1 = vcmp.lt.s32.totalorder %v12021_v22, 4 }
 0x5f4   :  { %v1707_v56 = vshll.u32 %v1706_v52, 30  ;;  %v12012_v18 = vshrl.u32 %v1808_v0, 30  ;;  %v1730_v13 = vsub.s32 4, %v1706_v52  ;;  %v1978_v38 = vor.u32 %v1977_v14, %v1976_v34 }
 0x5f5   :  { %vm1985_vm2 = vcmp.lt.s32.totalorder %v12021_v22, 1  ;;  %v1969_v48 = vshrl.u32 %v16841_v21, %v1968_v10  ;;  %vm1987_vm3 = vcmp.lt.s32.totalorder %v12021_v22, 3  ;;  %vm12048_vm4 = vcmp.le.f32.partialorder %v1644_v51, 0.7853982 }
 0x5f6   :  { %v1708_v57 = vsub.s32 %v1704_v23, %v1707_v56  ;;  %v1810_v20 = vshll.u32 %v12012_v18, 30  ;;  %v1731_v39 = vsel %vm1646_vm14, %v1730_v13, %v1706_v52  ;;  %v1982_v23 = vshll.u32 %v16839_v29, %v1967_v59 }
 0x5f7   :  { %vm1749_vm5 = vcmp.lt.s32.totalorder %v11914_v50, 0  ;;  %v1990_v31 = vsel %vm1988_vm1, %v1978_v38, 2102212464  ;;  %v1994_v16 = vsel %vm1988_vm1, %v1981_v43, 920167782  ;;  %v1833_v58 = vsub.s32 4, %v12012_v18 }
 0x5f8   :  { %v1710_v62 = vsub.s32 0, %v1708_v57  ;;  %v12029_v1 = vsub.s32 %v1807_v60, %v1810_v20  ;;  %v1984_v52 = vor.u32 %v1983_v24, %v1982_v23  ;;  %vm1986_vm6 = vcmp.lt.s32.totalorder %v12021_v22, 2 }
 0x5f9   :  { %v1993_v51 = vsel %vm1985_vm2, %v1972_v45, %v1975_v46  ;;  %v1997_v63 = vsel %vm1985_vm2, %v1975_v46, %v1978_v38  ;;  %v1989_v0 = vsel %vm1985_vm2, %v1969_v48, %v1972_v45  ;;  %vm12092_vm8 = vcmp.le.f32.partialorder %v1747_v54, 0.7853982 }
 0x5fa   :  { %v10540_v9 = vmin.u32 %v1710_v62, %v1708_v57  ;;  %v1813_v36 = vsub.s32 0, %v12029_v1  ;;  %v1995_v62 = vsel %vm1987_vm3, %v1978_v38, %v1994_v16  ;;  %v1998_v10 = vsel %vm1988_vm1, %v1984_v52, 1326507024 }
 0x5fb   :  { %v1996_v13 = vsel %vm1986_vm6, %v1993_v51, %v1995_v62  ;;  %v1999_v20 = vsel %vm1987_vm3, %v1981_v43, %v1998_v10  ;;  %v2159_v22 = vand.u32 2147483647, %v12024_v26  ;;  %v1834_v43 = vsel %vm1749_vm5, %v1833_v58, %v12012_v18 }
 0x5fc   :  { %v1712_v11 = vclz %v10540_v9  ;;  %v10544_v44 = vmin.u32 %v1813_v36, %v12029_v1  ;;  %v1991_v9 = vsel %vm1987_vm3, %v1975_v46, %v1990_v31  ;;  %v2000_v5 = vsel %vm1986_vm6, %v1997_v63, %v1999_v20  ;;  %v1455_v20 = vld [vmem:[%s16823_s0 + $0x50] sm:$0xff] }
 0x5fd   :  { %v1992_v17 = vsel %vm1986_vm6, %v1989_v0, %v1991_v9  ;;  %v12081_v33 = vmul.u32.u64.low %v12015_v15, %v2000_v5  ;;  %v12082_v34 = vmul.u32.u64.high %v12015_v15, %v2000_v5, %v12081_v33  ;;  %v1836_v18 = vsel %vm12092_vm8, 0, %v1834_v43 }
 0x5fe   :  { %v10541_v8 = vadd.s32 4294967294, %v1712_v11  ;;  %v1815_v47 = vclz %v10544_v44  ;;  %v12086_v36 = vmul.u32.u64.low %v12015_v15, %v1996_v13  ;;  %v12087_v23 = vmul.u32.u64.high %v12015_v15, %v1996_v13, %v12086_v36 }
 0x5ff   :  { %v2008_v54 = vmul.u32 %v12015_v15, %v1992_v17  ;;  %v5138_v53 = vadd.s32 3, %v1836_v18  ;;  %v2166_v16 = vand.u32 8388607, %v2159_v22  ;;  %vm1736_vm11 = vweird.f32 %v11911_v49 }
 0x600   :  { %vm10542_vm15 = vcmp.lt.s32.totalorder %v10541_v8, 0  ;;  %vm2010_vm9 = vc.u32 %v12082_v34, %v12086_v36  ;;  %v12127_v9 = vand.u32 3, %v1836_v18  ;;  %v12148_v33 = vadd.s32 %v12086_v36, %v12082_v34 }
 0x601   :  { %v1715_v35 = vsel %vm10542_vm15, 0, %v10541_v8  ;;  %v12129_v10 = vand.u32 3, %v5138_v53 }
 0x602   :  { %v1716_v40 = vsub.s32 32, %v1715_v35  ;;  %v1717_v41 = vshll.u32 %v1708_v57, %v1715_v35  ;;  %v1720_v42 = vsub.s32 4294967266, %v1715_v35  ;;  %v10545_v57 = vadd.s32 4294967294, %v1815_v47 }
 0x603   :  { %vm1845_vm3 = vcmp.eq.s32.totalorder %v12127_v9, 2  ;;  %vm5141_vm6 = vcmp.eq.s32.totalorder %v12129_v10, 0 }
 0x604   :  { %v1718_v2 = vshrl.u32 %v1700_v4, %v1716_v40  ;;  %v1721_v6 = vadd.s32 127, %v1720_v42  ;;  %vm10546_vm7 = vcmp.lt.s32.totalorder %v10545_v57, 0  ;;  %v2162_v40 = vand.u32 2139095040, %v12024_v26 }
 0x605   :  { %v1818_v11 = vsel %vm10546_vm7, 0, %v10545_v57  ;;  %vm1841_vm7 = vcmp.lt.s32.totalorder %v12127_v9, 2 }
 0x606   :  { %v1719_v55 = vor.u32 %v1718_v2, %v1717_v41  ;;  %v1722_v56 = vshll.u32 %v1721_v6, 23  ;;  %v1819_v8 = vsub.s32 32, %v1818_v11  ;;  %v1820_v28 = vshll.u32 %v12029_v1, %v1818_v11 }
 0x607   :  { %v1823_v30 = vsub.s32 4294967266, %v1818_v11  ;;  %v2163_v45 = vshrl.u32 %v2162_v40, 23  ;;  %v2011_v6 = vadd.s32 1, %v12087_v23 }
 0x608   :  { %v1723_v59 = vor.u32 4788187, %v1722_v56  ;;  %v1726_v60 = vcvt.s32.f32 %v1719_v55  ;;  %v1821_v14 = vshrl.u32 %v12018_v12, %v1819_v8  ;;  %v1733_v12 = vsel %vm12048_vm4, 0, %v1731_v39 }
 0x609   :  { %v1824_v35 = vadd.s32 127, %v1823_v30  ;;  %v10559_v38 = vadd.s32 4294967169, %v2163_v45  ;;  %v5034_v47 = vadd.s32 3, %v1733_v12  ;;  %v2012_v48 = vsel %vm2010_vm9, %v2011_v6, %v12087_v23 }
 0x60a   :  { %v1724_v4 = vand.u32 2147483647, %v1723_v59  ;;  %v1822_v41 = vor.u32 %v1821_v14, %v1820_v28  ;;  %v1737_v52 = vand.u32 3, %v1733_v12  ;;  %v2013_v55 = vadd.s32 %v2012_v48, %v2008_v54  ;;  %v1457_v28 = vld [vmem:[%s16823_s0 + $0x60] sm:$0xff] }
 0x60b   :  { %v1825_v42 = vshll.u32 %v1824_v35, 23  ;;  %v2169_v56 = vadd.s32 1, %v10559_v38  ;;  %v5035_v58 = vand.u32 3, %v5034_v47  ;;  %vm1839_vm9 = vweird.f32 %v11914_v50 }
 0x60c   :  { %v1727_v32 = vmul.f32 %v1726_v60, %v1724_v4  ;;  %v1829_v2 = vcvt.s32.f32 %v1822_v41  ;;  %v2014_v57 = vadd.s32 536870912, %v2013_v55  ;;  %v1453_v60 = vld [vmem:[%s16823_s0 + $0x40] sm:$0xff]  ;;  %vm1738_vm12 = vcmp.lt.s32.totalorder %v1737_v52, 2 }
 0x60d   :  { %v1826_v39 = vor.u32 4788187, %v1825_v42  ;;  %vm2170_vm10 = vcmp.gt.s32.totalorder %v2169_v56, 0  ;;  %v2167_v4 = vor.u32 8388608, %v2166_v16  ;;  %vm1739_vm13 = vcmp.eq.s32.totalorder %v1737_v52, 0 }
 0x60e   :  { %v1728_v1 = vxor.u32 2147483648, %v1727_v32  ;;  %v2171_v59 = vsel %vm2170_vm10, %v2169_v56, 0  ;;  %v12121_v62 = vshrl.u32 %v2014_v57, 30  ;;  %vm5036_vm15 = vcmp.lt.s32.totalorder %v5035_v58, 2 }
 0x60f   :  { %v1827_v15 = vand.u32 2147483647, %v1826_v39  ;;  %v12123_v63 = vand.u32 31, %v2171_v59  ;;  %vm5037_vm1 = vcmp.eq.s32.totalorder %v5035_v58, 0  ;;  %vm5040_vm2 = vcmp.eq.s32.totalorder %v5035_v58, 2 }
 0x610   :  { %v1729_v44 = vsel %vm1646_vm14, %v1728_v1, %v1727_v32  ;;  %v2016_v13 = vshll.u32 %v12121_v62, 30  ;;  %vm1742_vm14 = vcmp.eq.s32.totalorder %v1737_v52, 2  ;;  %v12150_v14 = vshll.u32 %v2167_v4, 8 }
 0x611   :  { %v1732_v46 = vsel %vm12048_vm4, %v11911_v49, %v1729_v44  ;;  %v1830_v31 = vmul.f32 %v1829_v2, %v1827_v15  ;;  %v2174_v8 = vsub.s32 32, %v12123_v63  ;;  %vm5144_vm4 = vcmp.eq.s32.totalorder %v12129_v10, 2 }
 0x612   :  { %11529 = vcosq.f32 %v1732_v46  ;;  %v12142_v5 = vsub.s32 %v2013_v55, %v2016_v13  ;;  %v2176_v1 = vshll.u32 %v16841_v21, %v12123_v63  ;;  %v2179_v36 = vshll.u32 %v16830_v25, %v12123_v63 }
 0x613   :  { %11531 = vsinq.f32 %v1732_v46  ;;  %v1831_v51 = vxor.u32 2147483648, %v1830_v31  ;;  %v2177_v34 = vshrl.u32 %v16830_v25, %v2174_v8  ;;  %v2180_v43 = vshrl.u32 %v16832_v7, %v2174_v8 }
 0x614   :  { %11533 = vtanh.f32 %v1453_v60  ;;  %v2019_v23 = vsub.s32 0, %v12142_v5  ;;  %v12171_v45 = vshrl.u32 %v2171_v59, 5  ;;  %v2182_v46 = vshll.u32 %v16832_v7, %v12123_v63 }
 0x615   :  { %v1832_v0 = vsel %vm1749_vm5, %v1831_v51, %v1830_v31  ;;  %vm1842_vm5 = vcmp.eq.s32.totalorder %v12127_v9, 0  ;;  %v2039_v18 = vsub.s32 4, %v12121_v62  ;;  %v2183_v15 = vshrl.u32 %v16827_v27, %v2174_v8 }
 0x616   :  { %v1835_v11 = vsel %vm12092_vm8, %v11914_v50, %v1832_v0  ;;  %vm5140_vm8 = vcmp.lt.s32.totalorder %v12129_v10, 2  ;;  %v10552_v42 = vmin.u32 %v2019_v23, %v12142_v5  ;;  %v2185_v48 = vshll.u32 %v16827_v27, %v12123_v63 }
 0x617   :  { %11535 = vcosq.f32 %v1835_v11  ;;  %v2175_v56 = vshrl.u32 %v16841_v21, %v2174_v8  ;;  %v2178_v31 = vor.u32 %v2177_v34, %v2176_v1  ;;  %v2181_v53 = vor.u32 %v2180_v43, %v2179_v36 }
 0x618   :  { %11537 = vsinq.f32 %v1835_v11  ;;  %v2021_v6 = vclz %v10552_v42  ;;  %v2184_v58 = vor.u32 %v2183_v15, %v2182_v46  ;;  %v2186_v51 = vshrl.u32 %v16839_v29, %v2174_v8 }
 0x619   :  { %11539 = vtanh.f32 %v1455_v20  ;;  %v2188_v0 = vshll.u32 %v16839_v29, %v12123_v63  ;;  %v2189_v4 = vshrl.u32 %v16834_v37, %v2174_v8 }
 0x61a   :  { %11541 = vtanh.f32 %v1457_v28  ;;  %v10553_v55 = vadd.s32 4294967294, %v2021_v6 }
 0x61c   :  { %v11530_v30 = vpop.eup %11529  ;;  %vm10554_vm10 = vcmp.lt.s32.totalorder %v10553_v55, 0 }
 0x61d   :  { %v11532_v32 = vpop.eup %11531  ;;  %v1743_v17 = vxor.u32 2147483648, %v11530_v30  ;;  %v2024_v28 = vsel %vm10554_vm10, 0, %v10553_v55 }
 0x61e   :  { %v1740_v35 = vxor.u32 2147483648, %v11532_v32  ;;  %v12183_v52 = vpop.eup %11533  ;;  %v2025_v63 = vsub.s32 32, %v2024_v28  ;;  %v2026_v8 = vshll.u32 %v12142_v5, %v2024_v28 }
 0x61f   :  { %v1744_v24 = vsel %vm1742_vm14, %v1743_v17, %v11532_v32  ;;  %v5042_v40 = vsel %vm5040_vm2, %v1743_v17, %v11532_v32  ;;  %vm2193_vm14 = vcmp.lt.s32.totalorder %v12171_v45, 3 }
 0x620   :  { %v1741_v12 = vsel %vm1739_vm13, %v11530_v30, %v1740_v35  ;;  %v5039_v41 = vsel %vm5037_vm1, %v11530_v30, %v1740_v35  ;;  %v2187_v30 = vor.u32 %v2186_v51, %v2185_v48  ;;  %vm2192_vm13 = vcmp.lt.s32.totalorder %v12171_v45, 2 }
 0x621   :  { %v1745_v44 = vsel %vm1738_vm12, %v1741_v12, %v1744_v24  ;;  %v5043_v54 = vsel %vm5036_vm15, %v5039_v41, %v5042_v40  ;;  %v11536_v16 = vpop.eup %11535  ;;  %v2029_v24 = vsub.s32 4294967266, %v2024_v28  ;;  %v2190_v40 = vor.u32 %v2189_v4, %v2188_v0 }
 0x622   :  { %v1746_v39 = vsel %vm1736_vm11, nan, %v1745_v44  ;;  %v5044_v2 = vsel %vm1736_vm11, nan, %v5043_v54  ;;  %v11538_v59 = vpop.eup %11537  ;;  %v1846_v60 = vxor.u32 2147483648, %v11536_v16  ;;  %vm1955_vm11 = vcmp.lt.s32.totalorder %v11926_v61, 0 }
 0x623   :  { %v8166_v38 = vsub.f32 %v1746_v39, %v5044_v2  ;;  %v8230_v47 = vadd.f32 %v5044_v2, %v1746_v39  ;;  %v11540_v11 = vpop.eup %11539  ;;  %v1843_v20 = vxor.u32 2147483648, %v11538_v59  ;;  %v2027_v12 = vshrl.u32 %v12148_v33, %v2025_v63 }
 0x624   :  { %v12196_v32 = vpop.eup %11541  ;;  %v1847_v17 = vsel %vm1845_vm3, %v1846_v60, %v11538_v59  ;;  %v5146_v35 = vsel %vm5144_vm4, %v1846_v60, %v11538_v59  ;;  %vm2191_vm12 = vcmp.lt.s32.totalorder %v12171_v45, 1  ;;  %v2030_v42 = vadd.s32 127, %v2029_v24 }
 0x625   :  { %v12186_v49 = vmul.f32 0.70710677, %v8166_v38  ;;  %v8262_v57 = vmul.f32 0.70710677, %v8230_v47  ;;  %v1844_v23 = vsel %vm1842_vm5, %v11536_v16, %v1843_v20  ;;  %v5143_v1 = vsel %vm5141_vm6, %v11536_v16, %v1843_v20 }
 0x626   :  { %v1848_v34 = vsel %vm1841_vm7, %v1844_v23, %v1847_v17  ;;  %v5147_v36 = vsel %vm5140_vm8, %v5143_v1, %v5146_v35  ;;  %v2028_v9 = vor.u32 %v2027_v12, %v2026_v8  ;;  %v2031_v10 = vshll.u32 %v2030_v42, 23  ;;  %v878_v17 = vpop.permute.xlu0 %877 }
 0x627   :  { %v12193_v13 = vsub.f32 %v8262_v57, %v12186_v49  ;;  %v1849_v5 = vsel %vm1839_vm9, nan, %v1848_v34  ;;  %v5148_v41 = vsel %vm1839_vm9, nan, %v5147_v36  ;;  %vm2194_vm15 = vcmp.lt.s32.totalorder %v12171_v45, 4  ;;  %11290 = vpush %v878_v17 }
 0x628   :  { %v8167_v43 = vsub.f32 %v1849_v5, %v5148_v41  ;;  %v8231_v44 = vadd.f32 %v5148_v41, %v1849_v5  ;;  %v2195_v33 = vsel %vm2191_vm12, %v2175_v56, %v2178_v31  ;;  %v2199_v54 = vsel %vm2191_vm12, %v2178_v31, %v2181_v53 }
 0x629   :  { %8337 = vperm.xlu1 %11460, %v12193_v13   ;;  %v2035_v39 = vcvt.s32.f32 %v2028_v9  ;;  %v2196_v2 = vsel %vm2194_vm15, %v2184_v58, 2102212464  ;;  %v2032_v6 = vor.u32 4788187, %v2031_v10  ;;  %v2200_v47 = vsel %vm2194_vm15, %v2187_v30, 920167782 }
 0x62a   :  { %v12225_v46 = vmul.f32 0.70710677, %v8167_v43  ;;  %v8263_v50 = vmul.f32 0.70710677, %v8231_v44  ;;  %v2197_v38 = vsel %vm2193_vm14, %v2181_v53, %v2196_v2  ;;  %v2203_v15 = vsel %vm2191_vm12, %v2181_v53, %v2184_v58 }
 0x62b   :  { %v2040_v55 = vsel %vm1955_vm11, %v2039_v18, %v12121_v62  ;;  %v2201_v56 = vsel %vm2193_vm14, %v2184_v58, %v2200_v47  ;;  %v2204_v31 = vsel %vm2194_vm15, %v2190_v40, 1326507024  ;;  %v2033_v16 = vand.u32 2147483647, %v2032_v6 }
 0x62c   :  { %v12232_v48 = vsub.f32 %v8263_v50, %v12225_v46  ;;  %v2198_v57 = vsel %vm2192_vm13, %v2195_v33, %v2197_v38  ;;  %v2202_v51 = vsel %vm2192_vm13, %v2199_v54, %v2201_v56  ;;  %v2205_v53 = vsel %vm2193_vm14, %v2187_v30, %v2204_v31  ;;  %v885_v30 = vpop.permute.xlu1 %884 }
 0x62d   :  { %v2206_v59 = vsel %vm2192_vm13, %v2203_v15, %v2205_v53  ;;  %v12249_v62 = vmul.u32.u64.low %v12150_v14, %v2202_v51  ;;  %v12250_v18 = vmul.u32.u64.high %v12150_v14, %v2202_v51, %v12249_v62  ;;  %v12253_v58 = vmul.f32 0.7853982, %v12183_v52  ;;  %11292 = vpush %v885_v30 }
 0x62e   :  { %8342 = vperm.xlu1 %11460, %v12232_v48   ;;  %v2036_v60 = vmul.f32 %v2035_v39, %v2033_v16  ;;  %v12256_v0 = vmul.u32.u64.low %v12150_v14, %v2206_v59  ;;  %v12257_v4 = vmul.u32.u64.high %v12150_v14, %v2206_v59, %v12256_v0  ;;  %v12259_v20 = vmul.f32 0.7853982, %v11540_v11 }
 0x62f   :  { %vm12263_vm1 = vcmp.le.f32.partialorder %v1953_v19, 0.7853982  ;;  %v2368_v45 = vand.u32 2139095040, %v12253_v58  ;;  %v2214_v63 = vmul.u32 %v12150_v14, %v2198_v57  ;;  %v2365_v8 = vand.u32 2147483647, %v12253_v58 }
 0x630   :  { %v2037_v35 = vxor.u32 2147483648, %v2036_v60  ;;  %v2042_v52 = vsel %vm12263_vm1, 0, %v2040_v55  ;;  %v2217_v11 = vadd.s32 1, %v12250_v18  ;;  %v2574_v19 = vand.u32 2139095040, %v12259_v20 }
 0x631   :  { %v2369_v23 = vshrl.u32 %v2368_v45, 23  ;;  %vm2216_vm2 = vc.u32 %v12257_v4, %v12249_v62  ;;  %v5346_v40 = vadd.s32 3, %v2042_v52  ;;  %v2372_v12 = vand.u32 8388607, %v2365_v8 }
 0x632   :  { %v2038_v1 = vsel %vm1955_vm11, %v2037_v35, %v2036_v60  ;;  %v2218_v14 = vsel %vm2216_vm2, %v2217_v11, %v12250_v18  ;;  %v2571_v41 = vand.u32 2147483647, %v12259_v20  ;;  %v2575_v42 = vshrl.u32 %v2574_v19, 23 }
 0x633   :  { %v2041_v24 = vsel %vm12263_vm1, %v11926_v61, %v2038_v1  ;;  %v10567_v34 = vadd.s32 4294967169, %v2369_v23  ;;  %v2219_v36 = vadd.s32 %v2218_v14, %v2214_v63  ;;  %v2046_v43 = vand.u32 3, %v2042_v52 }
 0x634   :  { %11543 = vcosq.f32 %v2041_v24  ;;  %v5347_v9 = vand.u32 3, %v5346_v40  ;;  %v2373_v33 = vor.u32 8388608, %v2372_v12  ;;  %vm2045_vm4 = vweird.f32 %v11926_v61 }
 0x635   :  { %11545 = vsinq.f32 %v2041_v24  ;;  %v2375_v5 = vadd.s32 1, %v10567_v34  ;;  %v2220_v44 = vadd.s32 536870912, %v2219_v36  ;;  %v10575_v39 = vadd.s32 4294967169, %v2575_v42 }
 0x636   :  { %v12289_v2 = vand.u32 8388607, %v2571_v41  ;;  %vm2047_vm5 = vcmp.lt.s32.totalorder %v2046_v43, 2  ;;  %vm2048_vm6 = vcmp.eq.s32.totalorder %v2046_v43, 0  ;;  %v12293_v47 = vmul.f32 0.7853982, %v12196_v32 }
 0x637   :  { %vm2376_vm3 = vcmp.gt.s32.totalorder %v2375_v5, 0  ;;  %v12284_v10 = vshrl.u32 %v2220_v44, 30  ;;  %vm2051_vm7 = vcmp.eq.s32.totalorder %v2046_v43, 2  ;;  %vm5348_vm8 = vcmp.lt.s32.totalorder %v5347_v9, 2 }
 0x638   :  { %v2377_v54 = vsel %vm2376_vm3, %v2375_v5, 0  ;;  %vm5349_vm9 = vcmp.eq.s32.totalorder %v5347_v9, 0  ;;  %vm5352_vm10 = vcmp.eq.s32.totalorder %v5347_v9, 2  ;;  %v2215_v56 = vadd.s32 %v12249_v62, %v12257_v4 }
 0x639   :  { %v2379_v50 = vand.u32 31, %v2377_v54  ;;  %v2222_v38 = vshll.u32 %v12284_v10, 30  ;;  %v12299_v16 = vshll.u32 %v2373_v33, 8  ;;  %v2245_v57 = vsub.s32 4, %v12284_v10 }
 0x63a   :  { %v12303_v32 = vshrl.u32 %v2377_v54, 5  ;;  %v2579_v51 = vor.u32 8388608, %v12289_v2  ;;  %v12306_v53 = vadd.s32 1, %v10575_v39  ;;  %v2780_v0 = vand.u32 2139095040, %v12293_v47 }
 0x63b   :  { %v2380_v55 = vsub.s32 32, %v2379_v50  ;;  %v12297_v31 = vsub.s32 %v2219_v36, %v2222_v38  ;;  %v2382_v60 = vshll.u32 %v16841_v21, %v2379_v50  ;;  %v2385_v62 = vshll.u32 %v16830_v25, %v2379_v50 }
 0x63c   :  { %v2388_v17 = vshll.u32 %v16832_v7, %v2379_v50  ;;  %v2391_v11 = vshll.u32 %v16827_v27, %v2379_v50  ;;  %v2394_v1 = vshll.u32 %v16839_v29, %v2379_v50  ;;  %vm2161_vm11 = vcmp.lt.s32.totalorder %v12024_v26, 0 }
 0x63d   :  { %v2225_v18 = vsub.s32 0, %v12297_v31  ;;  %v2383_v45 = vshrl.u32 %v16830_v25, %v2380_v55  ;;  %v2386_v30 = vshrl.u32 %v16832_v7, %v2380_v55  ;;  %v2389_v63 = vshrl.u32 %v16827_v27, %v2380_v55 }
 0x63e   :  { %v11544_v59 = vpop.eup %11543  ;;  %v2381_v34 = vshrl.u32 %v16841_v21, %v2380_v55  ;;  %vm2582_vm12 = vcmp.gt.s32.totalorder %v12306_v53, 0  ;;  %v2395_v43 = vshrl.u32 %v16834_v37, %v2380_v55  ;;  %vm2397_vm14 = vcmp.lt.s32.totalorder %v12303_v32, 1 }
 0x63f   :  { %v11546_v4 = vpop.eup %11545  ;;  %v2052_v28 = vxor.u32 2147483648, %v11544_v59  ;;  %v10560_v52 = vmin.u32 %v2225_v18, %v12297_v31  ;;  %v2384_v5 = vor.u32 %v2383_v45, %v2382_v60  ;;  %v2387_v42 = vor.u32 %v2386_v30, %v2385_v62 }
 0x640   :  { %v2049_v35 = vxor.u32 2147483648, %v11546_v4  ;;  %v2390_v50 = vor.u32 %v2389_v63, %v2388_v17  ;;  %vm2398_vm15 = vcmp.lt.s32.totalorder %v12303_v32, 2  ;;  %vm2399_vm1 = vcmp.lt.s32.totalorder %v12303_v32, 3 }
 0x641   :  { %v2053_v23 = vsel %vm2051_vm7, %v2052_v28, %v11546_v4  ;;  %v5354_v19 = vsel %vm5352_vm10, %v2052_v28, %v11546_v4  ;;  %v2227_v14 = vclz %v10560_v52  ;;  %vm2400_vm2 = vcmp.lt.s32.totalorder %v12303_v32, 4 }
 0x642   :  { %v2050_v24 = vsel %vm2048_vm6, %v11544_v59, %v2049_v35  ;;  %v5351_v40 = vsel %vm5349_vm9, %v11544_v59, %v2049_v35  ;;  %v2396_v59 = vor.u32 %v2395_v43, %v2394_v1  ;;  %v2401_v4 = vsel %vm2397_vm14, %v2381_v34, %v2384_v5 }
 0x643   :  { %v2054_v36 = vsel %vm2047_vm5, %v2050_v24, %v2053_v23  ;;  %v5355_v12 = vsel %vm5348_vm8, %v5351_v40, %v5354_v19  ;;  %v10561_v54 = vadd.s32 4294967294, %v2227_v14  ;;  %v2402_v28 = vsel %vm2400_vm2, %v2390_v50, 2102212464  ;;  %v1459_v24 = vld [vmem:[%s16823_s0 + $0x70] sm:$0xff] }
 0x644   :  { %v2055_v44 = vsel %vm2045_vm4, nan, %v2054_v36  ;;  %v5356_v33 = vsel %vm2045_vm4, nan, %v5355_v12  ;;  %v2405_v45 = vsel %vm2397_vm14, %v2384_v5, %v2387_v42  ;;  %v2403_v35 = vsel %vm2399_vm1, %v2387_v42, %v2402_v28 }
 0x645   :  { %v8169_v39 = vsub.f32 %v2055_v44, %v5356_v33  ;;  %vm10562_vm13 = vcmp.lt.s32.totalorder %v10561_v54, 0  ;;  %vm12386_vm3 = vcmp.le.f32.partialorder %v2159_v22, 0.7853982  ;;  %11547 = vtanh.f32 %v1459_v24 }
 0x646   :  { %v12401_v22 = vshll.u32 %v2579_v51, 8  ;;  %vm2367_vm5 = vcmp.lt.s32.totalorder %v12253_v58, 0  ;;  %vm12431_vm10 = vcmp.le.f32.partialorder %v2365_v8, 0.7853982 }
 0x647   :  { %v12338_v9 = vmul.f32 0.70710677, %v8169_v39 }
 0x649   :  { %16947 = vst [vmem:[#allocation3_spill] sm:$0xff] %v12338_v9 }
 0x658   :  { %s13062_s9 = spop %11290 }
 0x65e   :  { %s13091_s10 = spop %11292 }
 0x6b5   :  { %v11040_v6 = vpop.f32.mrb[6].mxu1 }
 0x6b6   :  { %v771_v15 = vpop.f32.mrb[7].mxu1 }
 0x6b7   :  { %11045 = vmatprep.mubr.msk.f32.mxu0 %vm23_vm0, %v771_v15  ;;  %v2230_v15 = vsel %vm10562_vm13, 0, %v10561_v54 }
 0x6b8   :  { %11046 = vmatmul.mubr.msk.f32.vlgmr.msra.gmra.mrb[8].mxu0 %vm23_vm0, %v11040_v6  ;;  %v8233_v6 = vadd.f32 %v5356_v33, %v2055_v44  ;;  %v2231_v18 = vsub.s32 32, %v2230_v15  ;;  %v2232_v60 = vshll.u32 %v12297_v31, %v2230_v15  ;;  %v2235_v62 = vsub.s32 4294967266, %v2230_v15 }
 0x6b9   :  { %11237 = vmatpush3.bf16.msra.mxu0 %v11779_v3  ;;  %v2392_v3 = vshrl.u32 %v16839_v29, %v2380_v55  ;;  %v2246_v31 = vsel %vm2161_vm11, %v2245_v57, %v12284_v10  ;;  %v2404_v10 = vsel %vm2398_vm15, %v2401_v4, %v2403_v35  ;;  %v2583_v44 = vsel %vm2582_vm12, %v12306_v53, 0 }
 0x6ba   :  { %v8265_v61 = vmul.f32 0.70710677, %v8233_v6  ;;  %v2233_v30 = vshrl.u32 %v2215_v56, %v2231_v18  ;;  %v2236_v17 = vadd.s32 127, %v2235_v62  ;;  %v2410_v56 = vsel %vm2400_vm2, %v2396_v59, 1326507024 }
 0x6bb   :  { %v2393_v38 = vor.u32 %v2392_v3, %v2391_v11  ;;  %v2409_v11 = vsel %vm2397_vm14, %v2387_v42, %v2390_v50  ;;  %v1461_v42 = vld [vmem:[%s16823_s0 + $0x80] sm:$0xff]  ;;  %v2248_v54 = vsel %vm12386_vm3, 0, %v2246_v31  ;;  %v2585_v39 = vand.u32 31, %v2583_v44 }
 0x6bc   :  { %v12343_v55 = vsub.f32 %v8265_v61, %v12338_v9  ;;  %v2234_v23 = vor.u32 %v2233_v30, %v2232_v60  ;;  %v2237_v19 = vshll.u32 %v2236_v17, 23  ;;  %v12396_v6 = vand.u32 3, %v2248_v54 }
 0x6bd   :  { %v2406_v52 = vsel %vm2400_vm2, %v2393_v38, 920167782  ;;  %v2411_v1 = vsel %vm2399_vm1, %v2393_v38, %v2410_v56  ;;  %11549 = vtanh.f32 %v1461_v42  ;;  %v2586_v53 = vsub.s32 32, %v2585_v39 }
 0x6be   :  { %8352 = vperm.xlu1 %11460, %v12343_v55   ;;  %v2407_v63 = vsel %vm2399_vm1, %v2390_v50, %v2406_v52  ;;  %v2412_v57 = vsel %vm2398_vm15, %v2409_v11, %v2411_v1  ;;  %v2238_v34 = vor.u32 4788187, %v2237_v19  ;;  %v2241_v36 = vcvt.s32.f32 %v2234_v23 }
 0x6bf   :  { %v2408_v3 = vsel %vm2398_vm15, %v2405_v45, %v2407_v63  ;;  %v12378_v12 = vmul.u32.u64.low %v12299_v16, %v2412_v57  ;;  %v12379_v5 = vmul.u32.u64.high %v12299_v16, %v2412_v57, %v12378_v12  ;;  %v2420_v50 = vmul.u32 %v12299_v16, %v2404_v10 }
 0x6c0   :  { %v12373_v40 = vmul.u32.u64.low %v12299_v16, %v2408_v3  ;;  %v12374_v14 = vmul.u32.u64.high %v12299_v16, %v2408_v3, %v12373_v40  ;;  %v2239_v33 = vand.u32 2147483647, %v2238_v34  ;;  %v2781_v61 = vshrl.u32 %v2780_v0, 23  ;;  %v12424_v3 = vpop.eup %11547 }
 0x6c1   :  { %v2588_v15 = vshll.u32 %v16841_v21, %v2585_v39  ;;  %v2591_v59 = vshll.u32 %v16830_v25, %v2585_v39  ;;  %v2594_v18 = vshll.u32 %v16832_v7, %v2585_v39  ;;  %v2584_v60 = vshrl.u32 %v2583_v44, 5 }
 0x6c2   :  { %v2423_v38 = vadd.s32 1, %v12374_v14  ;;  %v2242_v43 = vmul.f32 %v2241_v36, %v2239_v33  ;;  %vm2422_vm4 = vc.u32 %v12379_v5, %v12373_v40  ;;  %v2589_v62 = vshrl.u32 %v16830_v25, %v2586_v53 }
 0x6c3   :  { %v2592_v4 = vshrl.u32 %v16832_v7, %v2586_v53  ;;  %v2595_v28 = vshrl.u32 %v16827_v27, %v2586_v53  ;;  %v2597_v45 = vshll.u32 %v16827_v27, %v2585_v39  ;;  %v2598_v0 = vshrl.u32 %v16839_v29, %v2586_v53 }
 0x6c4   :  { %v2424_v16 = vsel %vm2422_vm4, %v2423_v38, %v12374_v14  ;;  %v2243_v2 = vxor.u32 2147483648, %v2242_v43  ;;  %v2590_v35 = vor.u32 %v2589_v62, %v2588_v15  ;;  %v2600_v52 = vshll.u32 %v16839_v29, %v2585_v39 }
 0x6c5   :  { %v2425_v51 = vadd.s32 %v2424_v16, %v2420_v50  ;;  %v2593_v63 = vor.u32 %v2592_v4, %v2591_v59  ;;  %v2596_v11 = vor.u32 %v2595_v28, %v2594_v18  ;;  %v2599_v56 = vor.u32 %v2598_v0, %v2597_v45 }
 0x6c6   :  { %v2244_v30 = vsel %vm2161_vm11, %v2243_v2, %v2242_v43  ;;  %v2601_v19 = vshrl.u32 %v16834_v37, %v2586_v53  ;;  %vm2603_vm6 = vcmp.lt.s32.totalorder %v2584_v60, 1  ;;  %v2587_v1 = vshrl.u32 %v16841_v21, %v2586_v53 }
 0x6c7   :  { %v2426_v17 = vadd.s32 536870912, %v2425_v51  ;;  %v2247_v31 = vsel %vm12386_vm3, %v12024_v26, %v2244_v30  ;;  %vm2605_vm7 = vcmp.lt.s32.totalorder %v2584_v60, 3  ;;  %vm2606_vm8 = vcmp.lt.s32.totalorder %v2584_v60, 4  ;;  %v12427_v14 = vpop.eup %11549 }
 0x6c8   :  { %11551 = vcosq.f32 %v2247_v31  ;;  %v5554_v24 = vadd.s32 3, %v2248_v54  ;;  %v2602_v57 = vor.u32 %v2601_v19, %v2600_v52  ;;  %vm2604_vm9 = vcmp.lt.s32.totalorder %v2584_v60, 2 }
 0x6c9   :  { %v2427_v23 = vshrl.u32 %v2426_v17, 30  ;;  %11553 = vsinq.f32 %v2247_v31  ;;  %v2608_v36 = vsel %vm2606_vm8, %v2596_v11, 2102212464  ;;  %v2611_v12 = vsel %vm2603_vm6, %v2590_v35, %v2593_v63 }
 0x6ca   :  { %v2612_v42 = vsel %vm2606_vm8, %v2599_v56, 920167782  ;;  %v10583_v32 = vadd.s32 4294967169, %v2781_v61  ;;  %v2615_v50 = vsel %vm2603_vm6, %v2593_v63, %v2596_v11  ;;  %vm2251_vm11 = vweird.f32 %v12024_v26 }
 0x6cb   :  { %v2428_v10 = vshll.u32 %v2427_v23, 30  ;;  %v2451_v33 = vsub.s32 4, %v2427_v23  ;;  %v2613_v54 = vsel %vm2605_vm7, %v2596_v11, %v2612_v42  ;;  %v2607_v8 = vsel %vm2603_vm6, %v2587_v1, %v2590_v35 }
 0x6cc   :  { %v2609_v39 = vsel %vm2605_vm7, %v2593_v63, %v2608_v36  ;;  %v2614_v38 = vsel %vm2604_vm9, %v2611_v12, %v2613_v54  ;;  %v2616_v43 = vsel %vm2606_vm8, %v2602_v57, 1326507024  ;;  %v5555_v53 = vand.u32 3, %v5554_v24 }
 0x6cd   :  { %v12438_v44 = vsub.s32 %v2425_v51, %v2428_v10  ;;  %v2617_v16 = vsel %vm2605_vm7, %v2599_v56, %v2616_v43  ;;  %v2777_v15 = vand.u32 2147483647, %v12293_v47  ;;  %vm2253_vm12 = vcmp.lt.s32.totalorder %v12396_v6, 2 }
 0x6ce   :  { %v2618_v59 = vsel %vm2604_vm9, %v2615_v50, %v2617_v16  ;;  %v12453_v18 = vmul.u32.u64.low %v12401_v22, %v2614_v38  ;;  %v12454_v2 = vmul.u32.u64.high %v12401_v22, %v2614_v38, %v12453_v18  ;;  %vm2254_vm13 = vcmp.eq.s32.totalorder %v12396_v6, 0 }
 0x6cf   :  { %v2431_v61 = vsub.s32 0, %v12438_v44  ;;  %vm2257_vm14 = vcmp.eq.s32.totalorder %v12396_v6, 2  ;;  %v2610_v62 = vsel %vm2604_vm9, %v2607_v8, %v2609_v39  ;;  %v2452_v4 = vsel %vm2367_vm5, %v2451_v33, %v2427_v23 }
 0x6d0   :  { %v12464_v28 = vmul.u32.u64.low %v12401_v22, %v2618_v59  ;;  %v12465_v45 = vmul.u32.u64.high %v12401_v22, %v2618_v59, %v12464_v28  ;;  %v2787_v0 = vadd.s32 1, %v10583_v32  ;;  %vm5556_vm15 = vcmp.lt.s32.totalorder %v5555_v53, 2 }
 0x6d1   :  { %v10568_v51 = vmin.u32 %v2431_v61, %v12438_v44  ;;  %vm5557_vm1 = vcmp.eq.s32.totalorder %v5555_v53, 0  ;;  %vm5560_vm2 = vcmp.eq.s32.totalorder %v5555_v53, 2  ;;  %v2421_v31 = vadd.s32 %v12373_v40, %v12379_v5 }
 0x6d2   :  { %v11552_v30 = vpop.eup %11551  ;;  %v2626_v60 = vmul.u32 %v12401_v22, %v2610_v62  ;;  %v2784_v63 = vand.u32 8388607, %v2777_v15  ;;  %v2454_v23 = vsel %vm12431_vm10, 0, %v2452_v4  ;;  %v2629_v19 = vadd.s32 1, %v12454_v2 }
 0x6d3   :  { %v2433_v17 = vclz %v10568_v51  ;;  %v11554_v35 = vpop.eup %11553  ;;  %v2258_v52 = vxor.u32 2147483648, %v11552_v30  ;;  %vm2628_vm3 = vc.u32 %v12465_v45, %v12453_v18  ;;  %vm2788_vm4 = vcmp.gt.s32.totalorder %v2787_v0, 0 }
 0x6d4   :  { %v2255_v11 = vxor.u32 2147483648, %v11554_v35  ;;  %v2630_v22 = vsel %vm2628_vm3, %v2629_v19, %v12454_v2  ;;  %v2789_v6 = vsel %vm2788_vm4, %v2787_v0, 0  ;;  %v5762_v51 = vadd.s32 3, %v2454_v23 }
 0x6d5   :  { %v10569_v56 = vadd.s32 4294967294, %v2433_v17  ;;  %v2259_v1 = vsel %vm2257_vm14, %v2258_v52, %v11554_v35  ;;  %v5562_v24 = vsel %vm5560_vm2, %v2258_v52, %v11554_v35  ;;  %v2631_v12 = vadd.s32 %v2630_v22, %v2626_v60 }
 0x6d6   :  { %v2256_v40 = vsel %vm2254_vm13, %v11552_v30, %v2255_v11  ;;  %v5559_v5 = vsel %vm5557_vm1, %v11552_v30, %v2255_v11  ;;  %v2791_v26 = vand.u32 31, %v2789_v6  ;;  %v12497_v62 = vmul.f32 0.7853982, %v12424_v3 }
 0x6d7   :  { %vm10570_vm6 = vcmp.lt.s32.totalorder %v10569_v56, 0  ;;  %v2260_v10 = vsel %vm2253_vm12, %v2256_v40, %v2259_v1  ;;  %v5563_v57 = vsel %vm5556_vm15, %v5559_v5, %v5562_v24  ;;  %v2632_v38 = vadd.s32 536870912, %v2631_v12 }
 0x6d8   :  { %v2436_v36 = vsel %vm10570_vm6, 0, %v10569_v56  ;;  %v2261_v42 = vsel %vm2251_vm11, nan, %v2260_v10  ;;  %v5564_v32 = vsel %vm2251_vm11, nan, %v5563_v57  ;;  %v2785_v30 = vor.u32 8388608, %v2784_v63 }
 0x6d9   :  { %v2437_v33 = vsub.s32 32, %v2436_v36  ;;  %v2438_v54 = vshll.u32 %v12438_v44, %v2436_v36  ;;  %v8171_v50 = vsub.f32 %v2261_v42, %v5564_v32  ;;  %v8235_v8 = vadd.f32 %v5564_v32, %v2261_v42  ;;  %v1463_v44 = vld [vmem:[%s16823_s0 + $0x90] sm:$0xff] }
 0x6da   :  { %v2441_v39 = vsub.s32 4294967266, %v2436_v36  ;;  %v12494_v59 = vshrl.u32 %v2632_v38, 30  ;;  %v2792_v17 = vsub.s32 32, %v2791_v26  ;;  %v12507_v35 = vmul.f32 0.7853982, %v12427_v14 }
 0x6db   :  { %v2439_v43 = vshrl.u32 %v2421_v31, %v2437_v33  ;;  %v12492_v53 = vmul.f32 0.70710677, %v8171_v50  ;;  %v8267_v61 = vmul.f32 0.70710677, %v8235_v8  ;;  %11555 = vtanh.f32 %v1463_v44 }
 0x6dc   :  { %v2442_v16 = vadd.s32 127, %v2441_v39  ;;  %v2634_v0 = vshll.u32 %v12494_v59, 30  ;;  %v12512_v60 = vand.u32 3, %v2454_v23  ;;  %v12514_v11 = vand.u32 3, %v5762_v51 }
 0x6dd   :  { %16952 = vst [vmem:[#allocation4_spill] sm:$0xff] %v12492_v53  ;;  %v2440_v2 = vor.u32 %v2439_v43, %v2438_v54  ;;  %v12503_v4 = vsub.f32 %v8267_v61, %v12492_v53  ;;  %v2983_v56 = vand.u32 2147483647, %v12497_v62  ;;  %v2986_v19 = vand.u32 2139095040, %v12497_v62 }
 0x6de   :  { %v2443_v28 = vshll.u32 %v2442_v16, 23  ;;  %v12510_v31 = vsub.s32 %v2631_v12, %v2634_v0  ;;  %v2794_v14 = vshll.u32 %v16841_v21, %v2791_v26  ;;  %v12520_v24 = vshll.u32 %v2785_v30, 8 }
 0x6df   :  { %16953 = vst [vmem:[#allocation5_spill] sm:$0xff] %v12503_v4  ;;  %8362 = vperm.xlu1 %11460, %v12503_v4   ;;  %v2447_v3 = vcvt.s32.f32 %v2440_v2  ;;  %v2795_v40 = vshrl.u32 %v16830_v25, %v2792_v17  ;;  %v2797_v5 = vshll.u32 %v16830_v25, %v2791_v26  ;;  %v2798_v23 = vshrl.u32 %v16832_v7, %v2792_v17 }
 0x6e0   :  { %v2444_v52 = vor.u32 4788187, %v2443_v28  ;;  %v2637_v1 = vsub.s32 0, %v12510_v31  ;;  %v2800_v22 = vshll.u32 %v16832_v7, %v2791_v26  ;;  %v2801_v36 = vshrl.u32 %v16827_v27, %v2792_v17 }
 0x6e1   :  { %v2803_v12 = vshll.u32 %v16827_v27, %v2791_v26  ;;  %v2627_v42 = vadd.s32 %v12453_v18, %v12465_v45  ;;  %v2790_v32 = vshrl.u32 %v2789_v6, 5  ;;  %v2804_v33 = vshrl.u32 %v16839_v29, %v2792_v17 }
 0x6e2   :  { %v2445_v63 = vand.u32 2147483647, %v2444_v52  ;;  %v10576_v57 = vmin.u32 %v2637_v1, %v12510_v31  ;;  %v2987_v54 = vshrl.u32 %v2986_v19, 23  ;;  %vm2573_vm7 = vcmp.lt.s32.totalorder %v12259_v20, 0 }
 0x6e3   :  { %v2806_v39 = vshll.u32 %v16839_v29, %v2791_v26  ;;  %v2807_v38 = vshrl.u32 %v16834_v37, %v2792_v17  ;;  %v2657_v43 = vsub.s32 4, %v12494_v59  ;;  %v2793_v61 = vshrl.u32 %v16841_v21, %v2792_v17 }
 0x6e4   :  { %v2448_v10 = vmul.f32 %v2447_v3, %v2445_v63  ;;  %v2639_v8 = vclz %v10576_v57  ;;  %v2796_v16 = vor.u32 %v2795_v40, %v2794_v14  ;;  %v2799_v2 = vor.u32 %v2798_v23, %v2797_v5 }
 0x6e5   :  { %v2802_v6 = vor.u32 %v2801_v36, %v2800_v22  ;;  %v2805_v51 = vor.u32 %v2804_v33, %v2803_v12  ;;  %v2808_v28 = vor.u32 %v2807_v38, %v2806_v39  ;;  %vm2809_vm8 = vcmp.lt.s32.totalorder %v2790_v32, 1  ;;  %v12542_v26 = vpop.eup %11555 }
 0x6e6   :  { %v2449_v50 = vxor.u32 2147483648, %v2448_v10  ;;  %v10577_v45 = vadd.s32 4294967294, %v2639_v8  ;;  %vm2812_vm9 = vcmp.lt.s32.totalorder %v2790_v32, 4  ;;  %vm12546_vm11 = vcmp.le.f32.partialorder %v2571_v41, 0.7853982 }
 0x6e7   :  { %vm2810_vm12 = vcmp.lt.s32.totalorder %v2790_v32, 2  ;;  %v2814_v30 = vsel %vm2812_vm9, %v2802_v6, 2102212464  ;;  %vm2811_vm13 = vcmp.lt.s32.totalorder %v2790_v32, 3  ;;  %v2813_v34 = vsel %vm2809_vm8, %v2793_v61, %v2796_v16 }
 0x6e8   :  { %v2450_v18 = vsel %vm2367_vm5, %v2449_v50, %v2448_v10  ;;  %vm10578_vm5 = vcmp.lt.s32.totalorder %v10577_v45, 0  ;;  %v2817_v63 = vsel %vm2809_vm8, %v2796_v16, %v2799_v2  ;;  %v2815_v1 = vsel %vm2811_vm13, %v2799_v2, %v2814_v30 }
 0x6e9   :  { %v2453_v44 = vsel %vm12431_vm10, %v12253_v58, %v2450_v18  ;;  %v2642_v17 = vsel %vm10578_vm5, 0, %v10577_v45  ;;  %v2818_v41 = vsel %vm2812_vm9, %v2805_v51, 920167782  ;;  %v2821_v14 = vsel %vm2809_vm8, %v2799_v2, %v2802_v6 }
 0x6ea   :  { %11557 = vcosq.f32 %v2453_v44  ;;  %v2643_v52 = vsub.s32 32, %v2642_v17  ;;  %v2644_v3 = vshll.u32 %v12510_v31, %v2642_v17  ;;  %v2647_v19 = vsub.s32 4294967266, %v2642_v17 }
 0x6eb   :  { %11559 = vsinq.f32 %v2453_v44  ;;  %v2822_v40 = vsel %vm2812_vm9, %v2808_v28, 1326507024  ;;  %v2819_v22 = vsel %vm2811_vm13, %v2802_v6, %v2818_v41  ;;  %vm2457_vm10 = vweird.f32 %v12253_v58 }
 0x6ec   :  { %v2645_v5 = vshrl.u32 %v2627_v42, %v2643_v52  ;;  %v2648_v23 = vadd.s32 127, %v2647_v19  ;;  %v2823_v10 = vsel %vm2811_vm13, %v2805_v51, %v2822_v40  ;;  %v2658_v31 = vsel %vm2573_vm7, %v2657_v43, %v12494_v59 }
 0x6ed   :  { %v2820_v57 = vsel %vm2810_vm12, %v2817_v63, %v2819_v22  ;;  %v2824_v36 = vsel %vm2810_vm12, %v2821_v14, %v2823_v10  ;;  %v10591_v12 = vadd.s32 4294967169, %v2987_v54  ;;  %v2816_v42 = vsel %vm2810_vm12, %v2813_v34, %v2815_v1 }
 0x6ee   :  { %v2646_v33 = vor.u32 %v2645_v5, %v2644_v3  ;;  %v2649_v50 = vshll.u32 %v2648_v23, 23  ;;  %v12564_v8 = vmul.u32.u64.low %v12520_v24, %v2824_v36  ;;  %v12565_v39 = vmul.u32.u64.high %v12520_v24, %v2824_v36, %v12564_v8 }
 0x6ef   :  { %v12569_v38 = vmul.u32.u64.low %v12520_v24, %v2820_v57  ;;  %v12570_v61 = vmul.u32.u64.high %v12520_v24, %v2820_v57, %v12569_v38  ;;  %v2993_v16 = vadd.s32 1, %v10591_v12  ;;  %vm2459_vm14 = vcmp.lt.s32.totalorder %v12512_v60, 2 }
 0x6f0   :  { %vm2460_vm15 = vcmp.eq.s32.totalorder %v12512_v60, 0  ;;  %v2650_v59 = vor.u32 4788187, %v2649_v50  ;;  %v2653_v54 = vcvt.s32.f32 %v2646_v33  ;;  %vm2463_vm1 = vcmp.eq.s32.totalorder %v12512_v60, 2 }
 0x6f1   :  { %vm5768_vm2 = vcmp.eq.s32.totalorder %v12514_v11, 2  ;;  %v2660_v32 = vsel %vm12546_vm11, 0, %v2658_v31  ;;  %vm2994_vm3 = vcmp.gt.s32.totalorder %v2993_v16, 0  ;;  %v2832_v18 = vmul.u32 %v12520_v24, %v2816_v42 }
 0x6f2   :  { %v2651_v2 = vand.u32 2147483647, %v2650_v59  ;;  %vm2834_vm4 = vc.u32 %v12565_v39, %v12569_v38  ;;  %v2995_v45 = vsel %vm2994_vm3, %v2993_v16, 0  ;;  %vm5765_vm6 = vcmp.eq.s32.totalorder %v12514_v11, 0 }
 0x6f3   :  { %v2835_v44 = vadd.s32 1, %v12570_v61  ;;  %v2997_v28 = vand.u32 31, %v2995_v45  ;;  %vm5764_vm8 = vcmp.lt.s32.totalorder %v12514_v11, 2  ;;  %v2990_v34 = vand.u32 8388607, %v2983_v56 }
 0x6f4   :  { %v11558_v43 = vpop.eup %11557  ;;  %v2654_v17 = vmul.f32 %v2653_v54, %v2651_v2  ;;  %v5970_v3 = vadd.s32 3, %v2660_v32  ;;  %v12596_v23 = vand.u32 3, %v2660_v32  ;;  %v12611_v8 = vshrl.u32 %v2995_v45, 5 }
 0x6f5   :  { %v11560_v6 = vpop.eup %11559  ;;  %v2464_v51 = vxor.u32 2147483648, %v11558_v43  ;;  %v2836_v19 = vsel %vm2834_vm4, %v2835_v44, %v12570_v61  ;;  %v2998_v22 = vsub.s32 32, %v2997_v28  ;;  %v3000_v58 = vshll.u32 %v16841_v21, %v2997_v28 }
 0x6f6   :  { %v2461_v30 = vxor.u32 2147483648, %v11560_v6  ;;  %v2655_v41 = vxor.u32 2147483648, %v2654_v17  ;;  %v2837_v14 = vadd.s32 %v2836_v19, %v2832_v18  ;;  %v12607_v33 = vand.u32 3, %v5970_v3 }
 0x6f7   :  { %v2465_v24 = vsel %vm2463_vm1, %v2464_v51, %v11560_v6  ;;  %v5770_v52 = vsel %vm5768_vm2, %v2464_v51, %v11560_v6  ;;  %v3001_v16 = vshrl.u32 %v16830_v25, %v2998_v22  ;;  %v3003_v59 = vshll.u32 %v16830_v25, %v2997_v28 }
 0x6f8   :  { %v2462_v63 = vsel %vm2460_vm15, %v11558_v43, %v2461_v30  ;;  %v5767_v1 = vsel %vm5765_vm6, %v11558_v43, %v2461_v30  ;;  %v2656_v31 = vsel %vm2573_vm7, %v2655_v41, %v2654_v17  ;;  %v2838_v57 = vadd.s32 536870912, %v2837_v14 }
 0x6f9   :  { %v2466_v40 = vsel %vm2459_vm14, %v2462_v63, %v2465_v24  ;;  %v5771_v5 = vsel %vm5764_vm8, %v5767_v1, %v5770_v52  ;;  %v2659_v60 = vsel %vm12546_vm11, %v12259_v20, %v2656_v31  ;;  %vm2669_vm7 = vcmp.eq.s32.totalorder %v12596_v23, 2 }
 0x6fa   :  { %v2467_v11 = vsel %vm2457_vm10, nan, %v2466_v40  ;;  %v5772_v10 = vsel %vm2457_vm10, nan, %v5771_v5  ;;  %11561 = vcosq.f32 %v2659_v60  ;;  %v12609_v50 = vshrl.u32 %v2838_v57, 30 }
 0x6fb   :  { %v8173_v36 = vsub.f32 %v2467_v11, %v5772_v10  ;;  %v8237_v12 = vadd.f32 %v5772_v10, %v2467_v11  ;;  %11563 = vsinq.f32 %v2659_v60  ;;  %v3004_v54 = vshrl.u32 %v16832_v7, %v2998_v22 }
 0x6fc   :  { %v2840_v0 = vshll.u32 %v12609_v50, 30  ;;  %v3006_v32 = vshll.u32 %v16832_v7, %v2997_v28  ;;  %vm2666_vm9 = vcmp.eq.s32.totalorder %v12596_v23, 0  ;;  %v3007_v2 = vshrl.u32 %v16827_v27, %v2998_v22 }
 0x6fd   :  { %v12614_v42 = vmul.f32 0.70710677, %v8173_v36  ;;  %v8269_v61 = vmul.f32 0.70710677, %v8237_v12  ;;  %v3009_v18 = vshll.u32 %v16827_v27, %v2997_v28  ;;  %v3010_v45 = vshrl.u32 %v16839_v29, %v2998_v22 }
 0x6fe   :  { %vm2665_vm11 = vcmp.lt.s32.totalorder %v12596_v23, 2  ;;  %vm5972_vm5 = vcmp.lt.s32.totalorder %v12607_v33, 2  ;;  %vm5973_vm12 = vcmp.eq.s32.totalorder %v12607_v33, 0  ;;  %v12632_v6 = vsub.s32 %v2837_v14, %v2840_v0 }
 0x6ff   :  { %16956 = vst [vmem:[#allocation6_spill] sm:$0xff] %v12614_v42  ;;  %v12623_v43 = vsub.f32 %v8269_v61, %v12614_v42  ;;  %v2991_v51 = vor.u32 8388608, %v2990_v34  ;;  %vm2663_vm13 = vweird.f32 %v12259_v20  ;;  %v3011_v44 = vor.u32 %v3010_v45, %v3009_v18 }
 0x700   :  { %v3012_v30 = vshll.u32 %v16839_v29, %v2997_v28  ;;  %v3013_v17 = vshrl.u32 %v16834_v37, %v2998_v22  ;;  %v3192_v24 = vand.u32 2139095040, %v12507_v35  ;;  %v2843_v52 = vsub.s32 0, %v12632_v6 }
 0x701   :  { %16957 = vst [vmem:[#allocation7_spill] sm:$0xff] %v12623_v43  ;;  %8372 = vperm.xlu1 %11460, %v12623_v43   ;;  %v3002_v3 = vor.u32 %v3001_v16, %v3000_v58  ;;  %v3005_v19 = vor.u32 %v3004_v54, %v3003_v59  ;;  %v3008_v63 = vor.u32 %v3007_v2, %v3006_v32  ;;  %vm3015_vm10 = vcmp.lt.s32.totalorder %v12611_v8, 1 }
 0x702   :  { %v2999_v1 = vshrl.u32 %v16841_v21, %v2998_v22  ;;  %vm3017_vm14 = vcmp.lt.s32.totalorder %v12611_v8, 3  ;;  %vm3018_vm15 = vcmp.lt.s32.totalorder %v12611_v8, 4  ;;  %vm5976_vm1 = vcmp.eq.s32.totalorder %v12607_v33, 2 }
 0x703   :  { %v10584_v28 = vmin.u32 %v2843_v52, %v12632_v6  ;;  %v12646_v34 = vshll.u32 %v2991_v51, 8  ;;  %v3189_v41 = vand.u32 2147483647, %v12507_v35  ;;  %v2833_v14 = vadd.s32 %v12569_v38, %v12565_v39 }
 0x704   :  { %v3014_v40 = vor.u32 %v3013_v17, %v3012_v30  ;;  %v3020_v5 = vsel %vm3018_vm15, %v3008_v63, 2102212464  ;;  %v3024_v22 = vsel %vm3018_vm15, %v3011_v44, 920167782  ;;  %v11562_v11 = vpop.eup %11561  ;;  %vm3016_vm2 = vcmp.lt.s32.totalorder %v12611_v8, 2 }
 0x705   :  { %v2845_v10 = vclz %v10584_v28  ;;  %v3023_v31 = vsel %vm3015_vm10, %v3002_v3, %v3005_v19  ;;  %v3025_v57 = vsel %vm3017_vm14, %v3008_v63, %v3024_v22  ;;  %v11564_v36 = vpop.eup %11563  ;;  %v2670_v12 = vxor.u32 2147483648, %v11562_v11 }
 0x706   :  { %v2863_v39 = vsub.s32 4, %v12609_v50  ;;  %v3019_v38 = vsel %vm3015_vm10, %v2999_v1, %v3002_v3  ;;  %v3193_v60 = vshrl.u32 %v3192_v24, 23  ;;  %v2667_v58 = vxor.u32 2147483648, %v11564_v36 }
 0x707   :  { %vm2779_vm3 = vcmp.lt.s32.totalorder %v12293_v47, 0  ;;  %v10585_v61 = vadd.s32 4294967294, %v2845_v10  ;;  %v3021_v16 = vsel %vm3017_vm14, %v3005_v19, %v3020_v5  ;;  %v3027_v0 = vsel %vm3015_vm10, %v3005_v19, %v3008_v63 }
 0x708   :  { %v2671_v59 = vsel %vm2669_vm7, %v2670_v12, %v11564_v36  ;;  %v5978_v54 = vsel %vm5976_vm1, %v2670_v12, %v11564_v36  ;;  %v3026_v32 = vsel %vm3016_vm2, %v3023_v31, %v3025_v57  ;;  %v3028_v2 = vsel %vm3018_vm15, %v3014_v40, 1326507024 }
 0x709   :  { %v2668_v18 = vsel %vm2666_vm9, %v11562_v11, %v2667_v58  ;;  %v5975_v45 = vsel %vm5973_vm12, %v11562_v11, %v2667_v58  ;;  %vm10586_vm4 = vcmp.lt.s32.totalorder %v10585_v61, 0  ;;  %v3029_v51 = vsel %vm3017_vm14, %v3011_v44, %v3028_v2 }
 0x70a   :  { %v2672_v30 = vsel %vm2665_vm11, %v2668_v18, %v2671_v59  ;;  %v5979_v17 = vsel %vm5972_vm5, %v5975_v45, %v5978_v54  ;;  %v2848_v24 = vsel %vm10586_vm4, 0, %v10585_v61  ;;  %v3030_v52 = vsel %vm3016_vm2, %v3027_v0, %v3029_v51 }
 0x70b   :  { %v2673_v3 = vsel %vm2663_vm13, nan, %v2672_v30  ;;  %v5980_v19 = vsel %vm2663_vm13, nan, %v5979_v17  ;;  %v2849_v63 = vsub.s32 32, %v2848_v24  ;;  %v2850_v1 = vshll.u32 %v12632_v6, %v2848_v24 }
 0x70c   :  { %v8175_v44 = vsub.f32 %v2673_v3, %v5980_v19  ;;  %v8239_v28 = vadd.f32 %v5980_v19, %v2673_v3  ;;  %v2853_v23 = vsub.s32 4294967266, %v2848_v24  ;;  %v10599_v40 = vadd.s32 4294967169, %v3193_v60 }
 0x70d   :  { %v2851_v5 = vshrl.u32 %v2833_v14, %v2849_v63  ;;  %v3022_v33 = vsel %vm3016_vm2, %v3019_v38, %v3021_v16  ;;  %v12696_v22 = vmul.u32.u64.low %v12646_v34, %v3030_v52  ;;  %v12697_v11 = vmul.u32.u64.high %v12646_v34, %v3030_v52, %v12696_v22 }
 0x70e   :  { %v12699_v10 = vmul.f32 0.70710677, %v8175_v44  ;;  %v8271_v31 = vmul.f32 0.70710677, %v8239_v28  ;;  %v2854_v20 = vadd.s32 127, %v2853_v23  ;;  %v3199_v57 = vadd.s32 1, %v10599_v40 }
 0x70f   :  { %v2852_v36 = vor.u32 %v2851_v5, %v2850_v1  ;;  %v12702_v6 = vmul.u32.u64.low %v12646_v34, %v3026_v32  ;;  %v12703_v12 = vmul.u32.u64.high %v12646_v34, %v3026_v32, %v12702_v6  ;;  %v3196_v14 = vand.u32 8388607, %v3189_v41 }
 0x710   :  { %16958 = vst [vmem:[#allocation8_spill] sm:$0xff] %v12699_v10  ;;  %v12709_v8 = vsub.f32 %v8271_v31, %v12699_v10  ;;  %v2855_v38 = vshll.u32 %v2854_v20, 23  ;;  %v2864_v60 = vsel %vm2779_vm3, %v2863_v39, %v12609_v50  ;;  %vm3200_vm6 = vcmp.gt.s32.totalorder %v3199_v57, 0 }
 0x711   :  { %vm12716_vm8 = vcmp.le.f32.partialorder %v2777_v15, 0.7853982  ;;  %v3038_v61 = vmul.u32 %v12646_v34, %v3022_v33  ;;  %v3201_v16 = vsel %vm3200_vm6, %v3199_v57, 0  ;;  %v2859_v59 = vcvt.s32.f32 %v2852_v36 }
 0x712   :  { %16959 = vst [vmem:[#allocation9_spill] sm:$0xff] %v12709_v8  ;;  %8382 = vperm.xlu1 %11460, %v12709_v8   ;;  %v2856_v0 = vor.u32 4788187, %v2855_v38  ;;  %vm3040_vm7 = vc.u32 %v12697_v11, %v12702_v6  ;;  %v3203_v54 = vand.u32 31, %v3201_v16  ;;  %v2866_v50 = vsel %vm12716_vm8, 0, %v2864_v60 }
 0x713   :  { %v3041_v39 = vadd.s32 1, %v12703_v12  ;;  %v3197_v15 = vor.u32 8388608, %v3196_v14  ;;  %v3202_v2 = vshrl.u32 %v3201_v16, 5  ;;  %v12739_v33 = vmul.f32 0.7853982, %v12542_v26 }
 0x714   :  { %v2857_v32 = vand.u32 2147483647, %v2856_v0  ;;  %v3204_v18 = vsub.s32 32, %v3203_v54  ;;  %v3206_v34 = vshll.u32 %v16841_v21, %v3203_v54  ;;  %v3209_v51 = vshll.u32 %v16830_v25, %v3203_v54 }
 0x715   :  { %v3042_v45 = vsel %vm3040_vm7, %v3041_v39, %v12703_v12  ;;  %v3212_v30 = vshll.u32 %v16832_v7, %v3203_v54  ;;  %v3215_v17 = vshll.u32 %v16827_v27, %v3203_v54  ;;  %v3218_v19 = vshll.u32 %v16839_v29, %v3203_v54 }
 0x716   :  { %v2860_v24 = vmul.f32 %v2859_v59, %v2857_v32  ;;  %v3043_v52 = vadd.s32 %v3042_v45, %v3038_v61  ;;  %v3207_v3 = vshrl.u32 %v16830_v25, %v3204_v18  ;;  %v3210_v63 = vshrl.u32 %v16832_v7, %v3204_v18 }
 0x717   :  { %v3213_v1 = vshrl.u32 %v16827_v27, %v3204_v18  ;;  %v3216_v44 = vshrl.u32 %v16839_v29, %v3204_v18  ;;  %v3219_v28 = vshrl.u32 %v16834_v37, %v3204_v18  ;;  %v3205_v22 = vshrl.u32 %v16841_v21, %v3204_v18 }
 0x718   :  { %v2861_v23 = vxor.u32 2147483648, %v2860_v24  ;;  %v3044_v40 = vadd.s32 536870912, %v3043_v52  ;;  %v3208_v5 = vor.u32 %v3207_v3, %v3206_v34  ;;  %v3211_v31 = vor.u32 %v3210_v63, %v3209_v51 }
 0x719   :  { %v3217_v20 = vor.u32 %v3216_v44, %v3215_v17  ;;  %vm3221_vm9 = vcmp.lt.s32.totalorder %v3202_v2, 1  ;;  %v3214_v12 = vor.u32 %v3213_v1, %v3212_v30  ;;  %v3220_v14 = vor.u32 %v3219_v28, %v3218_v19 }
 0x71a   :  { %v2862_v57 = vsel %vm2779_vm3, %v2861_v23, %v2860_v24  ;;  %v3045_v36 = vshrl.u32 %v3044_v40, 30  ;;  %vm3222_vm11 = vcmp.lt.s32.totalorder %v3202_v2, 2  ;;  %vm3223_vm5 = vcmp.lt.s32.totalorder %v3202_v2, 3 }
 0x71b   :  { %v2865_v38 = vsel %vm12716_vm8, %v12293_v47, %v2862_v57  ;;  %vm3224_vm12 = vcmp.lt.s32.totalorder %v3202_v2, 4  ;;  %v3229_v61 = vsel %vm3221_vm9, %v3208_v5, %v3211_v31  ;;  %v6178_v16 = vadd.s32 3, %v2866_v50 }
 0x71c   :  { %11565 = vcosq.f32 %v2865_v38  ;;  %v3046_v26 = vshll.u32 %v3045_v36, 30  ;;  %v3226_v60 = vsel %vm3224_vm12, %v3214_v12, 2102212464  ;;  %v3230_v0 = vsel %vm3224_vm12, %v3217_v20, 920167782 }
 0x71d   :  { %11567 = vsinq.f32 %v2865_v38  ;;  %v3237_v59 = vshll.u32 %v3197_v15, 8  ;;  %v3231_v39 = vsel %vm3223_vm5, %v3214_v12, %v3230_v0  ;;  %v3233_v58 = vsel %vm3221_vm9, %v3211_v31, %v3214_v12 }
 0x71e   :  { %v12750_v54 = vsub.s32 %v3043_v52, %v3046_v26  ;;  %v3398_v32 = vand.u32 2139095040, %v12739_v33  ;;  %v3225_v18 = vsel %vm3221_vm9, %v3205_v22, %v3208_v5  ;;  %v3227_v34 = vsel %vm3223_vm5, %v3211_v31, %v3226_v60 }
 0x71f   :  { %v3232_v45 = vsel %vm3222_vm11, %v3229_v61, %v3231_v39  ;;  %v3234_v51 = vsel %vm3224_vm12, %v3220_v14, 1326507024  ;;  %v2870_v30 = vand.u32 3, %v2866_v50  ;;  %v6179_v24 = vand.u32 3, %v6178_v16 }
 0x720   :  { %v3049_v17 = vsub.s32 0, %v12750_v54  ;;  %v3235_v15 = vsel %vm3223_vm5, %v3217_v20, %v3234_v51  ;;  %v12762_v3 = vmul.u32.u64.low %v3237_v59, %v3232_v45  ;;  %v12763_v19 = vmul.u32.u64.high %v3237_v59, %v3232_v45, %v12762_v3 }
 0x721   :  { %v3236_v52 = vsel %vm3222_vm11, %v3233_v58, %v3235_v15  ;;  %vm2869_vm13 = vweird.f32 %v12293_v47  ;;  %vm2985_vm10 = vcmp.lt.s32.totalorder %v12497_v62, 0  ;;  %v3228_v1 = vsel %vm3222_vm11, %v3225_v18, %v3227_v34 }
 0x722   :  { %v10592_v63 = vmin.u32 %v3049_v17, %v12750_v54  ;;  %v3069_v50 = vsub.s32 4, %v3045_v36  ;;  %v12770_v44 = vmul.u32.u64.low %v3237_v59, %v3236_v52  ;;  %v12771_v28 = vmul.u32.u64.high %v3237_v59, %v3236_v52, %v12770_v44 }
 0x723   :  { %v3399_v23 = vshrl.u32 %v3398_v32, 23  ;;  %vm2871_vm14 = vcmp.lt.s32.totalorder %v2870_v30, 2  ;;  %vm2872_vm15 = vcmp.eq.s32.totalorder %v2870_v30, 0  ;;  %vm2875_vm1 = vcmp.eq.s32.totalorder %v2870_v30, 2 }
 0x724   :  { %v3051_v40 = vclz %v10592_v63  ;;  %vm6180_vm2 = vcmp.lt.s32.totalorder %v6179_v24, 2  ;;  %vm6181_vm3 = vcmp.eq.s32.totalorder %v6179_v24, 0  ;;  %vm12775_vm4 = vcmp.le.f32.partialorder %v2983_v56, 0.7853982 }
 0x725   :  { %v3244_v22 = vmul.u32 %v3237_v59, %v3228_v1  ;;  %v3247_v2 = vadd.s32 1, %v12763_v19  ;;  %vm6184_vm6 = vcmp.eq.s32.totalorder %v6179_v24, 2  ;;  %v3039_v20 = vadd.s32 %v12702_v6, %v12697_v11 }
 0x726   :  { %v11566_v31 = vpop.eup %11565  ;;  %v10593_v57 = vadd.s32 4294967294, %v3051_v40  ;;  %v10607_v12 = vadd.s32 4294967169, %v3399_v23  ;;  %v3070_v26 = vsel %vm2985_vm10, %v3069_v50, %v3045_v36  ;;  %vm3246_vm8 = vc.u32 %v12771_v28, %v12762_v3  ;;  %v1465_v23 = vld [vmem:[%s16823_s0 + $0xa0] sm:$0xff] }
 0x727   :  { %v11568_v14 = vpop.eup %11567  ;;  %v2876_v38 = vxor.u32 2147483648, %v11566_v31  ;;  %v3395_v56 = vand.u32 2147483647, %v12739_v33  ;;  %v3248_v61 = vsel %vm3246_vm8, %v3247_v2, %v12763_v19  ;;  %vm3191_vm11 = vcmp.lt.s32.totalorder %v12507_v35, 0 }
 0x728   :  { %v2873_v60 = vxor.u32 2147483648, %v11568_v14  ;;  %vm10594_vm7 = vcmp.lt.s32.totalorder %v10593_v57, 0  ;;  %v3405_v16 = vadd.s32 1, %v10607_v12  ;;  %v3249_v59 = vadd.s32 %v3248_v61, %v3244_v22 }
 0x729   :  { %v2877_v0 = vsel %vm2875_vm1, %v2876_v38, %v11568_v14  ;;  %v6186_v11 = vsel %vm6184_vm6, %v2876_v38, %v11568_v14  ;;  %v3054_v6 = vsel %vm10594_vm7, 0, %v10593_v57  ;;  %v3402_v30 = vand.u32 8388607, %v3395_v56 }
 0x72a   :  { %v2874_v39 = vsel %vm2872_vm15, %v11566_v31, %v2873_v60  ;;  %v6183_v58 = vsel %vm6181_vm3, %v11566_v31, %v2873_v60  ;;  %v3055_v36 = vsub.s32 32, %v3054_v6  ;;  %v3056_v32 = vshll.u32 %v12750_v54, %v3054_v6 }
 0x72b   :  { %v2878_v18 = vsel %vm2871_vm14, %v2874_v39, %v2877_v0  ;;  %v6187_v34 = vsel %vm6180_vm2, %v6183_v58, %v6186_v11  ;;  %v3059_v45 = vsub.s32 4294967266, %v3054_v6  ;;  %v3250_v51 = vadd.s32 536870912, %v3249_v59 }
 0x72c   :  { %v2879_v17 = vsel %vm2869_vm13, nan, %v2878_v18  ;;  %v6188_v15 = vsel %vm2869_vm13, nan, %v6187_v34  ;;  %v3057_v52 = vshrl.u32 %v3039_v20, %v3055_v36  ;;  %vm3406_vm9 = vcmp.gt.s32.totalorder %v3405_v16, 0 }
 0x72d   :  { %v8177_v19 = vsub.f32 %v2879_v17, %v6188_v15  ;;  %v8241_v63 = vadd.f32 %v6188_v15, %v2879_v17  ;;  %v3060_v1 = vadd.s32 127, %v3059_v45  ;;  %v3251_v50 = vshrl.u32 %v3250_v51, 30 }
 0x72e   :  { %v3058_v44 = vor.u32 %v3057_v52, %v3056_v32  ;;  %v3072_v54 = vsel %vm12775_vm4, 0, %v3070_v26  ;;  %v3407_v24 = vsel %vm3406_vm9, %v3405_v16, 0  ;;  %11569 = vtanh.f32 %v1465_v23 }
 0x72f   :  { %v12805_v47 = vmul.f32 0.70710677, %v8177_v19  ;;  %v8273_v40 = vmul.f32 0.70710677, %v8241_v63  ;;  %v3061_v22 = vshll.u32 %v3060_v1, 23  ;;  %v3252_v2 = vshll.u32 %v3251_v50, 30 }
 0x730   :  { %v3409_v31 = vand.u32 31, %v3407_v24  ;;  %v3065_v12 = vcvt.s32.f32 %v3058_v44  ;;  %v6386_v38 = vadd.s32 3, %v3072_v54  ;;  %v3275_v16 = vsub.s32 4, %v3251_v50 }
 0x731   :  { %16964 = vst [vmem:[#allocation10_spill] sm:$0xff] %v12805_v47  ;;  %v12808_v20 = vsub.f32 %v8273_v40, %v12805_v47  ;;  %v3062_v57 = vor.u32 4788187, %v3061_v22  ;;  %v12810_v14 = vsub.s32 %v3249_v59, %v3252_v2  ;;  %v3403_v0 = vor.u32 8388608, %v3402_v30 }
 0x732   :  { %v3410_v26 = vsub.s32 32, %v3409_v31  ;;  %v3412_v11 = vshll.u32 %v16841_v21, %v3409_v31  ;;  %v3415_v39 = vshll.u32 %v16830_v25, %v3409_v31  ;;  %v3418_v59 = vshll.u32 %v16832_v7, %v3409_v31 }
 0x733   :  { %16965 = vst [vmem:[#allocation11_spill] sm:$0xff] %v12808_v20  ;;  %8392 = vperm.xlu1 %11460, %v12808_v20   ;;  %v3063_v60 = vand.u32 2147483647, %v3062_v57  ;;  %v3255_v61 = vsub.s32 0, %v12810_v14  ;;  %v12822_v34 = vand.u32 3, %v3072_v54  ;;  %v12824_v45 = vand.u32 3, %v6386_v38 }
 0x734   :  { %v3413_v6 = vshrl.u32 %v16830_v25, %v3410_v26  ;;  %v3416_v32 = vshrl.u32 %v16832_v7, %v3410_v26  ;;  %v3419_v18 = vshrl.u32 %v16827_v27, %v3410_v26  ;;  %v3245_v51 = vadd.s32 %v12762_v3, %v12771_v28 }
 0x735   :  { %v3066_v58 = vmul.f32 %v3065_v12, %v3063_v60  ;;  %v10600_v36 = vmin.u32 %v3255_v61, %v12810_v14  ;;  %v3408_v17 = vshrl.u32 %v3407_v24, 5  ;;  %v3276_v19 = vsel %vm3191_vm11, %v3275_v16, %v3251_v50 }
 0x736   :  { %v12830_v63 = vshll.u32 %v3403_v0, 8  ;;  %vm12834_vm5 = vcmp.le.f32.partialorder %v3189_v41, 0.7853982  ;;  %v3411_v44 = vshrl.u32 %v16841_v21, %v3410_v26  ;;  %v3414_v54 = vor.u32 %v3413_v6, %v3412_v11 }
 0x737   :  { %v3067_v15 = vxor.u32 2147483648, %v3066_v58  ;;  %v3257_v52 = vclz %v10600_v36  ;;  %v3417_v30 = vor.u32 %v3416_v32, %v3415_v39  ;;  %v3420_v23 = vor.u32 %v3419_v18, %v3418_v59 }
 0x738   :  { %v3421_v24 = vshll.u32 %v16827_v27, %v3409_v31  ;;  %v3422_v50 = vshrl.u32 %v16839_v29, %v3410_v26  ;;  %v3424_v40 = vshll.u32 %v16839_v29, %v3409_v31  ;;  %v3425_v22 = vshrl.u32 %v16834_v37, %v3410_v26  ;;  %v11570_v57 = vpop.eup %11569 }
 0x739   :  { %v3068_v3 = vsel %vm2985_vm10, %v3067_v15, %v3066_v58  ;;  %v10601_v28 = vadd.s32 4294967294, %v3257_v52  ;;  %vm3427_vm12 = vcmp.lt.s32.totalorder %v3408_v17, 1  ;;  %vm3428_vm14 = vcmp.lt.s32.totalorder %v3408_v17, 2 }
 0x73a   :  { %v3071_v41 = vsel %vm12775_vm4, %v12497_v62, %v3068_v3  ;;  %v3423_v2 = vor.u32 %v3422_v50, %v3421_v24  ;;  %v3426_v38 = vor.u32 %v3425_v22, %v3424_v40  ;;  %vm3429_vm10 = vcmp.lt.s32.totalorder %v3408_v17, 3 }
 0x73b   :  { %11571 = vcosq.f32 %v3071_v41  ;;  %vm10602_vm13 = vcmp.lt.s32.totalorder %v10601_v28, 0  ;;  %vm3081_vm15 = vcmp.eq.s32.totalorder %v12822_v34, 2  ;;  %vm3430_vm1 = vcmp.lt.s32.totalorder %v3408_v17, 4 }
 0x73c   :  { %11573 = vsinq.f32 %v3071_v41  ;;  %v3260_v12 = vsel %vm10602_vm13, 0, %v10601_v28  ;;  %vm3078_vm2 = vcmp.eq.s32.totalorder %v12822_v34, 0  ;;  %v3431_v31 = vsel %vm3427_vm12, %v3411_v44, %v3414_v54 }
 0x73d   :  { %v3261_v60 = vsub.s32 32, %v3260_v12  ;;  %v3262_v5 = vshll.u32 %v12810_v14, %v3260_v12  ;;  %v3265_v61 = vsub.s32 4294967266, %v3260_v12  ;;  %v3432_v26 = vsel %vm3430_vm1, %v3420_v23, 2102212464 }
 0x73e   :  { %v3435_v16 = vsel %vm3427_vm12, %v3414_v54, %v3417_v30  ;;  %v3436_v0 = vsel %vm3430_vm1, %v3423_v2, 920167782  ;;  %vm3077_vm3 = vcmp.lt.s32.totalorder %v12822_v34, 2  ;;  %v3433_v39 = vsel %vm3429_vm10, %v3417_v30, %v3432_v26 }
 0x73f   :  { %v3263_v11 = vshrl.u32 %v3245_v51, %v3261_v60  ;;  %v3266_v6 = vadd.s32 127, %v3265_v61  ;;  %v3437_v59 = vsel %vm3429_vm10, %v3420_v23, %v3436_v0  ;;  %vm3075_vm4 = vweird.f32 %v12497_v62  ;;  %v1469_v62 = vld [vmem:[%s16823_s0 + $0xc0] sm:$0xff] }
 0x740   :  { %v3438_v14 = vsel %vm3428_vm14, %v3435_v16, %v3437_v59  ;;  %v3439_v58 = vsel %vm3427_vm12, %v3417_v30, %v3420_v23  ;;  %v3440_v36 = vsel %vm3430_vm1, %v3426_v38, 1326507024  ;;  %v12859_v32 = vmul.f32 0.7853982, %v11570_v57  ;;  %v1467_v30 = vld [vmem:[%s16823_s0 + $0xb0] sm:$0xff] }
 0x741   :  { %v3264_v18 = vor.u32 %v3263_v11, %v3262_v5  ;;  %v3267_v15 = vshll.u32 %v3266_v6, 23  ;;  %v3278_v52 = vsel %vm12834_vm5, 0, %v3276_v19  ;;  %v3441_v51 = vsel %vm3429_vm10, %v3423_v2, %v3440_v36 }
 0x742   :  { %v3434_v44 = vsel %vm3428_vm14, %v3431_v31, %v3433_v39  ;;  %v3442_v54 = vsel %vm3428_vm14, %v3439_v58, %v3441_v51  ;;  %v12867_v3 = vmul.u32.u64.low %v12830_v63, %v3438_v14  ;;  %v12868_v28 = vmul.u32.u64.high %v12830_v63, %v3438_v14, %v12867_v3 }
 0x743   :  { %v3268_v23 = vor.u32 4788187, %v3267_v15  ;;  %v3271_v24 = vcvt.s32.f32 %v3264_v18  ;;  %v12875_v50 = vmul.u32.u64.low %v12830_v63, %v3442_v54  ;;  %v12876_v19 = vmul.u32.u64.high %v12830_v63, %v3442_v54, %v12875_v50 }
 0x744   :  { %vm6388_vm6 = vcmp.lt.s32.totalorder %v12824_v45, 2  ;;  %vm6389_vm8 = vcmp.eq.s32.totalorder %v12824_v45, 0  ;;  %vm6392_vm7 = vcmp.eq.s32.totalorder %v12824_v45, 2  ;;  %v3604_v17 = vand.u32 2139095040, %v12859_v32 }
 0x745   :  { %v11572_v41 = vpop.eup %11571  ;;  %v3269_v40 = vand.u32 2147483647, %v3268_v23  ;;  %v12882_v22 = vand.u32 3, %v3278_v52  ;;  %v3450_v2 = vmul.u32 %v12830_v63, %v3434_v44  ;;  %11575 = vtanh.f32 %v1467_v30 }
 0x746   :  { %v11574_v57 = vpop.eup %11573  ;;  %v3082_v12 = vxor.u32 2147483648, %v11572_v41  ;;  %v6594_v38 = vadd.s32 3, %v3278_v52  ;;  %v3453_v60 = vadd.s32 1, %v12868_v28  ;;  %v3605_v5 = vshrl.u32 %v3604_v17, 23 }
 0x747   :  { %v3079_v61 = vxor.u32 2147483648, %v11574_v57  ;;  %v3272_v31 = vmul.f32 %v3271_v24, %v3269_v40  ;;  %vm3452_vm9 = vc.u32 %v12876_v19, %v12867_v3  ;;  %v3601_v26 = vand.u32 2147483647, %v12859_v32 }
 0x748   :  { %v3083_v16 = vsel %vm3081_vm15, %v3082_v12, %v11574_v57  ;;  %v6394_v63 = vsel %vm6392_vm7, %v3082_v12, %v11574_v57  ;;  %v3454_v0 = vsel %vm3452_vm9, %v3453_v60, %v12868_v28  ;;  %v10615_v11 = vadd.s32 4294967169, %v3605_v5 }
 0x749   :  { %v3080_v6 = vsel %vm3078_vm2, %v11572_v41, %v3079_v61  ;;  %v6391_v39 = vsel %vm6389_vm8, %v11572_v41, %v3079_v61  ;;  %v3273_v59 = vxor.u32 2147483648, %v3272_v31  ;;  %v3455_v14 = vadd.s32 %v3454_v0, %v3450_v2 }
 0x74a   :  { %v3084_v58 = vsel %vm3077_vm3, %v3080_v6, %v3083_v16  ;;  %v6395_v36 = vsel %vm6388_vm6, %v6391_v39, %v6394_v63  ;;  %v12902_v18 = vand.u32 3, %v6594_v38  ;;  %v3611_v15 = vadd.s32 1, %v10615_v11 }
 0x74b   :  { %v3085_v52 = vsel %vm3075_vm4, nan, %v3084_v58  ;;  %v6396_v51 = vsel %vm3075_vm4, nan, %v6395_v36  ;;  %v3274_v44 = vsel %vm3191_vm11, %v3273_v59, %v3272_v31  ;;  %v3456_v54 = vadd.s32 536870912, %v3455_v14 }
 0x74c   :  { %v8179_v28 = vsub.f32 %v3085_v52, %v6396_v51  ;;  %v8243_v30 = vadd.f32 %v6396_v51, %v3085_v52  ;;  %v3277_v34 = vsel %vm12834_vm5, %v12507_v35, %v3274_v44  ;;  %vm3612_vm12 = vcmp.gt.s32.totalorder %v3611_v15, 0 }
 0x74d   :  { %11577 = vcosq.f32 %v3277_v34  ;;  %v12913_v45 = vshrl.u32 %v3456_v54, 30  ;;  %v3608_v23 = vand.u32 8388607, %v3601_v26  ;;  %v3613_v24 = vsel %vm3612_vm12, %v3611_v15, 0 }
 0x74e   :  { %v12920_v50 = vmul.f32 0.70710677, %v8179_v28  ;;  %v8275_v17 = vmul.f32 0.70710677, %v8243_v30  ;;  %11579 = vsinq.f32 %v3277_v34  ;;  %v3615_v40 = vand.u32 31, %v3613_v24 }
 0x74f   :  { %v11576_v41 = vpop.eup %11575  ;;  %v3458_v1 = vshll.u32 %v12913_v45, 30  ;;  %vm3284_vm11 = vcmp.eq.s32.totalorder %v12882_v22, 0  ;;  %vm3287_vm5 = vcmp.eq.s32.totalorder %v12882_v22, 2  ;;  %11581 = vtanh.f32 %v1469_v62 }
 0x750   :  { %16968 = vst [vmem:[#allocation12_spill] sm:$0xff] %v12920_v50  ;;  %v12924_v2 = vsub.f32 %v8275_v17, %v12920_v50  ;;  %vm3283_vm13 = vcmp.lt.s32.totalorder %v12882_v22, 2  ;;  %vm6596_vm14 = vcmp.lt.s32.totalorder %v12902_v18, 2  ;;  %v3609_v12 = vor.u32 8388608, %v3608_v23 }
 0x751   :  { %v12930_v57 = vsub.s32 %v3455_v14, %v3458_v1  ;;  %v3616_v38 = vsub.s32 32, %v3615_v40  ;;  %vm3281_vm10 = vweird.f32 %v12507_v35  ;;  %vm6597_vm15 = vcmp.eq.s32.totalorder %v12902_v18, 0 }
 0x752   :  { %16969 = vst [vmem:[#allocation13_spill] sm:$0xff] %v12924_v2  ;;  %8402 = vperm.xlu1 %11460, %v12924_v2   ;;  %vm6600_vm1 = vcmp.eq.s32.totalorder %v12902_v18, 2  ;;  %v12936_v60 = vshrl.u32 %v3613_v24, 5  ;;  %v12938_v5 = vmul.f32 0.7853982, %v11576_v41  ;;  %v3451_v61 = vadd.s32 %v12867_v3, %v12876_v19 }
 0x753   :  { %v3461_v31 = vsub.s32 0, %v12930_v57  ;;  %v3618_v16 = vshll.u32 %v16841_v21, %v3615_v40  ;;  %v3621_v63 = vshll.u32 %v16830_v25, %v3615_v40  ;;  %v3619_v0 = vshrl.u32 %v16830_v25, %v3616_v38 }
 0x754   :  { %v3622_v11 = vshrl.u32 %v16832_v7, %v3616_v38  ;;  %v3624_v6 = vshll.u32 %v16832_v7, %v3615_v40  ;;  %v3625_v39 = vshrl.u32 %v16827_v27, %v3616_v38  ;;  %v3627_v14 = vshll.u32 %v16827_v27, %v3615_v40 }
 0x755   :  { %v10608_v59 = vmin.u32 %v3461_v31, %v12930_v57  ;;  %v3628_v3 = vshrl.u32 %v16839_v29, %v3616_v38  ;;  %v12952_v19 = vshll.u32 %v3609_v12, 8  ;;  %v3481_v58 = vsub.s32 4, %v12913_v45 }
 0x756   :  { %vm3633_vm2 = vcmp.lt.s32.totalorder %v12936_v60, 1  ;;  %vm3634_vm3 = vcmp.lt.s32.totalorder %v12936_v60, 2  ;;  %vm3635_vm4 = vcmp.lt.s32.totalorder %v12936_v60, 3  ;;  %v3617_v52 = vshrl.u32 %v16841_v21, %v3616_v38 }
 0x757   :  { %v11578_v36 = vpop.eup %11577  ;;  %v3463_v15 = vclz %v10608_v59  ;;  %v3630_v51 = vshll.u32 %v16839_v29, %v3615_v40  ;;  %v3631_v44 = vshrl.u32 %v16834_v37, %v3616_v38  ;;  %v3620_v30 = vor.u32 %v3619_v0, %v3618_v16 }
 0x758   :  { %v11580_v54 = vpop.eup %11579  ;;  %v3288_v28 = vxor.u32 2147483648, %v11578_v36  ;;  %v3623_v34 = vor.u32 %v3622_v11, %v3621_v63  ;;  %v3626_v23 = vor.u32 %v3625_v39, %v3624_v6  ;;  %vm3397_vm6 = vcmp.lt.s32.totalorder %v12739_v33, 0 }
 0x759   :  { %v3285_v24 = vxor.u32 2147483648, %v11580_v54  ;;  %v10609_v62 = vadd.s32 4294967294, %v3463_v15  ;;  %v3629_v17 = vor.u32 %v3628_v3, %v3627_v14  ;;  %vm3636_vm8 = vcmp.lt.s32.totalorder %v12936_v60, 4  ;;  %v11582_v41 = vpop.eup %11581 }
 0x75a   :  { %v3289_v1 = vsel %vm3287_vm5, %v3288_v28, %v11580_v54  ;;  %v6602_v40 = vsel %vm6600_vm1, %v3288_v28, %v11580_v54  ;;  %v3632_v12 = vor.u32 %v3631_v44, %v3630_v51  ;;  %v3638_v38 = vsel %vm3636_vm8, %v3626_v23, 2102212464 }
 0x75b   :  { %v3286_v31 = vsel %vm3284_vm11, %v11578_v36, %v3285_v24  ;;  %v6599_v16 = vsel %vm6597_vm15, %v11578_v36, %v3285_v24  ;;  %vm10610_vm7 = vcmp.lt.s32.totalorder %v10609_v62, 0  ;;  %v3637_v63 = vsel %vm3633_vm2, %v3617_v52, %v3620_v30 }
 0x75c   :  { %v3290_v0 = vsel %vm3283_vm13, %v3286_v31, %v3289_v1  ;;  %v6603_v11 = vsel %vm6596_vm14, %v6599_v16, %v6602_v40  ;;  %vm12981_vm9 = vcmp.le.f32.partialorder %v3395_v56, 0.7853982  ;;  %v3466_v39 = vsel %vm10610_vm7, 0, %v10609_v62 }
 0x75d   :  { %v3639_v59 = vsel %vm3635_vm4, %v3623_v34, %v3638_v38  ;;  %v3291_v14 = vsel %vm3281_vm10, nan, %v3290_v0  ;;  %v6604_v22 = vsel %vm3281_vm10, nan, %v6603_v11  ;;  %v3467_v3 = vsub.s32 32, %v3466_v39 }
 0x75e   :  { %v3468_v18 = vshll.u32 %v12930_v57, %v3466_v39  ;;  %v8181_v36 = vsub.f32 %v3291_v14, %v6604_v22  ;;  %v8245_v15 = vadd.f32 %v6604_v22, %v3291_v14  ;;  %v3471_v52 = vsub.s32 4294967266, %v3466_v39 }
 0x75f   :  { %v3641_v56 = vsel %vm3633_vm2, %v3620_v30, %v3623_v34  ;;  %v3469_v51 = vshrl.u32 %v3451_v61, %v3467_v3  ;;  %v3642_v44 = vsel %vm3636_vm8, %v3629_v17, 920167782  ;;  %v3645_v54 = vsel %vm3633_vm2, %v3623_v34, %v3626_v23 }
 0x760   :  { %v3646_v35 = vsel %vm3636_vm8, %v3632_v12, 1326507024  ;;  %v13000_v28 = vmul.f32 0.70710677, %v8181_v36  ;;  %v8277_v24 = vmul.f32 0.70710677, %v8245_v15  ;;  %v3643_v62 = vsel %vm3635_vm4, %v3626_v23, %v3642_v44 }
 0x761   :  { %v3472_v57 = vadd.s32 127, %v3471_v52  ;;  %v3470_v1 = vor.u32 %v3469_v51, %v3468_v18  ;;  %v3644_v61 = vsel %vm3634_vm3, %v3641_v56, %v3643_v62  ;;  %v3647_v30 = vsel %vm3635_vm4, %v3629_v17, %v3646_v35  ;;  %v1471_v44 = vld [vmem:[%s16823_s0 + $0xd0] sm:$0xff] }
 0x762   :  { %16972 = vst [vmem:[#allocation14_spill] sm:$0xff] %v13000_v28  ;;  %v13008_v40 = vmul.f32 0.7853982, %v11582_v41  ;;  %v13011_v34 = vsub.f32 %v8277_v24, %v13000_v28  ;;  %v3482_v38 = vsel %vm3397_vm6, %v3481_v58, %v12913_v45  ;;  %v3648_v23 = vsel %vm3634_vm3, %v3645_v54, %v3647_v30 }
 0x763   :  { %v3473_v12 = vshll.u32 %v3472_v57, 23  ;;  %v3640_v31 = vsel %vm3634_vm3, %v3637_v63, %v3639_v59  ;;  %v13021_v16 = vmul.u32.u64.low %v12952_v19, %v3648_v23  ;;  %v13022_v0 = vmul.u32.u64.high %v12952_v19, %v3648_v23, %v13021_v16 }
 0x764   :  { %16973 = vst [vmem:[#allocation15_spill] sm:$0xff] %v13011_v34  ;;  %v3810_v17 = vand.u32 2139095040, %v12938_v5  ;;  %8412 = vperm.xlu1 %11460, %v13011_v34   ;;  %v3477_v11 = vcvt.s32.f32 %v3470_v1  ;;  %v13027_v39 = vmul.u32.u64.low %v12952_v19, %v3644_v61  ;;  %v13028_v14 = vmul.u32.u64.high %v12952_v19, %v3644_v61, %v13027_v39 }
 0x765   :  { %v3474_v41 = vor.u32 4788187, %v3473_v12  ;;  %v3484_v45 = vsel %vm12981_vm9, 0, %v3482_v38  ;;  %v3656_v63 = vmul.u32 %v12952_v19, %v3640_v31  ;;  %v16826_v59 = vand.u32 2147483647, %v12938_v5 }
 0x766   :  { %v3811_v58 = vshrl.u32 %v3810_v17, 23  ;;  %vm3658_vm12 = vc.u32 %v13022_v0, %v13027_v39  ;;  %v6802_v18 = vadd.s32 3, %v3484_v45  ;;  %v3659_v36 = vadd.s32 1, %v13028_v14 }
 0x767   :  { %v3475_v60 = vand.u32 2147483647, %v3474_v41  ;;  %v4016_v15 = vand.u32 2139095040, %v13008_v40  ;;  %v13041_v19 = vand.u32 3, %v3484_v45  ;;  %v3814_v35 = vand.u32 8388607, %v16826_v59 }
 0x768   :  { %v10623_v22 = vadd.s32 4294967169, %v3811_v58  ;;  %v3660_v51 = vsel %vm3658_vm12, %v3659_v36, %v13028_v14  ;;  %v13047_v57 = vand.u32 3, %v6802_v18  ;;  %11583 = vtanh.f32 %v1471_v44 }
 0x769   :  { %v3478_v3 = vmul.f32 %v3477_v11, %v3475_v60  ;;  %v3661_v54 = vadd.s32 %v3660_v51, %v3656_v63  ;;  %v4017_v1 = vshrl.u32 %v4016_v15, 23  ;;  %v16825_v38 = vand.u32 2147483647, %v13008_v40 }
 0x76a   :  { %v3817_v52 = vadd.s32 1, %v10623_v22  ;;  %v3815_v31 = vor.u32 8388608, %v3814_v35  ;;  %vm3493_vm5 = vcmp.eq.s32.totalorder %v13041_v19, 2  ;;  %vm6808_vm13 = vcmp.eq.s32.totalorder %v13047_v57, 2 }
 0x76b   :  { %v3479_v56 = vxor.u32 2147483648, %v3478_v3  ;;  %v3662_v30 = vadd.s32 536870912, %v3661_v54  ;;  %v13058_v17 = vadd.s32 %v13027_v39, %v13022_v0  ;;  %v10631_v11 = vadd.s32 4294967169, %v4017_v1 }
 0x76c   :  { %vm3818_vm11 = vcmp.gt.s32.totalorder %v3817_v52, 0  ;;  %vm3490_vm14 = vcmp.eq.s32.totalorder %v13041_v19, 0  ;;  %vm6805_vm10 = vcmp.eq.s32.totalorder %v13047_v57, 0  ;;  %vm3489_vm15 = vcmp.lt.s32.totalorder %v13041_v19, 2 }
 0x76d   :  { %v3480_v24 = vsel %vm3397_vm6, %v3479_v56, %v3478_v3  ;;  %v3819_v62 = vsel %vm3818_vm11, %v3817_v52, 0  ;;  %v13053_v23 = vshrl.u32 %v3662_v30, 30  ;;  %vm6804_vm1 = vcmp.lt.s32.totalorder %v13047_v57, 2 }
 0x76e   :  { %v3483_v61 = vsel %vm12981_vm9, %v12739_v33, %v3480_v24  ;;  %v3821_v12 = vand.u32 31, %v3819_v62  ;;  %v13072_v39 = vshrl.u32 %v3819_v62, 5  ;;  %vm3487_vm2 = vweird.f32 %v12739_v33 }
 0x76f   :  { %11585 = vcosq.f32 %v3483_v61  ;;  %v3664_v14 = vshll.u32 %v13053_v23, 30  ;;  %v13080_v18 = vshll.u32 %v3815_v31, 8  ;;  %v13084_v36 = vand.u32 8388607, %v16825_v38  ;;  %v11713_v31 = vld [vmem:[%s16821_s2] sm:$0xff] }
 0x770   :  { %11587 = vsinq.f32 %v3483_v61  ;;  %v3822_v16 = vsub.s32 32, %v3821_v12  ;;  %v3824_v6 = vshll.u32 %v16841_v21, %v3821_v12  ;;  %v3833_v41 = vshll.u32 %v16827_v27, %v3821_v12 }
 0x771   :  { %v3827_v58 = vshll.u32 %v16830_v25, %v3821_v12  ;;  %v3830_v0 = vshll.u32 %v16832_v7, %v3821_v12  ;;  %v13078_v3 = vsub.s32 %v3661_v54, %v3664_v14  ;;  %v880_v15 = vstv %s13062_s9 }
 0x772   :  { %v3825_v45 = vshrl.u32 %v16830_v25, %v3822_v16  ;;  %v3828_v60 = vshrl.u32 %v16832_v7, %v3822_v16  ;;  %v3831_v63 = vshrl.u32 %v16827_v27, %v3822_v16  ;;  %v3834_v22 = vshrl.u32 %v16839_v29, %v3822_v16  ;;  %v13098_v61 = vpop.eup %11583 }
 0x773   :  { %v3836_v56 = vshll.u32 %v16839_v29, %v3821_v12  ;;  %v3837_v51 = vshrl.u32 %v16834_v37, %v3822_v16  ;;  %v13089_v44 = vadd.s32 1, %v10631_v11  ;;  %v3667_v54 = vsub.s32 0, %v13078_v3 }
 0x774   :  { %v3835_v52 = vor.u32 %v3834_v22, %v3833_v41  ;;  %v3826_v35 = vor.u32 %v3825_v45, %v3824_v6  ;;  %v3829_v24 = vor.u32 %v3828_v60, %v3827_v58  ;;  %v3832_v62 = vor.u32 %v3831_v63, %v3830_v0 }
 0x775   :  { %v3823_v1 = vshrl.u32 %v16841_v21, %v3822_v16  ;;  %vm3839_vm3 = vcmp.lt.s32.totalorder %v13072_v39, 1  ;;  %vm3841_vm4 = vcmp.lt.s32.totalorder %v13072_v39, 3  ;;  %vm3842_vm6 = vcmp.lt.s32.totalorder %v13072_v39, 4 }
 0x776   :  { %v10616_v30 = vmin.u32 %v3667_v54, %v13078_v3  ;;  %v13107_v6 = vmul.f32 %v11713_v31, %v880_v15  ;;  %v887_v16 = vstv %s13091_s10  ;;  %v3838_v11 = vor.u32 %v3837_v51, %v3836_v56 }
 0x777   :  { %vm3840_vm8 = vcmp.lt.s32.totalorder %v13072_v39, 2  ;;  %v3844_v14 = vsel %vm3842_vm6, %v3832_v62, 2102212464  ;;  %v3848_v45 = vsel %vm3842_vm6, %v3835_v52, 920167782  ;;  %v3847_v63 = vsel %vm3839_vm3, %v3826_v35, %v3829_v24 }
 0x778   :  { %v3669_v60 = vclz %v10616_v30  ;;  %v3849_v22 = vsel %vm3841_vm4, %v3832_v62, %v3848_v45  ;;  %v3687_v56 = vsub.s32 4, %v13053_v23  ;;  %v3843_v51 = vsel %vm3839_vm3, %v3823_v1, %v3826_v35 }
 0x779   :  { %v11586_v41 = vpop.eup %11585  ;;  %vm4024_vm7 = vcmp.gt.s32.totalorder %v13089_v44, 0  ;;  %v3845_v59 = vsel %vm3841_vm4, %v3829_v24, %v3844_v14  ;;  %vm3603_vm9 = vcmp.lt.s32.totalorder %v12859_v32, 0  ;;  %v3850_v35 = vsel %vm3840_vm8, %v3847_v63, %v3849_v22 }
 0x77a   :  { %v11588_v58 = vpop.eup %11587  ;;  %v3494_v0 = vxor.u32 2147483648, %v11586_v41  ;;  %v10617_v38 = vadd.s32 4294967294, %v3669_v60  ;;  %v3851_v1 = vsel %vm3839_vm3, %v3829_v24, %v3832_v62  ;;  %vm13162_vm11 = vcmp.le.f32.partialorder %v3601_v26, 0.7853982 }
 0x77b   :  { %v3491_v54 = vxor.u32 2147483648, %v11588_v58  ;;  %vm3693_vm3 = vweird.f32 %v12859_v32 }
 0x77c   :  { %v3495_v31 = vsel %vm3493_vm5, %v3494_v0, %v11588_v58  ;;  %v6810_v30 = vsel %vm6808_vm13, %v3494_v0, %v11588_v58  ;;  %vm10618_vm12 = vcmp.lt.s32.totalorder %v10617_v38, 0  ;;  %v3852_v0 = vsel %vm3842_vm6, %v3838_v11, 1326507024 }
 0x77d   :  { %v3492_v45 = vsel %vm3490_vm14, %v11586_v41, %v3491_v54  ;;  %v6807_v12 = vsel %vm6805_vm10, %v11586_v41, %v3491_v54  ;;  %v3672_v63 = vsel %vm10618_vm12, 0, %v10617_v38  ;;  %v3853_v24 = vsel %vm3841_vm4, %v3835_v52, %v3852_v0 }
 0x77e   :  { %v3496_v58 = vsel %vm3489_vm15, %v3492_v45, %v3495_v31  ;;  %v6811_v14 = vsel %vm6804_vm1, %v6807_v12, %v6810_v30  ;;  %v3673_v22 = vsub.s32 32, %v3672_v63  ;;  %v3674_v57 = vshll.u32 %v13078_v3, %v3672_v63 }
 0x77f   :  { %v3497_v41 = vsel %vm3487_vm2, nan, %v3496_v58  ;;  %v6812_v60 = vsel %vm3487_vm2, nan, %v6811_v14  ;;  %v3677_v12 = vsub.s32 4294967266, %v3672_v63  ;;  %v3854_v11 = vsel %vm3840_vm8, %v3851_v1, %v3853_v24 }
 0x780   :  { %v8183_v62 = vsub.f32 %v3497_v41, %v6812_v60  ;;  %v8247_v19 = vadd.f32 %v6812_v60, %v3497_v41  ;;  %v13154_v54 = vmul.u32.u64.low %v13080_v18, %v3850_v35  ;;  %v13155_v31 = vmul.u32.u64.high %v13080_v18, %v3850_v35, %v13154_v54 }
 0x781   :  { %v3675_v3 = vshrl.u32 %v13058_v17, %v3673_v22  ;;  %v3846_v30 = vsel %vm3840_vm8, %v3843_v51, %v3845_v59  ;;  %v3678_v45 = vadd.s32 127, %v3677_v12  ;;  %v4025_v58 = vsel %vm4024_vm7, %v13089_v44, 0  ;;  %v11714_v17 = vld [vmem:[%s16821_s2 + $0x8] sm:$0xff]  ;;  %v11715_v44 = vld [vmem:[%s16821_s2 + $0x50] sm:$0xff] }
 0x782   :  { %v13158_v33 = vmul.f32 0.70710677, %v8183_v62  ;;  %v8279_v38 = vmul.f32 0.70710677, %v8247_v19  ;;  %v13170_v35 = vmul.u32.u64.low %v13080_v18, %v3854_v11  ;;  %v13171_v1 = vmul.u32.u64.high %v13080_v18, %v3854_v11, %v13170_v35 }
 0x783   :  { %v3676_v26 = vor.u32 %v3675_v3, %v3674_v57  ;;  %v4027_v0 = vand.u32 31, %v4025_v58  ;;  %v13184_v59 = vmul.f32 %v11714_v17, %v880_v15  ;;  %v3679_v39 = vshll.u32 %v3678_v45, 23 }
 0x784   :  { %16974 = vst [vmem:[#allocation16_spill] sm:$0xff] %v13158_v33  ;;  %v13177_v14 = vsub.f32 %v8279_v38, %v13158_v33  ;;  %v3862_v51 = vmul.u32 %v13080_v18, %v3846_v30  ;;  %v3865_v41 = vadd.s32 1, %v13155_v31  ;;  %v13193_v60 = vmul.f32 %v11715_v44, %v887_v16 }
 0x785   :  { %v3688_v63 = vsel %vm3603_vm9, %v3687_v56, %v13053_v23  ;;  %v4028_v15 = vsub.s32 32, %v4027_v0  ;;  %v4030_v24 = vshll.u32 %v16841_v21, %v4027_v0  ;;  %v4033_v18 = vshll.u32 %v16830_v25, %v4027_v0 }
 0x786   :  { %16977 = vst [vmem:[#allocation17_spill] sm:$0xff] %v13177_v14  ;;  %8422 = vperm.xlu1 %11460, %v13177_v14   ;;  %v3680_v62 = vor.u32 4788187, %v3679_v39  ;;  %v3683_v19 = vcvt.s32.f32 %v3676_v26  ;;  %vm3864_vm5 = vc.u32 %v13171_v1, %v13154_v54  ;;  %v4026_v22 = vshrl.u32 %v4025_v58, 5 }
 0x787   :  { %v3866_v57 = vsel %vm3864_vm5, %v3865_v41, %v13155_v31  ;;  %v4031_v12 = vshrl.u32 %v16830_v25, %v4028_v15  ;;  %v4034_v11 = vshrl.u32 %v16832_v7, %v4028_v15  ;;  %v4036_v38 = vshll.u32 %v16832_v7, %v4027_v0 }
 0x788   :  { %v3681_v23 = vand.u32 2147483647, %v3680_v62  ;;  %v3867_v56 = vadd.s32 %v3866_v57, %v3862_v51  ;;  %v4037_v3 = vshrl.u32 %v16827_v27, %v4028_v15  ;;  %v4039_v30 = vshll.u32 %v16827_v27, %v4027_v0 }
 0x789   :  { %v4032_v45 = vor.u32 %v4031_v12, %v4030_v24  ;;  %v4035_v35 = vor.u32 %v4034_v11, %v4033_v18  ;;  %v4040_v26 = vshrl.u32 %v16839_v29, %v4028_v15  ;;  %v4042_v58 = vshll.u32 %v16839_v29, %v4027_v0 }
 0x78a   :  { %v3684_v17 = vmul.f32 %v3683_v19, %v3681_v23  ;;  %v3690_v31 = vsel %vm13162_vm11, 0, %v3688_v63  ;;  %v3868_v39 = vadd.s32 536870912, %v3867_v56  ;;  %v4043_v41 = vshrl.u32 %v16834_v37, %v4028_v15 }
 0x78b   :  { %v4029_v44 = vshrl.u32 %v16841_v21, %v4028_v15  ;;  %v4038_v51 = vor.u32 %v4037_v3, %v4036_v38  ;;  %v4041_v62 = vor.u32 %v4040_v26, %v4039_v30  ;;  %vm4045_vm13 = vcmp.lt.s32.totalorder %v4026_v22, 1 }
 0x78c   :  { %v3685_v57 = vxor.u32 2147483648, %v3684_v17  ;;  %v3869_v27 = vshrl.u32 %v3868_v39, 30  ;;  %vm4047_vm14 = vcmp.lt.s32.totalorder %v4026_v22, 3  ;;  %vm4048_vm10 = vcmp.lt.s32.totalorder %v4026_v22, 4 }
 0x78d   :  { %v4044_v24 = vor.u32 %v4043_v41, %v4042_v58  ;;  %vm4046_vm15 = vcmp.lt.s32.totalorder %v4026_v22, 2  ;;  %v4053_v0 = vsel %vm4045_vm13, %v4032_v45, %v4035_v35  ;;  %v4054_v18 = vsel %vm4048_vm10, %v4041_v62, 920167782 }
 0x78e   :  { %v3686_v63 = vsel %vm3603_vm9, %v3685_v57, %v3684_v17  ;;  %v3870_v19 = vshll.u32 %v3869_v27, 30  ;;  %v4050_v12 = vsel %vm4048_vm10, %v4038_v51, 2102212464  ;;  %v16978_v15 = vor.u32 8388608, %v13084_v36 }
 0x78f   :  { %v3689_v38 = vsel %vm13162_vm11, %v12859_v32, %v3686_v63  ;;  %v13225_v23 = vand.u32 3, %v3690_v31  ;;  %v7010_v3 = vadd.s32 3, %v3690_v31  ;;  %v4055_v30 = vsel %vm4047_vm14, %v4038_v51, %v4054_v18 }
 0x790   :  { %v4061_v11 = vshll.u32 %v16978_v15, 8  ;;  %11589 = vcosq.f32 %v3689_v38  ;;  %v16979_v26 = vand.u32 2147483647, %v12938_v5  ;;  %v13234_v17 = vsub.s32 %v3867_v56, %v3870_v19  ;;  %v11716_v56 = vld [vmem:[%s16821_s2 + $0x58] sm:$0xff] }
 0x791   :  { %v4056_v36 = vsel %vm4046_vm15, %v4053_v0, %v4055_v30  ;;  %v4057_v52 = vsel %vm4045_vm13, %v4035_v35, %v4038_v51  ;;  %11591 = vsinq.f32 %v3689_v38  ;;  %v4049_v39 = vsel %vm4045_vm13, %v4029_v44, %v4032_v45 }
 0x792   :  { %vm13230_vm1 = vcmp.le.f32.partialorder %v16979_v26, 0.7853982  ;;  %v4051_v31 = vsel %vm4047_vm14, %v4035_v35, %v4050_v12  ;;  %v4058_v41 = vsel %vm4048_vm10, %v4044_v24, 1326507024  ;;  %v3873_v57 = vsub.s32 0, %v13234_v17 }
 0x793   :  { %v3893_v18 = vsub.s32 4, %v3869_v27  ;;  %v4059_v63 = vsel %vm4047_vm14, %v4041_v62, %v4058_v41  ;;  %v890_v0 = vmul.f32 %v11716_v56, %v887_v16  ;;  %v13254_v45 = vmul.f32 0.7853982, %v13098_v61 }
 0x794   :  { %v4060_v51 = vsel %vm4046_vm15, %v4057_v52, %v4059_v63  ;;  %v13249_v19 = vmul.u32.u64.low %v4061_v11, %v4056_v36  ;;  %v13250_v15 = vmul.u32.u64.high %v4061_v11, %v4056_v36, %v13249_v19  ;;  %v7011_v35 = vand.u32 3, %v7010_v3 }
 0x795   :  { %vm3809_vm2 = vcmp.lt.s32.totalorder %v12938_v5, 0  ;;  %v10624_v44 = vmin.u32 %v3873_v57, %v13234_v17  ;;  %v4052_v62 = vsel %vm4046_vm15, %v4049_v39, %v4051_v31  ;;  %vm3695_vm4 = vcmp.lt.s32.totalorder %v13225_v23, 2 }
 0x796   :  { %vm3696_vm6 = vcmp.eq.s32.totalorder %v13225_v23, 0  ;;  %v13262_v16 = vmul.u32.u64.low %v4061_v11, %v4060_v51  ;;  %v13263_v24 = vmul.u32.u64.high %v4061_v11, %v4060_v51, %v13262_v16  ;;  %vm3699_vm8 = vcmp.eq.s32.totalorder %v13225_v23, 2 }
 0x797   :  { %v3875_v61 = vclz %v10624_v44  ;;  %v3894_v12 = vsel %vm3809_vm2, %v3893_v18, %v3869_v27  ;;  %v4222_v38 = vand.u32 2139095040, %v13254_v45  ;;  %v4068_v3 = vmul.u32 %v4061_v11, %v4052_v62 }
 0x798   :  { %v4071_v22 = vadd.s32 1, %v13250_v15  ;;  %v891_v30 = vadd.f32 %v13193_v60, %v13107_v6  ;;  %v892_v26 = vadd.f32 %v890_v0, %v13184_v59  ;;  %vm7012_vm7 = vcmp.lt.s32.totalorder %v7011_v35, 2 }
 0x799   :  { %vm7013_vm9 = vcmp.eq.s32.totalorder %v7011_v35, 0  ;;  %v10625_v36 = vadd.s32 4294967294, %v3875_v61  ;;  %v4223_v52 = vshrl.u32 %v4222_v38, 23  ;;  %vm7016_vm12 = vcmp.eq.s32.totalorder %v7011_v35, 2 }
 0x79a   :  { %v3863_v39 = vadd.s32 %v13154_v54, %v13171_v1  ;;  %v3896_v27 = vsel %vm13230_vm1, 0, %v3894_v12  ;;  %vm4070_vm11 = vc.u32 %v13263_v24, %v13249_v19  ;;  %v11590_v11 = vpop.eup %11589  ;;  %v16836_v59 = vand.u32 2147483647, %v13254_v45 }
 0x79b   :  { %vm10626_vm5 = vcmp.lt.s32.totalorder %v10625_v36, 0  ;;  %v4072_v6 = vsel %vm4070_vm11, %v4071_v22, %v13250_v15  ;;  %v10639_v60 = vadd.s32 4294967169, %v4223_v52  ;;  %v11592_v31 = vpop.eup %11591  ;;  %v3700_v41 = vxor.u32 2147483648, %v11590_v11 }
 0x79c   :  { %v3878_v57 = vsel %vm10626_vm5, 0, %v10625_v36  ;;  %v4073_v18 = vadd.s32 %v4072_v6, %v4068_v3  ;;  %v11230_v63 = vpack.c.bf16 %v892_v26, %v891_v30  ;;  %v3697_v56 = vxor.u32 2147483648, %v11592_v31 }
 0x79d   :  { %v3879_v54 = vsub.s32 32, %v3878_v57  ;;  %v3880_v1 = vshll.u32 %v13234_v17, %v3878_v57  ;;  %v3883_v0 = vsub.s32 4294967266, %v3878_v57  ;;  %v3701_v51 = vsel %vm3699_vm8, %v3700_v41, %v11592_v31 }
 0x79e   :  { %v7018_v44 = vsel %vm7016_vm12, %v3700_v41, %v11592_v31  ;;  %v4074_v62 = vadd.s32 536870912, %v4073_v18  ;;  %v4229_v15 = vadd.s32 1, %v10639_v60  ;;  %11231 = vmatprep.subr.bf16.mxu1 %v11230_v63  ;;  %v3698_v16 = vsel %vm3696_vm6, %v11590_v11, %v3697_v56 }
 0x79f   :  { %v7015_v61 = vsel %vm7013_vm9, %v11590_v11, %v3697_v56  ;;  %v3881_v12 = vshrl.u32 %v3863_v39, %v3879_v54  ;;  %v3884_v38 = vadd.s32 127, %v3883_v0  ;;  %11233 = vmatpush3.bf16.msra.mxu1 %v11230_v63  ;;  %v3702_v17 = vsel %vm3695_vm4, %v3698_v16, %v3701_v51 }
 0x7a0   :  { %v7019_v3 = vsel %vm7012_vm7, %v7015_v61, %v7018_v44  ;;  %v13291_v22 = vshrl.u32 %v4074_v62, 30  ;;  %vm4230_vm13 = vcmp.gt.s32.totalorder %v4229_v15, 0  ;;  %v3703_v30 = vsel %vm3693_vm3, nan, %v3702_v17  ;;  %v1473_v44 = vld [vmem:[%s16823_s0 + $0xe0] sm:$0xff] }
 0x7a1   :  { %v7020_v26 = vsel %vm3693_vm3, nan, %v7019_v3  ;;  %v3882_v36 = vor.u32 %v3881_v12, %v3880_v1  ;;  %v3885_v52 = vshll.u32 %v3884_v38, 23  ;;  %v7218_v6 = vadd.s32 3, %v3896_v27 }
 0x7a2   :  { %v8185_v11 = vsub.f32 %v3703_v30, %v7020_v26  ;;  %v8249_v39 = vadd.f32 %v7020_v26, %v3703_v30  ;;  %v4076_v60 = vshll.u32 %v13291_v22, 30  ;;  %v4226_v35 = vand.u32 8388607, %v16836_v59 }
 0x7a3   :  { %v3886_v23 = vor.u32 4788187, %v3885_v52  ;;  %v3889_v31 = vcvt.s32.f32 %v3882_v36  ;;  %v4231_v41 = vsel %vm4230_vm13, %v4229_v15, 0  ;;  %v13307_v0 = vand.u32 3, %v3896_v27 }
 0x7a4   :  { %v13300_v57 = vmul.f32 0.70710677, %v8185_v11  ;;  %v8281_v63 = vmul.f32 0.70710677, %v8249_v39  ;;  %v13302_v56 = vsub.s32 %v4073_v18, %v4076_v60  ;;  %v4233_v54 = vand.u32 31, %v4231_v41 }
 0x7a5   :  { %v3887_v32 = vand.u32 2147483647, %v3886_v23  ;;  %v13313_v15 = vand.u32 3, %v7218_v6  ;;  %v4227_v16 = vor.u32 8388608, %v4226_v35  ;;  %v4069_v18 = vadd.s32 %v13249_v19, %v13263_v24 }
 0x7a6   :  { %16982 = vst [vmem:[#allocation18_spill] sm:$0xff] %v13300_v57  ;;  %v13305_v1 = vsub.f32 %v8281_v63, %v13300_v57  ;;  %v4079_v51 = vsub.s32 0, %v13302_v56  ;;  %v4234_v61 = vsub.s32 32, %v4233_v54  ;;  %v4236_v27 = vshll.u32 %v16841_v21, %v4233_v54 }
 0x7a7   :  { %v3890_v62 = vmul.f32 %v3889_v31, %v3887_v32  ;;  %v4239_v38 = vshll.u32 %v16830_v25, %v4233_v54  ;;  %v4099_v3 = vsub.s32 4, %v13291_v22  ;;  %11593 = vtanh.f32 %v1473_v44 }
 0x7a8   :  { %16983 = vst [vmem:[#allocation19_spill] sm:$0xff] %v13305_v1  ;;  %8432 = vperm.xlu1 %11460, %v13305_v1   ;;  %v10632_v12 = vmin.u32 %v4079_v51, %v13302_v56  ;;  %v4237_v30 = vshrl.u32 %v16830_v25, %v4234_v61  ;;  %v4240_v36 = vshrl.u32 %v16832_v7, %v4234_v61  ;;  %v16984_v11 = vmov 2102212464  }
 0x7a9   :  { %v3891_v17 = vxor.u32 2147483648, %v3890_v62  ;;  %v4242_v52 = vshll.u32 %v16832_v7, %v4233_v54  ;;  %v4243_v39 = vshrl.u32 %v16984_v11, %v4234_v61  ;;  %v4232_v24 = vshrl.u32 %v4231_v41, 5 }
 0x7aa   :  { %v4081_v26 = vclz %v10632_v12  ;;  %v4235_v6 = vshrl.u32 %v16841_v21, %v4234_v61  ;;  %v13329_v60 = vshll.u32 %v4227_v16, 8  ;;  %v4238_v35 = vor.u32 %v4237_v30, %v4236_v27 }
 0x7ab   :  { %v3892_v19 = vsel %vm3809_vm2, %v3891_v17, %v3890_v62  ;;  %v4241_v63 = vor.u32 %v4240_v36, %v4239_v38  ;;  %v4244_v32 = vor.u32 %v4243_v39, %v4242_v52  ;;  %v4245_v51 = vshll.u32 %v16984_v11, %v4233_v54 }
 0x7ac   :  { %v3895_v23 = vsel %vm13230_vm1, %v12938_v5, %v3892_v19  ;;  %v10633_v31 = vadd.s32 4294967294, %v4081_v26  ;;  %v4246_v44 = vshrl.u32 %v16839_v29, %v4234_v61  ;;  %vm4015_vm14 = vcmp.lt.s32.totalorder %v13008_v40, 0 }
 0x7ad   :  { %11595 = vcosq.f32 %v3895_v23  ;;  %v4248_v41 = vshll.u32 %v16839_v29, %v4233_v54  ;;  %v4249_v62 = vshrl.u32 %v16834_v37, %v4234_v61  ;;  %vm3905_vm15 = vcmp.eq.s32.totalorder %v13307_v0, 2 }
 0x7ae   :  { %11597 = vsinq.f32 %v3895_v23  ;;  %vm10634_vm10 = vcmp.lt.s32.totalorder %v10633_v31, 0  ;;  %v4247_v16 = vor.u32 %v4246_v44, %v4245_v51  ;;  %vm4251_vm1 = vcmp.lt.s32.totalorder %v4232_v24, 1 }
 0x7af   :  { %v4084_v58 = vsel %vm10634_vm10, 0, %v10633_v31  ;;  %vm4252_vm2 = vcmp.lt.s32.totalorder %v4232_v24, 2  ;;  %vm3902_vm3 = vcmp.eq.s32.totalorder %v13307_v0, 0  ;;  %v4250_v17 = vor.u32 %v4249_v62, %v4248_v41 }
 0x7b0   :  { %v4085_v12 = vsub.s32 32, %v4084_v58  ;;  %v4086_v27 = vshll.u32 %v13302_v56, %v4084_v58  ;;  %v4089_v38 = vsub.s32 4294967266, %v4084_v58  ;;  %vm3901_vm4 = vcmp.lt.s32.totalorder %v13307_v0, 2 }
 0x7b1   :  { %v16985_v30 = vand.u32 2147483647, %v13008_v40  ;;  %vm4253_vm8 = vcmp.lt.s32.totalorder %v4232_v24, 3  ;;  %vm4254_vm7 = vcmp.lt.s32.totalorder %v4232_v24, 4  ;;  %v4255_v61 = vsel %vm4251_vm1, %v4235_v6, %v4238_v35  ;;  %v11594_v19 = vpop.eup %11593 }
 0x7b2   :  { %v4259_v26 = vsel %vm4251_vm1, %v4238_v35, %v4241_v63  ;;  %vm3899_vm9 = vweird.f32 %v12938_v5  ;;  %v4087_v36 = vshrl.u32 %v4069_v18, %v4085_v12  ;;  %v4090_v56 = vadd.s32 127, %v4089_v38  ;;  %v1475_v18 = vld [vmem:[%s16823_s0 + $0xf0] sm:$0xff] }
 0x7b3   :  { %vm13345_vm6 = vcmp.le.f32.partialorder %v16985_v30, 0.7853982  ;;  %v4256_v52 = vsel %vm4254_vm7, %v4244_v32, 2102212464  ;;  %v4260_v39 = vsel %vm4254_vm7, %v4247_v16, 920167782  ;;  %v4263_v51 = vsel %vm4251_vm1, %v4241_v63, %v4244_v32 }
 0x7b4   :  { %v4257_v23 = vsel %vm4253_vm8, %v4241_v63, %v4256_v52  ;;  %v4261_v31 = vsel %vm4253_vm8, %v4244_v32, %v4260_v39  ;;  %v4264_v44 = vsel %vm4254_vm7, %v4250_v17, 1326507024  ;;  %vm7224_vm12 = vcmp.eq.s32.totalorder %v13313_v15, 2 }
 0x7b5   :  { %v4088_v41 = vor.u32 %v4087_v36, %v4086_v27  ;;  %v4091_v6 = vshll.u32 %v4090_v56, 23  ;;  %v4262_v35 = vsel %vm4252_vm2, %v4259_v26, %v4261_v31  ;;  %v4258_v62 = vsel %vm4252_vm2, %v4255_v61, %v4257_v23  ;;  %v11047_v36 = vpop.f32.mrb[8].mxu0 }
 0x7b6   :  { %v4265_v58 = vsel %vm4253_vm8, %v4247_v16, %v4264_v44  ;;  %v13363_v12 = vmul.u32.u64.low %v13329_v60, %v4262_v35  ;;  %v13364_v38 = vmul.u32.u64.high %v13329_v60, %v4262_v35, %v13363_v12  ;;  %v13368_v17 = vmul.f32 0.7853982, %v11594_v19 }
 0x7b7   :  { %v4092_v63 = vor.u32 4788187, %v4091_v6  ;;  %v4095_v32 = vcvt.s32.f32 %v4088_v41  ;;  %v4266_v27 = vsel %vm4252_vm2, %v4263_v51, %v4265_v58  ;;  %v11596_v30 = vpop.eup %11595  ;;  %v4100_v61 = vsel %vm4015_vm14, %v4099_v3, %v13291_v22  ;;  %v868_v3 = vpop.f32.mrb[9].mxu0 }
 0x7b8   :  { %v13376_v16 = vmul.u32.u64.low %v13329_v60, %v4266_v27  ;;  %v13377_v26 = vmul.u32.u64.high %v13329_v60, %v4266_v27, %v13376_v16  ;;  %11599 = vtanh.f32 %v1475_v18  ;;  %v11598_v56 = vpop.eup %11597  ;;  %v3906_v52 = vxor.u32 2147483648, %v11596_v30  ;;  %11052 = vmatprep.mubr.msk.f32.mxu1 %vm23_vm0, %v868_v3 }
 0x7b9   :  { %vm7220_vm11 = vcmp.lt.s32.totalorder %v13313_v15, 2  ;;  %vm7221_vm5 = vcmp.eq.s32.totalorder %v13313_v15, 0  ;;  %v4093_v24 = vand.u32 2147483647, %v4092_v63  ;;  %v3903_v39 = vxor.u32 2147483648, %v11598_v56  ;;  %11053 = vmatmul.mubr.msk.f32.vlgmr.msra.gmra.mrb[8].mxu1 %vm23_vm0, %v11047_v36 }
 0x7ba   :  { %v4274_v19 = vmul.u32 %v13329_v60, %v4258_v62  ;;  %v4277_v23 = vadd.s32 1, %v13364_v38  ;;  %v4428_v22 = vand.u32 2139095040, %v13368_v17  ;;  %v3907_v31 = vsel %vm3905_vm15, %v3906_v52, %v11598_v56 }
 0x7bb   :  { %v7226_v51 = vsel %vm7224_vm12, %v3906_v52, %v11598_v56  ;;  %v4096_v44 = vmul.f32 %v4095_v32, %v4093_v24  ;;  %v4102_v41 = vsel %vm13345_vm6, 0, %v4100_v61  ;;  %v3904_v60 = vsel %vm3902_vm3, %v11596_v30, %v3903_v39 }
 0x7bc   :  { %v7223_v6 = vsel %vm7221_vm5, %v11596_v30, %v3903_v39  ;;  %vm4276_vm13 = vc.u32 %v13377_v26, %v13363_v12  ;;  %v16829_v35 = vand.u32 2147483647, %v13368_v17  ;;  %v3908_v18 = vsel %vm3901_vm4, %v3904_v60, %v3907_v31 }
 0x7bd   :  { %v7227_v62 = vsel %vm7220_vm11, %v7223_v6, %v7226_v51  ;;  %v4097_v58 = vxor.u32 2147483648, %v4096_v44  ;;  %v4278_v63 = vsel %vm4276_vm13, %v4277_v23, %v13364_v38  ;;  %v3909_v32 = vsel %vm3899_vm9, nan, %v3908_v18 }
 0x7be   :  { %v7228_v27 = vsel %vm3899_vm9, nan, %v7227_v62  ;;  %v4279_v30 = vadd.s32 %v4278_v63, %v4274_v19  ;;  %v4429_v61 = vshrl.u32 %v4428_v22, 23  ;;  %v7426_v36 = vadd.s32 3, %v4102_v41 }
 0x7bf   :  { %v8187_v16 = vsub.f32 %v3909_v32, %v7228_v27  ;;  %v8251_v56 = vadd.f32 %v7228_v27, %v3909_v32  ;;  %v4098_v0 = vsel %vm4015_vm14, %v4097_v58, %v4096_v44  ;;  %v4432_v5 = vand.u32 8388607, %v16829_v35  ;;  %v1445_v58 = vld [vmem:[%s16823_s0] sm:$0xff] }
 0x7c0   :  { %v4101_v15 = vsel %vm13345_vm6, %v13008_v40, %v4098_v0  ;;  %v4280_v52 = vadd.s32 536870912, %v4279_v30  ;;  %v10647_v38 = vadd.s32 4294967169, %v4429_v61  ;;  %v4106_v31 = vand.u32 3, %v4102_v41 }
 0x7c1   :  { %v13411_v24 = vmul.f32 0.70710677, %v8187_v16  ;;  %v8283_v39 = vmul.f32 0.70710677, %v8251_v56  ;;  %11601 = vcosq.f32 %v4101_v15  ;;  %v7427_v54 = vand.u32 3, %v7426_v36 }
 0x7c2   :  { %v11600_v19 = vpop.eup %11599  ;;  %11603 = vsinq.f32 %v4101_v15  ;;  %v13415_v23 = vshrl.u32 %v4280_v52, 30  ;;  %v4435_v22 = vadd.s32 1, %v10647_v38  ;;  %v4433_v44 = vor.u32 8388608, %v4432_v5 }
 0x7c3   :  { %16988 = vst [vmem:[#allocation20_spill] sm:$0xff] %v13411_v24  ;;  %v13418_v3 = vsub.f32 %v8283_v39, %v13411_v24  ;;  %v13422_v6 = vmul.f32 0.7853982, %v11600_v19  ;;  %vm4105_vm10 = vweird.f32 %v13008_v40  ;;  %vm4107_vm15 = vcmp.lt.s32.totalorder %v4106_v31, 2 }
 0x7c4   :  { %v4282_v51 = vshll.u32 %v13415_v23, 30  ;;  %vm4436_vm14 = vcmp.gt.s32.totalorder %v4435_v22, 0  ;;  %vm4108_vm1 = vcmp.eq.s32.totalorder %v4106_v31, 0  ;;  %vm4111_vm2 = vcmp.eq.s32.totalorder %v4106_v31, 2 }
 0x7c5   :  { %16989 = vst [vmem:[#allocation21_spill] sm:$0xff] %v13418_v3  ;;  %8442 = vperm.xlu1 %11460, %v13418_v3   ;;  %v4437_v60 = vsel %vm4436_vm14, %v4435_v22, 0  ;;  %vm7428_vm3 = vcmp.lt.s32.totalorder %v7427_v54, 2  ;;  %vm7429_vm4 = vcmp.eq.s32.totalorder %v7427_v54, 0  ;;  %vm7432_vm6 = vcmp.eq.s32.totalorder %v7427_v54, 2 }
 0x7c6   :  { %v13425_v18 = vsub.s32 %v4279_v30, %v4282_v51  ;;  %v4439_v62 = vand.u32 31, %v4437_v60  ;;  %v4275_v32 = vadd.s32 %v13363_v12, %v13377_v26  ;;  %v13433_v27 = vshll.u32 %v4433_v44, 8 }
 0x7c7   :  { %v4634_v30 = vand.u32 2139095040, %v13422_v6  ;;  %11605 = vtanh.f32 %v1445_v58  ;;  %v4438_v44 = vshrl.u32 %v4437_v60, 5  ;;  %vm4221_vm8 = vcmp.lt.s32.totalorder %v13254_v45, 0 }
 0x7c8   :  { %v4285_v41 = vsub.s32 0, %v13425_v18  ;;  %v4440_v63 = vsub.s32 32, %v4439_v62  ;;  %v4442_v56 = vshll.u32 %v16841_v21, %v4439_v62  ;;  %v4445_v0 = vshll.u32 %v16830_v25, %v4439_v62 }
 0x7c9   :  { %v4448_v12 = vshll.u32 %v16832_v7, %v4439_v62  ;;  %v4451_v26 = vshll.u32 %v16984_v11, %v4439_v62  ;;  %vm4457_vm12 = vcmp.lt.s32.totalorder %v4438_v44, 1  ;;  %vm4458_vm11 = vcmp.lt.s32.totalorder %v4438_v44, 2 }
 0x7ca   :  { %v10640_v61 = vmin.u32 %v4285_v41, %v13425_v18  ;;  %v4443_v15 = vshrl.u32 %v16830_v25, %v4440_v63  ;;  %v4446_v52 = vshrl.u32 %v16832_v7, %v4440_v63  ;;  %v4449_v19 = vshrl.u32 %v16984_v11, %v4440_v63 }
 0x7cb   :  { %v11602_v36 = vpop.eup %11601  ;;  %v4452_v22 = vshrl.u32 %v16839_v29, %v4440_v63  ;;  %v4441_v58 = vshrl.u32 %v16841_v21, %v4440_v63  ;;  %v4635_v41 = vshrl.u32 %v4634_v30, 23  ;;  %vm4459_vm5 = vcmp.lt.s32.totalorder %v4438_v44, 3 }
 0x7cc   :  { %v11604_v38 = vpop.eup %11603  ;;  %v4112_v39 = vxor.u32 2147483648, %v11602_v36  ;;  %v4287_v5 = vclz %v10640_v61  ;;  %v4444_v7 = vor.u32 %v4443_v15, %v4442_v56  ;;  %v4447_v61 = vor.u32 %v4446_v52, %v4445_v0 }
 0x7cd   :  { %v4109_v51 = vxor.u32 2147483648, %v11604_v38  ;;  %v4450_v3 = vor.u32 %v4449_v19, %v4448_v12  ;;  %v4453_v30 = vor.u32 %v4452_v22, %v4451_v26  ;;  %v16991_v0 = vand.u32 2147483647, %v13254_v45 }
 0x7ce   :  { %v4113_v35 = vsel %vm4111_vm2, %v4112_v39, %v11604_v38  ;;  %v7434_v25 = vsel %vm7432_vm6, %v4112_v39, %v11604_v38  ;;  %v10641_v16 = vadd.s32 4294967294, %v4287_v5  ;;  %v16990_v38 = vmov 920167782  }
 0x7cf   :  { %v4110_v37 = vsel %vm4108_vm1, %v11602_v36, %v4109_v51  ;;  %v7431_v59 = vsel %vm7429_vm4, %v11602_v36, %v4109_v51  ;;  %v4454_v39 = vshll.u32 %v16990_v38, %v4439_v62  ;;  %vm13461_vm9 = vcmp.le.f32.partialorder %v16991_v0, 0.7853982 }
 0x7d0   :  { %v4114_v29 = vsel %vm4107_vm15, %v4110_v37, %v4113_v35  ;;  %v7435_v60 = vsel %vm7428_vm3, %v7431_v59, %v7434_v25  ;;  %vm10642_vm7 = vcmp.lt.s32.totalorder %v10641_v16, 0  ;;  %v16994_v35 = vmov 1326507024  }
 0x7d1   :  { %v4115_v21 = vsel %vm4105_vm10, nan, %v4114_v29  ;;  %v7436_v56 = vsel %vm4105_vm10, nan, %v7435_v60  ;;  %v4290_v15 = vsel %vm10642_vm7, 0, %v10641_v16  ;;  %v13466_v59 = vpop.eup %11605  ;;  %v4455_v40 = vshrl.u32 %v16994_v35, %v4440_v63 }
 0x7d2   :  { %v8189_v36 = vsub.f32 %v4115_v21, %v7436_v56  ;;  %v8253_v5 = vadd.f32 %v7436_v56, %v4115_v21  ;;  %v4291_v25 = vsub.s32 32, %v4290_v15  ;;  %v4292_v37 = vshll.u32 %v13425_v18, %v4290_v15 }
 0x7d3   :  { %v4295_v29 = vsub.s32 4294967266, %v4290_v15  ;;  %v4456_v52 = vor.u32 %v4455_v40, %v4454_v39  ;;  %vm4460_vm13 = vcmp.lt.s32.totalorder %v4438_v44, 4  ;;  %v4461_v12 = vsel %vm4457_vm12, %v4441_v58, %v4444_v7 }
 0x7d4   :  { %v13469_v54 = vmul.f32 0.70710677, %v8189_v36  ;;  %v8285_v62 = vmul.f32 0.70710677, %v8253_v5  ;;  %v4293_v21 = vshrl.u32 %v4275_v32, %v4291_v25  ;;  %v4462_v19 = vsel %vm4460_vm13, %v4450_v3, 2102212464 }
 0x7d5   :  { %v4296_v16 = vadd.s32 127, %v4295_v29  ;;  %v4465_v22 = vsel %vm4457_vm12, %v4444_v7, %v4447_v61  ;;  %v4463_v51 = vsel %vm4459_vm5, %v4447_v61, %v4462_v19  ;;  %v4466_v60 = vsel %vm4460_vm13, %v4453_v30, 920167782 }
 0x7d6   :  { %16995 = vst [vmem:[#allocation22_spill] sm:$0xff] %v13469_v54  ;;  %v13473_v26 = vsub.f32 %v8285_v62, %v13469_v54  ;;  %v4294_v18 = vor.u32 %v4293_v21, %v4292_v37  ;;  %v4469_v56 = vsel %vm4457_vm12, %v4447_v61, %v4450_v3  ;;  %v16997_v15 = vsub.s32 4, %v13415_v23 }
 0x7d7   :  { %v4297_v63 = vshll.u32 %v4296_v16, 23  ;;  %v4467_v39 = vsel %vm4459_vm5, %v4450_v3, %v4466_v60  ;;  %v4470_v36 = vsel %vm4460_vm13, %v4456_v52, 1326507024  ;;  %v4464_v7 = vsel %vm4458_vm11, %v4461_v12, %v4463_v51 }
 0x7d8   :  { %16996 = vst [vmem:[#allocation23_spill] sm:$0xff] %v13473_v26  ;;  %8452 = vperm.xlu1 %11460, %v13473_v26   ;;  %v4301_v32 = vcvt.s32.f32 %v4294_v18  ;;  %v4306_v58 = vsel %vm4221_vm8, %v16997_v15, %v13415_v23  ;;  %v4468_v0 = vsel %vm4458_vm11, %v4465_v22, %v4467_v39  ;;  %v4471_v25 = vsel %vm4459_vm5, %v4453_v30, %v4470_v36 }
 0x7d9   :  { %v4298_v5 = vor.u32 4788187, %v4297_v63  ;;  %v4472_v61 = vsel %vm4458_vm11, %v4469_v56, %v4471_v25  ;;  %v13490_v37 = vmul.u32.u64.low %v13433_v27, %v4468_v0  ;;  %v13491_v29 = vmul.u32.u64.high %v13433_v27, %v4468_v0, %v13490_v37 }
 0x7da   :  { %v10655_v40 = vadd.s32 4294967169, %v4635_v41  ;;  %v4308_v23 = vsel %vm13461_vm9, 0, %v4306_v58  ;;  %v13496_v3 = vmul.u32.u64.low %v13433_v27, %v4472_v61  ;;  %v13497_v21 = vmul.u32.u64.high %v13433_v27, %v4472_v61, %v13496_v3  ;;  %v1448_v41 = vld [vmem:[%s16823_s0 + $0x18] sm:$0xff] }
 0x7db   :  { %v4299_v62 = vand.u32 2147483647, %v4298_v5  ;;  %v4480_v12 = vmul.u32 %v13433_v27, %v4464_v7  ;;  %v7634_v30 = vadd.s32 3, %v4308_v23  ;;  %v4483_v44 = vadd.s32 1, %v13491_v29 }
 0x7dc   :  { %v4641_v16 = vadd.s32 1, %v10655_v40  ;;  %v16843_v18 = vand.u32 2147483647, %v13422_v6  ;;  %vm4482_vm10 = vc.u32 %v13497_v21, %v13490_v37  ;;  %v13509_v60 = vand.u32 3, %v4308_v23 }
 0x7dd   :  { %v4302_v52 = vmul.f32 %v4301_v32, %v4299_v62  ;;  %v4484_v63 = vsel %vm4482_vm10, %v4483_v44, %v13491_v29  ;;  %11607 = vtanh.f32 %v1448_v41  ;;  %v13514_v15 = vand.u32 3, %v7634_v30 }
 0x7de   :  { %vm4642_vm14 = vcmp.gt.s32.totalorder %v4641_v16, 0  ;;  %v4485_v56 = vadd.s32 %v4484_v63, %v4480_v12  ;;  %v4638_v58 = vand.u32 8388607, %v16843_v18  ;;  %v16998_v0 = vmov 2475754826  }
 0x7df   :  { %v4303_v19 = vxor.u32 2147483648, %v4302_v52  ;;  %v4643_v22 = vsel %vm4642_vm14, %v4641_v16, 0  ;;  %v16999_v61 = vmov 2131351028   ;;  %vm4317_vm15 = vcmp.eq.s32.totalorder %v13509_v60, 2 }
 0x7e0   :  { %v4645_v51 = vand.u32 31, %v4643_v22  ;;  %v4486_v36 = vadd.s32 536870912, %v4485_v56  ;;  %v13518_v5 = vshrl.u32 %v4643_v22, 5  ;;  %vm4314_vm1 = vcmp.eq.s32.totalorder %v13509_v60, 0 }
 0x7e1   :  { %v4304_v27 = vsel %vm4221_vm8, %v4303_v19, %v4302_v52  ;;  %v4639_v16 = vor.u32 8388608, %v4638_v58  ;;  %v17000_v52 = vmov 683565275   ;;  %vm4313_vm2 = vcmp.lt.s32.totalorder %v13509_v60, 2 }
 0x7e2   :  { %v4307_v32 = vsel %vm13461_vm9, %v13254_v45, %v4304_v27  ;;  %v4646_v39 = vsub.s32 32, %v4645_v51  ;;  %v4657_v7 = vshll.u32 %v16984_v11, %v4645_v51  ;;  %v4651_v25 = vshll.u32 %v16998_v0, %v4645_v51 }
 0x7e3   :  { %11609 = vcosq.f32 %v4307_v32  ;;  %v4654_v31 = vshll.u32 %v16999_v61, %v4645_v51  ;;  %v13525_v40 = vshrl.u32 %v4486_v36, 30  ;;  %v4660_v3 = vshll.u32 %v16990_v38, %v4645_v51 }
 0x7e4   :  { %11611 = vsinq.f32 %v4307_v32  ;;  %v4652_v29 = vshrl.u32 %v16999_v61, %v4646_v39  ;;  %v4655_v62 = vshrl.u32 %v16984_v11, %v4646_v39  ;;  %v4658_v23 = vshrl.u32 %v16990_v38, %v4646_v39 }
 0x7e5   :  { %v4648_v12 = vshll.u32 %v17000_v52, %v4645_v51  ;;  %v4649_v30 = vshrl.u32 %v16998_v0, %v4646_v39  ;;  %v4661_v44 = vshrl.u32 %v16994_v35, %v4646_v39  ;;  %vm7636_vm3 = vcmp.lt.s32.totalorder %v13514_v15, 2 }
 0x7e6   :  { %v4488_v41 = vshll.u32 %v13525_v40, 30  ;;  %v4659_v19 = vor.u32 %v4658_v23, %v4657_v7  ;;  %v13538_v22 = vmul.f32 0.7853982, %v13466_v59  ;;  %vm4311_vm4 = vweird.f32 %v13254_v45 }
 0x7e7   :  { %v4653_v63 = vor.u32 %v4652_v29, %v4651_v25  ;;  %v4656_v27 = vor.u32 %v4655_v62, %v4654_v31  ;;  %v4662_v32 = vor.u32 %v4661_v44, %v4660_v3  ;;  %vm4666_vm6 = vcmp.lt.s32.totalorder %v13518_v5, 4  ;;  %v13551_v25 = vpop.eup %11607 }
 0x7e8   :  { %vm7637_vm8 = vcmp.eq.s32.totalorder %v13514_v15, 0  ;;  %v13543_v51 = vsub.s32 %v4485_v56, %v4488_v41  ;;  %vm4663_vm7 = vcmp.lt.s32.totalorder %v13518_v5, 1  ;;  %v16850_v58 = vand.u32 2147483647, %v13538_v22 }
 0x7e9   :  { %vm7640_vm9 = vcmp.eq.s32.totalorder %v13514_v15, 2  ;;  %v4481_v59 = vadd.s32 %v13490_v37, %v13497_v21  ;;  %v4650_v36 = vor.u32 %v4649_v30, %v4648_v12  ;;  %v13549_v7 = vshll.u32 %v4639_v16, 8 }
 0x7ea   :  { %v4491_v29 = vsub.s32 0, %v13543_v51  ;;  %vm4665_vm12 = vcmp.lt.s32.totalorder %v13518_v5, 3  ;;  %v4672_v56 = vsel %vm4666_vm6, %v4659_v19, 920167782  ;;  %v1544_v31 = vand.u32 2139095040, %v13538_v22 }
 0x7eb   :  { %v4647_v62 = vshrl.u32 %v17000_v52, %v4646_v39  ;;  %vm4664_vm11 = vcmp.lt.s32.totalorder %v13518_v5, 2  ;;  %v4675_v37 = vsel %vm4663_vm7, %v4653_v63, %v4656_v27  ;;  %v4676_v21 = vsel %vm4666_vm6, %v4662_v32, 1326507024 }
 0x7ec   :  { %v10648_v3 = vmin.u32 %v4491_v29, %v13543_v51  ;;  %v4511_v16 = vsub.s32 4, %v13525_v40  ;;  %v4668_v12 = vsel %vm4666_vm6, %v4656_v27, 2102212464  ;;  %v13570_v30 = vand.u32 8388607, %v16850_v58 }
 0x7ed   :  { %v11610_v23 = vpop.eup %11609  ;;  %v4671_v41 = vsel %vm4663_vm7, %v4650_v36, %v4653_v63  ;;  %v4673_v32 = vsel %vm4665_vm12, %v4656_v27, %v4672_v56  ;;  %v4677_v29 = vsel %vm4665_vm12, %v4659_v19, %v4676_v21  ;;  %v1545_v14 = vshrl.u32 %v1544_v31, 23 }
 0x7ee   :  { %v11612_v39 = vpop.eup %11611  ;;  %v4318_v44 = vxor.u32 2147483648, %v11610_v23  ;;  %v4493_v26 = vclz %v10648_v3  ;;  %v4678_v1 = vsel %vm4664_vm11, %v4675_v37, %v4677_v29  ;;  %v4667_v2 = vsel %vm4663_vm7, %v4647_v62, %v4650_v36 }
 0x7ef   :  { %v4315_v18 = vxor.u32 2147483648, %v11612_v39  ;;  %v4669_v27 = vsel %vm4665_vm12, %v4653_v63, %v4668_v12  ;;  %v4674_v31 = vsel %vm4664_vm11, %v4671_v41, %v4673_v32  ;;  %vm4427_vm14 = vcmp.lt.s32.totalorder %v13368_v17, 0 }
 0x7f0   :  { %v4319_v58 = vsel %vm4317_vm15, %v4318_v44, %v11612_v39  ;;  %v7642_v34 = vsel %vm7640_vm9, %v4318_v44, %v11612_v39  ;;  %v10649_v37 = vadd.s32 4294967294, %v4493_v26  ;;  %v10535_v26 = vadd.s32 4294967169, %v1545_v14 }
 0x7f1   :  { %v4316_v19 = vsel %vm4314_vm1, %v11610_v23, %v4315_v18  ;;  %v7639_v56 = vsel %vm7637_vm8, %v11610_v23, %v4315_v18  ;;  %v13599_v36 = vmul.u32.u64.low %v13549_v7, %v4678_v1  ;;  %v13600_v62 = vmul.u32.u64.high %v13549_v7, %v4678_v1, %v13599_v36 }
 0x7f2   :  { %v4320_v21 = vsel %vm4313_vm2, %v4316_v19, %v4319_v58  ;;  %v7643_v3 = vsel %vm7636_vm3, %v7639_v56, %v7642_v34  ;;  %vm10650_vm5 = vcmp.lt.s32.totalorder %v10649_v37, 0  ;;  %v4670_v60 = vsel %vm4664_vm11, %v4667_v2, %v4669_v27 }
 0x7f3   :  { %v4321_v63 = vsel %vm4311_vm4, nan, %v4320_v21  ;;  %v7644_v18 = vsel %vm4311_vm4, nan, %v7643_v3  ;;  %v4496_v39 = vsel %vm10650_vm5, 0, %v10649_v37  ;;  %v1551_v1 = vadd.s32 1, %v10535_v26 }
 0x7f4   :  { %v8191_v23 = vsub.f32 %v4321_v63, %v7644_v18  ;;  %v8255_v12 = vadd.f32 %v7644_v18, %v4321_v63  ;;  %v4497_v15 = vsub.s32 32, %v4496_v39  ;;  %v4498_v34 = vshll.u32 %v13543_v51, %v4496_v39 }
 0x7f5   :  { %v4501_v58 = vsub.s32 4294967266, %v4496_v39  ;;  %v13612_v32 = vmul.u32.u64.low %v13549_v7, %v4674_v31  ;;  %v13613_v45 = vmul.u32.u64.high %v13549_v7, %v4674_v31, %v13612_v32  ;;  %vm1552_vm13 = vcmp.gt.s32.totalorder %v1551_v1, 0 }
 0x7f6   :  { %v13609_v44 = vmul.f32 0.70710677, %v8191_v23  ;;  %v8287_v41 = vmul.f32 0.70710677, %v8255_v12  ;;  %v4499_v14 = vshrl.u32 %v4481_v59, %v4497_v15  ;;  %v4686_v2 = vmul.u32 %v13549_v7, %v4670_v60 }
 0x7f7   :  { %v4502_v29 = vadd.s32 127, %v4501_v58  ;;  %v1553_v5 = vsel %vm1552_vm13, %v1551_v1, 0  ;;  %vm4688_vm10 = vc.u32 %v13600_v62, %v13612_v32  ;;  %v4512_v59 = vsel %vm4427_vm14, %v4511_v16, %v13525_v40  ;;  %v1450_v1 = vld [vmem:[%s16823_s0 + $0x28] sm:$0xff] }
 0x7f8   :  { %17001 = vst [vmem:[#allocation24_spill] sm:$0xff] %v13609_v44  ;;  %v13617_v19 = vsub.f32 %v8287_v41, %v13609_v44  ;;  %v4500_v51 = vor.u32 %v4499_v14, %v4498_v34  ;;  %v1555_v56 = vand.u32 31, %v1553_v5  ;;  %v4689_v37 = vadd.s32 1, %v13613_v45 }
 0x7f9   :  { %v4503_v27 = vshll.u32 %v4502_v29, 23  ;;  %v1549_v31 = vor.u32 8388608, %v13570_v30  ;;  %v13629_v7 = vshrl.u32 %v1553_v5, 5  ;;  %v17003_v58 = vand.u32 2147483647, %v13368_v17 }
 0x7fa   :  { %17002 = vst [vmem:[#allocation25_spill] sm:$0xff] %v13617_v19  ;;  %8462 = vperm.xlu1 %11460, %v13617_v19   ;;  %v4507_v3 = vcvt.s32.f32 %v4500_v51  ;;  %v1556_v36 = vsub.s32 32, %v1555_v56  ;;  %v4690_v63 = vsel %vm4688_vm10, %v4689_v37, %v13613_v45  ;;  %v1558_v18 = vshll.u32 %v17000_v52, %v1555_v56 }
 0x7fb   :  { %v4504_v21 = vor.u32 4788187, %v4503_v27  ;;  %v1561_v26 = vshll.u32 %v16998_v0, %v1555_v56  ;;  %v1567_v23 = vshll.u32 %v16984_v11, %v1555_v56  ;;  %v4691_v39 = vadd.s32 %v4690_v63, %v4686_v2 }
 0x7fc   :  { %v1559_v40 = vshrl.u32 %v16998_v0, %v1556_v36  ;;  %v1564_v16 = vshll.u32 %v16999_v61, %v1555_v56  ;;  %v1562_v30 = vshrl.u32 %v16999_v61, %v1556_v36  ;;  %v1565_v60 = vshrl.u32 %v16984_v11, %v1556_v36 }
 0x7fd   :  { %v4505_v12 = vand.u32 2147483647, %v4504_v21  ;;  %v1568_v15 = vshrl.u32 %v16990_v38, %v1556_v36  ;;  %v1570_v34 = vshll.u32 %v16990_v38, %v1555_v56  ;;  %vm13643_vm15 = vcmp.le.f32.partialorder %v17003_v58, 0.7853982 }
 0x7fe   :  { %v4692_v45 = vadd.s32 536870912, %v4691_v39  ;;  %v1571_v14 = vshrl.u32 %v16994_v35, %v1556_v36  ;;  %v1560_v29 = vor.u32 %v1559_v40, %v1558_v18  ;;  %v1563_v2 = vor.u32 %v1562_v30, %v1561_v26 }
 0x7ff   :  { %v4508_v41 = vmul.f32 %v4507_v3, %v4505_v12  ;;  %v1569_v5 = vor.u32 %v1568_v15, %v1567_v23  ;;  %v13649_v51 = vmul.f32 0.7853982, %v13551_v25  ;;  %v4514_v56 = vsel %vm13643_vm15, 0, %v4512_v59 }
 0x800   :  { %v4693_v37 = vshrl.u32 %v4692_v45, 30  ;;  %vm1573_vm1 = vcmp.lt.s32.totalorder %v13629_v7, 1  ;;  %v1566_v21 = vor.u32 %v1565_v60, %v1564_v16  ;;  %v1572_v63 = vor.u32 %v1571_v14, %v1570_v34 }
 0x801   :  { %v4509_v27 = vxor.u32 2147483648, %v4508_v41  ;;  %vm1576_vm2 = vcmp.lt.s32.totalorder %v13629_v7, 4  ;;  %v13655_v3 = vshll.u32 %v1549_v31, 8  ;;  %v1557_v25 = vshrl.u32 %v17000_v52, %v1556_v36 }
 0x802   :  { %v4694_v26 = vshll.u32 %v4693_v37, 30  ;;  %vm1575_vm3 = vcmp.lt.s32.totalorder %v13629_v7, 3  ;;  %vm1574_vm4 = vcmp.lt.s32.totalorder %v13629_v7, 2  ;;  %v1581_v23 = vsel %vm1573_vm1, %v1560_v29, %v1563_v2 }
 0x803   :  { %v4510_v18 = vsel %vm4427_vm14, %v4509_v27, %v4508_v41  ;;  %v1582_v31 = vsel %vm1576_vm2, %v1569_v5, 920167782  ;;  %v7842_v12 = vadd.s32 3, %v4514_v56  ;;  %v1578_v36 = vsel %vm1576_vm2, %v1566_v21, 2102212464 }
 0x804   :  { %v4513_v59 = vsel %vm13643_vm15, %v13368_v17, %v4510_v18  ;;  %v13669_v40 = vsub.s32 %v4691_v39, %v4694_v26  ;;  %v4518_v16 = vand.u32 3, %v4514_v56  ;;  %v1583_v30 = vsel %vm1575_vm3, %v1566_v21, %v1582_v31 }
 0x805   :  { %11613 = vcosq.f32 %v4513_v59  ;;  %v1586_v60 = vsel %vm1576_vm2, %v1572_v63, 1326507024  ;;  %v1577_v34 = vsel %vm1573_vm1, %v1557_v25, %v1560_v29  ;;  %v1584_v39 = vsel %vm1574_vm4, %v1581_v23, %v1583_v30 }
 0x806   :  { %11615 = vsinq.f32 %v4513_v59  ;;  %v4697_v15 = vsub.s32 0, %v13669_v40  ;;  %v1585_v58 = vsel %vm1573_vm1, %v1563_v2, %v1566_v21  ;;  %v1579_v41 = vsel %vm1575_vm3, %v1563_v2, %v1578_v36 }
 0x807   :  { %v1587_v45 = vsel %vm1575_vm3, %v1569_v5, %v1586_v60  ;;  %v13692_v14 = vmul.u32.u64.low %v13655_v3, %v1584_v39  ;;  %v13693_v27 = vmul.u32.u64.high %v13655_v3, %v1584_v39, %v13692_v14  ;;  %v7843_v29 = vand.u32 3, %v7842_v12 }
 0x808   :  { %v10656_v56 = vmin.u32 %v4697_v15, %v13669_v40  ;;  %v4717_v63 = vsub.s32 4, %v4693_v37  ;;  %v1853_v21 = vand.u32 2139095040, %v13649_v51  ;;  %vm4517_vm6 = vweird.f32 %v13368_v17 }
 0x809   :  { %v17006_v18 = vand.u32 2147483647, %v13422_v6  ;;  %vm4633_vm7 = vcmp.lt.s32.totalorder %v13422_v6, 0  ;;  %v1588_v5 = vsel %vm1574_vm4, %v1585_v58, %v1587_v45  ;;  %11617 = vtanh.f32 %v1450_v1 }
 0x80a   :  { %v4699_v26 = vclz %v10656_v56  ;;  %v1580_v25 = vsel %vm1574_vm4, %v1577_v34, %v1579_v41  ;;  %v13711_v59 = vmul.u32.u64.low %v13655_v3, %v1588_v5  ;;  %v13712_v23 = vmul.u32.u64.high %v13655_v3, %v1588_v5, %v13711_v59 }
 0x80b   :  { %vm13701_vm8 = vcmp.le.f32.partialorder %v17006_v18, 0.7853982  ;;  %vm4519_vm9 = vcmp.lt.s32.totalorder %v4518_v16, 2  ;;  %vm4520_vm12 = vcmp.eq.s32.totalorder %v4518_v16, 0  ;;  %vm4523_vm11 = vcmp.eq.s32.totalorder %v4518_v16, 2 }
 0x80c   :  { %v1599_v31 = vadd.s32 1, %v13693_v27  ;;  %vm7844_vm5 = vcmp.lt.s32.totalorder %v7843_v29, 2  ;;  %v10657_v12 = vadd.s32 4294967294, %v4699_v26  ;;  %v4718_v36 = vsel %vm4633_vm7, %v4717_v63, %v4693_v37 }
 0x80d   :  { %v1854_v30 = vshrl.u32 %v1853_v21, 23  ;;  %vm7845_vm13 = vcmp.eq.s32.totalorder %v7843_v29, 0  ;;  %vm7848_vm14 = vcmp.eq.s32.totalorder %v7843_v29, 2  ;;  %v4687_v7 = vadd.s32 %v13612_v32, %v13600_v62 }
 0x80e   :  { %v1596_v60 = vmul.u32 %v13655_v3, %v1580_v25  ;;  %vm10658_vm10 = vcmp.lt.s32.totalorder %v10657_v12, 0  ;;  %vm1598_vm15 = vc.u32 %v13712_v23, %v13692_v14  ;;  %v16855_v34 = vand.u32 2147483647, %v13649_v51 }
 0x80f   :  { %v11614_v15 = vpop.eup %11613  ;;  %v10547_v39 = vadd.s32 4294967169, %v1854_v30  ;;  %v4702_v41 = vsel %vm10658_vm10, 0, %v10657_v12  ;;  %v4720_v37 = vsel %vm13701_vm8, 0, %v4718_v36  ;;  %v1600_v45 = vsel %vm1598_vm15, %v1599_v31, %v13693_v27 }
 0x810   :  { %v11616_v58 = vpop.eup %11615  ;;  %v4524_v1 = vxor.u32 2147483648, %v11614_v15  ;;  %v4703_v62 = vsub.s32 32, %v4702_v41  ;;  %v4704_v32 = vshll.u32 %v13669_v40, %v4702_v41  ;;  %v4707_v3 = vsub.s32 4294967266, %v4702_v41 }
 0x811   :  { %v4521_v56 = vxor.u32 2147483648, %v11616_v58  ;;  %v1601_v18 = vadd.s32 %v1600_v45, %v1596_v60  ;;  %v1860_v5 = vadd.s32 1, %v10547_v39  ;;  %vm1543_vm2 = vcmp.lt.s32.totalorder %v13538_v22, 0 }
 0x812   :  { %v4525_v63 = vsel %vm4523_vm11, %v4524_v1, %v11616_v58  ;;  %v7850_v21 = vsel %vm7848_vm14, %v4524_v1, %v11616_v58  ;;  %v4705_v59 = vshrl.u32 %v4687_v7, %v4703_v62  ;;  %v4708_v12 = vadd.s32 127, %v4707_v3  ;;  %v1452_v62 = vld [vmem:[%s16823_s0 + $0x38] sm:$0xff] }
 0x813   :  { %v4522_v26 = vsel %vm4520_vm12, %v11614_v15, %v4521_v56  ;;  %v7847_v25 = vsel %vm7845_vm13, %v11614_v15, %v4521_v56  ;;  %v11618_v36 = vpop.eup %11617  ;;  %v1602_v30 = vadd.s32 536870912, %v1601_v18  ;;  %vm1861_vm1 = vcmp.gt.s32.totalorder %v1860_v5, 0 }
 0x814   :  { %v4526_v27 = vsel %vm4519_vm9, %v4522_v26, %v4525_v63  ;;  %v7851_v31 = vsel %vm7844_vm5, %v7847_v25, %v7850_v21  ;;  %v4706_v39 = vor.u32 %v4705_v59, %v4704_v32  ;;  %v4709_v58 = vshll.u32 %v4708_v12, 23 }
 0x815   :  { %v4527_v40 = vsel %vm4517_vm6, nan, %v4526_v27  ;;  %v7852_v60 = vsel %vm4517_vm6, nan, %v7851_v31  ;;  %v13737_v15 = vshrl.u32 %v1602_v30, 30  ;;  %v1862_v7 = vsel %vm1861_vm1, %v1860_v5, 0 }
 0x816   :  { %v8193_v1 = vsub.f32 %v4527_v40, %v7852_v60  ;;  %v8257_v41 = vadd.f32 %v7852_v60, %v4527_v40  ;;  %v4710_v45 = vor.u32 4788187, %v4709_v58  ;;  %v4713_v16 = vcvt.s32.f32 %v4706_v39 }
 0x817   :  { %v8050_v56 = vadd.s32 3, %v4720_v37  ;;  %v1864_v29 = vand.u32 31, %v1862_v7  ;;  %v1604_v17 = vshll.u32 %v13737_v15, 30  ;;  %v13750_v5 = vmul.f32 0.7853982, %v11618_v36 }
 0x818   :  { %v13742_v3 = vmul.f32 0.70710677, %v8193_v1  ;;  %v8289_v63 = vmul.f32 0.70710677, %v8257_v41  ;;  %v4711_v32 = vand.u32 2147483647, %v4710_v45  ;;  %11619 = vtanh.f32 %v1452_v62 }
 0x819   :  { %v1865_v21 = vsub.s32 32, %v1864_v29  ;;  %v13748_v25 = vsub.s32 %v1601_v18, %v1604_v17  ;;  %v13752_v12 = vand.u32 3, %v4720_v37  ;;  %v13754_v27 = vand.u32 3, %v8050_v56 }
 0x81a   :  { %17009 = vst [vmem:[#allocation26_spill] sm:$0xff] %v13742_v3  ;;  %v13746_v26 = vsub.f32 %v8289_v63, %v13742_v3  ;;  %v4714_v59 = vmul.f32 %v4713_v16, %v4711_v32  ;;  %v1857_v31 = vand.u32 8388607, %v16855_v34  ;;  %v1867_v40 = vshll.u32 %v17000_v52, %v1864_v29 }
 0x81b   :  { %v1607_v30 = vsub.s32 0, %v13748_v25  ;;  %v1870_v18 = vshll.u32 %v16998_v0, %v1864_v29  ;;  %v1873_v36 = vshll.u32 %v16999_v61, %v1864_v29  ;;  %v1868_v39 = vshrl.u32 %v16998_v0, %v1865_v21 }
 0x81c   :  { %17010 = vst [vmem:[#allocation27_spill] sm:$0xff] %v13746_v26  ;;  %8472 = vperm.xlu1 %11460, %v13746_v26   ;;  %v4715_v60 = vxor.u32 2147483648, %v4714_v59  ;;  %v1871_v37 = vshrl.u32 %v16999_v61, %v1865_v21  ;;  %v1874_v58 = vshrl.u32 %v16984_v11, %v1865_v21  ;;  %v1597_v1 = vadd.s32 %v13692_v14, %v13712_v23 }
 0x81d   :  { %v10536_v41 = vmin.u32 %v1607_v30, %v13748_v25  ;;  %v1876_v45 = vshll.u32 %v16984_v11, %v1864_v29  ;;  %v2059_v16 = vand.u32 2139095040, %v13750_v5  ;;  %v1858_v62 = vor.u32 8388608, %v1857_v31 }
 0x81e   :  { %v4716_v56 = vsel %vm4633_vm7, %v4715_v60, %v4714_v59  ;;  %v1863_v63 = vshrl.u32 %v1862_v7, 5  ;;  %v1866_v17 = vshrl.u32 %v17000_v52, %v1865_v21  ;;  %v1877_v14 = vshrl.u32 %v16990_v38, %v1865_v21 }
 0x81f   :  { %v4719_v32 = vsel %vm13701_vm8, %v13422_v6, %v4716_v56  ;;  %v1609_v34 = vclz %v10536_v41  ;;  %v1879_v23 = vshll.u32 %v16990_v38, %v1864_v29  ;;  %v1869_v30 = vor.u32 %v1868_v39, %v1867_v40 }
 0x820   :  { %11621 = vcosq.f32 %v4719_v32  ;;  %v1872_v26 = vor.u32 %v1871_v37, %v1870_v18  ;;  %v1875_v19 = vor.u32 %v1874_v58, %v1873_v36  ;;  %v1878_v7 = vor.u32 %v1877_v14, %v1876_v45 }
 0x821   :  { %11623 = vsinq.f32 %v4719_v32  ;;  %v10537_v59 = vadd.s32 4294967294, %v1609_v34  ;;  %v1880_v31 = vshrl.u32 %v16994_v35, %v1865_v21  ;;  %vm4729_vm3 = vcmp.eq.s32.totalorder %v13752_v12, 2 }
 0x822   :  { %v1627_v2 = vsub.s32 4, %v13737_v15  ;;  %vm1882_vm4 = vcmp.lt.s32.totalorder %v1863_v63, 1  ;;  %vm1883_vm6 = vcmp.lt.s32.totalorder %v1863_v63, 2  ;;  %vm1885_vm8 = vcmp.lt.s32.totalorder %v1863_v63, 4  ;;  %v13783_v60 = vpop.eup %11619 }
 0x823   :  { %vm4726_vm7 = vcmp.eq.s32.totalorder %v13752_v12, 0  ;;  %vm10538_vm9 = vcmp.lt.s32.totalorder %v10537_v59, 0  ;;  %v1881_v29 = vor.u32 %v1880_v31, %v1879_v23  ;;  %vm1884_vm12 = vcmp.lt.s32.totalorder %v1863_v63, 3 }
 0x824   :  { %v1887_v40 = vsel %vm1885_vm8, %v1875_v19, 2102212464  ;;  %vm4725_vm11 = vcmp.lt.s32.totalorder %v13752_v12, 2  ;;  %v17011_v34 = vand.u32 2147483647, %v13538_v22  ;;  %v1612_v18 = vsel %vm10538_vm9, 0, %v10537_v59 }
 0x825   :  { %v1886_v36 = vsel %vm1882_vm4, %v1866_v17, %v1869_v30  ;;  %v1890_v39 = vsel %vm1882_vm4, %v1869_v30, %v1872_v26  ;;  %v1891_v37 = vsel %vm1885_vm8, %v1878_v7, 920167782  ;;  %vm4723_vm13 = vweird.f32 %v13422_v6 }
 0x826   :  { %vm13790_vm5 = vcmp.le.f32.partialorder %v17011_v34, 0.7853982  ;;  %v1613_v58 = vsub.s32 32, %v1612_v18  ;;  %v1614_v41 = vshll.u32 %v13748_v25, %v1612_v18  ;;  %v1617_v45 = vsub.s32 4294967266, %v1612_v18 }
 0x827   :  { %v1888_v56 = vsel %vm1884_vm12, %v1872_v26, %v1887_v40  ;;  %v1892_v32 = vsel %vm1884_vm12, %v1875_v19, %v1891_v37  ;;  %v1894_v14 = vsel %vm1882_vm4, %v1872_v26, %v1875_v19  ;;  %v1895_v23 = vsel %vm1885_vm8, %v1881_v29, 1326507024 }
 0x828   :  { %v1898_v59 = vshll.u32 %v1858_v62, 8  ;;  %v1615_v17 = vshrl.u32 %v1597_v1, %v1613_v58  ;;  %v1618_v31 = vadd.s32 127, %v1617_v45  ;;  %v1893_v30 = vsel %vm1883_vm6, %v1890_v39, %v1892_v32 }
 0x829   :  { %v1896_v34 = vsel %vm1884_vm12, %v1878_v7, %v1895_v23  ;;  %v1889_v20 = vsel %vm1883_vm6, %v1886_v36, %v1888_v56  ;;  %vm8052_vm14 = vcmp.lt.s32.totalorder %v13754_v27, 2  ;;  %vm8056_vm10 = vcmp.eq.s32.totalorder %v13754_v27, 2 }
 0x82a   :  { %v1897_v25 = vsel %vm1883_vm6, %v1894_v14, %v1896_v34  ;;  %v13807_v18 = vmul.u32.u64.low %v1898_v59, %v1893_v30  ;;  %v13808_v8 = vmul.u32.u64.high %v1898_v59, %v1893_v30, %v13807_v18  ;;  %v1616_v40 = vor.u32 %v1615_v17, %v1614_v41  ;;  %v11622_v62 = vpop.eup %11621 }
 0x82b   :  { %v1619_v37 = vshll.u32 %v1618_v31, 23  ;;  %v13811_v19 = vmul.u32.u64.low %v1898_v59, %v1897_v25  ;;  %v13812_v26 = vmul.u32.u64.high %v1898_v59, %v1897_v25, %v13811_v19  ;;  %v1628_v1 = vsel %vm1543_vm2, %v1627_v2, %v13737_v15  ;;  %v11624_v7 = vpop.eup %11623 }
 0x82c   :  { %v2060_v63 = vshrl.u32 %v2059_v16, 23  ;;  %v4730_v29 = vxor.u32 2147483648, %v11622_v62  ;;  %vm8053_vm15 = vcmp.eq.s32.totalorder %v13754_v27, 0  ;;  %v1623_v39 = vcvt.s32.f32 %v1616_v40 }
 0x82d   :  { %v1620_v36 = vor.u32 4788187, %v1619_v37  ;;  %v4727_v58 = vxor.u32 2147483648, %v11624_v7  ;;  %v1905_v41 = vmul.u32 %v1898_v59, %v1889_v20  ;;  %v1908_v45 = vadd.s32 1, %v13808_v8 }
 0x82e   :  { %v10555_v56 = vadd.s32 4294967169, %v2060_v63  ;;  %v4731_v32 = vsel %vm4729_vm3, %v4730_v29, %v11624_v7  ;;  %v8058_v14 = vsel %vm8056_vm10, %v4730_v29, %v11624_v7  ;;  %v1630_v15 = vsel %vm13790_vm5, 0, %v1628_v1 }
 0x82f   :  { %v1621_v23 = vand.u32 2147483647, %v1620_v36  ;;  %v4728_v16 = vsel %vm4726_vm7, %v11622_v62, %v4727_v58  ;;  %v8055_v2 = vsel %vm8053_vm15, %v11622_v62, %v4727_v58  ;;  %vm1907_vm1 = vc.u32 %v13812_v26, %v13807_v18 }
 0x830   :  { %v2066_v17 = vadd.s32 1, %v10555_v56  ;;  %v4732_v20 = vsel %vm4725_vm11, %v4728_v16, %v4731_v32  ;;  %v8059_v59 = vsel %vm8052_vm14, %v8055_v2, %v8058_v14  ;;  %v1909_v30 = vsel %vm1907_vm1, %v1908_v45, %v13808_v8 }
 0x831   :  { %v1624_v31 = vmul.f32 %v1623_v39, %v1621_v23  ;;  %v4733_v34 = vsel %vm4723_vm13, nan, %v4732_v20  ;;  %v8060_v25 = vsel %vm4723_vm13, nan, %v8059_v59  ;;  %v1910_v40 = vadd.s32 %v1909_v30, %v1905_v41 }
 0x832   :  { %vm2067_vm3 = vcmp.gt.s32.totalorder %v2066_v17, 0  ;;  %v8195_v37 = vsub.f32 %v4733_v34, %v8060_v25  ;;  %v8259_v19 = vadd.f32 %v8060_v25, %v4733_v34  ;;  %v4930_v12 = vadd.s32 3, %v1630_v15 }
 0x833   :  { %v1625_v62 = vxor.u32 2147483648, %v1624_v31  ;;  %v2068_v1 = vsel %vm2067_vm3, %v2066_v17, 0  ;;  %v1911_v63 = vadd.s32 536870912, %v1910_v40  ;;  %v2056_v36 = vand.u32 2147483647, %v13750_v5 }
 0x834   :  { %v2070_v7 = vand.u32 31, %v2068_v1  ;;  %v13838_v27 = vmul.f32 0.70710677, %v8195_v37  ;;  %v8291_v29 = vmul.f32 0.70710677, %v8259_v19  ;;  %v13846_v39 = vand.u32 3, %v1630_v15 }
 0x835   :  { %v1626_v8 = vsel %vm1543_vm2, %v1625_v62, %v1624_v31  ;;  %v13848_v58 = vshrl.u32 %v1911_v63, 30  ;;  %v13853_v56 = vand.u32 3, %v4930_v12  ;;  %v13857_v14 = vmul.f32 0.7853982, %v13783_v60 }
 0x836   :  { %17014 = vst [vmem:[#allocation28_spill] sm:$0xff] %v13838_v27  ;;  %v1629_v6 = vsel %vm13790_vm5, %v13538_v22, %v1626_v8  ;;  %v2071_v41 = vsub.s32 32, %v2070_v7  ;;  %v13851_v45 = vsub.f32 %v8291_v29, %v13838_v27  ;;  %v2063_v21 = vand.u32 8388607, %v2056_v36 }
 0x837   :  { %11625 = vcosq.f32 %v1629_v6  ;;  %v1913_v32 = vshll.u32 %v13848_v58, 30  ;;  %v2073_v23 = vshll.u32 %v17000_v52, %v2070_v7  ;;  %v2076_v15 = vshll.u32 %v16998_v0, %v2070_v7 }
 0x838   :  { %17015 = vst [vmem:[#allocation29_spill] sm:$0xff] %v13851_v45  ;;  %11627 = vsinq.f32 %v1629_v6  ;;  %8482 = vperm.xlu1 %11460, %v13851_v45   ;;  %v2082_v16 = vshll.u32 %v16984_v11, %v2070_v7  ;;  %vm1636_vm2 = vcmp.eq.s32.totalorder %v13846_v39, 0  ;;  %v2074_v17 = vshrl.u32 %v16998_v0, %v2071_v41 }
 0x839   :  { %v13866_v2 = vsub.s32 %v1910_v40, %v1913_v32  ;;  %v2077_v60 = vshrl.u32 %v16999_v61, %v2071_v41  ;;  %v2083_v20 = vshrl.u32 %v16990_v38, %v2071_v41  ;;  %vm1635_vm4 = vcmp.lt.s32.totalorder %v13846_v39, 2 }
 0x83a   :  { %v13872_v59 = vshrl.u32 %v2068_v1, 5  ;;  %v2079_v31 = vshll.u32 %v16999_v61, %v2070_v7  ;;  %v2080_v30 = vshrl.u32 %v16984_v11, %v2071_v41  ;;  %v2085_v34 = vshll.u32 %v16990_v38, %v2070_v7 }
 0x83b   :  { %vm1633_vm6 = vweird.f32 %v13538_v22  ;;  %vm1639_vm8 = vcmp.eq.s32.totalorder %v13846_v39, 2  ;;  %vm4932_vm7 = vcmp.lt.s32.totalorder %v13853_v56, 2  ;;  %v1916_v25 = vsub.s32 0, %v13866_v2 }
 0x83c   :  { %v2084_v40 = vor.u32 %v2083_v20, %v2082_v16  ;;  %vm4933_vm9 = vcmp.eq.s32.totalorder %v13853_v56, 0  ;;  %v2064_v37 = vor.u32 8388608, %v2063_v21  ;;  %v2072_v19 = vshrl.u32 %v17000_v52, %v2071_v41 }
 0x83d   :  { %v2086_v62 = vshrl.u32 %v16994_v35, %v2071_v41  ;;  %vm4936_vm12 = vcmp.eq.s32.totalorder %v13853_v56, 2  ;;  %v10548_v1 = vmin.u32 %v1916_v25, %v13866_v2  ;;  %v2075_v12 = vor.u32 %v2074_v17, %v2073_v23 }
 0x83e   :  { %v2078_v63 = vor.u32 %v2077_v60, %v2076_v15  ;;  %v2081_v7 = vor.u32 %v2080_v30, %v2079_v31  ;;  %vm2088_vm11 = vcmp.lt.s32.totalorder %v13872_v59, 1  ;;  %vm2091_vm5 = vcmp.lt.s32.totalorder %v13872_v59, 4 }
 0x83f   :  { %v2087_v29 = vor.u32 %v2086_v62, %v2085_v34  ;;  %v1906_v8 = vadd.s32 %v13807_v18, %v13812_v26  ;;  %v1918_v6 = vclz %v10548_v1  ;;  %vm2090_vm13 = vcmp.lt.s32.totalorder %v13872_v59, 3 }
 0x840   :  { %v2097_v41 = vsel %vm2091_vm5, %v2084_v40, 920167782  ;;  %v1936_v21 = vsub.s32 4, %v13848_v58  ;;  %vm2089_vm14 = vcmp.lt.s32.totalorder %v13872_v59, 2  ;;  %v2092_v23 = vsel %vm2088_vm11, %v2072_v19, %v2075_v12 }
 0x841   :  { %v11626_v32 = vpop.eup %11625  ;;  %v13897_v15 = vshll.u32 %v2064_v37, 8  ;;  %v10549_v60 = vadd.s32 4294967294, %v1918_v6  ;;  %v2093_v18 = vsel %vm2091_vm5, %v2081_v7, 2102212464  ;;  %v2096_v26 = vsel %vm2088_vm11, %v2075_v12, %v2078_v63 }
 0x842   :  { %v11628_v16 = vpop.eup %11627  ;;  %v1640_v17 = vxor.u32 2147483648, %v11626_v32  ;;  %v2098_v31 = vsel %vm2090_vm13, %v2081_v7, %v2097_v41  ;;  %v2100_v30 = vsel %vm2088_vm11, %v2078_v63, %v2081_v7  ;;  %v2101_v34 = vsel %vm2091_vm5, %v2087_v29, 1326507024 }
 0x843   :  { %v1637_v20 = vxor.u32 2147483648, %v11628_v16  ;;  %vm10550_vm10 = vcmp.lt.s32.totalorder %v10549_v60, 0  ;;  %v2102_v19 = vsel %vm2090_vm13, %v2084_v40, %v2101_v34  ;;  %v2099_v56 = vsel %vm2089_vm14, %v2096_v26, %v2098_v31 }
 0x844   :  { %v1641_v25 = vsel %vm1639_vm8, %v1640_v17, %v11628_v16  ;;  %v4938_v37 = vsel %vm4936_vm12, %v1640_v17, %v11628_v16  ;;  %v1921_v12 = vsel %vm10550_vm10, 0, %v10549_v60  ;;  %v2103_v7 = vsel %vm2089_vm14, %v2100_v30, %v2102_v19 }
 0x845   :  { %v1638_v62 = vsel %vm1636_vm2, %v11626_v32, %v1637_v20  ;;  %v4935_v1 = vsel %vm4933_vm9, %v11626_v32, %v1637_v20  ;;  %v1922_v41 = vsub.s32 32, %v1921_v12  ;;  %v1923_v16 = vshll.u32 %v13866_v2, %v1921_v12 }
 0x846   :  { %v1642_v29 = vsel %vm1635_vm4, %v1638_v62, %v1641_v25  ;;  %v4939_v6 = vsel %vm4932_vm7, %v4935_v1, %v4938_v37  ;;  %v1926_v32 = vsub.s32 4294967266, %v1921_v12  ;;  %v2094_v60 = vsel %vm2090_vm13, %v2078_v63, %v2093_v18 }
 0x847   :  { %v1643_v40 = vsel %vm1633_vm6, nan, %v1642_v29  ;;  %v4940_v17 = vsel %vm1633_vm6, nan, %v4939_v6  ;;  %v1924_v39 = vshrl.u32 %v1906_v8, %v1922_v41  ;;  %v2265_v37 = vand.u32 2139095040, %v13857_v14 }
 0x848   :  { %v8165_v20 = vsub.f32 %v1643_v40, %v4940_v17  ;;  %v8229_v30 = vadd.f32 %v4940_v17, %v1643_v40  ;;  %v1927_v34 = vadd.s32 127, %v1926_v32  ;;  %v2095_v63 = vsel %vm2089_vm14, %v2092_v23, %v2094_v60 }
 0x849   :  { %v13935_v25 = vmul.u32.u64.low %v13897_v15, %v2103_v7  ;;  %v13936_v2 = vmul.u32.u64.high %v13897_v15, %v2103_v7, %v13935_v25  ;;  %v1925_v62 = vor.u32 %v1924_v39, %v1923_v16  ;;  %v2266_v26 = vshrl.u32 %v2265_v37, 23 }
 0x84a   :  { %v13939_v19 = vmul.f32 0.70710677, %v8165_v20  ;;  %v8261_v22 = vmul.f32 0.70710677, %v8229_v30  ;;  %v1928_v18 = vshll.u32 %v1927_v34, 23  ;;  %vm1852_vm15 = vcmp.lt.s32.totalorder %v13649_v51, 0 }
 0x84b   :  { %v13944_v8 = vmul.u32.u64.low %v13897_v15, %v2099_v56  ;;  %v13945_v1 = vmul.u32.u64.high %v13897_v15, %v2099_v56, %v13944_v8  ;;  %v1932_v7 = vcvt.s32.f32 %v1925_v62  ;;  %v10563_v29 = vadd.s32 4294967169, %v2266_v26 }
 0x84c   :  { %8524 = vperm.xlu1 %11460, %v13939_v19   ;;  %v13950_v31 = vsub.f32 %v8261_v22, %v13939_v19  ;;  %v1929_v12 = vor.u32 4788187, %v1928_v18  ;;  %v1937_v59 = vsel %vm1852_vm15, %v1936_v21, %v13848_v58  ;;  %v2111_v23 = vmul.u32 %v13897_v15, %v2095_v63 }
 0x84d   :  { %vm2113_vm1 = vc.u32 %v13936_v2, %v13944_v8  ;;  %v2114_v41 = vadd.s32 1, %v13945_v1  ;;  %v2272_v16 = vadd.s32 1, %v10563_v29  ;;  %v17017_v40 = vand.u32 2147483647, %v13649_v51 }
 0x84e   :  { %17016 = vst [vmem:[#allocation30_spill] sm:$0xff] %v13950_v31  ;;  %8332 = vperm.xlu0 %11459, %v13950_v31   ;;  %v1930_v6 = vand.u32 2147483647, %v1929_v12  ;;  %v16864_v58 = vand.u32 2147483647, %v13857_v14  ;;  %vm1942_vm7 = vweird.f32 %v13649_v51 }
 0x84f   :  { %vm13964_vm3 = vcmp.le.f32.partialorder %v17017_v40, 0.7853982  ;;  %v2115_v32 = vsel %vm2113_vm1, %v2114_v41, %v13945_v1  ;;  %vm2273_vm2 = vcmp.gt.s32.totalorder %v2272_v16, 0 }
 0x850   :  { %8534 = vperm.xlu1 %11460, %v12225_v46   ;;  %v1933_v21 = vmul.f32 %v1932_v7, %v1930_v6  ;;  %v1939_v15 = vsel %vm13964_vm3, 0, %v1937_v59  ;;  %v2116_v60 = vadd.s32 %v2115_v32, %v2111_v23  ;;  %v2274_v20 = vsel %vm2273_vm2, %v2272_v16, 0  ;;  %v1454_v23 = vld [vmem:[%s16823_s0 + $0x48] sm:$0xff] }
 0x851   :  { %v2276_v39 = vand.u32 31, %v2274_v20  ;;  %v13973_v56 = vand.u32 3, %v1939_v15  ;;  %v5242_v34 = vadd.s32 3, %v1939_v15  ;;  %v2269_v22 = vand.u32 8388607, %v16864_v58 }
 0x852   :  { %v1934_v30 = vxor.u32 2147483648, %v1933_v21  ;;  %v2117_v25 = vadd.s32 536870912, %v2116_v60  ;;  %v13979_v62 = vshrl.u32 %v2274_v20, 5 }
 0x853   :  { %v2277_v63 = vsub.s32 32, %v2276_v39  ;;  %v2279_v26 = vshll.u32 %v17000_v52, %v2276_v39  ;;  %v2282_v12 = vshll.u32 %v16998_v0, %v2276_v39  ;;  %v2288_v59 = vshll.u32 %v16984_v11, %v2276_v39 }
 0x854   :  { %8544 = vperm.xlu1 %11460, %v12338_v9   ;;  %v1935_v37 = vsel %vm1852_vm15, %v1934_v30, %v1933_v21  ;;  %v13984_v1 = vshrl.u32 %v2117_v25, 30  ;;  %v2285_v41 = vshll.u32 %v16999_v61, %v2276_v39  ;;  %v13998_v40 = vand.u32 3, %v5242_v34 }
 0x855   :  { %v1938_v18 = vsel %vm13964_vm3, %v13649_v51, %v1935_v37  ;;  %v2280_v7 = vshrl.u32 %v16998_v0, %v2277_v63  ;;  %v2283_v29 = vshrl.u32 %v16999_v61, %v2277_v63  ;;  %v2286_v16 = vshrl.u32 %v16984_v11, %v2277_v63 }
 0x856   :  { %11629 = vcosq.f32 %v1938_v18  ;;  %v2119_v6 = vshll.u32 %v13984_v1, 30  ;;  %v2289_v17 = vshrl.u32 %v16990_v38, %v2277_v63  ;;  %v2291_v21 = vshll.u32 %v16990_v38, %v2276_v39 }
 0x857   :  { %11631 = vsinq.f32 %v1938_v18  ;;  %vm1945_vm4 = vcmp.eq.s32.totalorder %v13973_v56, 0  ;;  %v2270_v32 = vor.u32 8388608, %v2269_v22  ;;  %v2292_v20 = vshrl.u32 %v16994_v35, %v2277_v63  ;;  %v1456_v22 = vld [vmem:[%s16823_s0 + $0x58] sm:$0xff] }
 0x858   :  { %8554 = vperm.xlu1 %11460, %v12492_v53   ;;  %v14003_v15 = vsub.s32 %v2116_v60, %v2119_v6  ;;  %11633 = vtanh.f32 %v1454_v23  ;;  %vm1944_vm6 = vcmp.lt.s32.totalorder %v13973_v56, 2  ;;  %vm1948_vm8 = vcmp.eq.s32.totalorder %v13973_v56, 2 }
 0x859   :  { %v2281_v30 = vor.u32 %v2280_v7, %v2279_v26  ;;  %v2284_v25 = vor.u32 %v2283_v29, %v2282_v12  ;;  %v2290_v34 = vor.u32 %v2289_v17, %v2288_v59  ;;  %v2287_v37 = vor.u32 %v2286_v16, %v2285_v41  ;;  %v1458_v7 = vld [vmem:[%s16823_s0 + $0x68] sm:$0xff] }
 0x85a   :  { %v2122_v39 = vsub.s32 0, %v14003_v15  ;;  %v2293_v60 = vor.u32 %v2292_v20, %v2291_v21  ;;  %vm2294_vm9 = vcmp.lt.s32.totalorder %v13979_v62, 1  ;;  %vm5244_vm12 = vcmp.lt.s32.totalorder %v13998_v40, 2 }
 0x85b   :  { %vm5245_vm11 = vcmp.eq.s32.totalorder %v13998_v40, 0  ;;  %vm2296_vm5 = vcmp.lt.s32.totalorder %v13979_v62, 3  ;;  %vm2297_vm13 = vcmp.lt.s32.totalorder %v13979_v62, 4  ;;  %vm5248_vm14 = vcmp.eq.s32.totalorder %v13998_v40, 2 }
 0x85c   :  { %8564 = vperm.xlu1 %11460, %v12614_v42   ;;  %v2112_v18 = vadd.s32 %v13944_v8, %v13936_v2  ;;  %v10556_v26 = vmin.u32 %v2122_v39, %v14003_v15  ;;  %v14023_v12 = vshll.u32 %v2270_v32, 8  ;;  %v2278_v29 = vshrl.u32 %v17000_v52, %v2277_v63 }
 0x85d   :  { %vm2295_vm10 = vcmp.lt.s32.totalorder %v13979_v62, 2  ;;  %v2302_v59 = vsel %vm2294_vm9, %v2281_v30, %v2284_v25  ;;  %v2303_v23 = vsel %vm2297_vm13, %v2290_v34, 920167782  ;;  %vm2058_vm15 = vcmp.lt.s32.totalorder %v13750_v5, 0 }
 0x85e   :  { %v2124_v2 = vclz %v10556_v26  ;;  %v2304_v8 = vsel %vm2296_vm5, %v2287_v37, %v2303_v23  ;;  %v2307_v6 = vsel %vm2297_vm13, %v2293_v60, 1326507024  ;;  %11635 = vtanh.f32 %v1456_v22 }
 0x85f   :  { %v2142_v41 = vsub.s32 4, %v13984_v1  ;;  %v2299_v16 = vsel %vm2297_vm13, %v2287_v37, 2102212464  ;;  %v2306_v17 = vsel %vm2294_vm9, %v2284_v25, %v2287_v37  ;;  %11637 = vtanh.f32 %v1458_v7 }
 0x860   :  { %8574 = vperm.xlu1 %11460, %v12699_v10   ;;  %v11630_v63 = vpop.eup %11629  ;;  %v10557_v20 = vadd.s32 4294967294, %v2124_v2  ;;  %v2305_v39 = vsel %vm2295_vm10, %v2302_v59, %v2304_v8  ;;  %v2308_v60 = vsel %vm2296_vm5, %v2290_v34, %v2307_v6  ;;  %v2298_v26 = vsel %vm2294_vm9, %v2278_v29, %v2281_v30 }
 0x861   :  { %v11632_v21 = vpop.eup %11631  ;;  %v1949_v32 = vxor.u32 2147483648, %v11630_v63  ;;  %v14052_v23 = vmul.u32.u64.low %v14023_v12, %v2305_v39  ;;  %v14053_v58 = vmul.u32.u64.high %v14023_v12, %v2305_v39, %v14052_v23  ;;  %v2300_v34 = vsel %vm2296_vm5, %v2284_v25, %v2299_v16 }
 0x862   :  { %v1946_v22 = vxor.u32 2147483648, %v11632_v21  ;;  %v11634_v37 = vpop.eup %11633  ;;  %vm10558_vm1 = vcmp.lt.s32.totalorder %v10557_v20, 0  ;;  %v2309_v8 = vsel %vm2295_vm10, %v2306_v17, %v2308_v60  ;;  %v2301_v40 = vsel %vm2295_vm10, %v2298_v26, %v2300_v34 }
 0x863   :  { %v1950_v7 = vsel %vm1948_vm8, %v1949_v32, %v11632_v21  ;;  %v5250_v59 = vsel %vm5248_vm14, %v1949_v32, %v11632_v21  ;;  %v2127_v2 = vsel %vm10558_vm1, 0, %v10557_v20  ;;  %v14078_v20 = vmul.f32 0.7853982, %v11634_v37 }
 0x864   :  { %8584 = vperm.xlu1 %11460, %v12805_v47   ;;  %v1947_v30 = vsel %vm1945_vm4, %v11630_v63, %v1946_v22  ;;  %v5247_v29 = vsel %vm5245_vm11, %v11630_v63, %v1946_v22  ;;  %v2128_v32 = vsub.s32 32, %v2127_v2  ;;  %v2129_v39 = vshll.u32 %v14003_v15, %v2127_v2 }
 0x865   :  { %v1951_v6 = vsel %vm1944_vm6, %v1947_v30, %v1950_v7  ;;  %v5251_v21 = vsel %vm5244_vm12, %v5247_v29, %v5250_v59  ;;  %v2132_v63 = vsub.s32 4294967266, %v2127_v2  ;;  %v2143_v15 = vsel %vm2058_vm15, %v2142_v41, %v13984_v1 }
 0x866   :  { %v1952_v25 = vsel %vm1942_vm7, nan, %v1951_v6  ;;  %v5252_v16 = vsel %vm1942_vm7, nan, %v5251_v21  ;;  %v2130_v60 = vshrl.u32 %v2112_v18, %v2128_v32  ;;  %v2320_v2 = vadd.s32 1, %v14053_v58 }
 0x867   :  { %v8168_v17 = vsub.f32 %v1952_v25, %v5252_v16  ;;  %v8232_v56 = vadd.f32 %v5252_v16, %v1952_v25  ;;  %v2133_v22 = vadd.s32 127, %v2132_v63  ;;  %vm14095_vm3 = vcmp.le.f32.partialorder %v2056_v36, 0.7853982 }
 0x868   :  { %8594 = vperm.xlu1 %11460, %v12920_v50   ;;  %v14087_v7 = vmul.u32.u64.low %v14023_v12, %v2309_v8  ;;  %v14088_v51 = vmul.u32.u64.high %v14023_v12, %v2309_v8, %v14087_v7  ;;  %v11636_v59 = vpop.eup %11635  ;;  %v2131_v29 = vor.u32 %v2130_v60, %v2129_v39  ;;  %v2317_v1 = vmul.u32 %v14023_v12, %v2301_v40 }
 0x869   :  { %v14090_v37 = vmul.f32 0.70710677, %v8168_v17  ;;  %v8264_v30 = vmul.f32 0.70710677, %v8232_v56  ;;  %v11638_v18 = vpop.eup %11637  ;;  %v2134_v26 = vshll.u32 %v2133_v22, 23  ;;  %v2471_v41 = vand.u32 2139095040, %v14078_v20 }
 0x86a   :  { %v2138_v8 = vcvt.s32.f32 %v2131_v29  ;;  %v2145_v6 = vsel %vm14095_vm3, 0, %v2143_v15  ;;  %vm2319_vm2 = vc.u32 %v14088_v51, %v14052_v23  ;;  %v14109_v32 = vmul.f32 0.7853982, %v11636_v59 }
 0x86b   :  { %v14103_v34 = vsub.f32 %v8264_v30, %v14090_v37  ;;  %v2135_v21 = vor.u32 4788187, %v2134_v26  ;;  %v2472_v36 = vshrl.u32 %v2471_v41, 23  ;;  %v2321_v12 = vsel %vm2319_vm2, %v2320_v2, %v14053_v58 }
 0x86c   :  { %8604 = vperm.xlu1 %11460, %v13000_v28   ;;  %v2322_v25 = vadd.s32 %v2321_v12, %v2317_v1  ;;  %v16865_v16 = vand.u32 2147483647, %v14078_v20  ;;  %v5450_v17 = vadd.s32 3, %v2145_v6  ;;  %v2677_v22 = vand.u32 2139095040, %v14109_v32 }
 0x86d   :  { %8347 = vperm.xlu0 %11459, %v14103_v34   ;;  %v2136_v39 = vand.u32 2147483647, %v2135_v21  ;;  %v10571_v63 = vadd.s32 4294967169, %v2472_v36  ;;  %v14119_v59 = vand.u32 3, %v2145_v6  ;;  %v14121_v29 = vmul.f32 0.7853982, %v11638_v18 }
 0x86e   :  { %v2323_v60 = vadd.s32 536870912, %v2322_v25  ;;  %v2475_v58 = vand.u32 8388607, %v16865_v16  ;;  %v14125_v26 = vand.u32 3, %v5450_v17  ;;  %v2678_v41 = vshrl.u32 %v2677_v22, 23 }
 0x86f   :  { %v2139_v56 = vmul.f32 %v2138_v8, %v2136_v39  ;;  %v2478_v40 = vadd.s32 1, %v10571_v63  ;;  %vm2264_vm6 = vcmp.lt.s32.totalorder %v13857_v14, 0  ;;  %v16868_v18 = vand.u32 2147483647, %v14109_v32 }
 0x870   :  { %8614 = vperm.xlu1 %11460, %v13158_v33   ;;  %v2324_v7 = vshrl.u32 %v2323_v60, 30  ;;  %v2476_v36 = vor.u32 8388608, %v2475_v58  ;;  %v2883_v63 = vand.u32 2139095040, %v14121_v29  ;;  %vm2154_vm8 = vcmp.eq.s32.totalorder %v14119_v59, 2 }
 0x871   :  { %v2140_v15 = vxor.u32 2147483648, %v2139_v56  ;;  %vm2479_vm4 = vcmp.gt.s32.totalorder %v2478_v40, 0  ;;  %vm5456_vm7 = vcmp.eq.s32.totalorder %v14125_v26, 2  ;;  %v2318_v62 = vadd.s32 %v14052_v23, %v14088_v51 }
 0x872   :  { %v2480_v30 = vsel %vm2479_vm4, %v2478_v40, 0  ;;  %v2325_v1 = vshll.u32 %v2324_v7, 30  ;;  %vm2151_vm9 = vcmp.eq.s32.totalorder %v14119_v59, 0  ;;  %vm5453_vm12 = vcmp.eq.s32.totalorder %v14125_v26, 0 }
 0x873   :  { %v2141_v2 = vsel %vm2058_vm15, %v2140_v15, %v2139_v56  ;;  %v2482_v21 = vand.u32 31, %v2480_v30  ;;  %v10579_v56 = vadd.s32 4294967169, %v2678_v41  ;;  %v2348_v60 = vsub.s32 4, %v2324_v7 }
 0x874   :  { %8624 = vperm.xlu1 %11460, %v13300_v57   ;;  %v2144_v8 = vsel %vm14095_vm3, %v13750_v5, %v2141_v2  ;;  %v14131_v6 = vsub.s32 %v2322_v25, %v2325_v1  ;;  %v14145_v40 = vshrl.u32 %v2480_v30, 5  ;;  %vm2150_vm11 = vcmp.lt.s32.totalorder %v14119_v59, 2 }
 0x875   :  { %11639 = vcosq.f32 %v2144_v8  ;;  %v2483_v12 = vsub.s32 32, %v2482_v21  ;;  %v2485_v39 = vshll.u32 %v17000_v52, %v2482_v21  ;;  %v2488_v17 = vshll.u32 %v16998_v0, %v2482_v21 }
 0x876   :  { %11641 = vsinq.f32 %v2144_v8  ;;  %v2328_v25 = vsub.s32 0, %v14131_v6  ;;  %vm5452_vm5 = vcmp.lt.s32.totalorder %v14125_v26, 2  ;;  %v2491_v51 = vshll.u32 %v16999_v61, %v2482_v21 }
 0x877   :  { %v2486_v22 = vshrl.u32 %v16998_v0, %v2483_v12  ;;  %v2489_v15 = vshrl.u32 %v16999_v61, %v2483_v12  ;;  %v14153_v58 = vshll.u32 %v2476_v36, 8  ;;  %v14157_v2 = vand.u32 8388607, %v16868_v18 }
 0x878   :  { %8634 = vperm.xlu1 %11460, %v13411_v24   ;;  %v10564_v23 = vmin.u32 %v2328_v25, %v14131_v6  ;;  %vm2148_vm13 = vweird.f32 %v13750_v5  ;;  %v2484_v30 = vshrl.u32 %v17000_v52, %v2483_v12  ;;  %v2492_v41 = vshrl.u32 %v16984_v11, %v2483_v12 }
 0x879   :  { %v2487_v1 = vor.u32 %v2486_v22, %v2485_v39  ;;  %v14163_v8 = vshrl.u32 %v2883_v63, 23  ;;  %v2490_v16 = vor.u32 %v2489_v15, %v2488_v17  ;;  %v2494_v36 = vshll.u32 %v16984_v11, %v2482_v21 }
 0x87a   :  { %v2330_v25 = vclz %v10564_v23  ;;  %v2495_v24 = vshrl.u32 %v16990_v38, %v2483_v12  ;;  %v14169_v18 = vsel %vm2264_vm6, %v2348_v60, %v2324_v7  ;;  %vm2500_vm14 = vcmp.lt.s32.totalorder %v14145_v40, 1 }
 0x87b   :  { %v2684_v57 = vadd.s32 1, %v10579_v56  ;;  %v2493_v22 = vor.u32 %v2492_v41, %v2491_v51  ;;  %v2498_v63 = vshrl.u32 %v16994_v35, %v2483_v12  ;;  %vm2501_vm10 = vcmp.lt.s32.totalorder %v14145_v40, 2 }
 0x87c   :  { %8644 = vperm.xlu1 %11460, %v13469_v54   ;;  %v2497_v54 = vshll.u32 %v16990_v38, %v2482_v21  ;;  %v10565_v39 = vadd.s32 4294967294, %v2330_v25  ;;  %v2496_v33 = vor.u32 %v2495_v24, %v2494_v36  ;;  %vm2502_vm15 = vcmp.lt.s32.totalorder %v14145_v40, 3 }
 0x87d   :  { %vm2503_vm1 = vcmp.lt.s32.totalorder %v14145_v40, 4  ;;  %v2504_v7 = vsel %vm2500_vm14, %v2484_v30, %v2487_v1  ;;  %v2508_v24 = vsel %vm2500_vm14, %v2487_v1, %v2490_v16  ;;  %vm2685_vm2 = vcmp.gt.s32.totalorder %v2684_v57, 0 }
 0x87e   :  { %vm10566_vm3 = vcmp.lt.s32.totalorder %v10565_v39, 0  ;;  %v2505_v17 = vsel %vm2503_vm1, %v2493_v22, 2102212464  ;;  %v2509_v12 = vsel %vm2503_vm1, %v2496_v33, 920167782  ;;  %v2499_v23 = vor.u32 %v2498_v63, %v2497_v54 }
 0x87f   :  { %v11640_v21 = vpop.eup %11639  ;;  %v2333_v15 = vsel %vm10566_vm3, 0, %v10565_v39  ;;  %v2506_v51 = vsel %vm2502_vm15, %v2490_v16, %v2505_v17  ;;  %v2510_v54 = vsel %vm2502_vm15, %v2493_v22, %v2509_v12 }
 0x880   :  { %8654 = vperm.xlu1 %11460, %v13609_v44   ;;  %v11642_v56 = vpop.eup %11641  ;;  %v2155_v60 = vxor.u32 2147483648, %v11640_v21  ;;  %v2334_v30 = vsub.s32 32, %v2333_v15  ;;  %v2335_v25 = vshll.u32 %v14131_v6, %v2333_v15  ;;  %v2338_v36 = vsub.s32 4294967266, %v2333_v15 }
 0x881   :  { %v2152_v41 = vxor.u32 2147483648, %v11642_v56  ;;  %v2507_v39 = vsel %vm2501_vm10, %v2504_v7, %v2506_v51  ;;  %v2512_v7 = vsel %vm2500_vm14, %v2490_v16, %v2493_v22  ;;  %v2513_v12 = vsel %vm2503_vm1, %v2499_v23, 1326507024 }
 0x882   :  { %v2156_v1 = vsel %vm2154_vm8, %v2155_v60, %v11642_v56  ;;  %v5458_v44 = vsel %vm5456_vm7, %v2155_v60, %v11642_v56  ;;  %v2336_v17 = vshrl.u32 %v2318_v62, %v2334_v30  ;;  %v2339_v15 = vadd.s32 127, %v2338_v36 }
 0x883   :  { %v2153_v63 = vsel %vm2151_vm9, %v11640_v21, %v2152_v41  ;;  %v5455_v6 = vsel %vm5453_vm12, %v11640_v21, %v2152_v41  ;;  %v2514_v16 = vsel %vm2502_vm15, %v2496_v33, %v2513_v12  ;;  %v2686_v33 = vsel %vm2685_vm2, %v2684_v57, 0 }
 0x884   :  { %8664 = vperm.xlu1 %11460, %v13742_v3   ;;  %v2157_v3 = vsel %vm2150_vm11, %v2153_v63, %v2156_v1  ;;  %v5459_v56 = vsel %vm5452_vm5, %v5455_v6, %v5458_v44  ;;  %v2337_v62 = vor.u32 %v2336_v17, %v2335_v25  ;;  %v2340_v51 = vshll.u32 %v2339_v15, 23 }
 0x885   :  { %v2158_v60 = vsel %vm2148_vm13, nan, %v2157_v3  ;;  %v5460_v21 = vsel %vm2148_vm13, nan, %v5459_v56  ;;  %v2511_v44 = vsel %vm2501_vm10, %v2508_v24, %v2510_v54  ;;  %v2515_v3 = vsel %vm2501_vm10, %v2512_v7, %v2514_v16 }
 0x886   :  { %v8170_v59 = vsub.f32 %v2158_v60, %v5460_v21  ;;  %v8234_v41 = vadd.f32 %v5460_v21, %v2158_v60  ;;  %v2341_v26 = vor.u32 4788187, %v2340_v51  ;;  %v2344_v22 = vcvt.s32.f32 %v2337_v62 }
 0x887   :  { %v14224_v30 = vmul.u32.u64.low %v14153_v58, %v2515_v3  ;;  %v14225_v25 = vmul.u32.u64.high %v14153_v58, %v2515_v3, %v14224_v30  ;;  %v14228_v1 = vmul.u32.u64.low %v14153_v58, %v2511_v44  ;;  %v14229_v24 = vmul.u32.u64.high %v14153_v58, %v2511_v44, %v14228_v1 }
 0x888   :  { %8674 = vperm.xlu1 %11460, %v13838_v27   ;;  %v14221_v5 = vmul.f32 0.70710677, %v8170_v59  ;;  %v8266_v23 = vmul.f32 0.70710677, %v8234_v41  ;;  %v2342_v36 = vand.u32 2147483647, %v2341_v26  ;;  %v2523_v12 = vmul.u32 %v14153_v58, %v2507_v39 }
 0x889   :  { %v16879_v54 = vmov 1   ;;  %v17023_v63 = vand.u32 2147483647, %v13857_v14  ;;  %v2688_v17 = vand.u32 31, %v2686_v33  ;;  %v2682_v56 = vor.u32 8388608, %v14157_v2 }
 0x88a   :  { %v14234_v40 = vsub.f32 %v8266_v23, %v14221_v5  ;;  %v2345_v15 = vmul.f32 %v2344_v22, %v2342_v36  ;;  %v10587_v7 = vadd.s32 4294967169, %v14163_v8  ;;  %vm2525_vm8 = vc.u32 %v14225_v25, %v14228_v1 }
 0x88b   :  { %vm14238_vm4 = vcmp.le.f32.partialorder %v17023_v63, 0.7853982  ;;  %v2689_v60 = vsub.s32 32, %v2688_v17  ;;  %v2691_v21 = vshll.u32 %v17000_v52, %v2688_v17  ;;  %v2526_v51 = vadd.s32 1, %v14229_v24 }
 0x88c   :  { %11461 = vset.pattern.permute.xlu1 %v16879_v54  ;;  %17022 = vst [vmem:[#allocation31_spill] sm:$0xff] %v14234_v40  ;;  %v2351_v57 = vsel %vm14238_vm4, 0, %v14169_v18  ;;  %8357 = vperm.xlu0 %11459, %v14234_v40   ;;  %v2346_v62 = vxor.u32 2147483648, %v2345_v15  ;;  %v2694_v59 = vshll.u32 %v16998_v0, %v2688_v17  ;;  %v2697_v18 = vshll.u32 %v16999_v61, %v2688_v17 }
 0x88d   :  { %8718 = vperm.xlu1 %11461, %v13950_v31   ;;  %v14256_v2 = vshrl.u32 %v2686_v33, 5  ;;  %v2692_v8 = vshrl.u32 %v16998_v0, %v2689_v60  ;;  %v2695_v58 = vshrl.u32 %v16999_v61, %v2689_v60  ;;  %v2698_v39 = vshrl.u32 %v16984_v11, %v2689_v60 }
 0x88e   :  { %v2347_v41 = vsel %vm2264_vm6, %v2346_v62, %v2345_v15  ;;  %v2527_v44 = vsel %vm2525_vm8, %v2526_v51, %v14229_v24  ;;  %v2700_v16 = vshll.u32 %v16984_v11, %v2688_v17  ;;  %v2701_v26 = vshrl.u32 %v16990_v38, %v2689_v60 }
 0x88f   :  { %v2350_v22 = vsel %vm14238_vm4, %v13857_v14, %v2347_v41  ;;  %v2528_v3 = vadd.s32 %v2527_v44, %v2523_v12  ;;  %v2693_v23 = vor.u32 %v2692_v8, %v2691_v21  ;;  %v2696_v30 = vor.u32 %v2695_v58, %v2694_v59 }
 0x890   :  { %11643 = vcosq.f32 %v2350_v22  ;;  %v2699_v36 = vor.u32 %v2698_v39, %v2697_v18  ;;  %v2702_v33 = vor.u32 %v2701_v26, %v2700_v16  ;;  %v2703_v63 = vshll.u32 %v16990_v38, %v2688_v17 }
 0x891   :  { %8726 = vperm.xlu1 %11461, %v12232_v48   ;;  %11645 = vsinq.f32 %v2350_v22  ;;  %v2529_v15 = vadd.s32 536870912, %v2528_v3  ;;  %v2704_v24 = vshrl.u32 %v16994_v35, %v2689_v60  ;;  %vm2706_vm6 = vcmp.lt.s32.totalorder %v14256_v2, 1 }
 0x892   :  { %v5658_v62 = vadd.s32 3, %v2351_v57  ;;  %v2690_v6 = vshrl.u32 %v17000_v52, %v2689_v60  ;;  %vm2708_vm7 = vcmp.lt.s32.totalorder %v14256_v2, 3  ;;  %vm2709_vm9 = vcmp.lt.s32.totalorder %v14256_v2, 4 }
 0x893   :  { %v14277_v12 = vshrl.u32 %v2529_v15, 30  ;;  %v2705_v21 = vor.u32 %v2704_v24, %v2703_v63  ;;  %vm2707_vm12 = vcmp.lt.s32.totalorder %v14256_v2, 2  ;;  %v2714_v17 = vsel %vm2706_vm6, %v2693_v23, %v2696_v30 }
 0x894   :  { %v2711_v51 = vsel %vm2709_vm9, %v2699_v36, 2102212464  ;;  %v2715_v59 = vsel %vm2709_vm9, %v2702_v33, 920167782  ;;  %v2722_v18 = vshll.u32 %v2682_v56, 8  ;;  %v2890_v60 = vadd.s32 1, %v10587_v7 }
 0x895   :  { %8730 = vperm.xlu1 %11461, %v14103_v34   ;;  %v2355_v8 = vand.u32 3, %v2351_v57  ;;  %v2531_v58 = vshll.u32 %v14277_v12, 30  ;;  %v2716_v39 = vsel %vm2708_vm7, %v2699_v36, %v2715_v59  ;;  %v2718_v41 = vsel %vm2706_vm6, %v2696_v30, %v2699_v36  ;;  %v1460_v57 = vld [vmem:[%s16823_s0 + $0x78] sm:$0xff] }
 0x896   :  { %vm2354_vm11 = vweird.f32 %v13857_v14  ;;  %v5659_v44 = vand.u32 3, %v5658_v62  ;;  %v2717_v16 = vsel %vm2707_vm12, %v2714_v17, %v2716_v39  ;;  %v2719_v56 = vsel %vm2709_vm9, %v2705_v21, 1326507024 }
 0x897   :  { %v14300_v7 = vsub.s32 %v2528_v3, %v2531_v58  ;;  %v2710_v26 = vsel %vm2706_vm6, %v2690_v6, %v2693_v23  ;;  %v2712_v22 = vsel %vm2708_vm7, %v2696_v30, %v2711_v51  ;;  %v2720_v36 = vsel %vm2708_vm7, %v2702_v33, %v2719_v56 }
 0x898   :  { %v2721_v63 = vsel %vm2707_vm12, %v2718_v41, %v2720_v36  ;;  %v14310_v15 = vmul.u32.u64.low %v2722_v18, %v2717_v16  ;;  %v14311_v24 = vmul.u32.u64.high %v2722_v18, %v2717_v16, %v14310_v15  ;;  %vm2891_vm5 = vcmp.gt.s32.totalorder %v2890_v60, 0 }
 0x899   :  { %8738 = vperm.xlu1 %11461, %v14234_v40   ;;  %vm2357_vm13 = vcmp.eq.s32.totalorder %v2355_v8, 0  ;;  %vm2360_vm14 = vcmp.eq.s32.totalorder %v2355_v8, 2  ;;  %v2534_v3 = vsub.s32 0, %v14300_v7  ;;  %11647 = vtanh.f32 %v1460_v57 }
 0x89a   :  { %v11644_v23 = vpop.eup %11643  ;;  %vm5661_vm10 = vcmp.eq.s32.totalorder %v5659_v44, 0  ;;  %vm5664_vm15 = vcmp.eq.s32.totalorder %v5659_v44, 2  ;;  %v14315_v30 = vmul.u32.u64.low %v2722_v18, %v2721_v63  ;;  %v14316_v62 = vmul.u32.u64.high %v2722_v18, %v2721_v63, %v14315_v30 }
 0x89b   :  { %v11646_v33 = vpop.eup %11645  ;;  %v2361_v6 = vxor.u32 2147483648, %v11644_v23  ;;  %vm2470_vm1 = vcmp.lt.s32.totalorder %v14078_v20, 0  ;;  %v10572_v21 = vmin.u32 %v2534_v3, %v14300_v7  ;;  %v2713_v17 = vsel %vm2707_vm12, %v2710_v26, %v2712_v22 }
 0x89c   :  { %v2892_v51 = vsel %vm2891_vm5, %v2890_v60, 0  ;;  %vm2356_vm3 = vcmp.lt.s32.totalorder %v2355_v8, 2  ;;  %v2358_v59 = vxor.u32 2147483648, %v11646_v33  ;;  %vm5660_vm2 = vcmp.lt.s32.totalorder %v5659_v44, 2 }
 0x89d   :  { %v16881_v58 = vand.u32 2147483647, %v14121_v29  ;;  %v2362_v39 = vsel %vm2360_vm14, %v2361_v6, %v11646_v33  ;;  %v5666_v41 = vsel %vm5664_vm15, %v2361_v6, %v11646_v33  ;;  %v2536_v16 = vclz %v10572_v21 }
 0x89e   :  { %v2732_v56 = vadd.s32 1, %v14311_v24  ;;  %v2359_v57 = vsel %vm2357_vm13, %v11644_v23, %v2358_v59  ;;  %v5663_v36 = vsel %vm5661_vm10, %v11644_v23, %v2358_v59  ;;  %v2729_v63 = vmul.u32 %v2722_v18, %v2713_v17 }
 0x89f   :  { %v2894_v3 = vand.u32 31, %v2892_v51  ;;  %v2363_v2 = vsel %vm2356_vm3, %v2359_v57, %v2362_v39  ;;  %v5667_v26 = vsel %vm5660_vm2, %v5663_v36, %v5666_v41  ;;  %v2524_v60 = vadd.s32 %v14228_v1, %v14225_v25 }
 0x8a0   :  { %v10573_v22 = vadd.s32 4294967294, %v2536_v16  ;;  %v2364_v30 = vsel %vm2354_vm11, nan, %v2363_v2  ;;  %v5668_v33 = vsel %vm2354_vm11, nan, %v5667_v26  ;;  %v2554_v6 = vsub.s32 4, %v14277_v12 }
 0x8a1   :  { %vm2731_vm4 = vc.u32 %v14316_v62, %v14310_v15  ;;  %v8172_v8 = vsub.f32 %v2364_v30, %v5668_v33  ;;  %v8236_v18 = vadd.f32 %v5668_v33, %v2364_v30  ;;  %v17026_v23 = vand.u32 2147483647, %v14078_v20 }
 0x8a2   :  { %vm10574_vm8 = vcmp.lt.s32.totalorder %v10573_v22, 0  ;;  %v2733_v44 = vsel %vm2731_vm4, %v2732_v56, %v14311_v24  ;;  %v2895_v14 = vsub.s32 32, %v2894_v3  ;;  %v2555_v24 = vsel %vm2470_vm1, %v2554_v6, %v14277_v12  ;;  %v1462_v12 = vld [vmem:[%s16823_s0 + $0x88] sm:$0xff] }
 0x8a3   :  { %vm14339_vm6 = vcmp.le.f32.partialorder %v17026_v23, 0.7853982  ;;  %v2539_v1 = vsel %vm10574_vm8, 0, %v10573_v22  ;;  %v2734_v21 = vadd.s32 %v2733_v44, %v2729_v63  ;;  %v11648_v17 = vpop.eup %11647  ;;  %v14343_v59 = vmul.f32 0.70710677, %v8172_v8 }
 0x8a4   :  { %v8268_v39 = vmul.f32 0.70710677, %v8236_v18  ;;  %v2540_v41 = vsub.s32 32, %v2539_v1  ;;  %v2541_v16 = vshll.u32 %v14300_v7, %v2539_v1  ;;  %v2544_v57 = vsub.s32 4294967266, %v2539_v1 }
 0x8a5   :  { %v2735_v56 = vadd.s32 536870912, %v2734_v21  ;;  %v2887_v36 = vand.u32 8388607, %v16881_v58  ;;  %v14354_v26 = vshrl.u32 %v2892_v51, 5  ;;  %v2897_v22 = vshll.u32 %v17000_v52, %v2894_v3 }
 0x8a6   :  { %v14352_v2 = vsub.f32 %v8268_v39, %v14343_v59  ;;  %v2542_v63 = vshrl.u32 %v2524_v60, %v2540_v41  ;;  %v2545_v30 = vadd.s32 127, %v2544_v57  ;;  %v2898_v7 = vshrl.u32 %v16998_v0, %v2895_v14 }
 0x8a7   :  { %v14357_v33 = vshrl.u32 %v2735_v56, 30  ;;  %v2900_v8 = vshll.u32 %v16998_v0, %v2894_v3  ;;  %v2901_v60 = vshrl.u32 %v16999_v61, %v2895_v14  ;;  %v2906_v51 = vshll.u32 %v16984_v11, %v2894_v3 }
 0x8a8   :  { %17029 = vst [vmem:[#allocation32_spill] sm:$0xff] %v14352_v2  ;;  %8746 = vperm.xlu1 %11461, %v14352_v2   ;;  %v2543_v6 = vor.u32 %v2542_v63, %v2541_v16  ;;  %v2907_v18 = vshrl.u32 %v16990_v38, %v2895_v14  ;;  %v2546_v44 = vshll.u32 %v2545_v30, 23  ;;  %v2903_v1 = vshll.u32 %v16999_v61, %v2894_v3 }
 0x8a9   :  { %v2737_v23 = vshll.u32 %v14357_v33, 30  ;;  %v2904_v39 = vshrl.u32 %v16984_v11, %v2895_v14  ;;  %8367 = vperm.xlu0 %11459, %v14352_v2   ;;  %v2557_v57 = vsel %vm14339_vm6, 0, %v2555_v24  ;;  %v2888_v16 = vor.u32 8388608, %v2887_v36 }
 0x8aa   :  { %v2550_v41 = vcvt.s32.f32 %v2543_v6  ;;  %11649 = vtanh.f32 %v1462_v12  ;;  %v2547_v56 = vor.u32 4788187, %v2546_v44  ;;  %v2909_v54 = vshll.u32 %v16990_v38, %v2894_v3 }
 0x8ab   :  { %v14374_v63 = vsub.s32 %v2734_v21, %v2737_v23  ;;  %v2910_v30 = vshrl.u32 %v16994_v35, %v2895_v14  ;;  %v2899_v58 = vor.u32 %v2898_v7, %v2897_v22  ;;  %v2902_v27 = vor.u32 %v2901_v60, %v2900_v8 }
 0x8ac   :  { %v2908_v31 = vor.u32 %v2907_v18, %v2906_v51  ;;  %v14378_v28 = vmul.f32 0.7853982, %v11648_v17  ;;  %v2548_v50 = vand.u32 2147483647, %v2547_v56  ;;  %v2905_v47 = vor.u32 %v2904_v39, %v2903_v1 }
 0x8ad   :  { %v2740_v6 = vsub.s32 0, %v14374_v63  ;;  %vm2912_vm7 = vcmp.lt.s32.totalorder %v14354_v26, 1  ;;  %v5866_v24 = vadd.s32 3, %v2557_v57  ;;  %vm2676_vm9 = vcmp.lt.s32.totalorder %v14109_v32, 0 }
 0x8ae   :  { %v2896_v21 = vshrl.u32 %v17000_v52, %v2895_v14  ;;  %vm2914_vm12 = vcmp.lt.s32.totalorder %v14354_v26, 3  ;;  %vm2915_vm11 = vcmp.lt.s32.totalorder %v14354_v26, 4  ;;  %v2551_v3 = vmul.f32 %v2550_v41, %v2548_v50 }
 0x8af   :  { %v10580_v36 = vmin.u32 %v2740_v6, %v14374_v63  ;;  %v2911_v17 = vor.u32 %v2910_v30, %v2909_v54  ;;  %v2928_v22 = vshll.u32 %v2888_v16, 8  ;;  %vm2913_vm5 = vcmp.lt.s32.totalorder %v14354_v26, 2 }
 0x8b0   :  { %v2917_v7 = vsel %vm2915_vm11, %v2905_v47, 2102212464  ;;  %v2920_v8 = vsel %vm2912_vm7, %v2899_v58, %v2902_v27  ;;  %v2921_v14 = vsel %vm2915_vm11, %v2908_v31, 920167782  ;;  %v2552_v12 = vxor.u32 2147483648, %v2551_v3 }
 0x8b1   :  { %v2730_v60 = vadd.s32 %v14310_v15, %v14316_v62  ;;  %v2742_v50 = vclz %v10580_v36  ;;  %v2922_v54 = vsel %vm2914_vm12, %v2905_v47, %v2921_v14  ;;  %v2760_v51 = vsub.s32 4, %v14357_v33 }
 0x8b2   :  { %v2916_v18 = vsel %vm2912_vm7, %v2896_v21, %v2899_v58  ;;  %v2918_v44 = vsel %vm2914_vm12, %v2902_v27, %v2917_v7  ;;  %v2924_v23 = vsel %vm2912_vm7, %v2902_v27, %v2905_v47  ;;  %v2553_v1 = vsel %vm2470_vm1, %v2552_v12, %v2551_v3 }
 0x8b3   :  { %v10581_v39 = vadd.s32 4294967294, %v2742_v50  ;;  %v2923_v15 = vsel %vm2913_vm5, %v2920_v8, %v2922_v54  ;;  %v2925_v62 = vsel %vm2915_vm11, %v2911_v17, 1326507024  ;;  %v2556_v58 = vsel %vm14339_vm6, %v14078_v20, %v2553_v1  ;;  %v1464_v50 = vld [vmem:[%s16823_s0 + $0x98] sm:$0xff] }
 0x8b4   :  { %v11650_v41 = vpop.eup %11649  ;;  %v2926_v16 = vsel %vm2914_vm12, %v2908_v31, %v2925_v62  ;;  %v14416_v56 = vmul.u32.u64.low %v2928_v22, %v2923_v15  ;;  %v14417_v47 = vmul.u32.u64.high %v2928_v22, %v2923_v15, %v14416_v56  ;;  %11651 = vcosq.f32 %v2556_v58 }
 0x8b5   :  { %vm10582_vm13 = vcmp.lt.s32.totalorder %v10581_v39, 0  ;;  %v2919_v27 = vsel %vm2913_vm5, %v2916_v18, %v2918_v44  ;;  %v2927_v30 = vsel %vm2913_vm5, %v2924_v23, %v2926_v16  ;;  %11653 = vsinq.f32 %v2556_v58 }
 0x8b6   :  { %v2745_v6 = vsel %vm10582_vm13, 0, %v10581_v39  ;;  %v14424_v21 = vmul.u32.u64.low %v2928_v22, %v2927_v30  ;;  %v14425_v25 = vmul.u32.u64.high %v2928_v22, %v2927_v30, %v14424_v21  ;;  %v2761_v17 = vsel %vm2676_vm9, %v2760_v51, %v14357_v33 }
 0x8b7   :  { %v2746_v3 = vsub.s32 32, %v2745_v6  ;;  %v2747_v31 = vshll.u32 %v14374_v63, %v2745_v6  ;;  %v2750_v36 = vsub.s32 4294967266, %v2745_v6  ;;  %v2561_v7 = vand.u32 3, %v2557_v57 }
 0x8b8   :  { %v2935_v8 = vmul.u32 %v2928_v22, %v2919_v27  ;;  %v2938_v14 = vadd.s32 1, %v14417_v47  ;;  %v3089_v26 = vand.u32 2139095040, %v14378_v28  ;;  %v17030_v12 = vand.u32 2147483647, %v14109_v32 }
 0x8b9   :  { %v2748_v54 = vshrl.u32 %v2730_v60, %v2746_v3  ;;  %v2751_v18 = vadd.s32 127, %v2750_v36  ;;  %vm2937_vm10 = vc.u32 %v14425_v25, %v14416_v56  ;;  %v16892_v33 = vand.u32 2147483647, %v14378_v28 }
 0x8ba   :  { %vm14435_vm14 = vcmp.le.f32.partialorder %v17030_v12, 0.7853982  ;;  %v3090_v57 = vshrl.u32 %v3089_v26, 23  ;;  %v5867_v22 = vand.u32 3, %v5866_v24  ;;  %v2939_v23 = vsel %vm2937_vm10, %v2938_v14, %v14417_v47 }
 0x8bb   :  { %v2763_v63 = vsel %vm14435_vm14, 0, %v2761_v17  ;;  %v2749_v51 = vor.u32 %v2748_v54, %v2747_v31  ;;  %v2752_v44 = vshll.u32 %v2751_v18, 23  ;;  %vm2560_vm15 = vweird.f32 %v14078_v20 }
 0x8bc   :  { %vm2562_vm1 = vcmp.lt.s32.totalorder %v2561_v7, 2  ;;  %v2940_v1 = vadd.s32 %v2939_v23, %v2935_v8  ;;  %v10595_v60 = vadd.s32 4294967169, %v3090_v57  ;;  %vm2563_vm3 = vcmp.eq.s32.totalorder %v2561_v7, 0 }
 0x8bd   :  { %v2753_v39 = vor.u32 4788187, %v2752_v44  ;;  %v2756_v15 = vcvt.s32.f32 %v2749_v51  ;;  %v6074_v62 = vadd.s32 3, %v2763_v63  ;;  %vm2566_vm2 = vcmp.eq.s32.totalorder %v2561_v7, 2 }
 0x8be   :  { %v2941_v58 = vadd.s32 536870912, %v2940_v1  ;;  %v3093_v16 = vand.u32 8388607, %v16892_v33  ;;  %v3096_v27 = vadd.s32 1, %v10595_v60  ;;  %v11652_v24 = vpop.eup %11651  ;;  %vm5868_vm4 = vcmp.lt.s32.totalorder %v5867_v22, 2 }
 0x8bf   :  { %vm5872_vm8 = vcmp.eq.s32.totalorder %v5867_v22, 2  ;;  %v2754_v30 = vand.u32 2147483647, %v2753_v39  ;;  %v14448_v47 = vmul.f32 0.7853982, %v11650_v41  ;;  %v11654_v6 = vpop.eup %11653  ;;  %v2567_v21 = vxor.u32 2147483648, %v11652_v24 }
 0x8c0   :  { %vm5869_vm6 = vcmp.eq.s32.totalorder %v5867_v22, 0  ;;  %v14450_v3 = vand.u32 3, %v2763_v63  ;;  %vm2882_vm7 = vcmp.lt.s32.totalorder %v14121_v29, 0  ;;  %v2942_v31 = vshrl.u32 %v2941_v58, 30 }
 0x8c1   :  { %v2564_v36 = vxor.u32 2147483648, %v11654_v6  ;;  %v2757_v17 = vmul.f32 %v2756_v15, %v2754_v30  ;;  %v14453_v8 = vand.u32 3, %v6074_v62  ;;  %vm3097_vm12 = vcmp.gt.s32.totalorder %v3096_v27, 0 }
 0x8c2   :  { %v2568_v14 = vsel %vm2566_vm2, %v2567_v21, %v11654_v6  ;;  %v5874_v26 = vsel %vm5872_vm8, %v2567_v21, %v11654_v6  ;;  %v2943_v12 = vshll.u32 %v2942_v31, 30  ;;  %v3094_v54 = vor.u32 8388608, %v3093_v16 }
 0x8c3   :  { %v2565_v41 = vsel %vm2563_vm3, %v11652_v24, %v2564_v36  ;;  %v5871_v18 = vsel %vm5869_vm6, %v11652_v24, %v2564_v36  ;;  %v2758_v57 = vxor.u32 2147483648, %v2757_v17  ;;  %v3295_v63 = vand.u32 2139095040, %v14448_v47 }
 0x8c4   :  { %v2569_v51 = vsel %vm2562_vm1, %v2565_v41, %v2568_v14  ;;  %v5875_v44 = vsel %vm5868_vm4, %v5871_v18, %v5874_v26  ;;  %v14460_v23 = vsub.s32 %v2940_v1, %v2943_v12  ;;  %v3098_v60 = vsel %vm3097_vm12, %v3096_v27, 0 }
 0x8c5   :  { %v2570_v39 = vsel %vm2560_vm15, nan, %v2569_v51  ;;  %v5876_v15 = vsel %vm2560_vm15, nan, %v5875_v44  ;;  %v2759_v62 = vsel %vm2676_vm9, %v2758_v57, %v2757_v17  ;;  %v2966_v58 = vsub.s32 4, %v2942_v31 }
 0x8c6   :  { %v8174_v16 = vsub.f32 %v2570_v39, %v5876_v15  ;;  %v8238_v24 = vadd.f32 %v5876_v15, %v2570_v39  ;;  %v2762_v7 = vsel %vm14435_vm14, %v14109_v32, %v2759_v62  ;;  %v2946_v22 = vsub.s32 0, %v14460_v23 }
 0x8c7   :  { %11655 = vcosq.f32 %v2762_v7  ;;  %v17033_v1 = vand.u32 2147483647, %v14121_v29  ;;  %v3100_v20 = vand.u32 31, %v3098_v60  ;;  %v3296_v30 = vshrl.u32 %v3295_v63, 23 }
 0x8c8   :  { %v14478_v6 = vmul.f32 0.70710677, %v8174_v16  ;;  %v8270_v21 = vmul.f32 0.70710677, %v8238_v24  ;;  %11657 = vsinq.f32 %v2762_v7  ;;  %v10588_v36 = vmin.u32 %v2946_v22, %v14460_v23 }
 0x8c9   :  { %vm14474_vm11 = vcmp.le.f32.partialorder %v17033_v1, 0.7853982  ;;  %vm2772_vm9 = vcmp.eq.s32.totalorder %v14450_v3, 2  ;;  %vm6080_vm5 = vcmp.eq.s32.totalorder %v14453_v8, 2  ;;  %v2936_v17 = vadd.s32 %v14416_v56, %v14425_v25 }
 0x8ca   :  { %v2967_v14 = vsel %vm2882_vm7, %v2966_v58, %v2942_v31  ;;  %v14490_v26 = vshll.u32 %v3094_v54, 8  ;;  %v14493_v12 = vsub.f32 %v8270_v21, %v14478_v6  ;;  %vm2769_vm13 = vcmp.eq.s32.totalorder %v14450_v3, 0 }
 0x8cb   :  { %vm6077_vm14 = vcmp.eq.s32.totalorder %v14453_v8, 0  ;;  %v2948_v41 = vclz %v10588_v36  ;;  %v3101_v18 = vsub.s32 32, %v3100_v20  ;;  %v3103_v57 = vshll.u32 %v17000_v52, %v3100_v20 }
 0x8cc   :  { %17036 = vst [vmem:[#allocation33_spill] sm:$0xff] %v14493_v12  ;;  %vm2768_vm10 = vcmp.lt.s32.totalorder %v14450_v3, 2  ;;  %vm6076_vm15 = vcmp.lt.s32.totalorder %v14453_v8, 2  ;;  %v14500_v56 = vshrl.u32 %v3098_v60, 5  ;;  %v3106_v25 = vshll.u32 %v16998_v0, %v3100_v20  ;;  %8754 = vperm.xlu1 %11461, %v14493_v12   ;;  %8377 = vperm.xlu0 %11459, %v14493_v12  }
 0x8cd   :  { %v14503_v31 = vadd.s32 4294967169, %v3296_v30  ;;  %11659 = vtanh.f32 %v1464_v50  ;;  %vm2766_vm1 = vweird.f32 %v14109_v32  ;;  %v10589_v54 = vadd.s32 4294967294, %v2948_v41 }
 0x8ce   :  { %v14509_v63 = vsel %vm14474_vm11, 0, %v2967_v14  ;;  %v3104_v51 = vshrl.u32 %v16998_v0, %v3101_v18  ;;  %v3107_v44 = vshrl.u32 %v16999_v61, %v3101_v18  ;;  %v3109_v60 = vshll.u32 %v16999_v61, %v3100_v20 }
 0x8cf   :  { %v3110_v39 = vshrl.u32 %v16984_v11, %v3101_v18  ;;  %v3112_v15 = vshll.u32 %v16984_v11, %v3100_v20  ;;  %v3113_v62 = vshrl.u32 %v16990_v38, %v3101_v18  ;;  %vm10590_vm3 = vcmp.lt.s32.totalorder %v10589_v54, 0 }
 0x8d0   :  { %v3102_v58 = vshrl.u32 %v17000_v52, %v3101_v18  ;;  %v3105_v16 = vor.u32 %v3104_v51, %v3103_v57  ;;  %v3115_v24 = vshll.u32 %v16990_v38, %v3100_v20  ;;  %v2951_v7 = vsel %vm10590_vm3, 0, %v10589_v54 }
 0x8d1   :  { %v3108_v22 = vor.u32 %v3107_v44, %v3106_v25  ;;  %v3114_v1 = vor.u32 %v3113_v62, %v3112_v15  ;;  %v3116_v30 = vshrl.u32 %v16994_v35, %v3101_v18  ;;  %v2952_v21 = vsub.s32 32, %v2951_v7  ;;  %v11656_v14 = vpop.eup %11655 }
 0x8d2   :  { %v2953_v36 = vshll.u32 %v14460_v23, %v2951_v7  ;;  %v2956_v50 = vsub.s32 4294967266, %v2951_v7  ;;  %vm3118_vm2 = vcmp.lt.s32.totalorder %v14500_v56, 1  ;;  %v3111_v41 = vor.u32 %v3110_v39, %v3109_v60  ;;  %v11658_v57 = vpop.eup %11657 }
 0x8d3   :  { %v3117_v33 = vor.u32 %v3116_v30, %v3115_v24  ;;  %vm3119_vm4 = vcmp.lt.s32.totalorder %v14500_v56, 2  ;;  %vm3121_vm8 = vcmp.lt.s32.totalorder %v14500_v56, 4  ;;  %v2773_v20 = vxor.u32 2147483648, %v11656_v14 }
 0x8d4   :  { %v2954_v54 = vshrl.u32 %v2936_v17, %v2952_v21  ;;  %v2957_v25 = vadd.s32 127, %v2956_v50  ;;  %vm3120_vm6 = vcmp.lt.s32.totalorder %v14500_v56, 3  ;;  %v2770_v18 = vxor.u32 2147483648, %v11658_v57 }
 0x8d5   :  { %v3123_v23 = vsel %vm3121_vm8, %v3111_v41, 2102212464  ;;  %v3126_v51 = vsel %vm3118_vm2, %v3105_v16, %v3108_v22  ;;  %v3127_v44 = vsel %vm3121_vm8, %v3114_v1, 920167782  ;;  %v2774_v60 = vsel %vm2772_vm9, %v2773_v20, %v11658_v57 }
 0x8d6   :  { %v6082_v39 = vsel %vm6080_vm5, %v2773_v20, %v11658_v57  ;;  %v2955_v17 = vor.u32 %v2954_v54, %v2953_v36  ;;  %v2958_v15 = vshll.u32 %v2957_v25, 23  ;;  %v2771_v24 = vsel %vm2769_vm13, %v11656_v14, %v2770_v18 }
 0x8d7   :  { %v11660_v62 = vpop.eup %11659  ;;  %v6079_v7 = vsel %vm6077_vm14, %v11656_v14, %v2770_v18  ;;  %v3122_v30 = vsel %vm3118_vm2, %v3102_v58, %v3105_v16  ;;  %v3128_v21 = vsel %vm3120_vm6, %v3111_v41, %v3127_v44  ;;  %v2775_v50 = vsel %vm2768_vm10, %v2771_v24, %v2774_v60 }
 0x8d8   :  { %v6083_v36 = vsel %vm6076_vm15, %v6079_v7, %v6082_v39  ;;  %v2959_v57 = vor.u32 4788187, %v2958_v15  ;;  %v2962_v20 = vcvt.s32.f32 %v2955_v17  ;;  %v2776_v54 = vsel %vm2766_vm1, nan, %v2775_v50 }
 0x8d9   :  { %v6084_v14 = vsel %vm2766_vm1, nan, %v6083_v36  ;;  %v3124_v58 = vsel %vm3120_vm6, %v3108_v22, %v3123_v23  ;;  %v3129_v16 = vsel %vm3119_vm4, %v3126_v51, %v3128_v21  ;;  %v3130_v8 = vsel %vm3118_vm2, %v3108_v22, %v3111_v41 }
 0x8da   :  { %v8176_v25 = vsub.f32 %v2776_v54, %v6084_v14  ;;  %v8240_v3 = vadd.f32 %v6084_v14, %v2776_v54  ;;  %v2960_v18 = vand.u32 2147483647, %v2959_v57  ;;  %v3131_v44 = vsel %vm3121_vm8, %v3117_v33, 1326507024 }
 0x8db   :  { %v14561_v60 = vmul.u32.u64.low %v14490_v26, %v3129_v16  ;;  %v14562_v39 = vmul.u32.u64.high %v14490_v26, %v3129_v16, %v14561_v60  ;;  %v16893_v32 = vand.u32 2147483647, %v14448_v47  ;;  %v3132_v15 = vsel %vm3120_vm6, %v3114_v1, %v3131_v44 }
 0x8dc   :  { %v14566_v23 = vmul.f32 0.70710677, %v8176_v25  ;;  %v8272_v17 = vmul.f32 0.70710677, %v8240_v3  ;;  %v2963_v51 = vmul.f32 %v2962_v20, %v2960_v18  ;;  %v6282_v24 = vadd.s32 3, %v14509_v63 }
 0x8dd   :  { %v3125_v22 = vsel %vm3119_vm4, %v3122_v30, %v3124_v58  ;;  %v3133_v33 = vsel %vm3119_vm4, %v3130_v8, %v3132_v15  ;;  %v3302_v41 = vadd.s32 1, %v14503_v31  ;;  %v3144_v1 = vadd.s32 1, %v14562_v39 }
 0x8de   :  { %v14577_v7 = vsub.f32 %v8272_v17, %v14566_v23  ;;  %v2964_v21 = vxor.u32 2147483648, %v2963_v51  ;;  %v14580_v50 = vmul.u32.u64.low %v14490_v26, %v3133_v33  ;;  %v14581_v36 = vmul.u32.u64.high %v14490_v26, %v3133_v33, %v14580_v50 }
 0x8df   :  { %vm3303_vm12 = vcmp.gt.s32.totalorder %v3302_v41, 0  ;;  %v3141_v56 = vmul.u32 %v14490_v26, %v3125_v22  ;;  %v14593_v20 = vand.u32 3, %v14509_v63  ;;  %v3299_v54 = vand.u32 8388607, %v16893_v32 }
 0x8e0   :  { %17037 = vst [vmem:[#allocation34_spill] sm:$0xff] %v14577_v7  ;;  %8762 = vperm.xlu1 %11461, %v14577_v7   ;;  %v2965_v30 = vsel %vm2882_vm7, %v2964_v21, %v2963_v51  ;;  %v3304_v57 = vsel %vm3303_vm12, %v3302_v41, 0  ;;  %8387 = vperm.xlu0 %11459, %v14577_v7   ;;  %v14597_v58 = vand.u32 3, %v6282_v24  ;;  %vm3143_vm7 = vc.u32 %v14581_v36, %v14561_v60 }
 0x8e1   :  { %v2968_v31 = vsel %vm14474_vm11, %v14121_v29, %v2965_v30  ;;  %v3306_v14 = vand.u32 31, %v3304_v57  ;;  %v14601_v26 = vmul.f32 0.7853982, %v11660_v62  ;;  %v3145_v16 = vsel %vm3143_vm7, %v3144_v1, %v14562_v39 }
 0x8e2   :  { %11661 = vcosq.f32 %v2968_v31  ;;  %v14604_v27 = vshrl.u32 %v3304_v57, 5  ;;  %v3146_v63 = vadd.s32 %v3145_v16, %v3141_v56  ;;  %vm2972_vm11 = vweird.f32 %v14121_v29 }
 0x8e3   :  { %11663 = vsinq.f32 %v2968_v31  ;;  %v3307_v25 = vsub.s32 32, %v3306_v14  ;;  %v3309_v3 = vshll.u32 %v17000_v52, %v3306_v14  ;;  %v3312_v18 = vshll.u32 %v16998_v0, %v3306_v14 }
 0x8e4   :  { %v3318_v8 = vshll.u32 %v16984_v11, %v3306_v14  ;;  %v3315_v62 = vshll.u32 %v16999_v61, %v3306_v14  ;;  %v3147_v15 = vadd.s32 536870912, %v3146_v63  ;;  %v3321_v24 = vshll.u32 %v16990_v38, %v3306_v14 }
 0x8e5   :  { %v3310_v44 = vshrl.u32 %v16998_v0, %v3307_v25  ;;  %v3313_v17 = vshrl.u32 %v16999_v61, %v3307_v25  ;;  %v3316_v51 = vshrl.u32 %v16984_v11, %v3307_v25  ;;  %v3319_v39 = vshrl.u32 %v16990_v38, %v3307_v25 }
 0x8e6   :  { %v3322_v22 = vshrl.u32 %v16994_v35, %v3307_v25  ;;  %vm2974_vm9 = vcmp.lt.s32.totalorder %v14593_v20, 2  ;;  %vm2975_vm5 = vcmp.eq.s32.totalorder %v14593_v20, 0  ;;  %vm2978_vm13 = vcmp.eq.s32.totalorder %v14593_v20, 2 }
 0x8e7   :  { %v3300_v33 = vor.u32 8388608, %v3299_v54  ;;  %v14620_v41 = vshrl.u32 %v3147_v15, 30  ;;  %v3320_v21 = vor.u32 %v3319_v39, %v3318_v8  ;;  %v3501_v1 = vand.u32 2139095040, %v14601_v26 }
 0x8e8   :  { %v3323_v50 = vor.u32 %v3322_v22, %v3321_v24  ;;  %v3311_v30 = vor.u32 %v3310_v44, %v3309_v3  ;;  %v3314_v56 = vor.u32 %v3313_v17, %v3312_v18  ;;  %v3317_v57 = vor.u32 %v3316_v51, %v3315_v62 }
 0x8e9   :  { %vm3327_vm14 = vcmp.lt.s32.totalorder %v14604_v27, 4  ;;  %vm6284_vm10 = vcmp.lt.s32.totalorder %v14597_v58, 2  ;;  %v3149_v31 = vshll.u32 %v14620_v41, 30  ;;  %vm3324_vm15 = vcmp.lt.s32.totalorder %v14604_v27, 1 }
 0x8ea   :  { %vm3326_vm1 = vcmp.lt.s32.totalorder %v14604_v27, 3  ;;  %vm6285_vm3 = vcmp.eq.s32.totalorder %v14597_v58, 0  ;;  %v3308_v54 = vshrl.u32 %v17000_v52, %v3307_v25  ;;  %v3333_v14 = vsel %vm3327_vm14, %v3320_v21, 920167782 }
 0x8eb   :  { %v3337_v16 = vsel %vm3327_vm14, %v3323_v50, 1326507024  ;;  %vm6288_vm2 = vcmp.eq.s32.totalorder %v14597_v58, 2  ;;  %v14635_v18 = vsub.s32 %v3146_v63, %v3149_v31  ;;  %vm3325_vm4 = vcmp.lt.s32.totalorder %v14604_v27, 2 }
 0x8ec   :  { %v11662_v3 = vpop.eup %11661  ;;  %v3502_v8 = vshrl.u32 %v3501_v1, 23  ;;  %v3332_v62 = vsel %vm3324_vm15, %v3311_v30, %v3314_v56  ;;  %v3336_v25 = vsel %vm3324_vm15, %v3314_v56, %v3317_v57  ;;  %v3338_v51 = vsel %vm3326_vm1, %v3320_v21, %v3337_v16 }
 0x8ed   :  { %v11664_v44 = vpop.eup %11663  ;;  %v2979_v17 = vxor.u32 2147483648, %v11662_v3  ;;  %v3152_v39 = vsub.s32 0, %v14635_v18  ;;  %v3329_v63 = vsel %vm3327_vm14, %v3317_v57, 2102212464  ;;  %v3334_v24 = vsel %vm3326_vm1, %v3317_v57, %v3333_v14 }
 0x8ee   :  { %v2976_v15 = vxor.u32 2147483648, %v11664_v44  ;;  %v3328_v1 = vsel %vm3324_vm15, %v3308_v54, %v3311_v30  ;;  %v3340_v31 = vshll.u32 %v3300_v33, 8  ;;  %v3339_v7 = vsel %vm3325_vm4, %v3336_v25, %v3338_v51 }
 0x8ef   :  { %v2980_v22 = vsel %vm2978_vm13, %v2979_v17, %v11664_v44  ;;  %v6290_v50 = vsel %vm6288_vm2, %v2979_v17, %v11664_v44  ;;  %v10596_v32 = vmin.u32 %v3152_v39, %v14635_v18  ;;  %v3330_v33 = vsel %vm3326_vm1, %v3314_v56, %v3329_v63 }
 0x8f0   :  { %v2977_v21 = vsel %vm2975_vm5, %v11662_v3, %v2976_v15  ;;  %v6287_v16 = vsel %vm6285_vm3, %v11662_v3, %v2976_v15  ;;  %v3335_v30 = vsel %vm3325_vm4, %v3332_v62, %v3334_v24  ;;  %v10611_v17 = vadd.s32 4294967169, %v3502_v8 }
 0x8f1   :  { %v2981_v57 = vsel %vm2974_vm9, %v2977_v21, %v2980_v22  ;;  %v6291_v14 = vsel %vm6284_vm10, %v6287_v16, %v6290_v50  ;;  %v3154_v44 = vclz %v10596_v32  ;;  %v3331_v56 = vsel %vm3325_vm4, %v3328_v1, %v3330_v33 }
 0x8f2   :  { %v2982_v54 = vsel %vm2972_vm11, nan, %v2981_v57  ;;  %v6292_v3 = vsel %vm2972_vm11, nan, %v6291_v14  ;;  %v14672_v51 = vmul.u32.u64.low %v3340_v31, %v3339_v7  ;;  %v14673_v15 = vmul.u32.u64.high %v3340_v31, %v3339_v7, %v14672_v51 }
 0x8f3   :  { %v8178_v25 = vsub.f32 %v2982_v54, %v6292_v3  ;;  %v8242_v20 = vadd.f32 %v6292_v3, %v2982_v54  ;;  %v10597_v58 = vadd.s32 4294967294, %v3154_v44  ;;  %v3142_v29 = vadd.s32 %v14561_v60, %v14581_v36 }
 0x8f4   :  { %v14679_v63 = vmul.u32.u64.low %v3340_v31, %v3335_v30  ;;  %v14680_v24 = vmul.u32.u64.high %v3340_v31, %v3335_v30, %v14679_v63  ;;  %v16896_v32 = vand.u32 2147483647, %v14601_v26  ;;  %v3508_v8 = vadd.s32 1, %v10611_v17 }
 0x8f5   :  { %v14677_v39 = vmul.f32 0.70710677, %v8178_v25  ;;  %v8274_v62 = vmul.f32 0.70710677, %v8242_v20  ;;  %vm10598_vm8 = vcmp.lt.s32.totalorder %v10597_v58, 0  ;;  %v3172_v27 = vsub.s32 4, %v14620_v41 }
 0x8f6   :  { %v3157_v22 = vsel %vm10598_vm8, 0, %v10597_v58  ;;  %v3347_v50 = vmul.u32 %v3340_v31, %v3331_v56  ;;  %vm3349_vm6 = vc.u32 %v14673_v15, %v14679_v63  ;;  %v3350_v60 = vadd.s32 1, %v14680_v24 }
 0x8f7   :  { %v14687_v7 = vsub.f32 %v8274_v62, %v14677_v39  ;;  %v3158_v1 = vsub.s32 32, %v3157_v22  ;;  %v3159_v21 = vshll.u32 %v14635_v18, %v3157_v22  ;;  %v3162_v16 = vsub.s32 4294967266, %v3157_v22  ;;  %v1466_v18 = vld [vmem:[%s16823_s0 + $0xa8] sm:$0xff] }
 0x8f8   :  { %vm3509_vm12 = vcmp.gt.s32.totalorder %v3508_v8, 0  ;;  %vm3088_vm7 = vcmp.lt.s32.totalorder %v14378_v28, 0  ;;  %v17039_v31 = vand.u32 2147483647, %v14378_v28  ;;  %v3351_v54 = vsel %vm3349_vm6, %v3350_v60, %v14680_v24 }
 0x8f9   :  { %17038 = vst [vmem:[#allocation35_spill] sm:$0xff] %v14687_v7  ;;  %8770 = vperm.xlu1 %11461, %v14687_v7   ;;  %8397 = vperm.xlu0 %11459, %v14687_v7   ;;  %v3160_v36 = vshrl.u32 %v3142_v29, %v3158_v1  ;;  %v3163_v57 = vadd.s32 127, %v3162_v16  ;;  %v3510_v14 = vsel %vm3509_vm12, %v3508_v8, 0  ;;  %v3173_v30 = vsel %vm3088_vm7, %v3172_v27, %v14620_v41 }
 0x8fa   :  { %vm14702_vm11 = vcmp.le.f32.partialorder %v17039_v31, 0.7853982  ;;  %v3512_v3 = vand.u32 31, %v3510_v14  ;;  %v3352_v25 = vadd.s32 %v3351_v54, %v3347_v50  ;;  %v3505_v20 = vand.u32 8388607, %v16896_v32 }
 0x8fb   :  { %v3161_v44 = vor.u32 %v3160_v36, %v3159_v21  ;;  %v3164_v17 = vshll.u32 %v3163_v57, 23  ;;  %v14712_v51 = vshrl.u32 %v3510_v14, 5  ;;  %11665 = vtanh.f32 %v1466_v18 }
 0x8fc   :  { %v3513_v58 = vsub.s32 32, %v3512_v3  ;;  %v3515_v56 = vshll.u32 %v17000_v52, %v3512_v3  ;;  %v3353_v8 = vadd.s32 536870912, %v3352_v25  ;;  %v3518_v41 = vshll.u32 %v16998_v0, %v3512_v3 }
 0x8fd   :  { %v3165_v62 = vor.u32 4788187, %v3164_v17  ;;  %v3168_v29 = vcvt.s32.f32 %v3161_v44  ;;  %v3521_v22 = vshll.u32 %v16999_v61, %v3512_v3  ;;  %v3524_v50 = vshll.u32 %v16984_v11, %v3512_v3 }
 0x8fe   :  { %v3516_v24 = vshrl.u32 %v16998_v0, %v3513_v58  ;;  %v3522_v27 = vshrl.u32 %v16984_v11, %v3513_v58  ;;  %v3354_v21 = vshrl.u32 %v3353_v8, 30  ;;  %v3519_v16 = vshrl.u32 %v16999_v61, %v3513_v58 }
 0x8ff   :  { %v3166_v1 = vand.u32 2147483647, %v3165_v62  ;;  %v3525_v60 = vshrl.u32 %v16990_v38, %v3513_v58  ;;  %v3175_v36 = vsel %vm14702_vm11, 0, %v3173_v30  ;;  %v3506_v57 = vor.u32 8388608, %v3505_v20 }
 0x900   :  { %v3355_v18 = vshll.u32 %v3354_v21, 30  ;;  %v3527_v31 = vshll.u32 %v16990_v38, %v3512_v3  ;;  %v3528_v54 = vshrl.u32 %v16994_v35, %v3513_v58  ;;  %v3514_v44 = vshrl.u32 %v17000_v52, %v3513_v58 }
 0x901   :  { %v3169_v14 = vmul.f32 %v3168_v29, %v3166_v1  ;;  %v3517_v17 = vor.u32 %v3516_v24, %v3515_v56  ;;  %v3523_v32 = vor.u32 %v3522_v27, %v3521_v22  ;;  %v3526_v62 = vor.u32 %v3525_v60, %v3524_v50 }
 0x902   :  { %v14727_v7 = vsub.s32 %v3352_v25, %v3355_v18  ;;  %v3520_v10 = vor.u32 %v3519_v16, %v3518_v41  ;;  %vm3533_vm9 = vcmp.lt.s32.totalorder %v14712_v51, 4  ;;  %v14730_v42 = vand.u32 3, %v3175_v36 }
 0x903   :  { %v3170_v8 = vxor.u32 2147483648, %v3169_v14  ;;  %vm3530_vm5 = vcmp.lt.s32.totalorder %v14712_v51, 1  ;;  %v3535_v30 = vsel %vm3533_vm9, %v3523_v32, 2102212464  ;;  %v14735_v3 = vshll.u32 %v3506_v57, 8 }
 0x904   :  { %v3358_v58 = vsub.s32 0, %v14727_v7  ;;  %v3529_v56 = vor.u32 %v3528_v54, %v3527_v31  ;;  %vm3531_vm13 = vcmp.lt.s32.totalorder %v14712_v51, 2  ;;  %vm3532_vm14 = vcmp.lt.s32.totalorder %v14712_v51, 3  ;;  %v1468_v51 = vld [vmem:[%s16823_s0 + $0xb8] sm:$0xff] }
 0x905   :  { %v3171_v20 = vsel %vm3088_vm7, %v3170_v8, %v3169_v14  ;;  %v11666_v25 = vpop.eup %11665  ;;  %v3534_v41 = vsel %vm3530_vm5, %v3514_v44, %v3517_v17  ;;  %v3539_v24 = vsel %vm3533_vm9, %v3526_v62, 920167782  ;;  %v3536_v27 = vsel %vm3532_vm14, %v3520_v10, %v3535_v30 }
 0x906   :  { %v3174_v29 = vsel %vm14702_vm11, %v14378_v28, %v3171_v20  ;;  %v10604_v22 = vmin.u32 %v3358_v58, %v14727_v7  ;;  %v3538_v50 = vsel %vm3530_vm5, %v3517_v17, %v3520_v10  ;;  %v6490_v33 = vadd.s32 3, %v3175_v36 }
 0x907   :  { %11667 = vcosq.f32 %v3174_v29  ;;  %vm3294_vm10 = vcmp.lt.s32.totalorder %v14448_v47, 0  ;;  %v17042_v1 = vand.u32 2147483647, %v14448_v47  ;;  %v3540_v57 = vsel %vm3532_vm14, %v3523_v32, %v3539_v24 }
 0x908   :  { %11669 = vsinq.f32 %v3174_v29  ;;  %v3360_v60 = vclz %v10604_v22  ;;  %v3542_v14 = vsel %vm3530_vm5, %v3520_v10, %v3523_v32  ;;  %v3543_v18 = vsel %vm3533_vm9, %v3529_v56, 1326507024 }
 0x909   :  { %vm14757_vm15 = vcmp.le.f32.partialorder %v17042_v1, 0.7853982  ;;  %vm3181_vm1 = vcmp.eq.s32.totalorder %v14730_v42, 0  ;;  %v3378_v36 = vsub.s32 4, %v3354_v21  ;;  %v3537_v31 = vsel %vm3531_vm13, %v3534_v41, %v3536_v27 }
 0x90a   :  { %v3541_v54 = vsel %vm3531_vm13, %v3538_v50, %v3540_v57  ;;  %vm3180_vm3 = vcmp.lt.s32.totalorder %v14730_v42, 2  ;;  %v10605_v44 = vadd.s32 4294967294, %v3360_v60  ;;  %v3544_v17 = vsel %vm3532_vm14, %v3526_v62, %v3543_v18 }
 0x90b   :  { %v14776_v10 = vmul.u32.u64.low %v14735_v3, %v3541_v54  ;;  %v14777_v32 = vmul.u32.u64.high %v14735_v3, %v3541_v54, %v14776_v10  ;;  %vm3178_vm2 = vweird.f32 %v14378_v28  ;;  %vm3184_vm4 = vcmp.eq.s32.totalorder %v14730_v42, 2 }
 0x90c   :  { %v6491_v8 = vand.u32 3, %v6490_v33  ;;  %v3545_v30 = vsel %vm3531_vm13, %v3542_v14, %v3544_v17  ;;  %v14784_v20 = vmul.f32 0.7853982, %v11666_v25  ;;  %v3348_v58 = vadd.s32 %v14679_v63, %v14673_v15 }
 0x90d   :  { %vm10606_vm8 = vcmp.lt.s32.totalorder %v10605_v44, 0  ;;  %v14789_v62 = vmul.u32.u64.low %v14735_v3, %v3545_v30  ;;  %v14790_v56 = vmul.u32.u64.high %v14735_v3, %v3545_v30, %v14789_v62  ;;  %v3379_v41 = vsel %vm3294_vm10, %v3378_v36, %v3354_v21 }
 0x90e   :  { %v3363_v29 = vsel %vm10606_vm8, 0, %v10605_v44  ;;  %v3553_v24 = vmul.u32 %v14735_v3, %v3537_v31  ;;  %v3707_v22 = vand.u32 2139095040, %v14784_v20  ;;  %v3556_v27 = vadd.s32 1, %v14777_v32 }
 0x90f   :  { %v3364_v25 = vsub.s32 32, %v3363_v29  ;;  %v3365_v15 = vshll.u32 %v14727_v7, %v3363_v29  ;;  %v3368_v63 = vsub.s32 4294967266, %v3363_v29  ;;  %vm6492_vm6 = vcmp.lt.s32.totalorder %v6491_v8, 2 }
 0x910   :  { %vm6493_vm12 = vcmp.eq.s32.totalorder %v6491_v8, 0  ;;  %vm6496_vm7 = vcmp.eq.s32.totalorder %v6491_v8, 2  ;;  %v3708_v50 = vshrl.u32 %v3707_v22, 23  ;;  %vm3555_vm11 = vc.u32 %v14790_v56, %v14776_v10 }
 0x911   :  { %v11668_v33 = vpop.eup %11667  ;;  %v3366_v21 = vshrl.u32 %v3348_v58, %v3364_v25  ;;  %v3369_v1 = vadd.s32 127, %v3368_v63  ;;  %11671 = vtanh.f32 %v1468_v51  ;;  %v3381_v57 = vsel %vm14757_vm15, 0, %v3379_v41 }
 0x912   :  { %v11670_v3 = vpop.eup %11669  ;;  %v3185_v60 = vxor.u32 2147483648, %v11668_v33  ;;  %v3557_v7 = vsel %vm3555_vm11, %v3556_v27, %v14777_v32  ;;  %v10619_v14 = vadd.s32 4294967169, %v3708_v50  ;;  %v16903_v30 = vand.u32 2147483647, %v14784_v20 }
 0x913   :  { %v3182_v18 = vxor.u32 2147483648, %v11670_v3  ;;  %v3367_v36 = vor.u32 %v3366_v21, %v3365_v15  ;;  %v3370_v31 = vshll.u32 %v3369_v1, 23  ;;  %v3558_v54 = vadd.s32 %v3557_v7, %v3553_v24 }
 0x914   :  { %v3186_v44 = vsel %vm3184_vm4, %v3185_v60, %v11670_v3  ;;  %v6498_v17 = vsel %vm6496_vm7, %v3185_v60, %v11670_v3  ;;  %v3714_v58 = vadd.s32 1, %v10619_v14  ;;  %v3711_v42 = vand.u32 8388607, %v16903_v30 }
 0x915   :  { %v3183_v62 = vsel %vm3181_vm1, %v11668_v33, %v3182_v18  ;;  %v6495_v29 = vsel %vm6493_vm12, %v11668_v33, %v3182_v18  ;;  %v3371_v41 = vor.u32 4788187, %v3370_v31  ;;  %v3374_v32 = vcvt.s32.f32 %v3367_v36  ;;  %v1470_v31 = vld [vmem:[%s16823_s0 + $0xc8] sm:$0xff] }
 0x916   :  { %v3187_v22 = vsel %vm3180_vm3, %v3183_v62, %v3186_v44  ;;  %v6499_v24 = vsel %vm6492_vm6, %v6495_v29, %v6498_v17  ;;  %v3559_v51 = vadd.s32 536870912, %v3558_v54  ;;  %vm3715_vm9 = vcmp.gt.s32.totalorder %v3714_v58, 0 }
 0x917   :  { %v3188_v25 = vsel %vm3178_vm2, nan, %v3187_v22  ;;  %v6500_v15 = vsel %vm3178_vm2, nan, %v6499_v24  ;;  %v3372_v63 = vand.u32 2147483647, %v3371_v41  ;;  %v3716_v27 = vsel %vm3715_vm9, %v3714_v58, 0 }
 0x918   :  { %v8180_v50 = vsub.f32 %v3188_v25, %v6500_v15  ;;  %v8244_v21 = vadd.f32 %v6500_v15, %v3188_v25  ;;  %v6698_v33 = vadd.s32 3, %v3381_v57  ;;  %v14820_v1 = vshrl.u32 %v3559_v51, 30 }
 0x919   :  { %v3375_v3 = vmul.f32 %v3374_v32, %v3372_v63  ;;  %v3718_v8 = vand.u32 31, %v3716_v27  ;;  %v14833_v17 = vand.u32 3, %v3381_v57  ;;  %v3712_v51 = vor.u32 8388608, %v3711_v42 }
 0x91a   :  { %v14824_v60 = vmul.f32 0.70710677, %v8180_v50  ;;  %v8276_v7 = vmul.f32 0.70710677, %v8244_v21  ;;  %v3561_v14 = vshll.u32 %v14820_v1, 30  ;;  %v14835_v58 = vand.u32 3, %v6698_v33 }
 0x91b   :  { %v11672_v18 = vpop.eup %11671  ;;  %v3376_v28 = vxor.u32 2147483648, %v3375_v3  ;;  %v3719_v36 = vsub.s32 32, %v3718_v8  ;;  %v3721_v41 = vshll.u32 %v17000_v52, %v3718_v8  ;;  %v3724_v22 = vshll.u32 %v16998_v0, %v3718_v8 }
 0x91c   :  { %v14831_v44 = vsub.f32 %v8276_v7, %v14824_v60  ;;  %v14837_v62 = vsub.s32 %v3558_v54, %v3561_v14  ;;  %11673 = vtanh.f32 %v1470_v31  ;;  %v3727_v25 = vshll.u32 %v16999_v61, %v3718_v8 }
 0x91d   :  { %v3377_v29 = vsel %vm3294_vm10, %v3376_v28, %v3375_v3  ;;  %v3722_v32 = vshrl.u32 %v16998_v0, %v3719_v36  ;;  %v3725_v54 = vshrl.u32 %v16999_v61, %v3719_v36  ;;  %v3728_v15 = vshrl.u32 %v16984_v11, %v3719_v36 }
 0x91e   :  { %17045 = vst [vmem:[#allocation36_spill] sm:$0xff] %v14831_v44  ;;  %8778 = vperm.xlu1 %11461, %v14831_v44   ;;  %v3380_v57 = vsel %vm14757_vm15, %v14448_v47, %v3377_v29  ;;  %v3564_v24 = vsub.s32 0, %v14837_v62  ;;  %8407 = vperm.xlu0 %11459, %v14831_v44   ;;  %vm3500_vm5 = vcmp.lt.s32.totalorder %v14601_v26, 0  ;;  %v3717_v16 = vshrl.u32 %v3716_v27, 5 }
 0x91f   :  { %11675 = vcosq.f32 %v3380_v57  ;;  %v14855_v50 = vmul.f32 0.7853982, %v11672_v18  ;;  %vm3390_vm13 = vcmp.eq.s32.totalorder %v14833_v17, 2  ;;  %vm6704_vm14 = vcmp.eq.s32.totalorder %v14835_v58, 2 }
 0x920   :  { %11677 = vsinq.f32 %v3380_v57  ;;  %v10612_v63 = vmin.u32 %v3564_v24, %v14837_v62  ;;  %v3554_v21 = vadd.s32 %v14776_v10, %v14790_v56  ;;  %v3720_v33 = vshrl.u32 %v17000_v52, %v3719_v36 }
 0x921   :  { %v3723_v3 = vor.u32 %v3722_v32, %v3721_v41  ;;  %v3726_v42 = vor.u32 %v3725_v54, %v3724_v22  ;;  %vm3387_vm10 = vcmp.eq.s32.totalorder %v14833_v17, 0  ;;  %vm6701_vm15 = vcmp.eq.s32.totalorder %v14835_v58, 0 }
 0x922   :  { %v3566_v7 = vclz %v10612_v63  ;;  %v3730_v27 = vshll.u32 %v16984_v11, %v3718_v8  ;;  %v3731_v14 = vshrl.u32 %v16990_v38, %v3719_v36  ;;  %v3733_v18 = vshll.u32 %v16990_v38, %v3718_v8 }
 0x923   :  { %vm3386_vm1 = vcmp.lt.s32.totalorder %v14833_v17, 2  ;;  %vm6700_vm3 = vcmp.lt.s32.totalorder %v14835_v58, 2  ;;  %v3584_v10 = vsub.s32 4, %v14820_v1  ;;  %v3729_v56 = vor.u32 %v3728_v15, %v3727_v25 }
 0x924   :  { %v3734_v28 = vshrl.u32 %v16994_v35, %v3719_v36  ;;  %v14871_v31 = vshll.u32 %v3712_v51, 8  ;;  %vm3384_vm2 = vweird.f32 %v14448_v47  ;;  %v10613_v29 = vadd.s32 4294967294, %v3566_v7 }
 0x925   :  { %v3732_v41 = vor.u32 %v3731_v14, %v3730_v27  ;;  %vm3736_vm4 = vcmp.lt.s32.totalorder %v3717_v16, 1  ;;  %vm3737_vm8 = vcmp.lt.s32.totalorder %v3717_v16, 2  ;;  %vm3738_vm6 = vcmp.lt.s32.totalorder %v3717_v16, 3 }
 0x926   :  { %v3735_v32 = vor.u32 %v3734_v28, %v3733_v18  ;;  %vm3739_vm12 = vcmp.lt.s32.totalorder %v3717_v16, 4  ;;  %v3740_v8 = vsel %vm3736_vm4, %v3720_v33, %v3723_v3  ;;  %vm10614_vm7 = vcmp.lt.s32.totalorder %v10613_v29, 0  ;;  %v11674_v15 = vpop.eup %11673 }
 0x927   :  { %v3741_v22 = vsel %vm3739_vm12, %v3729_v56, 2102212464  ;;  %v3744_v57 = vsel %vm3736_vm4, %v3723_v3, %v3726_v42  ;;  %v3745_v24 = vsel %vm3739_vm12, %v3732_v41, 920167782  ;;  %v3569_v54 = vsel %vm10614_vm7, 0, %v10613_v29 }
 0x928   :  { %v3742_v36 = vsel %vm3738_vm6, %v3726_v42, %v3741_v22  ;;  %v3746_v51 = vsel %vm3738_vm6, %v3729_v56, %v3745_v24  ;;  %v3748_v25 = vsel %vm3736_vm4, %v3726_v42, %v3729_v56  ;;  %v17046_v63 = vand.u32 2147483647, %v14601_v26 }
 0x929   :  { %v3570_v33 = vsub.s32 32, %v3569_v54  ;;  %v3571_v27 = vshll.u32 %v14837_v62, %v3569_v54  ;;  %v3574_v14 = vsub.s32 4294967266, %v3569_v54  ;;  %v3743_v3 = vsel %vm3737_vm8, %v3740_v8, %v3742_v36  ;;  %v11676_v18 = vpop.eup %11675 }
 0x92a   :  { %vm14880_vm11 = vcmp.le.f32.partialorder %v17046_v63, 0.7853982  ;;  %v3585_v28 = vsel %vm3500_vm5, %v3584_v10, %v14820_v1  ;;  %v3747_v42 = vsel %vm3737_vm8, %v3744_v57, %v3746_v51  ;;  %v3749_v56 = vsel %vm3739_vm12, %v3735_v32, 1326507024  ;;  %v11678_v22 = vpop.eup %11677 }
 0x92b   :  { %v3759_v29 = vmul.u32 %v14871_v31, %v3743_v3  ;;  %v3391_v24 = vxor.u32 2147483648, %v11676_v18  ;;  %v3572_v63 = vshrl.u32 %v3554_v21, %v3570_v33  ;;  %v3575_v30 = vadd.s32 127, %v3574_v14 }
 0x92c   :  { %v3750_v62 = vsel %vm3738_vm6, %v3732_v41, %v3749_v56  ;;  %v3388_v54 = vxor.u32 2147483648, %v11678_v22  ;;  %v14895_v36 = vmul.u32.u64.low %v14871_v31, %v3747_v42  ;;  %v14896_v44 = vmul.u32.u64.high %v14871_v31, %v3747_v42, %v14895_v36 }
 0x92d   :  { %v3751_v8 = vsel %vm3737_vm8, %v3748_v25, %v3750_v62  ;;  %v3392_v1 = vsel %vm3390_vm13, %v3391_v24, %v11678_v22  ;;  %v6706_v10 = vsel %vm6704_vm14, %v3391_v24, %v11678_v22  ;;  %v3573_v32 = vor.u32 %v3572_v63, %v3571_v27 }
 0x92e   :  { %v3576_v57 = vshll.u32 %v3575_v30, 23  ;;  %v3389_v21 = vsel %vm3387_vm10, %v11676_v18, %v3388_v54  ;;  %v6703_v16 = vsel %vm6701_vm15, %v11676_v18, %v3388_v54  ;;  %v3762_v18 = vadd.s32 1, %v14896_v44 }
 0x92f   :  { %v14908_v41 = vmul.u32.u64.low %v14871_v31, %v3751_v8  ;;  %v14909_v51 = vmul.u32.u64.high %v14871_v31, %v3751_v8, %v14908_v41  ;;  %v3393_v25 = vsel %vm3386_vm1, %v3389_v21, %v3392_v1  ;;  %v6707_v33 = vsel %vm6700_vm3, %v6703_v16, %v6706_v10 }
 0x930   :  { %v3577_v14 = vor.u32 4788187, %v3576_v57  ;;  %v3580_v3 = vcvt.s32.f32 %v3573_v32  ;;  %v3394_v30 = vsel %vm3384_vm2, nan, %v3393_v25  ;;  %v6708_v27 = vsel %vm3384_vm2, nan, %v6707_v33 }
 0x931   :  { %v3913_v42 = vand.u32 2139095040, %v14855_v50  ;;  %v8182_v31 = vsub.f32 %v3394_v30, %v6708_v27  ;;  %v8246_v56 = vadd.f32 %v6708_v27, %v3394_v30  ;;  %v14921_v17 = vmul.f32 0.7853982, %v11674_v15 }
 0x932   :  { %v3578_v22 = vand.u32 2147483647, %v3577_v14  ;;  %v3587_v58 = vsel %vm14880_vm11, 0, %v3585_v28  ;;  %vm3761_vm9 = vc.u32 %v14909_v51, %v14895_v36  ;;  %v16907_v24 = vand.u32 2147483647, %v14855_v50 }
 0x933   :  { %v3914_v63 = vshrl.u32 %v3913_v42, 23  ;;  %v14928_v47 = vmul.f32 0.70710677, %v8182_v31  ;;  %v8278_v62 = vmul.f32 0.70710677, %v8246_v56  ;;  %v3763_v8 = vsel %vm3761_vm9, %v3762_v18, %v14896_v44 }
 0x934   :  { %v3581_v54 = vmul.f32 %v3580_v3, %v3578_v22  ;;  %v3764_v1 = vadd.s32 %v3763_v8, %v3759_v29  ;;  %v6906_v57 = vadd.s32 3, %v3587_v58  ;;  %v4119_v28 = vand.u32 2139095040, %v14921_v17  ;;  %v1472_v3 = vld [vmem:[%s16823_s0 + $0xd8] sm:$0xff] }
 0x935   :  { %v10627_v10 = vadd.s32 4294967169, %v3914_v63  ;;  %v14932_v15 = vsub.f32 %v8278_v62, %v14928_v47  ;;  %v14938_v25 = vand.u32 3, %v3587_v58  ;;  %v3917_v44 = vand.u32 8388607, %v16907_v24 }
 0x936   :  { %v3582_v32 = vxor.u32 2147483648, %v3581_v54  ;;  %v3765_v21 = vadd.s32 536870912, %v3764_v1  ;;  %v16906_v14 = vand.u32 2147483647, %v14921_v17  ;;  %v14950_v30 = vand.u32 3, %v6906_v57 }
 0x937   :  { %17049 = vst [vmem:[#allocation37_spill] sm:$0xff] %v14932_v15  ;;  %v3920_v16 = vadd.s32 1, %v10627_v10  ;;  %8786 = vperm.xlu1 %11461, %v14932_v15   ;;  %8417 = vperm.xlu0 %11459, %v14932_v15   ;;  %v4120_v18 = vshrl.u32 %v4119_v28, 23  ;;  %vm3593_vm14 = vcmp.eq.s32.totalorder %v14938_v25, 0  ;;  %vm3596_vm10 = vcmp.eq.s32.totalorder %v14938_v25, 2 }
 0x938   :  { %v3583_v41 = vsel %vm3500_vm5, %v3582_v32, %v3581_v54  ;;  %v3766_v33 = vshrl.u32 %v3765_v21, 30  ;;  %vm3706_vm5 = vcmp.lt.s32.totalorder %v14784_v20, 0  ;;  %v3918_v56 = vor.u32 8388608, %v3917_v44 }
 0x939   :  { %v3586_v29 = vsel %vm14880_vm11, %v14601_v26, %v3583_v41  ;;  %vm3921_vm13 = vcmp.gt.s32.totalorder %v3920_v16, 0  ;;  %v14959_v22 = vand.u32 8388607, %v16906_v14  ;;  %vm3592_vm15 = vcmp.lt.s32.totalorder %v14938_v25, 2 }
 0x93a   :  { %11679 = vcosq.f32 %v3586_v29  ;;  %v3922_v27 = vsel %vm3921_vm13, %v3920_v16, 0  ;;  %v3767_v42 = vshll.u32 %v3766_v33, 30  ;;  %vm6908_vm1 = vcmp.lt.s32.totalorder %v14950_v30, 2 }
 0x93b   :  { %11681 = vsinq.f32 %v3586_v29  ;;  %v3924_v31 = vand.u32 31, %v3922_v27  ;;  %v3790_v58 = vsub.s32 4, %v3766_v33  ;;  %v14963_v63 = vshrl.u32 %v3922_v27, 5 }
 0x93c   :  { %11683 = vtanh.f32 %v1472_v3  ;;  %v14955_v7 = vsub.s32 %v3764_v1, %v3767_v42  ;;  %v10635_v54 = vadd.s32 4294967169, %v4120_v18  ;;  %vm3590_vm3 = vweird.f32 %v14601_v26 }
 0x93d   :  { %v3925_v62 = vsub.s32 32, %v3924_v31  ;;  %vm6909_vm2 = vcmp.eq.s32.totalorder %v14950_v30, 0  ;;  %vm6912_vm4 = vcmp.eq.s32.totalorder %v14950_v30, 2  ;;  %v3760_v8 = vadd.s32 %v14895_v36, %v14909_v51 }
 0x93e   :  { %v3770_v1 = vsub.s32 0, %v14955_v7  ;;  %v3927_v10 = vshll.u32 %v17000_v52, %v3924_v31  ;;  %v3930_v57 = vshll.u32 %v16998_v0, %v3924_v31  ;;  %v3933_v16 = vshll.u32 %v16999_v61, %v3924_v31 }
 0x93f   :  { %v3928_v32 = vshrl.u32 %v16998_v0, %v3925_v62  ;;  %v3931_v28 = vshrl.u32 %v16999_v61, %v3925_v62  ;;  %v3934_v41 = vshrl.u32 %v16984_v11, %v3925_v62  ;;  %v14978_v44 = vshll.u32 %v3918_v56, 8 }
 0x940   :  { %v10620_v21 = vmin.u32 %v3770_v1, %v14955_v7  ;;  %v14982_v36 = vsel %vm3706_vm5, %v3790_v58, %v3766_v33  ;;  %vm3942_vm8 = vcmp.lt.s32.totalorder %v14963_v63, 1  ;;  %v4126_v29 = vadd.s32 1, %v10635_v54 }
 0x941   :  { %v3936_v27 = vshll.u32 %v16984_v11, %v3924_v31  ;;  %v3937_v18 = vshrl.u32 %v16990_v38, %v3925_v62  ;;  %v3939_v42 = vshll.u32 %v16990_v38, %v3924_v31  ;;  %vm3943_vm6 = vcmp.lt.s32.totalorder %v14963_v63, 2 }
 0x942   :  { %v3772_v3 = vclz %v10620_v21  ;;  %v3926_v1 = vshrl.u32 %v17000_v52, %v3925_v62  ;;  %v3929_v14 = vor.u32 %v3928_v32, %v3927_v10  ;;  %v3932_v33 = vor.u32 %v3931_v28, %v3930_v57 }
 0x943   :  { %v3940_v58 = vshrl.u32 %v16994_v35, %v3925_v62  ;;  %v3935_v54 = vor.u32 %v3934_v41, %v3933_v16  ;;  %v3938_v21 = vor.u32 %v3937_v18, %v3936_v27  ;;  %vm3944_vm12 = vcmp.lt.s32.totalorder %v14963_v63, 3 }
 0x944   :  { %v11680_v56 = vpop.eup %11679  ;;  %v10621_v51 = vadd.s32 4294967294, %v3772_v3  ;;  %vm3945_vm7 = vcmp.lt.s32.totalorder %v14963_v63, 4  ;;  %v3946_v16 = vsel %vm3942_vm8, %v3926_v1, %v3929_v14  ;;  %v3950_v30 = vsel %vm3942_vm8, %v3929_v14, %v3932_v33 }
 0x945   :  { %v11682_v24 = vpop.eup %11681  ;;  %v3597_v15 = vxor.u32 2147483648, %v11680_v56  ;;  %v3941_v45 = vor.u32 %v3940_v58, %v3939_v42  ;;  %v3947_v62 = vsel %vm3945_vm7, %v3935_v54, 2102212464  ;;  %v3954_v58 = vsel %vm3942_vm8, %v3932_v33, %v3935_v54 }
 0x946   :  { %v14992_v12 = vpop.eup %11683  ;;  %v3594_v2 = vxor.u32 2147483648, %v11682_v24  ;;  %vm10622_vm11 = vcmp.lt.s32.totalorder %v10621_v51, 0  ;;  %vm4127_vm9 = vcmp.gt.s32.totalorder %v4126_v29, 0 }
 0x947   :  { %v3598_v31 = vsel %vm3596_vm10, %v3597_v15, %v11682_v24  ;;  %v6914_v10 = vsel %vm6912_vm4, %v3597_v15, %v11682_v24  ;;  %v3775_v28 = vsel %vm10622_vm11, 0, %v10621_v51  ;;  %v3948_v51 = vsel %vm3944_vm12, %v3932_v33, %v3947_v62 }
 0x948   :  { %v3595_v32 = vsel %vm3593_vm14, %v11680_v56, %v3594_v2  ;;  %v6911_v57 = vsel %vm6909_vm2, %v11680_v56, %v3594_v2  ;;  %v3776_v15 = vsub.s32 32, %v3775_v28  ;;  %v3777_v3 = vshll.u32 %v14955_v7, %v3775_v28 }
 0x949   :  { %v3599_v41 = vsel %vm3592_vm15, %v3595_v32, %v3598_v31  ;;  %v6915_v24 = vsel %vm6908_vm1, %v6911_v57, %v6914_v10  ;;  %v3780_v2 = vsub.s32 4294967266, %v3775_v28  ;;  %v3951_v7 = vsel %vm3945_vm7, %v3938_v21, 920167782 }
 0x94a   :  { %v3600_v27 = vsel %vm3590_vm3, nan, %v3599_v41  ;;  %v6916_v18 = vsel %vm3590_vm3, nan, %v6915_v24  ;;  %v3778_v25 = vshrl.u32 %v3760_v8, %v3776_v15  ;;  %v3955_v26 = vsel %vm3945_vm7, %v3941_v45, 1326507024 }
 0x94b   :  { %v8184_v42 = vsub.f32 %v3600_v27, %v6916_v18  ;;  %v8248_v56 = vadd.f32 %v6916_v18, %v3600_v27  ;;  %v3781_v1 = vadd.s32 127, %v3780_v2  ;;  %v3952_v8 = vsel %vm3944_vm12, %v3935_v54, %v3951_v7 }
 0x94c   :  { %v3779_v62 = vor.u32 %v3778_v25, %v3777_v3  ;;  %v3949_v14 = vsel %vm3943_vm6, %v3946_v16, %v3948_v51  ;;  %v3953_v57 = vsel %vm3943_vm6, %v3950_v30, %v3952_v8  ;;  %v3956_v33 = vsel %vm3944_vm12, %v3938_v21, %v3955_v26 }
 0x94d   :  { %v15027_v31 = vmul.f32 0.70710677, %v8184_v42  ;;  %v8280_v10 = vmul.f32 0.70710677, %v8248_v56  ;;  %v3782_v32 = vshll.u32 %v3781_v1, 23  ;;  %v3957_v41 = vsel %vm3943_vm6, %v3954_v58, %v3956_v33 }
 0x94e   :  { %v3786_v45 = vcvt.s32.f32 %v3779_v62  ;;  %v15043_v54 = vmul.u32.u64.low %v14978_v44, %v3957_v41  ;;  %v15044_v15 = vmul.u32.u64.high %v14978_v44, %v3957_v41, %v15043_v54  ;;  %v4128_v16 = vsel %vm4127_vm9, %v4126_v29, 0 }
 0x94f   :  { %v15038_v28 = vsub.f32 %v8280_v10, %v15027_v31  ;;  %v3783_v24 = vor.u32 4788187, %v3782_v32  ;;  %v17051_v3 = vand.u32 2147483647, %v14784_v20  ;;  %v4130_v63 = vand.u32 31, %v4128_v16 }
 0x950   :  { %v15054_v27 = vmul.u32.u64.low %v14978_v44, %v3953_v57  ;;  %v15055_v18 = vmul.u32.u64.high %v14978_v44, %v3953_v57, %v15054_v27  ;;  %v17054_v51 = vor.u32 8388608, %v14959_v22  ;;  %v3965_v56 = vmul.u32 %v14978_v44, %v3949_v14 }
 0x951   :  { %17050 = vst [vmem:[#allocation38_spill] sm:$0xff] %v15038_v28  ;;  %8794 = vperm.xlu1 %11461, %v15038_v28   ;;  %vm15049_vm13 = vcmp.le.f32.partialorder %v17051_v3, 0.7853982  ;;  %8427 = vperm.xlu0 %11459, %v15038_v28   ;;  %v3784_v2 = vand.u32 2147483647, %v3783_v24  ;;  %v4131_v25 = vsub.s32 32, %v4130_v63  ;;  %v4133_v30 = vshll.u32 %v17000_v52, %v4130_v63 }
 0x952   :  { %v3793_v29 = vsel %vm15049_vm13, 0, %v14982_v36  ;;  %v15064_v42 = vshll.u32 %v17054_v51, 8  ;;  %v4136_v1 = vshll.u32 %v16998_v0, %v4130_v63  ;;  %vm3967_vm14 = vc.u32 %v15044_v15, %v15054_v27 }
 0x953   :  { %v3787_v7 = vmul.f32 %v3786_v45, %v3784_v2  ;;  %v4139_v58 = vshll.u32 %v16999_v61, %v4130_v63  ;;  %v4142_v26 = vshll.u32 %v16984_v11, %v4130_v63  ;;  %v3968_v36 = vadd.s32 1, %v15055_v18 }
 0x954   :  { %v4129_v22 = vshrl.u32 %v4128_v16, 5  ;;  %v4134_v10 = vshrl.u32 %v16998_v0, %v4131_v25  ;;  %v4137_v44 = vshrl.u32 %v16999_v61, %v4131_v25  ;;  %v4140_v8 = vshrl.u32 %v16984_v11, %v4131_v25 }
 0x955   :  { %v3788_v62 = vxor.u32 2147483648, %v3787_v7  ;;  %v4143_v32 = vshrl.u32 %v16990_v38, %v4131_v25  ;;  %v4145_v14 = vshll.u32 %v16990_v38, %v4130_v63  ;;  %v3969_v57 = vsel %vm3967_vm14, %v3968_v36, %v15055_v18  ;;  %v15087_v63 = vpop.permute.xlu1 %1062 }
 0x956   :  { %v4135_v33 = vor.u32 %v4134_v10, %v4133_v30  ;;  %v4138_v45 = vor.u32 %v4137_v44, %v4136_v1  ;;  %v4146_v41 = vshrl.u32 %v16994_v35, %v4131_v25  ;;  %v3970_v54 = vadd.s32 %v3969_v57, %v3965_v56 }
 0x957   :  { %v3789_v24 = vsel %vm3706_vm5, %v3788_v62, %v3787_v7  ;;  %v4141_v16 = vor.u32 %v4140_v8, %v4139_v58  ;;  %v4144_v3 = vor.u32 %v4143_v32, %v4142_v26  ;;  %v4132_v51 = vshrl.u32 %v17000_v52, %v4131_v25 }
 0x958   :  { %v3792_v2 = vsel %vm15049_vm13, %v14784_v20, %v3789_v24  ;;  %v4147_v28 = vor.u32 %v4146_v41, %v4145_v14  ;;  %vm4148_vm10 = vcmp.lt.s32.totalorder %v4129_v22, 1  ;;  %v3971_v18 = vadd.s32 536870912, %v3970_v54 }
 0x959   :  { %11685 = vcosq.f32 %v3792_v2  ;;  %vm4150_vm15 = vcmp.lt.s32.totalorder %v4129_v22, 3  ;;  %vm4151_vm1 = vcmp.lt.s32.totalorder %v4129_v22, 4  ;;  %v7114_v30 = vadd.s32 3, %v3793_v29 }
 0x95a   :  { %11687 = vsinq.f32 %v3792_v2  ;;  %vm4149_vm5 = vcmp.lt.s32.totalorder %v4129_v22, 2  ;;  %v4156_v56 = vsel %vm4148_vm10, %v4135_v33, %v4138_v45  ;;  %v15090_v1 = vshrl.u32 %v3971_v18, 30 }
 0x95b   :  { %v4153_v7 = vsel %vm4151_vm1, %v4141_v16, 2102212464  ;;  %v4157_v21 = vsel %vm4151_vm1, %v4144_v3, 920167782  ;;  %v4160_v58 = vsel %vm4148_vm10, %v4138_v45, %v4141_v16  ;;  %v3797_v25 = vand.u32 3, %v3793_v29 }
 0x95c   :  { %v4158_v26 = vsel %vm4150_vm15, %v4141_v16, %v4157_v21  ;;  %v4161_v36 = vsel %vm4151_vm1, %v4147_v28, 1326507024  ;;  %v15095_v10 = vmul.f32 0.7853982, %v14992_v12  ;;  %v3973_v44 = vshll.u32 %v15090_v1, 30 }
 0x95d   :  { %v4152_v62 = vsel %vm4148_vm10, %v4132_v51, %v4135_v33  ;;  %v4159_v8 = vsel %vm4149_vm5, %v4156_v56, %v4158_v26  ;;  %v4162_v32 = vsel %vm4150_vm15, %v4144_v3, %v4161_v36  ;;  %v4154_v14 = vsel %vm4150_vm15, %v4138_v45, %v4153_v7  ;;  %v15114_v33 = vpop.permute.xlu1 %1159 }
 0x95e   :  { %v4163_v57 = vsel %vm4149_vm5, %v4160_v58, %v4162_v32  ;;  %v15104_v29 = vmul.u32.u64.low %v15064_v42, %v4159_v8  ;;  %v15105_v41 = vmul.u32.u64.high %v15064_v42, %v4159_v8, %v15104_v29  ;;  %v7115_v28 = vand.u32 3, %v7114_v30 }
 0x95f   :  { %v15108_v12 = vsub.s32 %v3970_v54, %v3973_v44  ;;  %v15111_v24 = vmul.u32.u64.low %v15064_v42, %v4163_v57  ;;  %v15112_v16 = vmul.u32.u64.high %v15064_v42, %v4163_v57, %v15111_v24  ;;  %v4325_v3 = vand.u32 2139095040, %v15095_v10 }
 0x960   :  { %vm3796_vm3 = vweird.f32 %v14784_v20  ;;  %v4155_v2 = vsel %vm4149_vm5, %v4152_v62, %v4154_v14  ;;  %vm3798_vm2 = vcmp.lt.s32.totalorder %v3797_v25, 2  ;;  %vm3799_vm4 = vcmp.eq.s32.totalorder %v3797_v25, 0 }
 0x961   :  { %v3976_v45 = vsub.s32 0, %v15108_v12  ;;  %v4174_v51 = vadd.s32 1, %v15105_v41  ;;  %v4326_v54 = vshrl.u32 %v4325_v3, 23  ;;  %vm3802_vm8 = vcmp.eq.s32.totalorder %v3797_v25, 2  ;;  %v15126_v8 = vpop.permute.xlu1 %1256 }
 0x962   :  { %vm7116_vm6 = vcmp.lt.s32.totalorder %v7115_v28, 2  ;;  %vm7120_vm12 = vcmp.eq.s32.totalorder %v7115_v28, 2  ;;  %vm7117_vm7 = vcmp.eq.s32.totalorder %v7115_v28, 0  ;;  %v4171_v21 = vmul.u32 %v15064_v42, %v4155_v2 }
 0x963   :  { %v11686_v18 = vpop.eup %11685  ;;  %v10628_v30 = vmin.u32 %v3976_v45, %v15108_v12  ;;  %vm4173_vm11 = vc.u32 %v15112_v16, %v15104_v29  ;;  %v10643_v36 = vadd.s32 4294967169, %v4326_v54  ;;  %vm3912_vm9 = vcmp.lt.s32.totalorder %v14855_v50, 0 }
 0x964   :  { %v11688_v56 = vpop.eup %11687  ;;  %v3803_v7 = vxor.u32 2147483648, %v11686_v18  ;;  %v4175_v26 = vsel %vm4173_vm11, %v4174_v51, %v15105_v41  ;;  %v16918_v32 = vand.u32 2147483647, %v15095_v10  ;;  %v3966_v42 = vadd.s32 %v15054_v27, %v15044_v15 }
 0x965   :  { %v3800_v22 = vxor.u32 2147483648, %v11688_v56  ;;  %v3978_v58 = vclz %v10628_v30  ;;  %v3996_v45 = vsub.s32 4, %v15090_v1  ;;  %v4176_v2 = vadd.s32 %v4175_v26, %v4171_v21 }
 0x966   :  { %v3804_v44 = vsel %vm3802_vm8, %v3803_v7, %v11688_v56  ;;  %v7122_v62 = vsel %vm7120_vm12, %v3803_v7, %v11688_v56  ;;  %v4332_v30 = vadd.s32 1, %v10643_v36  ;;  %v4329_v36 = vand.u32 8388607, %v16918_v32 }
 0x967   :  { %v3801_v14 = vsel %vm3799_vm4, %v11686_v18, %v3800_v22  ;;  %v7119_v57 = vsel %vm7117_vm7, %v11686_v18, %v3800_v22  ;;  %v10629_v24 = vadd.s32 4294967294, %v3978_v58  ;;  %v4177_v15 = vadd.s32 536870912, %v4176_v2  ;;  %v15143_v58 = vpop.permute.xlu1 %1353 }
 0x968   :  { %v3805_v3 = vsel %vm3798_vm2, %v3801_v14, %v3804_v44  ;;  %v7123_v41 = vsel %vm7116_vm6, %v7119_v57, %v7122_v62  ;;  %vm4333_vm14 = vcmp.gt.s32.totalorder %v4332_v30, 0  ;;  %vm4002_vm4 = vweird.f32 %v14855_v50 }
 0x969   :  { %v3806_v51 = vsel %vm3796_vm3, nan, %v3805_v3  ;;  %v7124_v54 = vsel %vm3796_vm3, nan, %v7123_v41  ;;  %vm10630_vm13 = vcmp.lt.s32.totalorder %v10629_v24, 0  ;;  %v15145_v26 = vshrl.u32 %v4177_v15, 30 }
 0x96a   :  { %v8186_v18 = vsub.f32 %v3806_v51, %v7124_v54  ;;  %v8250_v56 = vadd.f32 %v7124_v54, %v3806_v51  ;;  %v3981_v7 = vsel %vm10630_vm13, 0, %v10629_v24  ;;  %v4334_v20 = vsel %vm4333_vm14, %v4332_v30, 0 }
 0x96b   :  { %v3982_v27 = vsub.s32 32, %v3981_v7  ;;  %v3983_v25 = vshll.u32 %v15108_v12, %v3981_v7  ;;  %v3986_v28 = vsub.s32 4294967266, %v3981_v7  ;;  %v4336_v14 = vand.u32 31, %v4334_v20  ;;  %v15169_v15 = vpop.permute.xlu1 %8337 }
 0x96c   :  { %v15141_v22 = vmul.f32 0.70710677, %v8186_v18  ;;  %v8282_v21 = vmul.f32 0.70710677, %v8250_v56  ;;  %v3997_v12 = vsel %vm3912_vm9, %v3996_v45, %v15090_v1  ;;  %v4179_v24 = vshll.u32 %v15145_v26, 30  ;;  %17059 = vst [vmem:[#allocation40_spill] sm:$0xff] %v15169_v15 }
 0x96d   :  { %v3984_v44 = vshrl.u32 %v3966_v42, %v3982_v27  ;;  %v3987_v62 = vadd.s32 127, %v3986_v28  ;;  %v4337_v51 = vsub.s32 32, %v4336_v14  ;;  %v17056_v42 = vand.u32 2147483647, %v14855_v50 }
 0x96e   :  { %v15150_v57 = vsub.f32 %v8282_v21, %v15141_v22  ;;  %v15163_v30 = vsub.s32 %v4176_v2, %v4179_v24  ;;  %v4330_v45 = vor.u32 8388608, %v4329_v36  ;;  %v4339_v27 = vshll.u32 %v17000_v52, %v4336_v14 }
 0x96f   :  { %v3985_v3 = vor.u32 %v3984_v44, %v3983_v25  ;;  %v3988_v41 = vshll.u32 %v3987_v62, 23  ;;  %vm15159_vm10 = vcmp.le.f32.partialorder %v17056_v42, 0.7853982  ;;  %v4342_v25 = vshll.u32 %v16998_v0, %v4336_v14 }
 0x970   :  { %17055 = vst [vmem:[#allocation39_spill] sm:$0xff] %v15150_v57  ;;  %8802 = vperm.xlu1 %11461, %v15150_v57   ;;  %v3999_v1 = vsel %vm15159_vm10, 0, %v3997_v12  ;;  %8437 = vperm.xlu0 %11459, %v15150_v57   ;;  %v4182_v7 = vsub.s32 0, %v15163_v30  ;;  %v4345_v28 = vshll.u32 %v16999_v61, %v4336_v14  ;;  %v4340_v21 = vshrl.u32 %v16998_v0, %v4337_v51 }
 0x971   :  { %v3989_v18 = vor.u32 4788187, %v3988_v41  ;;  %v3992_v56 = vcvt.s32.f32 %v3985_v3  ;;  %v4343_v44 = vshrl.u32 %v16999_v61, %v4337_v51  ;;  %v4346_v62 = vshrl.u32 %v16984_v11, %v4337_v51 }
 0x972   :  { %v10636_v36 = vmin.u32 %v4182_v7, %v15163_v30  ;;  %v4335_v12 = vshrl.u32 %v4334_v20, 5  ;;  %v4348_v24 = vshll.u32 %v16984_v11, %v4336_v14  ;;  %v7322_v41 = vadd.s32 3, %v3999_v1 }
 0x973   :  { %v3990_v2 = vand.u32 2147483647, %v3989_v18  ;;  %v4172_v42 = vadd.s32 %v15104_v29, %v15112_v16  ;;  %v15181_v32 = vshll.u32 %v4330_v45, 8  ;;  %v4338_v18 = vshrl.u32 %v17000_v52, %v4337_v51 }
 0x974   :  { %v4184_v15 = vclz %v10636_v36  ;;  %v4349_v57 = vshrl.u32 %v16990_v38, %v4337_v51  ;;  %v4351_v53 = vshll.u32 %v16990_v38, %v4336_v14  ;;  %v4341_v40 = vor.u32 %v4340_v21, %v4339_v27 }
 0x975   :  { %v3993_v3 = vmul.f32 %v3992_v56, %v3990_v2  ;;  %v4344_v7 = vor.u32 %v4343_v44, %v4342_v25  ;;  %v4347_v20 = vor.u32 %v4346_v62, %v4345_v28  ;;  %v4352_v56 = vshrl.u32 %v16994_v35, %v4337_v51  ;;  %v15187_v2 = vpop.permute.xlu1 %8342 }
 0x976   :  { %v10637_v43 = vadd.s32 4294967294, %v4184_v15  ;;  %v4350_v4 = vor.u32 %v4349_v57, %v4348_v24  ;;  %vm4354_vm15 = vcmp.lt.s32.totalorder %v4335_v12, 1  ;;  %17060 = vst [vmem:[#allocation41_spill] sm:$0xff] %v15187_v2  ;;  %vm4355_vm1 = vcmp.lt.s32.totalorder %v4335_v12, 2 }
 0x977   :  { %v3994_v9 = vxor.u32 2147483648, %v3993_v3  ;;  %vm4356_vm5 = vcmp.lt.s32.totalorder %v4335_v12, 3  ;;  %vm4357_vm3 = vcmp.lt.s32.totalorder %v4335_v12, 4  ;;  %v4353_v14 = vor.u32 %v4352_v56, %v4351_v53 }
 0x978   :  { %vm10638_vm2 = vcmp.lt.s32.totalorder %v10637_v43, 0  ;;  %v4358_v45 = vsel %vm4354_vm15, %v4338_v18, %v4341_v40  ;;  %v4359_v51 = vsel %vm4357_vm3, %v4347_v20, 2102212464  ;;  %v4362_v15 = vsel %vm4354_vm15, %v4341_v40, %v4344_v7 }
 0x979   :  { %v3995_v29 = vsel %vm3912_vm9, %v3994_v9, %v3993_v3  ;;  %v4187_v57 = vsel %vm10638_vm2, 0, %v10637_v43  ;;  %v4360_v28 = vsel %vm4356_vm5, %v4344_v7, %v4359_v51  ;;  %v4363_v54 = vsel %vm4357_vm3, %v4350_v4, 920167782  ;;  %v1474_v43 = vld [vmem:[%s16823_s0 + $0xe8] sm:$0xff]  ;;  %v15206_v24 = vpop.permute.xlu1 %8352 }
 0x97a   :  { %v3998_v16 = vsel %vm15159_vm10, %v14855_v50, %v3995_v29  ;;  %v4188_v27 = vsub.s32 32, %v4187_v57  ;;  %v4189_v9 = vshll.u32 %v15163_v30, %v4187_v57  ;;  %v4192_v25 = vsub.s32 4294967266, %v4187_v57  ;;  %17061 = vst [vmem:[#allocation42_spill] sm:$0xff] %v15206_v24 }
 0x97b   :  { %11689 = vcosq.f32 %v3998_v16  ;;  %v4366_v21 = vsel %vm4354_vm15, %v4344_v7, %v4347_v20  ;;  %v4367_v53 = vsel %vm4357_vm3, %v4353_v14, 1326507024  ;;  %v4003_v44 = vand.u32 3, %v3999_v1  ;;  %v1476_v1 = vld [vmem:[%s16823_s0 + $0xf8] sm:$0xff] }
 0x97c   :  { %11691 = vsinq.f32 %v3998_v16  ;;  %v4190_v62 = vshrl.u32 %v4172_v42, %v4188_v27  ;;  %v4193_v40 = vadd.s32 127, %v4192_v25  ;;  %v4364_v36 = vsel %vm4356_vm5, %v4347_v20, %v4363_v54 }
 0x97d   :  { %v7323_v30 = vand.u32 3, %v7322_v41  ;;  %v4361_v3 = vsel %vm4355_vm1, %v4358_v45, %v4360_v28  ;;  %v4365_v18 = vsel %vm4355_vm1, %v4362_v15, %v4364_v36  ;;  %v4368_v7 = vsel %vm4356_vm5, %v4350_v4, %v4367_v53 }
 0x97e   :  { %v4191_v56 = vor.u32 %v4190_v62, %v4189_v9  ;;  %v4194_v29 = vshll.u32 %v4193_v40, 23  ;;  %v4369_v16 = vsel %vm4355_vm1, %v4366_v21, %v4368_v7  ;;  %11693 = vtanh.f32 %v1474_v43  ;;  %v15234_v9 = vpop.permute.xlu1 %8362 }
 0x97f   :  { %v15216_v42 = vmul.u32.u64.low %v15181_v32, %v4369_v16  ;;  %v15217_v20 = vmul.u32.u64.high %v15181_v32, %v4369_v16, %v15216_v42  ;;  %v15220_v41 = vmul.u32.u64.low %v15181_v32, %v4365_v18  ;;  %v15221_v14 = vmul.u32.u64.high %v15181_v32, %v4365_v18, %v15220_v41  ;;  %17065 = vst [vmem:[#allocation43_spill] sm:$0xff] %v15234_v9 }
 0x980   :  { %v4195_v45 = vor.u32 4788187, %v4194_v29  ;;  %v4198_v4 = vcvt.s32.f32 %v4191_v56  ;;  %v4202_v57 = vsub.s32 4, %v15145_v26  ;;  %vm4118_vm8 = vcmp.lt.s32.totalorder %v14921_v17, 0 }
 0x981   :  { %11695 = vtanh.f32 %v1476_v1  ;;  %vm4005_vm6 = vcmp.eq.s32.totalorder %v4003_v44, 0  ;;  %v17062_v12 = vand.u32 2147483647, %v14921_v17  ;;  %v4377_v27 = vmul.u32 %v15181_v32, %v4361_v3 }
 0x982   :  { %v4196_v15 = vand.u32 2147483647, %v4195_v45  ;;  %vm4008_vm7 = vcmp.eq.s32.totalorder %v4003_v44, 2  ;;  %vm7328_vm11 = vcmp.eq.s32.totalorder %v7323_v30, 2  ;;  %vm4379_vm9 = vc.u32 %v15217_v20, %v15220_v41  ;;  %v15243_v7 = vpop.permute.xlu1 %8372 }
 0x983   :  { %vm15229_vm12 = vcmp.le.f32.partialorder %v17062_v12, 0.7853982  ;;  %v4380_v28 = vadd.s32 1, %v15221_v14  ;;  %vm7325_vm13 = vcmp.eq.s32.totalorder %v7323_v30, 0  ;;  %v4203_v43 = vsel %vm4118_vm8, %v4202_v57, %v15145_v26  ;;  %17066 = vst [vmem:[#allocation44_spill] sm:$0xff] %v15243_v7 }
 0x984   :  { %v4199_v53 = vmul.f32 %v4198_v4, %v4196_v15  ;;  %vm4004_vm14 = vcmp.lt.s32.totalorder %v4003_v44, 2  ;;  %vm7324_vm10 = vcmp.lt.s32.totalorder %v7323_v30, 2  ;;  %v4205_v16 = vsel %vm15229_vm12, 0, %v4203_v43 }
 0x985   :  { %v11690_v25 = vpop.eup %11689  ;;  %v4381_v62 = vsel %vm4379_vm9, %v4380_v28, %v15221_v14  ;;  %v7530_v51 = vadd.s32 3, %v4205_v16  ;;  %vm4208_vm15 = vweird.f32 %v14921_v17 }
 0x986   :  { %v11692_v54 = vpop.eup %11691  ;;  %v4009_v21 = vxor.u32 2147483648, %v11690_v25  ;;  %v4200_v3 = vxor.u32 2147483648, %v4199_v53  ;;  %v4382_v18 = vadd.s32 %v4381_v62, %v4377_v27 }
 0x987   :  { %v4006_v32 = vxor.u32 2147483648, %v11692_v54 }
 0x988   :  { %v4010_v40 = vsel %vm4008_vm7, %v4009_v21, %v11692_v54  ;;  %v7330_v36 = vsel %vm7328_vm11, %v4009_v21, %v11692_v54  ;;  %v11694_v1 = vpop.eup %11693  ;;  %v4201_v30 = vsel %vm4118_vm8, %v4200_v3, %v4199_v53  ;;  %v4383_v45 = vadd.s32 536870912, %v4382_v18 }
 0x989   :  { %v4007_v56 = vsel %vm4005_vm6, %v11690_v25, %v4006_v32  ;;  %v7327_v29 = vsel %vm7325_vm13, %v11690_v25, %v4006_v32  ;;  %v4204_v44 = vsel %vm15229_vm12, %v14921_v17, %v4201_v30  ;;  %v15257_v57 = vmul.f32 0.7853982, %v11694_v1  ;;  %v15261_v25 = vpop.permute.xlu1 %8382 }
 0x98a   :  { %v4011_v42 = vsel %vm4004_vm14, %v4007_v56, %v4010_v40  ;;  %v7331_v26 = vsel %vm7324_vm10, %v7327_v29, %v7330_v36  ;;  %11697 = vcosq.f32 %v4204_v44  ;;  %v15259_v27 = vshrl.u32 %v4383_v45, 30  ;;  %17067 = vst [vmem:[#allocation45_spill] sm:$0xff] %v15261_v25 }
 0x98b   :  { %v4012_v14 = vsel %vm4002_vm4, nan, %v4011_v42  ;;  %v7332_v4 = vsel %vm4002_vm4, nan, %v7331_v26  ;;  %v11696_v28 = vpop.eup %11695  ;;  %11699 = vsinq.f32 %v4204_v44  ;;  %v16931_v54 = vand.u32 2147483647, %v15257_v57 }
 0x98c   :  { %v8188_v12 = vsub.f32 %v4012_v14, %v7332_v4  ;;  %v8252_v15 = vadd.f32 %v7332_v4, %v4012_v14  ;;  %v4531_v50 = vand.u32 2139095040, %v15257_v57  ;;  %v4385_v43 = vshll.u32 %v15259_v27, 30 }
 0x98d   :  { %v4209_v32 = vand.u32 3, %v4205_v16  ;;  %v4535_v3 = vand.u32 8388607, %v16931_v54  ;;  %v15275_v56 = vmul.f32 0.7853982, %v11696_v28  ;;  %v15277_v29 = vpop.permute.xlu1 %8392  ;;  %v7531_v42 = vand.u32 3, %v7530_v51 }
 0x98e   :  { %v15265_v21 = vmul.f32 0.70710677, %v8188_v12  ;;  %v8284_v53 = vmul.f32 0.70710677, %v8252_v15  ;;  %v4532_v62 = vshrl.u32 %v4531_v50, 23  ;;  %v15271_v36 = vsub.s32 %v4382_v18, %v4385_v43  ;;  %17068 = vst [vmem:[#allocation46_spill] sm:$0xff] %v15277_v29 }
 0x98f   :  { %v4737_v30 = vand.u32 2139095040, %v15275_v56  ;;  %vm4210_vm1 = vcmp.lt.s32.totalorder %v4209_v32, 2  ;;  %v4536_v45 = vor.u32 8388608, %v4535_v3  ;;  %vm4211_vm5 = vcmp.eq.s32.totalorder %v4209_v32, 0 }
 0x990   :  { %v15269_v40 = vsub.f32 %v8284_v53, %v15265_v21  ;;  %v10651_v1 = vadd.s32 4294967169, %v4532_v62  ;;  %v4388_v26 = vsub.s32 0, %v15271_v36  ;;  %vm4214_vm3 = vcmp.eq.s32.totalorder %v4209_v32, 2 }
 0x991   :  { %v15285_v14 = vpop.permute.xlu1 %8402  ;;  %v4738_v4 = vshrl.u32 %v4737_v30, 23  ;;  %vm7532_vm4 = vcmp.lt.s32.totalorder %v7531_v42, 2  ;;  %vm7536_vm8 = vcmp.eq.s32.totalorder %v7531_v42, 2  ;;  %vm7533_vm6 = vcmp.eq.s32.totalorder %v7531_v42, 0 }
 0x992   :  { %8810 = vperm.xlu1 %11461, %v15269_v40   ;;  %8447 = vperm.xlu0 %11459, %v15269_v40   ;;  %v4538_v16 = vadd.s32 1, %v10651_v1  ;;  %v10644_v18 = vmin.u32 %v4388_v26, %v15271_v36  ;;  %17069 = vst [vmem:[#allocation47_spill] sm:$0xff] %v15285_v14  ;;  %v4378_v53 = vadd.s32 %v15220_v41, %v15217_v20  ;;  %v15290_v1 = vshll.u32 %v4536_v45, 8 }
 0x993   :  { %vm4324_vm7 = vcmp.lt.s32.totalorder %v15095_v10, 0  ;;  %v17077_v2 = vsub.s32 4, %v15259_v27 }
 0x994   :  { %vm4539_vm2 = vcmp.gt.s32.totalorder %v4538_v16, 0  ;;  %v11698_v44 = vpop.eup %11697  ;;  %v4390_v12 = vclz %v10644_v18 }
 0x995   :  { %v4540_v15 = vsel %vm4539_vm2, %v4538_v16, 0  ;;  %v11700_v28 = vpop.eup %11699  ;;  %v4215_v50 = vxor.u32 2147483648, %v11698_v44  ;;  %v15292_v26 = vpop.permute.xlu1 %8412  ;;  %v15297_v16 = vadd.s32 4294967169, %v4738_v4 }
 0x996   :  { %v4212_v43 = vxor.u32 2147483648, %v11700_v28  ;;  %v10645_v62 = vadd.s32 4294967294, %v4390_v12  ;;  %v4542_v3 = vand.u32 31, %v4540_v15  ;;  %17070 = vst [vmem:[#allocation48_spill] sm:$0xff] %v15292_v26  ;;  %v15295_v18 = vshrl.u32 %v4540_v15, 5 }
 0x997   :  { %v4216_v30 = vsel %vm4214_vm3, %v4215_v50, %v11700_v28  ;;  %v7538_v54 = vsel %vm7536_vm8, %v4215_v50, %v11700_v28 }
 0x998   :  { %v4213_v14 = vsel %vm4211_vm5, %v11698_v44, %v4212_v43  ;;  %v7535_v29 = vsel %vm7533_vm6, %v11698_v44, %v4212_v43  ;;  %vm10646_vm12 = vcmp.lt.s32.totalorder %v10645_v62, 0  ;;  %v4543_v20 = vsub.s32 32, %v4542_v3 }
 0x999   :  { %v4217_v41 = vsel %vm4210_vm1, %v4213_v14, %v4216_v30  ;;  %v7539_v12 = vsel %vm7532_vm4, %v7535_v29, %v7538_v54  ;;  %v4393_v45 = vsel %vm10646_vm12, 0, %v10645_v62  ;;  %v4545_v51 = vshll.u32 %v17000_v52, %v4542_v3  ;;  %v15308_v50 = vpop.permute.xlu1 %8422 }
 0x99a   :  { %v4218_v25 = vsel %vm4208_vm15, nan, %v4217_v41  ;;  %v7540_v15 = vsel %vm4208_vm15, nan, %v7539_v12  ;;  %v4394_v4 = vsub.s32 32, %v4393_v45  ;;  %v4395_v28 = vshll.u32 %v15271_v36, %v4393_v45  ;;  %17071 = vst [vmem:[#allocation49_spill] sm:$0xff] %v15308_v50 }
 0x99b   :  { %v8190_v44 = vsub.f32 %v4218_v25, %v7540_v15  ;;  %v8254_v43 = vadd.f32 %v7540_v15, %v4218_v25  ;;  %v4398_v32 = vsub.s32 4294967266, %v4393_v45  ;;  %v4544_v42 = vshrl.u32 %v17000_v52, %v4543_v20 }
 0x99c   :  { %v4396_v54 = vshrl.u32 %v4378_v53, %v4394_v4  ;;  %v4546_v29 = vshrl.u32 %v16998_v0, %v4543_v20  ;;  %v4548_v14 = vshll.u32 %v16998_v0, %v4542_v3  ;;  %v4549_v17 = vshrl.u32 %v16999_v61, %v4543_v20 }
 0x99d   :  { %v15315_v62 = vmul.f32 0.70710677, %v8190_v44  ;;  %v8286_v30 = vmul.f32 0.70710677, %v8254_v43  ;;  %v4399_v36 = vadd.s32 127, %v4398_v32  ;;  %v4551_v41 = vshll.u32 %v16999_v61, %v4542_v3  ;;  %v15319_v7 = vpop.permute.xlu1 %8432 }
 0x99e   :  { %v4397_v12 = vor.u32 %v4396_v54, %v4395_v28  ;;  %v4547_v25 = vor.u32 %v4546_v29, %v4545_v51  ;;  %v4550_v45 = vor.u32 %v4549_v17, %v4548_v14  ;;  %v4552_v15 = vshrl.u32 %v16984_v11, %v4543_v20  ;;  %17072 = vst [vmem:[#allocation50_spill] sm:$0xff] %v15319_v7  ;;  %v17173_v7 = vld [vmem:[#allocation14_spill] sm:$0xff] }
 0x99f   :  { %v15322_v53 = vsub.f32 %v8286_v30, %v15315_v62  ;;  %v17073_v4 = vand.u32 2147483647, %v15095_v10  ;;  %v4400_v44 = vshll.u32 %v4399_v36, 23  ;;  %v4554_v43 = vshll.u32 %v16984_v11, %v4542_v3 }
 0x9a0   :  { %v4555_v28 = vshrl.u32 %v16990_v38, %v4543_v20  ;;  %v4404_v51 = vcvt.s32.f32 %v4397_v12  ;;  %v4553_v32 = vor.u32 %v4552_v15, %v4551_v41  ;;  %v4557_v54 = vshll.u32 %v16990_v38, %v4542_v3 }
 0x9a1   :  { %vm15326_vm11 = vcmp.le.f32.partialorder %v17073_v4, 0.7853982  ;;  %v4558_v29 = vshrl.u32 %v16994_v35, %v4543_v20  ;;  %8818 = vperm.xlu1 %11461, %v15322_v53   ;;  %v4401_v14 = vor.u32 4788187, %v4400_v44  ;;  %vm4560_vm9 = vcmp.lt.s32.totalorder %v15295_v18, 1  ;;  %8457 = vperm.xlu0 %11459, %v15322_v53   ;;  %v15340_v15 = vpop.permute.xlu1 %8442 }
 0x9a2   :  { %v4556_v17 = vor.u32 %v4555_v28, %v4554_v43  ;;  %vm4561_vm13 = vcmp.lt.s32.totalorder %v15295_v18, 2  ;;  %vm4562_vm14 = vcmp.lt.s32.totalorder %v15295_v18, 3  ;;  %vm4563_vm10 = vcmp.lt.s32.totalorder %v15295_v18, 4  ;;  %17076 = vst [vmem:[#allocation51_spill] sm:$0xff] %v15340_v15 }
 0x9a3   :  { %v4559_v30 = vor.u32 %v4558_v29, %v4557_v54  ;;  %v4564_v36 = vsel %vm4560_vm9, %v4544_v42, %v4547_v25  ;;  %v4402_v41 = vand.u32 2147483647, %v4401_v14  ;;  %v4565_v3 = vsel %vm4563_vm10, %v4553_v32, 2102212464 }
 0x9a4   :  { %v4568_v12 = vsel %vm4560_vm9, %v4547_v25, %v4550_v45  ;;  %v4569_v20 = vsel %vm4563_vm10, %v4556_v17, 920167782  ;;  %v4566_v4 = vsel %vm4562_vm14, %v4550_v45, %v4565_v3  ;;  %v4572_v43 = vsel %vm4560_vm9, %v4550_v45, %v4553_v32 }
 0x9a5   :  { %v4570_v44 = vsel %vm4562_vm14, %v4553_v32, %v4569_v20  ;;  %v4573_v28 = vsel %vm4563_vm10, %v4559_v30, 1326507024  ;;  %v4405_v24 = vmul.f32 %v4404_v51, %v4402_v41  ;;  %v4409_v54 = vsel %vm4324_vm7, %v17077_v2, %v15259_v27  ;;  %v15369_v3 = vpop.permute.xlu1 %8452 }
 0x9a6   :  { %v4571_v42 = vsel %vm4561_vm13, %v4568_v12, %v4570_v44  ;;  %v4574_v29 = vsel %vm4562_vm14, %v4556_v17, %v4573_v28  ;;  %v4567_v25 = vsel %vm4561_vm13, %v4564_v36, %v4566_v4  ;;  %v4744_v2 = vadd.s32 1, %v15297_v16  ;;  %17078 = vst [vmem:[#allocation52_spill] sm:$0xff] %v15369_v3 }
 0x9a7   :  { %v4575_v14 = vsel %vm4561_vm13, %v4572_v43, %v4574_v29  ;;  %v15354_v45 = vmul.u32.u64.low %v15290_v1, %v4571_v42  ;;  %v15355_v32 = vmul.u32.u64.high %v15290_v1, %v4571_v42, %v15354_v45  ;;  %v4406_v51 = vxor.u32 2147483648, %v4405_v24 }
 0x9a8   :  { %v15359_v30 = vmul.u32.u64.low %v15290_v1, %v4575_v14  ;;  %v15360_v41 = vmul.u32.u64.high %v15290_v1, %v4575_v14, %v15359_v30  ;;  %v4411_v27 = vsel %vm15326_vm11, 0, %v4409_v54  ;;  %v16932_v17 = vand.u32 2147483647, %v15275_v56 }
 0x9a9   :  { %v4407_v18 = vsel %vm4324_vm7, %v4406_v51, %v4405_v24  ;;  %v4583_v36 = vmul.u32 %v15290_v1, %v4567_v25  ;;  %vm4745_vm15 = vcmp.gt.s32.totalorder %v4744_v2, 0  ;;  %v15374_v20 = vand.u32 3, %v4411_v27  ;;  %v15386_v25 = vpop.permute.xlu1 %8462 }
 0x9aa   :  { %v4410_v12 = vsel %vm15326_vm11, %v15095_v10, %v4407_v18  ;;  %v4586_v16 = vadd.s32 1, %v15355_v32  ;;  %v4746_v4 = vsel %vm4745_vm15, %v4744_v2, 0  ;;  %v7738_v44 = vadd.s32 3, %v4411_v27  ;;  %17079 = vst [vmem:[#allocation53_spill] sm:$0xff] %v15386_v25 }
 0x9ab   :  { %11701 = vcosq.f32 %v4410_v12  ;;  %vm4585_vm1 = vc.u32 %v15360_v41, %v15354_v45  ;;  %v4741_v1 = vand.u32 8388607, %v16932_v17  ;;  %v4748_v43 = vand.u32 31, %v4746_v4 }
 0x9ac   :  { %11703 = vsinq.f32 %v4410_v12  ;;  %v4587_v24 = vsel %vm4585_vm1, %v4586_v16, %v15355_v32  ;;  %vm4417_vm5 = vcmp.eq.s32.totalorder %v15374_v20, 0  ;;  %vm4416_vm3 = vcmp.lt.s32.totalorder %v15374_v20, 2 }
 0x9ad   :  { %v4588_v28 = vadd.s32 %v4587_v24, %v4583_v36  ;;  %v4749_v9 = vsub.s32 32, %v4748_v43  ;;  %vm4420_vm2 = vcmp.eq.s32.totalorder %v15374_v20, 2  ;;  %v7739_v54 = vand.u32 3, %v7738_v44 }
 0x9ae   :  { %v4760_v29 = vshll.u32 %v16984_v11, %v4748_v43  ;;  %vm4414_vm4 = vweird.f32 %v15095_v10  ;;  %v4742_v14 = vor.u32 8388608, %v4741_v1  ;;  %v15389_v32 = vshrl.u32 %v4746_v4, 5 }
 0x9af   :  { %v4589_v42 = vadd.s32 536870912, %v4588_v28  ;;  %v4751_v51 = vshll.u32 %v17000_v52, %v4748_v43  ;;  %v4754_v30 = vshll.u32 %v16998_v0, %v4748_v43  ;;  %v4761_v27 = vshrl.u32 %v16990_v38, %v4749_v9 }
 0x9b0   :  { %v4763_v18 = vshll.u32 %v16990_v38, %v4748_v43  ;;  %v4764_v36 = vshrl.u32 %v16994_v35, %v4749_v9  ;;  %v4752_v12 = vshrl.u32 %v16998_v0, %v4749_v9  ;;  %v4755_v16 = vshrl.u32 %v16999_v61, %v4749_v9 }
 0x9b1   :  { %v15393_v2 = vshrl.u32 %v4589_v42, 30  ;;  %v4757_v44 = vshll.u32 %v16999_v61, %v4748_v43  ;;  %v4758_v4 = vshrl.u32 %v16984_v11, %v4749_v9  ;;  %vm7740_vm8 = vcmp.lt.s32.totalorder %v7739_v54, 2  ;;  %v15409_v11 = vpop.permute.xlu1 %8472 }
 0x9b2   :  { %vm7741_vm6 = vcmp.eq.s32.totalorder %v7739_v54, 0  ;;  %v4762_v1 = vor.u32 %v4761_v27, %v4760_v29  ;;  %vm7744_vm12 = vcmp.eq.s32.totalorder %v7739_v54, 2  ;;  %v4750_v42 = vshrl.u32 %v17000_v52, %v4749_v9  ;;  %17080 = vst [vmem:[#allocation54_spill] sm:$0xff] %v15409_v11 }
 0x9b3   :  { %v4591_v24 = vshll.u32 %v15393_v2, 30  ;;  %vm4769_vm7 = vcmp.lt.s32.totalorder %v15389_v32, 4  ;;  %v15405_v38 = vshll.u32 %v4742_v14, 8  ;;  %v4765_v17 = vor.u32 %v4764_v36, %v4763_v18 }
 0x9b4   :  { %vm4766_vm11 = vcmp.lt.s32.totalorder %v15389_v32, 1  ;;  %vm4767_vm9 = vcmp.lt.s32.totalorder %v15389_v32, 2  ;;  %v4753_v25 = vor.u32 %v4752_v12, %v4751_v51  ;;  %v4756_v29 = vor.u32 %v4755_v16, %v4754_v30 }
 0x9b5   :  { %v11702_v35 = vpop.eup %11701  ;;  %v4592_v0 = vsub.s32 %v4588_v28, %v4591_v24  ;;  %v4759_v27 = vor.u32 %v4758_v4, %v4757_v44  ;;  %vm4768_vm13 = vcmp.lt.s32.totalorder %v15389_v32, 3  ;;  %v4775_v9 = vsel %vm4769_vm7, %v4762_v1, 920167782  ;;  %v15439_v20 = vpop.permute.xlu1 %8482 }
 0x9b6   :  { %v11704_v61 = vpop.eup %11703  ;;  %v4421_v43 = vxor.u32 2147483648, %v11702_v35  ;;  %v4770_v18 = vsel %vm4766_vm11, %v4750_v42, %v4753_v25  ;;  %v4779_v16 = vsel %vm4769_vm7, %v4765_v17, 1326507024  ;;  %v4774_v24 = vsel %vm4766_vm11, %v4753_v25, %v4756_v29  ;;  %17081 = vst [vmem:[#allocation55_spill] sm:$0xff] %v15439_v20 }
 0x9b7   :  { %v4418_v3 = vxor.u32 2147483648, %v11704_v61  ;;  %v4594_v52 = vsub.s32 0, %v4592_v0  ;;  %v4771_v51 = vsel %vm4769_vm7, %v4759_v27, 2102212464  ;;  %v4776_v42 = vsel %vm4768_vm13, %v4759_v27, %v4775_v9 }
 0x9b8   :  { %v4422_v28 = vsel %vm4420_vm2, %v4421_v43, %v11704_v61  ;;  %v7746_v14 = vsel %vm7744_vm12, %v4421_v43, %v11704_v61  ;;  %v4778_v17 = vsel %vm4766_vm11, %v4756_v29, %v4759_v27  ;;  %v4772_v25 = vsel %vm4768_vm13, %v4756_v29, %v4771_v51 }
 0x9b9   :  { %v4419_v30 = vsel %vm4417_vm5, %v11702_v35, %v4418_v3  ;;  %v7743_v36 = vsel %vm7741_vm6, %v11702_v35, %v4418_v3  ;;  %v10652_v12 = vmin.u32 %v4594_v52, %v4592_v0  ;;  %v4780_v52 = vsel %vm4768_vm13, %v4762_v1, %v4779_v16 }
 0x9ba   :  { %v4423_v44 = vsel %vm4416_vm3, %v4419_v30, %v4422_v28  ;;  %v7747_v4 = vsel %vm7740_vm8, %v7743_v36, %v7746_v14  ;;  %v4777_v28 = vsel %vm4767_vm9, %v4774_v24, %v4776_v42  ;;  %v4584_v27 = vadd.s32 %v15354_v45, %v15360_v41  ;;  %v15466_v24 = vpop.permute.xlu1 %8524 }
 0x9bb   :  { %v4424_v61 = vsel %vm4414_vm4, nan, %v4423_v44  ;;  %v7748_v3 = vsel %vm4414_vm4, nan, %v7747_v4  ;;  %v4596_v35 = vclz %v10652_v12  ;;  %v4781_v30 = vsel %vm4767_vm9, %v4778_v17, %v4780_v52  ;;  %17083 = vst [vmem:[#allocation57_spill] sm:$0xff] %v15466_v24 }
 0x9bc   :  { %v8192_v54 = vsub.f32 %v4424_v61, %v7748_v3  ;;  %v8256_v43 = vadd.f32 %v7748_v3, %v4424_v61  ;;  %v4773_v29 = vsel %vm4767_vm9, %v4770_v18, %v4772_v25  ;;  %vm4530_vm15 = vcmp.lt.s32.totalorder %v15257_v57, 0 }
 0x9bd   :  { %v10653_v9 = vadd.s32 4294967294, %v4596_v35  ;;  %v15456_v51 = vmul.u32.u64.low %v15405_v38, %v4781_v30  ;;  %v15457_v1 = vmul.u32.u64.high %v15405_v38, %v4781_v30, %v15456_v51  ;;  %v4789_v42 = vmul.u32 %v15405_v38, %v4773_v29 }
 0x9be   :  { %v15447_v10 = vmul.f32 0.70710677, %v8192_v54  ;;  %v8288_v14 = vmul.f32 0.70710677, %v8256_v43  ;;  %v15463_v16 = vmul.u32.u64.low %v15405_v38, %v4777_v28  ;;  %v15464_v44 = vmul.u32.u64.high %v15405_v38, %v4777_v28, %v15463_v16  ;;  %v15474_v25 = vpop.permute.xlu1 %8534 }
 0x9bf   :  { %vm10654_vm14 = vcmp.lt.s32.totalorder %v10653_v9, 0  ;;  %17084 = vst [vmem:[#allocation58_spill] sm:$0xff] %v15474_v25  ;;  %v17085_v38 = vand.u32 2147483647, %v15257_v57  ;;  %vm4620_vm7 = vweird.f32 %v15257_v57  ;;  %vm4736_vm11 = vcmp.lt.s32.totalorder %v15275_v56, 0 }
 0x9c0   :  { %v15460_v36 = vsub.f32 %v8288_v14, %v15447_v10  ;;  %v4599_v12 = vsel %vm10654_vm14, 0, %v10653_v9  ;;  %vm4791_vm10 = vc.u32 %v15457_v1, %v15463_v16  ;;  %v4792_v61 = vadd.s32 1, %v15464_v44 }
 0x9c1   :  { %v4600_v45 = vsub.s32 32, %v4599_v12  ;;  %v4601_v41 = vshll.u32 %v4592_v0, %v4599_v12  ;;  %v4604_v4 = vsub.s32 4294967266, %v4599_v12  ;;  %v4614_v9 = vsub.s32 4, %v15393_v2 }
 0x9c2   :  { %17082 = vst [vmem:[#allocation56_spill] sm:$0xff] %v15460_v36  ;;  %8826 = vperm.xlu1 %11461, %v15460_v36   ;;  %8467 = vperm.xlu0 %11459, %v15460_v36   ;;  %v4793_v17 = vsel %vm4791_vm10, %v4792_v61, %v15464_v44  ;;  %vm4529_vm1 = vcmp.le.f32.partialorder %v17085_v38, 0.7853982  ;;  %v15484_v12 = vpop.permute.xlu1 %8544 }
 0x9c3   :  { %v4602_v32 = vshrl.u32 %v4584_v27, %v4600_v45  ;;  %v4605_v18 = vadd.s32 127, %v4604_v4  ;;  %v4794_v43 = vadd.s32 %v4793_v17, %v4789_v42  ;;  %v4615_v29 = vsel %vm4530_vm15, %v4614_v9, %v15393_v2  ;;  %17086 = vst [vmem:[#allocation59_spill] sm:$0xff] %v15484_v12  ;;  %v17141_v12 = vld [vmem:[#allocation23_spill] sm:$0xff] }
 0x9c4   :  { %v4617_v4 = vsel %vm4529_vm1, 0, %v4615_v29 }
 0x9c5   :  { %v4603_v3 = vor.u32 %v4602_v32, %v4601_v41  ;;  %v4606_v35 = vshll.u32 %v4605_v18, 23  ;;  %v4795_v28 = vadd.s32 536870912, %v4794_v43  ;;  %v11054_v18 = vpop.f32.mrb[8].mxu1  ;;  %v7946_v42 = vadd.s32 3, %v4617_v4 }
 0x9c6   :  { %v4621_v17 = vand.u32 3, %v4617_v4 }
 0x9c7   :  { %v4607_v0 = vor.u32 4788187, %v4606_v35  ;;  %v4610_v54 = vcvt.s32.f32 %v4603_v3  ;;  %v15477_v27 = vshrl.u32 %v4795_v28, 30  ;;  %v15487_v3 = vpop.permute.xlu1 %8554  ;;  %v965_v35 = vpop.f32.mrb[9].mxu1 }
 0x9c8   :  { %17087 = vst [vmem:[#allocation60_spill] sm:$0xff] %v15487_v3  ;;  %11059 = vmatprep.mubr.msk.f32.mxu0 %vm23_vm0, %v965_v35  ;;  %vm4626_vm3 = vcmp.eq.s32.totalorder %v4621_v17, 2  ;;  %vm4622_vm4 = vcmp.lt.s32.totalorder %v4621_v17, 2  ;;  %vm4623_vm8 = vcmp.eq.s32.totalorder %v4621_v17, 0  ;;  %v17091_v17 = vand.u32 2147483647, %v15275_v56 }
 0x9c9   :  { %v4608_v52 = vand.u32 2147483647, %v4607_v0  ;;  %v4797_v51 = vshll.u32 %v15477_v27, 30  ;;  %11060 = vmatmul.mubr.msk.f32.vlgmr.msra.gmra.mrb[10].mxu0 %vm23_vm0, %v11054_v18  ;;  %v7947_v0 = vand.u32 3, %v7946_v42  ;;  %v17138_v3 = vld [vmem:[#allocation21_spill] sm:$0xff] }
 0x9ca   :  { %vm4735_vm9 = vcmp.le.f32.partialorder %v17091_v17, 0.7853982 }
 0x9cb   :  { %v4611_v14 = vmul.f32 %v4610_v54, %v4608_v52  ;;  %v4798_v45 = vsub.s32 %v4794_v43, %v4797_v51  ;;  %v4790_v43 = vadd.s32 %v15463_v16, %v15457_v1  ;;  %v15492_v52 = vpop.permute.xlu1 %8564  ;;  %vm7952_vm2 = vcmp.eq.s32.totalorder %v7947_v0, 2 }
 0x9cc   :  { %17088 = vst [vmem:[#allocation61_spill] sm:$0xff] %v15492_v52  ;;  %vm7949_vm6 = vcmp.eq.s32.totalorder %v7947_v0, 0  ;;  %vm7948_vm12 = vcmp.lt.s32.totalorder %v7947_v0, 2 }
 0x9cd   :  { %v4612_v30 = vxor.u32 2147483648, %v4611_v14  ;;  %v4800_v32 = vsub.s32 0, %v4798_v45 }
 0x9cf   :  { %v4613_v44 = vsel %vm4530_vm15, %v4612_v30, %v4611_v14  ;;  %v10660_v61 = vmin.u32 %v4800_v32, %v4798_v45 }
 0x9d0   :  { %v4616_v41 = vsel %vm4529_vm1, %v15257_v57, %v4613_v44  ;;  %v4820_v57 = vsub.s32 4, %v15477_v27 }
 0x9d1   :  { %11705 = vcosq.f32 %v4616_v41  ;;  %v4802_v2 = vclz %v10660_v61 }
 0x9d2   :  { %11707 = vsinq.f32 %v4616_v41 }
 0x9d3   :  { %v10661_v54 = vadd.s32 4294967294, %v4802_v2 }
 0x9d5   :  { %vm10662_vm5 = vcmp.lt.s32.totalorder %v10661_v54, 0 }
 0x9d6   :  { %v4805_v9 = vsel %vm10662_vm5, 0, %v10661_v54 }
 0x9d7   :  { %v4806_v14 = vsub.s32 32, %v4805_v9  ;;  %v4807_v38 = vshll.u32 %v4798_v45, %v4805_v9  ;;  %v4810_v30 = vsub.s32 4294967266, %v4805_v9  ;;  %v15496_v45 = vpop.permute.xlu1 %8574 }
 0x9d8   :  { %17089 = vst [vmem:[#allocation62_spill] sm:$0xff] %v15496_v45  ;;  %v17133_v45 = vld [vmem:[#allocation17_spill] sm:$0xff] }
 0x9d9   :  { %v4808_v41 = vshrl.u32 %v4790_v43, %v4806_v14  ;;  %v4811_v4 = vadd.s32 127, %v4810_v30 }
 0x9db   :  { %v11706_v28 = vpop.eup %11705  ;;  %v4809_v42 = vor.u32 %v4808_v41, %v4807_v38  ;;  %v4812_v61 = vshll.u32 %v4811_v4, 23  ;;  %v15502_v38 = vpop.permute.xlu1 %8584  ;;  %v4821_v41 = vsel %vm4736_vm11, %v4820_v57, %v15477_v27 }
 0x9dc   :  { %v11708_v29 = vpop.eup %11707  ;;  %v4627_v51 = vxor.u32 2147483648, %v11706_v28  ;;  %17090 = vst [vmem:[#allocation63_spill] sm:$0xff] %v15502_v38 }
 0x9dd   :  { %v4624_v44 = vxor.u32 2147483648, %v11708_v29  ;;  %v4813_v20 = vor.u32 4788187, %v4812_v61  ;;  %v4816_v0 = vcvt.s32.f32 %v4809_v42 }
 0x9de   :  { %v4628_v1 = vsel %vm4626_vm3, %v4627_v51, %v11708_v29  ;;  %v7954_v16 = vsel %vm7952_vm2, %v4627_v51, %v11708_v29  ;;  %vm4826_vm3 = vweird.f32 %v15275_v56  ;;  %vm10458_vm2 = vcmask 31744  }
 0x9df   :  { %v4625_v32 = vsel %vm4623_vm8, %v11706_v28, %v4624_v44  ;;  %v7951_v18 = vsel %vm7949_vm6, %v11706_v28, %v4624_v44  ;;  %v4814_v30 = vand.u32 2147483647, %v4813_v20 }
 0x9e0   :  { %v4629_v35 = vsel %vm4622_vm4, %v4625_v32, %v4628_v1  ;;  %v7955_v2 = vsel %vm7948_vm12, %v7951_v18, %v7954_v16  ;;  %v4823_v1 = vsel %vm4735_vm9, 0, %v4821_v41  ;;  %v15514_v16 = vpop.permute.xlu1 %8594 }
 0x9e1   :  { %v4630_v54 = vsel %vm4620_vm7, nan, %v4629_v35  ;;  %v7956_v9 = vsel %vm4620_vm7, nan, %v7955_v2  ;;  %v4817_v28 = vmul.f32 %v4816_v0, %v4814_v30  ;;  %17092 = vst [vmem:[#allocation64_spill] sm:$0xff] %v15514_v16  ;;  %v8154_v32 = vadd.s32 3, %v4823_v1  ;;  %v17131_v16 = vld [vmem:[#allocation15_spill] sm:$0xff] }
 0x9e2   :  { %v8194_v43 = vsub.f32 %v4630_v54, %v7956_v9  ;;  %v8258_v14 = vadd.f32 %v7956_v9, %v4630_v54  ;;  %v4827_v18 = vand.u32 3, %v4823_v1 }
 0x9e3   :  { %v4818_v44 = vxor.u32 2147483648, %v4817_v28  ;;  %v8155_v42 = vand.u32 3, %v8154_v32 }
 0x9e4   :  { %v15500_v11 = vmul.f32 0.70710677, %v8194_v43  ;;  %v8290_v29 = vmul.f32 0.70710677, %v8258_v14  ;;  %v15516_v61 = vpop.permute.xlu1 %8604  ;;  %vm4832_vm13 = vcmp.eq.s32.totalorder %v4827_v18, 2  ;;  %vm4829_vm10 = vcmp.eq.s32.totalorder %v4827_v18, 0 }
 0x9e5   :  { %v4819_v20 = vsel %vm4736_vm11, %v4818_v44, %v4817_v28  ;;  %17093 = vst [vmem:[#allocation65_spill] sm:$0xff] %v15516_v61  ;;  %vm8160_vm14 = vcmp.eq.s32.totalorder %v8155_v42, 2  ;;  %vm8157_vm15 = vcmp.eq.s32.totalorder %v8155_v42, 0  ;;  %vm4828_vm1 = vcmp.lt.s32.totalorder %v4827_v18, 2  ;;  %v17174_v61 = vld [vmem:[#allocation16_spill] sm:$0xff] }
 0x9e6   :  { %v15505_v51 = vsub.f32 %v8290_v29, %v15500_v11  ;;  %v4822_v4 = vsel %vm4735_vm9, %v15275_v56, %v4819_v20  ;;  %vm8156_vm5 = vcmp.lt.s32.totalorder %v8155_v42, 2  ;;  %v1056_v42 = vpop.permute.xlu0 %1055 }
 0x9e7   :  { %11709 = vcosq.f32 %v4822_v4  ;;  %11294 = vpush %v1056_v42 }
 0x9e8   :  { %8834 = vperm.xlu1 %11461, %v15505_v51   ;;  %8477 = vperm.xlu0 %11459, %v15505_v51   ;;  %11711 = vsinq.f32 %v4822_v4  ;;  %v15518_v9 = vpop.permute.xlu1 %8614  ;;  %11296 = vpush %v15087_v63 }
 0x9e9   :  { %17094 = vst [vmem:[#allocation66_spill] sm:$0xff] %v15518_v9 }
 0x9ec   :  { %v15521_v20 = vpop.permute.xlu1 %8624 }
 0x9ed   :  { %17095 = vst [vmem:[#allocation67_spill] sm:$0xff] %v15521_v20  ;;  %v17172_v20 = vld [vmem:[#allocation34_spill] sm:$0xff] }
 0x9f0   :  { %v15530_v56 = vpop.permute.xlu1 %8634 }
 0x9f1   :  { %v11710_v35 = vpop.eup %11709  ;;  %17097 = vst [vmem:[#allocation69_spill] sm:$0xff] %v15530_v56  ;;  %v11720_v56 = vld [vmem:[%s16821_s2 + $0x28] sm:$0xff] }
 0x9f2   :  { %v11712_v27 = vpop.eup %11711  ;;  %v4833_v2 = vxor.u32 2147483648, %v11710_v35 }
 0x9f3   :  { %v4830_v54 = vxor.u32 2147483648, %v11712_v27 }
 0x9f4   :  { %v4834_v0 = vsel %vm4832_vm13, %v4833_v2, %v11712_v27  ;;  %v8162_v43 = vsel %vm8160_vm14, %v4833_v2, %v11712_v27  ;;  %v15534_v18 = vpop.permute.xlu1 %8644  ;;  %v1153_v27 = vpop.permute.xlu0 %1152 }
 0x9f5   :  { %v4831_v14 = vsel %vm4829_vm10, %v11710_v35, %v4830_v54  ;;  %v8159_v30 = vsel %vm8157_vm15, %v11710_v35, %v4830_v54  ;;  %17098 = vst [vmem:[#allocation70_spill] sm:$0xff] %v15534_v18  ;;  %11298 = vpush %v1153_v27 }
 0x9f6   :  { %v4835_v57 = vsel %vm4828_vm1, %v4831_v14, %v4834_v0  ;;  %v8163_v29 = vsel %vm8156_vm5, %v8159_v30, %v8162_v43  ;;  %11300 = vpush %v15114_v33  ;;  %v16935_v30 = vmov 2  }
 0x9f7   :  { %v4836_v28 = vsel %vm4826_vm3, nan, %v4835_v57  ;;  %v8164_v17 = vsel %vm4826_vm3, nan, %v8163_v29 }
 0x9f8   :  { %v8196_v44 = vsub.f32 %v4836_v28, %v8164_v17  ;;  %v8260_v41 = vadd.f32 %v8164_v17, %v4836_v28  ;;  %v15540_v35 = vpop.permute.xlu1 %8654  ;;  %v1250_v54 = vpop.permute.xlu0 %1249 }
 0x9f9   :  { %17099 = vst [vmem:[#allocation71_spill] sm:$0xff] %v15540_v35  ;;  %11302 = vpush %v1250_v54  ;;  %v17115_v54 = vmov 1  }
 0x9fa   :  { %v15523_v4 = vmul.f32 0.70710677, %v8196_v44  ;;  %v8292_v1 = vmul.f32 0.70710677, %v8260_v41  ;;  %11304 = vpush %v15126_v8  ;;  %v16933_v44 = vmov 3  }
 0x9fc   :  { %17096 = vst [vmem:[#allocation68_spill] sm:$0xff] %v15523_v4  ;;  %v15526_v32 = vsub.f32 %v8292_v1, %v15523_v4  ;;  %v15546_v2 = vpop.permute.xlu1 %8664  ;;  %v1347_v0 = vpop.permute.xlu0 %1346 }
 0x9fd   :  { %17100 = vst [vmem:[#allocation72_spill] sm:$0xff] %v15546_v2  ;;  %11306 = vpush %v1347_v0 }
 0x9fe   :  { %8842 = vperm.xlu1 %11461, %v15526_v32   ;;  %8487 = vperm.xlu0 %11459, %v15526_v32   ;;  %11308 = vpush %v15143_v58 }
 0xa00   :  { %v15553_v63 = vpop.permute.xlu1 %8674  ;;  %v15566_v43 = vpop.permute.xlu0 %8332 }
 0xa01   :  { %17101 = vst [vmem:[#allocation73_spill] sm:$0xff] %v15553_v63  ;;  %17104 = vst [vmem:[#allocation76_spill] sm:$0xff] %v15566_v43  ;;  %v17118_v63 = vmov 3   ;;  %v17144_v43 = vld [vmem:[#allocation25_spill] sm:$0xff] }
 0xa02   :  { %8882 = vperm.xlu1 %11461, %v12186_v49   ;;  %8529 = vperm.xlu0 %11459, %v12186_v49  }
 0xa04   :  { %v15558_v33 = vpop.permute.xlu1 %8718  ;;  %v15572_v14 = vpop.permute.xlu0 %8347 }
 0xa05   :  { %17102 = vst [vmem:[#allocation74_spill] sm:$0xff] %v15558_v33  ;;  %17106 = vst [vmem:[#allocation78_spill] sm:$0xff] %v15572_v14  ;;  %v17136_v14 = vld [vmem:[#allocation19_spill] sm:$0xff]  ;;  %v17145_v33 = vld [vmem:[#allocation4_spill] sm:$0xff] }
 0xa06   :  { %8890 = vperm.xlu1 %11461, %v14090_v37   ;;  %8539 = vperm.xlu0 %11459, %v14090_v37  }
 0xa08   :  { %v15564_v8 = vpop.permute.xlu1 %8726  ;;  %v15581_v29 = vpop.permute.xlu0 %8357 }
 0xa09   :  { %17103 = vst [vmem:[#allocation75_spill] sm:$0xff] %v15564_v8  ;;  %17108 = vst [vmem:[#allocation80_spill] sm:$0xff] %v15581_v29 }
 0xa0a   :  { %8898 = vperm.xlu1 %11461, %v14221_v5   ;;  %8549 = vperm.xlu0 %11459, %v14221_v5  }
 0xa0c   :  { %v15570_v58 = vpop.permute.xlu1 %8730  ;;  %v15587_v17 = vpop.permute.xlu0 %8367 }
 0xa0d   :  { %17105 = vst [vmem:[#allocation77_spill] sm:$0xff] %v15570_v58  ;;  %17110 = vst [vmem:[#allocation82_spill] sm:$0xff] %v15587_v17  ;;  %v17125_v17 = vld [vmem:[#allocation31_spill] sm:$0xff] }
 0xa0e   :  { %8906 = vperm.xlu1 %11461, %v14343_v59   ;;  %8559 = vperm.xlu0 %11459, %v14343_v59  }
 0xa10   :  { %v15579_v57 = vpop.permute.xlu1 %8738  ;;  %v15595_v1 = vpop.permute.xlu0 %8377 }
 0xa11   :  { %17107 = vst [vmem:[#allocation79_spill] sm:$0xff] %v15579_v57  ;;  %17112 = vst [vmem:[#allocation84_spill] sm:$0xff] %v15595_v1 }
 0xa12   :  { %8914 = vperm.xlu1 %11461, %v14478_v6   ;;  %8569 = vperm.xlu0 %11459, %v14478_v6  }
 0xa14   :  { %v15585_v28 = vpop.permute.xlu1 %8746  ;;  %v15603_v27 = vpop.permute.xlu0 %8387 }
 0xa15   :  { %17109 = vst [vmem:[#allocation81_spill] sm:$0xff] %v15585_v28  ;;  %17114 = vst [vmem:[#allocation86_spill] sm:$0xff] %v15603_v27  ;;  %v17121_v27 = vmov 2  }
 0xa16   :  { %8922 = vperm.xlu1 %11461, %v14566_v23   ;;  %8579 = vperm.xlu0 %11459, %v14566_v23  }
 0xa18   :  { %v15593_v41 = vpop.permute.xlu1 %8754  ;;  %s11295_s0 = spop %11294 }
 0xa19   :  { %17111 = vst [vmem:[#allocation83_spill] sm:$0xff] %v15593_v41  ;;  %s11297_s26 = spop %11296 }
 0xa1a   :  { %8930 = vperm.xlu1 %11461, %v14677_v39   ;;  %8589 = vperm.xlu0 %11459, %v14677_v39  }
 0xa1c   :  { %v15601_v42 = vpop.permute.xlu1 %8762 }
 0xa1d   :  { %17113 = vst [vmem:[#allocation85_spill] sm:$0xff] %v15601_v42  ;;  %v17126_v42 = vld [vmem:[#allocation11_spill] sm:$0xff] }
 0xa1e   :  { %8938 = vperm.xlu1 %11461, %v14824_v60   ;;  %8599 = vperm.xlu0 %11459, %v14824_v60  }
 0xa20   :  { %v15608_v0 = vpop.permute.xlu1 %8770 }
 0xa21   :  { %17116 = vst [vmem:[#allocation87_spill] sm:$0xff] %v15608_v0 }
 0xa22   :  { %8946 = vperm.xlu1 %11461, %v14928_v47   ;;  %8609 = vperm.xlu0 %11459, %v14928_v47  }
 0xa24   :  { %v15616_v2 = vpop.permute.xlu1 %8778 }
 0xa26   :  { %8954 = vperm.xlu1 %11461, %v15027_v31   ;;  %8619 = vperm.xlu0 %11459, %v15027_v31   ;;  %s11299_s8 = spop %11298 }
 0xa27   :  { %s11301_s9 = spop %11300 }
 0xa28   :  { %v15624_v0 = vpop.permute.xlu1 %8786 }
 0xa2a   :  { %11463 = vset.pattern.permute.xlu1 %v16935_v30  ;;  %8629 = vperm.xlu0 %11459, %v15141_v22   ;;  %s11303_s14 = spop %11302 }
 0xa2b   :  { %9077 = vperm.xlu1 %11463, %v12193_v13   ;;  %s11305_s15 = spop %11304 }
 0xa2c   :  { %v15631_v41 = vpop.permute.xlu1 %8794 }
 0xa2e   :  { %8639 = vperm.xlu0 %11459, %v15265_v21   ;;  %s11307_s16 = spop %11306 }
 0xa2f   :  { %9233 = vperm.xlu1 %11463, %v13939_v19   ;;  %s11309_s21 = spop %11308 }
 0xa30   :  { %v15638_v8 = vpop.permute.xlu1 %8802 }
 0xa31   :  { %17130 = vst [vmem:[#allocation11_spill] sm:$0xff] %v15638_v8 }
 0xa32   :  { %8649 = vperm.xlu0 %11459, %v15315_v62  }
 0xa33   :  { %9237 = vperm.xlu1 %11463, %v12186_v49  }
 0xa34   :  { %v15647_v52 = vpop.permute.xlu1 %8810 }
 0xa35   :  { %17134 = vst [vmem:[#allocation15_spill] sm:$0xff] %v15647_v52 }
 0xa36   :  { %8659 = vperm.xlu0 %11459, %v15447_v10  }
 0xa37   :  { %11464 = vset.pattern.permute.xlu1 %v16933_v44  ;;  %v15611_v44 = vpop.permute.xlu0 %8397 }
 0xa38   :  { %9431 = vperm.xlu1 %11464, %v12193_v13   ;;  %17117 = vst [vmem:[#allocation88_spill] sm:$0xff] %v15611_v44  ;;  %v17123_v44 = vld [vmem:[#allocation9_spill] sm:$0xff]  ;;  %v15653_v57 = vpop.permute.xlu1 %8818 }
 0xa39   :  { %17127 = vst [vmem:[#allocation9_spill] sm:$0xff] %v15631_v41  ;;  %17137 = vst [vmem:[#allocation19_spill] sm:$0xff] %v15653_v57 }
 0xa3a   :  { %8669 = vperm.xlu0 %11459, %v15500_v11  }
 0xa3b   :  { %v15618_v35 = vpop.permute.xlu0 %8407 }
 0xa3c   :  { %9587 = vperm.xlu1 %11464, %v13939_v19  }
 0xa3e   :  { %8679 = vperm.xlu0 %11459, %v15523_v4  }
 0xa3f   :  { %v15627_v1 = vpop.permute.xlu0 %8417 }
 0xa40   :  { %11465 = vset.pattern.permute.xlu1 %v16935_v30  ;;  %v17119_v30 = vld [vmem:[#allocation5_spill] sm:$0xff] }
 0xa41   :  { %9085 = vperm.xlu1 %11465, %v14103_v34   ;;  %17122 = vst [vmem:[#allocation5_spill] sm:$0xff] %v15624_v0  ;;  %v15661_v25 = vpop.permute.xlu1 %8826  ;;  %v11719_v0 = vld [vmem:[%s16821_s2 + $0x20] sm:$0xff] }
 0xa42   :  { %11462 = vset.pattern.permute.xlu0 %v17115_v54 }
 0xa43   :  { %8722 = vperm.xlu0 %11462, %v12193_v13   ;;  %v17120_v13 = vld [vmem:[#allocation7_spill] sm:$0xff]  ;;  %v15633_v28 = vpop.permute.xlu0 %8427 }
 0xa44   :  { %17124 = vst [vmem:[#allocation7_spill] sm:$0xff] %v15627_v1  ;;  %17128 = vst [vmem:[#allocation31_spill] sm:$0xff] %v15633_v28 }
 0xa45   :  { %9241 = vperm.xlu1 %11465, %v12225_v46  }
 0xa47   :  { %8734 = vperm.xlu0 %11462, %v12343_v55   ;;  %v15641_v38 = vpop.permute.xlu0 %8437 }
 0xa49   :  { %11466 = vset.pattern.permute.xlu1 %v17118_v63 }
 0xa4a   :  { %9435 = vperm.xlu1 %11466, %v12232_v48  }
 0xa4b   :  { %8742 = vperm.xlu0 %11462, %v17119_v30   ;;  %v15649_v29 = vpop.permute.xlu0 %8447 }
 0xa4c   :  { %17135 = vst [vmem:[#allocation17_spill] sm:$0xff] %v15649_v29  ;;  %v17149_v29 = vld [vmem:[#allocation29_spill] sm:$0xff] }
 0xa4e   :  { %9439 = vperm.xlu1 %11466, %v14103_v34   ;;  %v17129_v34 = vld [vmem:[#allocation13_spill] sm:$0xff] }
 0xa4f   :  { %8750 = vperm.xlu0 %11462, %v17120_v13   ;;  %17132 = vst [vmem:[#allocation13_spill] sm:$0xff] %v15641_v38  ;;  %v15656_v58 = vpop.permute.xlu0 %8457 }
 0xa50   :  { %17139 = vst [vmem:[#allocation21_spill] sm:$0xff] %v15656_v58  ;;  %v17147_v58 = vld [vmem:[#allocation27_spill] sm:$0xff] }
 0xa52   :  { %11467 = vset.pattern.permute.xlu1 %v17121_v27 }
 0xa53   :  { %9089 = vperm.xlu1 %11467, %v12343_v55   ;;  %8758 = vperm.xlu0 %11462, %v17123_v44   ;;  %v15663_v24 = vpop.permute.xlu0 %8467 }
 0xa54   :  { %17143 = vst [vmem:[#allocation23_spill] sm:$0xff] %v15663_v24 }
 0xa57   :  { %9093 = vperm.xlu1 %11467, %v17125_v17   ;;  %8766 = vperm.xlu0 %11462, %v17126_v42  }
 0xa5b   :  { %11468 = vset.pattern.permute.xlu1 %v17118_v63  ;;  %8774 = vperm.xlu0 %11462, %v17129_v34  }
 0xa5c   :  { %9599 = vperm.xlu1 %11468, %v14090_v37  }
 0xa5f   :  { %8782 = vperm.xlu0 %11462, %v17131_v16  }
 0xa60   :  { %9443 = vperm.xlu1 %11468, %v12343_v55   ;;  %v17140_v55 = vld [vmem:[#allocation3_spill] sm:$0xff] }
 0xa61   :  { %17142 = vst [vmem:[#allocation3_spill] sm:$0xff] %v15661_v25 }
 0xa63   :  { %8790 = vperm.xlu0 %11462, %v17133_v45  }
 0xa64   :  { %11469 = vset.pattern.permute.xlu1 %v17121_v27 }
 0xa65   :  { %9253 = vperm.xlu1 %11469, %v14221_v5  }
 0xa67   :  { %8798 = vperm.xlu0 %11462, %v17136_v14   ;;  %v15669_v57 = vpop.permute.xlu1 %8834  ;;  %v15672_v18 = vpop.permute.xlu0 %8477 }
 0xa68   :  { %17146 = vst [vmem:[#allocation4_spill] sm:$0xff] %v15669_v57  ;;  %17148 = vst [vmem:[#allocation27_spill] sm:$0xff] %v15672_v18 }
 0xa69   :  { %9097 = vperm.xlu1 %11469, %v17119_v30  }
 0xa6b   :  { %8806 = vperm.xlu0 %11462, %v17138_v3  }
 0xa6d   :  { %11470 = vset.pattern.permute.xlu1 %v17118_v63 }
 0xa6e   :  { %9603 = vperm.xlu1 %11470, %v17140_v55  }
 0xa6f   :  { %8814 = vperm.xlu0 %11462, %v17141_v12  }
 0xa72   :  { %9607 = vperm.xlu1 %11470, %v14221_v5   ;;  %v17152_v5 = vld [vmem:[#allocation32_spill] sm:$0xff] }
 0xa73   :  { %8822 = vperm.xlu0 %11462, %v17144_v43  }
 0xa76   :  { %11471 = vset.pattern.permute.xlu1 %v17121_v27 }
 0xa77   :  { %9257 = vperm.xlu1 %11471, %v17145_v33   ;;  %8830 = vperm.xlu0 %11462, %v17147_v58  }
 0xa7b   :  { %9261 = vperm.xlu1 %11471, %v14343_v59   ;;  %8838 = vperm.xlu0 %11462, %v17149_v29  }
 0xa7d   :  { %v15676_v25 = vpop.permute.xlu1 %8842  ;;  %v15678_v24 = vpop.permute.xlu0 %8487 }
 0xa7e   :  { %17150 = vst [vmem:[#allocation29_spill] sm:$0xff] %v15676_v25  ;;  %17151 = vst [vmem:[#allocation89_spill] sm:$0xff] %v15678_v24  ;;  %v17157_v25 = vld [vmem:[#allocation33_spill] sm:$0xff] }
 0xa7f   :  { %11472 = vset.pattern.permute.xlu1 %v17118_v63  ;;  %8878 = vperm.xlu0 %11462, %v13939_v19  }
 0xa80   :  { %9455 = vperm.xlu1 %11472, %v17152_v5  }
 0xa81   :  { %v15683_v52 = vpop.permute.xlu1 %8882  ;;  %v15685_v57 = vpop.permute.xlu0 %8529 }
 0xa82   :  { %17153 = vst [vmem:[#allocation32_spill] sm:$0xff] %v15683_v52  ;;  %17154 = vst [vmem:[#allocation90_spill] sm:$0xff] %v15685_v57  ;;  %v17160_v52 = vld [vmem:[#allocation6_spill] sm:$0xff] }
 0xa83   :  { %8886 = vperm.xlu0 %11462, %v12225_v46  }
 0xa84   :  { %9611 = vperm.xlu1 %11472, %v17145_v33  }
 0xa85   :  { %v15689_v18 = vpop.permute.xlu1 %8890  ;;  %v15691_v9 = vpop.permute.xlu0 %8539 }
 0xa86   :  { %17155 = vst [vmem:[#allocation91_spill] sm:$0xff] %v15689_v18  ;;  %17156 = vst [vmem:[#allocation92_spill] sm:$0xff] %v15691_v9 }
 0xa87   :  { %8894 = vperm.xlu0 %11462, %v17140_v55  }
 0xa88   :  { %11473 = vset.pattern.permute.xlu1 %v17121_v27 }
 0xa89   :  { %9109 = vperm.xlu1 %11473, %v17157_v25   ;;  %v15696_v19 = vpop.permute.xlu1 %8898  ;;  %v15698_v24 = vpop.permute.xlu0 %8549 }
 0xa8a   :  { %17158 = vst [vmem:[#allocation33_spill] sm:$0xff] %v15696_v19  ;;  %17159 = vst [vmem:[#allocation93_spill] sm:$0xff] %v15698_v24  ;;  %v17165_v19 = vld [vmem:[#allocation8_spill] sm:$0xff] }
 0xa8b   :  { %8902 = vperm.xlu0 %11462, %v17145_v33  }
 0xa8d   :  { %9265 = vperm.xlu1 %11473, %v17160_v52   ;;  %v15702_v57 = vpop.permute.xlu1 %8906  ;;  %v15704_v28 = vpop.permute.xlu0 %8559 }
 0xa8e   :  { %17161 = vst [vmem:[#allocation6_spill] sm:$0xff] %v15702_v57  ;;  %17162 = vst [vmem:[#allocation94_spill] sm:$0xff] %v15704_v28  ;;  %v17168_v57 = vld [vmem:[#allocation10_spill] sm:$0xff] }
 0xa8f   :  { %8910 = vperm.xlu0 %11462, %v17160_v52  }
 0xa91   :  { %11474 = vset.pattern.permute.xlu1 %v17118_v63  ;;  %v15708_v9 = vpop.permute.xlu1 %8914  ;;  %v15710_v18 = vpop.permute.xlu0 %8569 }
 0xa92   :  { %17163 = vst [vmem:[#allocation95_spill] sm:$0xff] %v15708_v9  ;;  %17164 = vst [vmem:[#allocation96_spill] sm:$0xff] %v15710_v18  ;;  %9459 = vperm.xlu1 %11474, %v17120_v13   ;;  %v17171_v18 = vld [vmem:[#allocation12_spill] sm:$0xff]  ;;  %v1058_v9 = vstv %s11295_s0 }
 0xa93   :  { %8918 = vperm.xlu0 %11462, %v17165_v19  }
 0xa95   :  { %v15714_v24 = vpop.permute.xlu1 %8922  ;;  %v15716_v33 = vpop.permute.xlu0 %8579 }
 0xa96   :  { %17166 = vst [vmem:[#allocation8_spill] sm:$0xff] %v15714_v24  ;;  %17167 = vst [vmem:[#allocation97_spill] sm:$0xff] %v15716_v33  ;;  %9463 = vperm.xlu1 %11474, %v17157_v25   ;;  %v15730_v33 = vld [vmem:[%s16821_s2] sm:$0xff]  ;;  %v1065_v24 = vstv %s11297_s26 }
 0xa97   :  { %8926 = vperm.xlu0 %11462, %v17168_v57   ;;  %v1060_v25 = vmul.f32 %v15730_v33, %v1058_v9  ;;  %v1067_v4 = vmul.f32 %v11719_v0, %v1065_v24  ;;  %v1068_v15 = vmul.f32 %v11720_v56, %v1065_v24 }
 0xa99   :  { %v15720_v28 = vpop.permute.xlu1 %8930  ;;  %v15722_v41 = vpop.permute.xlu0 %8589 }
 0xa9a   :  { %17169 = vst [vmem:[#allocation10_spill] sm:$0xff] %v15720_v28  ;;  %17170 = vst [vmem:[#allocation98_spill] sm:$0xff] %v15722_v41  ;;  %11475 = vset.pattern.permute.xlu1 %v17121_v27  ;;  %v15736_v41 = vld [vmem:[%s16821_s2 + $0x8] sm:$0xff] }
 0xa9b   :  { %9113 = vperm.xlu1 %11475, %v17123_v44   ;;  %8934 = vperm.xlu0 %11462, %v17171_v18   ;;  %v1061_v28 = vmul.f32 %v15736_v41, %v1058_v9  ;;  %v1069_v9 = vadd.f32 %v1067_v4, %v1060_v25  ;;  %v17175_v4 = vld [vmem:[#allocation18_spill] sm:$0xff] }
 0xa9c   :  { %v11061_v43 = vpop.f32.mrb[10].mxu0 }
 0xa9d   :  { %v15739_v50 = vpop.permute.xlu1 %8938  ;;  %v15741_v1 = vpop.permute.xlu0 %8599  ;;  %v1070_v38 = vadd.f32 %v1068_v15, %v1061_v28 }
 0xa9e   :  { %v1046_v15 = vpop.f32.mrb[11].mxu0 }
 0xa9f   :  { %9117 = vperm.xlu1 %11475, %v17172_v20   ;;  %8942 = vperm.xlu0 %11462, %v17173_v7   ;;  %v11238_v0 = vpack.c.bf16 %v1070_v38, %v1069_v9 }
 0xaa0   :  { %11066 = vmatprep.mubr.msk.f32.mxu1 %vm23_vm0, %v1046_v15 }
 0xaa1   :  { %v15751_v8 = vpop.permute.xlu1 %8946  ;;  %v15753_v36 = vpop.permute.xlu0 %8609  ;;  %11239 = vmatprep.subr.bf16.mxu1 %v11238_v0 }
 0xaa2   :  { %11241 = vmatpush3.bf16.msra.mxu1 %v11238_v0 }
 0xaa3   :  { %11476 = vset.pattern.permute.xlu1 %v17118_v63  ;;  %8950 = vperm.xlu0 %11462, %v17174_v61  }
 0xaa4   :  { %9623 = vperm.xlu1 %11476, %v14478_v6  }
 0xaa5   :  { %v15758_v26 = vpop.permute.xlu1 %8954  ;;  %v15760_v24 = vpop.permute.xlu0 %8619  ;;  %11067 = vmatmul.mubr.msk.f32.vlgmr.msra.gmra.mrb[10].mxu1 %vm23_vm0, %v11061_v43  ;;  %v17180_v43 = vld [vmem:[#allocation24_spill] sm:$0xff] }
 0xaa7   :  { %8958 = vperm.xlu0 %11462, %v17175_v4  }
 0xaa8   :  { %9467 = vperm.xlu1 %11476, %v17123_v44  }
 0xaa9   :  { %v15765_v56 = vpop.permute.xlu0 %8629 }
 0xaaa   :  { %v15768_v38 = vpop.permute.xlu1 %9077 }
 0xaab   :  { %17176 = vst [vmem:[#allocation12_spill] sm:$0xff] %v15768_v38  ;;  %8962 = vperm.xlu0 %11462, %v15141_v22  }
 0xaac   :  { %11477 = vset.pattern.permute.xlu1 %v17121_v27 }
 0xaad   :  { %9277 = vperm.xlu1 %11477, %v14566_v23   ;;  %v15773_v28 = vpop.permute.xlu0 %8639 }
 0xaae   :  { %v15775_v25 = vpop.permute.xlu1 %9233 }
 0xaaf   :  { %17177 = vst [vmem:[#allocation34_spill] sm:$0xff] %v15775_v25  ;;  %8970 = vperm.xlu0 %11462, %v15265_v21  }
 0xab1   :  { %9121 = vperm.xlu1 %11477, %v17126_v42   ;;  %v15779_v44 = vpop.permute.xlu0 %8649 }
 0xab2   :  { %17178 = vst [vmem:[#allocation14_spill] sm:$0xff] %v15779_v44  ;;  %v15781_v9 = vpop.permute.xlu1 %9237 }
 0xab3   :  { %17179 = vst [vmem:[#allocation16_spill] sm:$0xff] %v15781_v9  ;;  %8982 = vperm.xlu0 %11462, %v17180_v43  }
 0xab5   :  { %11478 = vset.pattern.permute.xlu1 %v17118_v63  ;;  %v15785_v0 = vpop.permute.xlu0 %8659 }
 0xab6   :  { %17181 = vst [vmem:[#allocation18_spill] sm:$0xff] %v15785_v0  ;;  %9627 = vperm.xlu1 %11478, %v17165_v19  }
 0xab7   :  { %v15788_v15 = vpop.permute.xlu1 %9431  ;;  %8986 = vperm.xlu0 %11462, %v15447_v10  }
 0xab8   :  { %17182 = vst [vmem:[#allocation24_spill] sm:$0xff] %v15788_v15  ;;  %v17187_v15 = vld [vmem:[#allocation30_spill] sm:$0xff] }
 0xab9   :  { %v15791_v38 = vpop.permute.xlu0 %8669 }
 0xaba   :  { %17183 = vst [vmem:[#allocation99_spill] sm:$0xff] %v15791_v38  ;;  %9631 = vperm.xlu1 %11478, %v14566_v23  }
 0xabb   :  { %v15794_v25 = vpop.permute.xlu1 %9587  ;;  %8994 = vperm.xlu0 %11462, %v15500_v11  }
 0xabc   :  { %17184 = vst [vmem:[#allocation100_spill] sm:$0xff] %v15794_v25 }
 0xabd   :  { %v15797_v9 = vpop.permute.xlu0 %8679 }
 0xabe   :  { %17185 = vst [vmem:[#allocation101_spill] sm:$0xff] %v15797_v9  ;;  %11479 = vset.pattern.permute.xlu1 %v17121_v27  ;;  %v17191_v9 = vld [vmem:[#allocation35_spill] sm:$0xff] }
 0xabf   :  { %9281 = vperm.xlu1 %11479, %v17168_v57   ;;  %11510 = vset.pattern.permute.xlu0 %v17121_v27 }
 0xac0   :  { %v15802_v0 = vpop.permute.xlu1 %9085  ;;  %9073 = vperm.xlu0 %11510, %v17187_v15  }
 0xac1   :  { %17186 = vst [vmem:[#allocation102_spill] sm:$0xff] %v15802_v0 }
 0xac2   :  { %v15805_v44 = vpop.permute.xlu0 %8722 }
 0xac3   :  { %17188 = vst [vmem:[#allocation30_spill] sm:$0xff] %v15805_v44  ;;  %9285 = vperm.xlu1 %11479, %v14677_v39  }
 0xac4   :  { %v15808_v23 = vpop.permute.xlu1 %9241  ;;  %9081 = vperm.xlu0 %11510, %v12232_v48   ;;  %v17194_v48 = vld [vmem:[#allocation36_spill] sm:$0xff] }
 0xac5   :  { %17189 = vst [vmem:[#allocation103_spill] sm:$0xff] %v15808_v23 }
 0xac6   :  { %v15811_v38 = vpop.permute.xlu0 %8734 }
 0xac7   :  { %17190 = vst [vmem:[#allocation104_spill] sm:$0xff] %v15811_v38  ;;  %11480 = vset.pattern.permute.xlu1 %v17118_v63 }
 0xac8   :  { %9479 = vperm.xlu1 %11480, %v17191_v9   ;;  %9245 = vperm.xlu0 %11510, %v14090_v37  }
 0xac9   :  { %v15816_v25 = vpop.permute.xlu1 %9435 }
 0xaca   :  { %v15818_v0 = vpop.permute.xlu0 %8742 }
 0xacc   :  { %9635 = vperm.xlu1 %11480, %v17168_v57   ;;  %9249 = vperm.xlu0 %11510, %v17140_v55  }
 0xacd   :  { %v15822_v44 = vpop.permute.xlu1 %9439 }
 0xace   :  { %17192 = vst [vmem:[#allocation35_spill] sm:$0xff] %v15822_v44  ;;  %v15824_v23 = vpop.permute.xlu0 %8750 }
 0xacf   :  { %17193 = vst [vmem:[#allocation105_spill] sm:$0xff] %v15824_v23 }
 0xad0   :  { %11481 = vset.pattern.permute.xlu1 %v17121_v27  ;;  %9101 = vperm.xlu0 %11510, %v17152_v5  }
 0xad1   :  { %9133 = vperm.xlu1 %11481, %v17194_v48  }
 0xad2   :  { %v15829_v38 = vpop.permute.xlu1 %9089  ;;  %v15831_v37 = vpop.permute.xlu0 %8758 }
 0xad3   :  { %17195 = vst [vmem:[#allocation36_spill] sm:$0xff] %v15829_v38  ;;  %17196 = vst [vmem:[#allocation106_spill] sm:$0xff] %v15831_v37 }
 0xad4   :  { %9105 = vperm.xlu0 %11510, %v17120_v13  }
 0xad5   :  { %9289 = vperm.xlu1 %11481, %v17171_v18  }
 0xad6   :  { %v15835_v57 = vpop.permute.xlu1 %9093  ;;  %v15837_v55 = vpop.permute.xlu0 %8766 }
 0xad7   :  { %17197 = vst [vmem:[#allocation107_spill] sm:$0xff] %v15835_v57  ;;  %17198 = vst [vmem:[#allocation108_spill] sm:$0xff] %v15837_v55 }
 0xad8   :  { %9269 = vperm.xlu0 %11510, %v14478_v6  }
 0xad9   :  { %11482 = vset.pattern.permute.xlu1 %v17118_v63 }
 0xada   :  { %9483 = vperm.xlu1 %11482, %v17129_v34   ;;  %v15842_v5 = vpop.permute.xlu0 %8774 }
 0xadb   :  { %17199 = vst [vmem:[#allocation109_spill] sm:$0xff] %v15842_v5  ;;  %v15844_v23 = vpop.permute.xlu1 %9599 }
 0xadc   :  { %17200 = vst [vmem:[#allocation110_spill] sm:$0xff] %v15844_v23  ;;  %9273 = vperm.xlu0 %11510, %v17165_v19   ;;  %v17203_v19 = vld [vmem:[#allocation37_spill] sm:$0xff] }
 0xade   :  { %9487 = vperm.xlu1 %11482, %v17194_v48   ;;  %v15848_v13 = vpop.permute.xlu0 %8782 }
 0xadf   :  { %v15850_v37 = vpop.permute.xlu1 %9443 }
 0xae0   :  { %17201 = vst [vmem:[#allocation111_spill] sm:$0xff] %v15850_v37  ;;  %9125 = vperm.xlu0 %11510, %v17191_v9  }
 0xae2   :  { %11483 = vset.pattern.permute.xlu1 %v17121_v27  ;;  %v15854_v6 = vpop.permute.xlu0 %8790 }
 0xae3   :  { %9137 = vperm.xlu1 %11483, %v17131_v16  }
 0xae4   :  { %v15857_v55 = vpop.permute.xlu1 %9253  ;;  %9129 = vperm.xlu0 %11510, %v17129_v34   ;;  %v17206_v34 = vld [vmem:[#allocation38_spill] sm:$0xff] }
 0xae5   :  { %17202 = vst [vmem:[#allocation112_spill] sm:$0xff] %v15857_v55 }
 0xae6   :  { %v15860_v5 = vpop.permute.xlu0 %8798 }
 0xae7   :  { %9141 = vperm.xlu1 %11483, %v17203_v19  }
 0xae8   :  { %v15863_v48 = vpop.permute.xlu1 %9097  ;;  %9293 = vperm.xlu0 %11510, %v14824_v60  }
 0xae9   :  { %17204 = vst [vmem:[#allocation37_spill] sm:$0xff] %v15863_v48 }
 0xaea   :  { %v15866_v23 = vpop.permute.xlu0 %8806 }
 0xaeb   :  { %11484 = vset.pattern.permute.xlu1 %v17118_v63 }
 0xaec   :  { %9647 = vperm.xlu1 %11484, %v14824_v60   ;;  %9297 = vperm.xlu0 %11510, %v17173_v7  }
 0xaed   :  { %v15871_v9 = vpop.permute.xlu1 %9603 }
 0xaee   :  { %17205 = vst [vmem:[#allocation113_spill] sm:$0xff] %v15871_v9  ;;  %v15873_v55 = vpop.permute.xlu0 %8814 }
 0xaf0   :  { %9491 = vperm.xlu1 %11484, %v17131_v16   ;;  %9149 = vperm.xlu0 %11510, %v17206_v34  }
 0xaf1   :  { %v15877_v37 = vpop.permute.xlu1 %9607 }
 0xaf2   :  { %17207 = vst [vmem:[#allocation38_spill] sm:$0xff] %v15877_v37  ;;  %v15879_v48 = vpop.permute.xlu0 %8822  ;;  %v17213_v37 = vld [vmem:[#allocation20_spill] sm:$0xff] }
 0xaf3   :  { %17208 = vst [vmem:[#allocation114_spill] sm:$0xff] %v15879_v48 }
 0xaf4   :  { %11485 = vset.pattern.permute.xlu1 %v17121_v27  ;;  %9317 = vperm.xlu0 %11510, %v15141_v22  }
 0xaf5   :  { %9301 = vperm.xlu1 %11485, %v14928_v47  }
 0xaf6   :  { %v15884_v60 = vpop.permute.xlu1 %9257  ;;  %v15886_v57 = vpop.permute.xlu0 %8830 }
 0xaf7   :  { %17209 = vst [vmem:[#allocation115_spill] sm:$0xff] %v15884_v60  ;;  %17210 = vst [vmem:[#allocation116_spill] sm:$0xff] %v15886_v57 }
 0xaf8   :  { %9161 = vperm.xlu0 %11510, %v17138_v3  }
 0xaf9   :  { %9145 = vperm.xlu1 %11485, %v17133_v45  }
 0xafa   :  { %v15890_v16 = vpop.permute.xlu1 %9261  ;;  %v15892_v9 = vpop.permute.xlu0 %8838 }
 0xafb   :  { %17211 = vst [vmem:[#allocation117_spill] sm:$0xff] %v15890_v16  ;;  %17212 = vst [vmem:[#allocation118_spill] sm:$0xff] %v15892_v9 }
 0xafc   :  { %9321 = vperm.xlu0 %11510, %v17213_v37  }
 0xafd   :  { %11486 = vset.pattern.permute.xlu1 %v17118_v63 }
 0xafe   :  { %9651 = vperm.xlu1 %11486, %v17173_v7   ;;  %v15897_v48 = vpop.permute.xlu0 %8878 }
 0xaff   :  { %v15899_v44 = vpop.permute.xlu1 %9455 }
 0xb00   :  { %17214 = vst [vmem:[#allocation20_spill] sm:$0xff] %v15899_v44  ;;  %9173 = vperm.xlu0 %11510, %v15322_v53   ;;  %v17220_v44 = vld [vmem:[#allocation26_spill] sm:$0xff] }
 0xb02   :  { %9655 = vperm.xlu1 %11486, %v14928_v47   ;;  %v15903_v57 = vpop.permute.xlu0 %8886 }
 0xb03   :  { %v15905_v60 = vpop.permute.xlu1 %9611 }
 0xb04   :  { %17215 = vst [vmem:[#allocation119_spill] sm:$0xff] %v15905_v60  ;;  %9341 = vperm.xlu0 %11510, %v15447_v10  }
 0xb06   :  { %11487 = vset.pattern.permute.xlu1 %v17121_v27  ;;  %v15909_v9 = vpop.permute.xlu0 %8894 }
 0xb07   :  { %17216 = vst [vmem:[#allocation120_spill] sm:$0xff] %v15909_v9  ;;  %9305 = vperm.xlu1 %11487, %v17174_v61  }
 0xb08   :  { %v15912_v7 = vpop.permute.xlu1 %9109  ;;  %9185 = vperm.xlu0 %11510, %v17147_v58  }
 0xb09   :  { %17217 = vst [vmem:[#allocation121_spill] sm:$0xff] %v15912_v7 }
 0xb0a   :  { %v15915_v16 = vpop.permute.xlu0 %8902 }
 0xb0b   :  { %17218 = vst [vmem:[#allocation122_spill] sm:$0xff] %v15915_v16  ;;  %9309 = vperm.xlu1 %11487, %v15027_v31  }
 0xb0c   :  { %v15918_v47 = vpop.permute.xlu1 %9265  ;;  %9345 = vperm.xlu0 %11510, %v17220_v44  }
 0xb0d   :  { %17219 = vst [vmem:[#allocation123_spill] sm:$0xff] %v15918_v47 }
 0xb0e   :  { %v15921_v60 = vpop.permute.xlu0 %8910 }
 0xb0f   :  { %17221 = vst [vmem:[#allocation26_spill] sm:$0xff] %v15921_v60  ;;  %11488 = vset.pattern.permute.xlu1 %v17118_v63 }
 0xb10   :  { %9503 = vperm.xlu1 %11488, %v17206_v34   ;;  %9197 = vperm.xlu0 %11510, %v15526_v32  }
 0xb11   :  { %v15926_v9 = vpop.permute.xlu1 %9459 }
 0xb12   :  { %17222 = vst [vmem:[#allocation124_spill] sm:$0xff] %v15926_v9  ;;  %v15928_v7 = vpop.permute.xlu0 %8918 }
 0xb13   :  { %17223 = vst [vmem:[#allocation125_spill] sm:$0xff] %v15928_v7 }
 0xb14   :  { %11489 = vset.pattern.permute.xlu1 %v17121_v27  ;;  %11517 = vset.pattern.permute.xlu0 %v17118_v63 }
 0xb15   :  { %9153 = vperm.xlu1 %11489, %v17136_v14   ;;  %v15933_v47 = vpop.permute.xlu1 %9463  ;;  %9427 = vperm.xlu0 %11517, %v17187_v15   ;;  %v17229_v15 = vld [vmem:[#allocation39_spill] sm:$0xff] }
 0xb16   :  { %17224 = vst [vmem:[#allocation126_spill] sm:$0xff] %v15933_v47  ;;  %v15936_v60 = vpop.permute.xlu0 %8926 }
 0xb17   :  { %17225 = vst [vmem:[#allocation127_spill] sm:$0xff] %v15936_v60 }
 0xb19   :  { %11490 = vset.pattern.permute.xlu1 %v17118_v63  ;;  %9591 = vperm.xlu0 %11517, %v12186_v49  }
 0xb1a   :  { %9659 = vperm.xlu1 %11490, %v17174_v61   ;;  %v15941_v34 = vpop.permute.xlu1 %9113  ;;  %v15943_v9 = vpop.permute.xlu0 %8934 }
 0xb1b   :  { %17226 = vst [vmem:[#allocation128_spill] sm:$0xff] %v15941_v34  ;;  %17227 = vst [vmem:[#allocation129_spill] sm:$0xff] %v15943_v9 }
 0xb1d   :  { %9595 = vperm.xlu0 %11517, %v12225_v46  }
 0xb1e   :  { %11491 = vset.pattern.permute.xlu1 %v17121_v27  ;;  %v15947_v7 = vpop.permute.xlu1 %9117  ;;  %v15949_v47 = vpop.permute.xlu0 %8942 }
 0xb1f   :  { %17228 = vst [vmem:[#allocation130_spill] sm:$0xff] %v15947_v7  ;;  %9157 = vperm.xlu1 %11491, %v17229_v15  }
 0xb21   :  { %9447 = vperm.xlu0 %11517, %v17125_v17  }
 0xb22   :  { %v15953_v60 = vpop.permute.xlu0 %8950 }
 0xb23   :  { %9313 = vperm.xlu1 %11491, %v17175_v4   ;;  %v15956_v49 = vpop.permute.xlu1 %9623 }
 0xb24   :  { %17230 = vst [vmem:[#allocation39_spill] sm:$0xff] %v15956_v49 }
 0xb25   :  { %9451 = vperm.xlu0 %11517, %v17119_v30  }
 0xb26   :  { %v15959_v61 = vpop.permute.xlu0 %8958 }
 0xb27   :  { %11492 = vset.pattern.permute.xlu1 %v17118_v63  ;;  %v15962_v46 = vpop.permute.xlu1 %9467 }
 0xb28   :  { %17231 = vst [vmem:[#allocation131_spill] sm:$0xff] %v15962_v46  ;;  %9507 = vperm.xlu1 %11492, %v17136_v14  }
 0xb29   :  { %9615 = vperm.xlu0 %11517, %v14343_v59  }
 0xb2a   :  { %v15966_v9 = vpop.permute.xlu0 %8962 }
 0xb2c   :  { %9511 = vperm.xlu1 %11492, %v17229_v15   ;;  %v15969_v17 = vpop.permute.xlu1 %9277 }
 0xb2d   :  { %17232 = vst [vmem:[#allocation132_spill] sm:$0xff] %v15969_v17  ;;  %9619 = vperm.xlu0 %11517, %v17160_v52  }
 0xb2e   :  { %v15972_v49 = vpop.permute.xlu0 %8970 }
 0xb30   :  { %11493 = vset.pattern.permute.xlu1 %v17115_v54  ;;  %v15975_v30 = vpop.permute.xlu1 %9121 }
 0xb31   :  { %17233 = vst [vmem:[#allocation133_spill] sm:$0xff] %v15975_v30  ;;  %8966 = vperm.xlu1 %11493, %v17213_v37   ;;  %9471 = vperm.xlu0 %11517, %v17172_v20  }
 0xb32   :  { %v15979_v14 = vpop.permute.xlu0 %8982 }
 0xb33   :  { %17234 = vst [vmem:[#allocation134_spill] sm:$0xff] %v15979_v14 }
 0xb35   :  { %11494 = vset.pattern.permute.xlu1 %v17118_v63  ;;  %v15982_v59 = vpop.permute.xlu1 %9627  ;;  %9475 = vperm.xlu0 %11517, %v17126_v42  }
 0xb36   :  { %17235 = vst [vmem:[#allocation135_spill] sm:$0xff] %v15982_v59  ;;  %9667 = vperm.xlu1 %11494, %v17175_v4   ;;  %v15986_v52 = vpop.permute.xlu0 %8986 }
 0xb37   :  { %17236 = vst [vmem:[#allocation136_spill] sm:$0xff] %v15986_v52  ;;  %v8293_v52 = vlaneseq }
 0xb39   :  { %v15988_v15 = vpop.permute.xlu1 %9631  ;;  %9639 = vperm.xlu0 %11517, %v14677_v39   ;;  %v8294_v14 = vand.u32 127, %v8293_v52 }
 0xb3a   :  { %17237 = vst [vmem:[#allocation137_spill] sm:$0xff] %v15988_v15  ;;  %11495 = vset.pattern.permute.xlu1 %v17121_v27  ;;  %v15992_v17 = vpop.permute.xlu0 %8994 }
 0xb3b   :  { %17238 = vst [vmem:[#allocation138_spill] sm:$0xff] %v15992_v17  ;;  %9165 = vperm.xlu1 %11495, %v15269_v40   ;;  %v9069_v59 = vshra.s32 %v8294_v14, 1 }
 0xb3d   :  { %9643 = vperm.xlu0 %11517, %v17171_v18  }
 0xb3e   :  { %v15996_v20 = vpop.permute.xlu1 %9281 }
 0xb3f   :  { %17239 = vst [vmem:[#allocation139_spill] sm:$0xff] %v15996_v20  ;;  %11496 = vset.pattern.permute.xlu1 %v17118_v63  ;;  %v15999_v42 = vpop.permute.xlu0 %9073 }
 0xb40   :  { %9671 = vperm.xlu1 %11496, %v15141_v22  }
 0xb41   :  { %9495 = vperm.xlu0 %11517, %v17203_v19  }
 0xb42   :  { %v16003_v4 = vpop.permute.xlu1 %9285 }
 0xb43   :  { %17240 = vst [vmem:[#allocation140_spill] sm:$0xff] %v16003_v4  ;;  %v16005_v39 = vpop.permute.xlu0 %9081  ;;  %v8714_v4 = vshra.s32 %v8294_v14, 2 }
 0xb44   :  { %9515 = vperm.xlu1 %11496, %v17138_v3   ;;  %v17245_v3 = vld [vmem:[#allocation22_spill] sm:$0xff] }
 0xb45   :  { %9499 = vperm.xlu0 %11517, %v17133_v45   ;;  %v8715_v20 = vand.u32 1, %v8714_v4 }
 0xb47   :  { %v16009_v17 = vpop.permute.xlu1 %9479  ;;  %v16011_v18 = vpop.permute.xlu0 %9245 }
 0xb48   :  { %17241 = vst [vmem:[#allocation141_spill] sm:$0xff] %v16009_v17  ;;  %17242 = vst [vmem:[#allocation142_spill] sm:$0xff] %v16011_v18  ;;  %11497 = vset.pattern.permute.xlu1 %v17121_v27 }
 0xb49   :  { %9325 = vperm.xlu1 %11497, %v15265_v21   ;;  %9663 = vperm.xlu0 %11517, %v15027_v31  }
 0xb4b   :  { %v16016_v22 = vpop.permute.xlu1 %9635  ;;  %v16018_v19 = vpop.permute.xlu0 %9249 }
 0xb4c   :  { %17243 = vst [vmem:[#allocation143_spill] sm:$0xff] %v16016_v22  ;;  %17244 = vst [vmem:[#allocation144_spill] sm:$0xff] %v16018_v19  ;;  %v8295_v22 = vshra.s32 %v8294_v14, 3 }
 0xb4d   :  { %11498 = vset.pattern.permute.xlu1 %v17115_v54  ;;  %9519 = vperm.xlu0 %11517, %v15269_v40  }
 0xb4e   :  { %8974 = vperm.xlu1 %11498, %v17245_v3   ;;  %v8296_v52 = vand.u32 1, %v8295_v22 }
 0xb4f   :  { %v16023_v45 = vpop.permute.xlu0 %9101 }
 0xb50   :  { %17246 = vst [vmem:[#allocation22_spill] sm:$0xff] %v16023_v45  ;;  %v9134_v15 = vpop.permute.xlu1 %9133  ;;  %v16042_v46 = vcvt.s32.f32 %v8296_v52  ;;  %v9424_v52 = vand.u32 1, %v8294_v14  ;;  %v1155_v14 = vstv %s11299_s8 }
 0xb51   :  { %9675 = vperm.xlu0 %11517, %v17213_v37  }
 0xb52   :  { %11499 = vset.pattern.permute.xlu1 %v17121_v27  ;;  %v8505_v22 = vmul.f32 %v15618_v35, %v16042_v46 }
 0xb53   :  { %9169 = vperm.xlu1 %11499, %v17141_v12   ;;  %v16028_v31 = vpop.permute.xlu0 %9105 }
 0xb54   :  { %17247 = vst [vmem:[#allocation145_spill] sm:$0xff] %v16028_v31  ;;  %v16030_v17 = vpop.permute.xlu1 %9289 }
 0xb55   :  { %17248 = vst [vmem:[#allocation146_spill] sm:$0xff] %v16030_v17  ;;  %9523 = vperm.xlu0 %11517, %v17141_v12   ;;  %v16044_v17 = vcvt.s32.f32 %v8715_v20 }
 0xb57   :  { %11500 = vset.pattern.permute.xlu1 %v17115_v54  ;;  %v16034_v40 = vpop.permute.xlu0 %9269  ;;  %v8860_v4 = vmul.f32 %v15616_v2, %v16044_v17 }
 0xb58   :  { %17249 = vst [vmem:[#allocation147_spill] sm:$0xff] %v16034_v40  ;;  %8978 = vperm.xlu1 %11500, %v15315_v62  }
 0xb59   :  { %v16037_v37 = vpop.permute.xlu1 %9483  ;;  %9687 = vperm.xlu0 %11517, %v15315_v62   ;;  %v9020_v20 = vadd.f32 %v15739_v50, %v8860_v4  ;;  %v1162_v4 = vstv %s11301_s9 }
 0xb5a   :  { %17250 = vst [vmem:[#allocation148_spill] sm:$0xff] %v16037_v37  ;;  %v9070_v37 = vand.u32 1, %v9069_v59  ;;  %v16065_v59 = vcvt.s32.f32 %v9424_v52 }
 0xb5b   :  { %v16040_v30 = vpop.permute.xlu0 %9273 }
 0xb5c   :  { %17251 = vst [vmem:[#allocation149_spill] sm:$0xff] %v16040_v30  ;;  %11501 = vset.pattern.permute.xlu1 %v17118_v63  ;;  %v8697_v30 = vadd.f32 %v15741_v1, %v8505_v22  ;;  %v1157_v1 = vmul.f32 %v15730_v33, %v1155_v14 }
 0xb5d   :  { %9679 = vperm.xlu1 %11501, %v15265_v21   ;;  %v9488_v12 = vpop.permute.xlu1 %9487  ;;  %9543 = vperm.xlu0 %11517, %v15505_v51   ;;  %v16058_v21 = vcvt.s32.f32 %v9070_v37  ;;  %v1158_v37 = vmul.f32 %v15736_v41, %v1155_v14 }
 0xb5f   :  { %v16053_v40 = vpop.permute.xlu0 %9125  ;;  %v9215_v35 = vmul.f32 %v9134_v15, %v16058_v21  ;;  %v11721_v15 = vld [vmem:[%s16821_s2 + $0x30] sm:$0xff] }
 0xb60   :  { %17252 = vst [vmem:[#allocation150_spill] sm:$0xff] %v16053_v40  ;;  %v9052_v40 = vmul.f32 %v9020_v20, %v8697_v30  ;;  %v1164_v52 = vmul.f32 %v11721_v15, %v1162_v4  ;;  %v9569_v30 = vmul.f32 %v9488_v12, %v16065_v59  ;;  %v17254_v20 = vld [vmem:[#allocation28_spill] sm:$0xff] }
 0xb61   :  { %11502 = vset.pattern.permute.xlu1 %v17121_v27  ;;  %9699 = vperm.xlu0 %11517, %v17220_v44  }
 0xb62   :  { %9329 = vperm.xlu1 %11502, %v17245_v3   ;;  %v9138_v2 = vpop.permute.xlu1 %9137  ;;  %v1166_v31 = vadd.f32 %v1164_v52, %v1157_v1  ;;  %v17256_v1 = vld [vmem:[#allocation25_spill] sm:$0xff] }
 0xb63   :  { %v16062_v7 = vpop.permute.xlu0 %9129 }
 0xb64   :  { %17253 = vst [vmem:[#allocation151_spill] sm:$0xff] %v16062_v7  ;;  %v11722_v7 = vld [vmem:[%s16821_s2 + $0x38] sm:$0xff] }
 0xb65   :  { %9547 = vperm.xlu0 %11517, %v17149_v29   ;;  %v1165_v34 = vmul.f32 %v11722_v7, %v1162_v4 }
 0xb66   :  { %9333 = vperm.xlu1 %11502, %v15315_v62   ;;  %v9142_v50 = vpop.permute.xlu1 %9141 }
 0xb67   :  { %v9294_v22 = vpop.permute.xlu0 %9293  ;;  %v1167_v45 = vadd.f32 %v1165_v34, %v1158_v37  ;;  %v9216_v37 = vmul.f32 %v9138_v2, %v16058_v21 }
 0xb68   :  { %v9375_v62 = vadd.f32 %v9294_v22, %v9215_v35  ;;  %v17255_v35 = vld [vmem:[#allocation48_spill] sm:$0xff] }
 0xb69   :  { %9707 = vperm.xlu0 %11517, %v17254_v20   ;;  %v11242_v15 = vpack.c.bf16 %v1167_v45, %v1166_v31  ;;  %v8506_v34 = vmul.f32 %v17255_v35, %v16042_v46 }
 0xb6a   :  { %11503 = vset.pattern.permute.xlu1 %v17118_v63  ;;  %v9407_v14 = vmul.f32 %v9375_v62, %v9052_v40  ;;  %v8861_v40 = vmul.f32 %v15848_v13, %v16044_v17 }
 0xb6b   :  { %9527 = vperm.xlu1 %11503, %v15322_v53   ;;  %v9648_v19 = vpop.permute.xlu1 %9647  ;;  %v9298_v18 = vpop.permute.xlu0 %9297  ;;  %11243 = vmatprep.subr.bf16.mxu0 %v11242_v15  ;;  %v9217_v53 = vmul.f32 %v9142_v50, %v16058_v21 }
 0xb6c   :  { %v9729_v16 = vadd.f32 %v9648_v19, %v9569_v30  ;;  %11245 = vmatpush3.bf16.msra.mxu0 %v11242_v15  ;;  %v17257_v19 = vld [vmem:[#allocation65_spill] sm:$0xff]  ;;  %v9021_v31 = vadd.f32 %v15949_v47, %v8861_v40  ;;  %v9376_v62 = vadd.f32 %v9298_v18, %v9216_v37 }
 0xb6e   :  { %v16081_v38 = vmul.f32 %v9729_v16, %v9407_v14  ;;  %v8698_v16 = vadd.f32 %v17257_v19, %v8506_v34  ;;  %v17258_v14 = vld [vmem:[#allocation56_spill] sm:$0xff] }
 0xb6f   :  { %11504 = vset.pattern.permute.xlu1 %v17121_v27  ;;  %v9492_v7 = vpop.permute.xlu1 %9491  ;;  %v9150_v12 = vpop.permute.xlu0 %9149 }
 0xb70   :  { %9177 = vperm.xlu1 %11504, %v17256_v1   ;;  %v9053_v52 = vmul.f32 %v9021_v31, %v8698_v16  ;;  %v9570_v15 = vmul.f32 %v9492_v7, %v16065_v59 }
 0xb72   :  { %v9408_v35 = vmul.f32 %v9376_v62, %v9053_v52 }
 0xb73   :  { %v16090_v45 = vpop.permute.xlu0 %9317 }
 0xb74   :  { %11505 = vset.pattern.permute.xlu1 %v17118_v63  ;;  %v9302_v4 = vpop.permute.xlu1 %9301 }
 0xb75   :  { %9683 = vperm.xlu1 %11505, %v17245_v3   ;;  %v16097_v22 = vadd.f32 %v9302_v4, %v9217_v53 }
 0xb77   :  { %v9162_v13 = vpop.permute.xlu0 %9161 }
 0xb78   :  { %v9146_v30 = vpop.permute.xlu1 %9145  ;;  %v9222_v50 = vmul.f32 %v9162_v13, %v16058_v21  ;;  %v11068_v34 = vpop.f32.mrb[10].mxu1  ;;  %v9219_v13 = vmul.f32 %v9150_v12, %v16058_v21 }
 0xb79   :  { %11506 = vset.pattern.permute.xlu1 %v17121_v27  ;;  %v1143_v40 = vpop.f32.mrb[11].mxu1  ;;  %v9218_v7 = vmul.f32 %v9146_v30, %v16058_v21 }
 0xb7a   :  { %9181 = vperm.xlu1 %11506, %v17258_v14   ;;  %11073 = vmatprep.mubr.msk.f32.mxu0 %vm23_vm0, %v1143_v40 }
 0xb7b   :  { %v9322_v47 = vpop.permute.xlu0 %9321  ;;  %11074 = vmatmul.mubr.msk.f32.vlgmr.msra.gmra.mrb[12].mxu0 %vm23_vm0, %v11068_v34  ;;  %v17263_v34 = vld [vmem:[#allocation11_spill] sm:$0xff] }
 0xb7c   :  { %v16103_v2 = vadd.f32 %v9322_v47, %v9222_v50 }
 0xb7d   :  { %v9652_v3 = vpop.permute.xlu1 %9651 }
 0xb7e   :  { %9337 = vperm.xlu1 %11506, %v17180_v43   ;;  %v9730_v53 = vadd.f32 %v9652_v3, %v9570_v15  ;;  %v17264_v3 = vld [vmem:[#allocation13_spill] sm:$0xff] }
 0xb7f   :  { %v16107_v18 = vpop.permute.xlu0 %9173  ;;  %v8511_v40 = vmul.f32 %v17264_v3, %v16042_v46 }
 0xb80   :  { %v16110_v19 = vmul.f32 %v9730_v53, %v9408_v35 }
 0xb81   :  { %v16112_v16 = vpop.permute.xlu1 %9655 }
 0xb82   :  { %17259 = vst [vmem:[#allocation28_spill] sm:$0xff] %v16110_v19  ;;  %11507 = vset.pattern.permute.xlu1 %v17118_v63 }
 0xb83   :  { %9531 = vperm.xlu1 %11507, %v17256_v1   ;;  %v16117_v31 = vpop.permute.xlu0 %9341 }
 0xb84   :  { %17260 = vst [vmem:[#allocation48_spill] sm:$0xff] %v16117_v31 }
 0xb86   :  { %v9306_v37 = vpop.permute.xlu1 %9305 }
 0xb87   :  { %9535 = vperm.xlu1 %11507, %v17258_v14   ;;  %v16120_v4 = vadd.f32 %v9306_v37, %v9218_v7  ;;  %v9186_v52 = vpop.permute.xlu0 %9185  ;;  %v17265_v7 = vld [vmem:[#allocation50_spill] sm:$0xff] }
 0xb88   :  { %v9228_v62 = vmul.f32 %v9186_v52, %v16058_v21  ;;  %v8510_v37 = vmul.f32 %v17265_v7, %v16042_v46 }
 0xb8a   :  { %v9310_v50 = vpop.permute.xlu1 %9309 }
 0xb8b   :  { %11508 = vset.pattern.permute.xlu1 %v17115_v54  ;;  %v16125_v15 = vadd.f32 %v9310_v50, %v9219_v13  ;;  %v9346_v1 = vpop.permute.xlu0 %9345  ;;  %v17266_v50 = vld [vmem:[#allocation67_spill] sm:$0xff] }
 0xb8c   :  { %8990 = vperm.xlu1 %11508, %v17220_v44   ;;  %v16128_v30 = vadd.f32 %v9346_v1, %v9228_v62  ;;  %v8866_v44 = vmul.f32 %v17263_v34, %v16044_v17  ;;  %v8702_v1 = vadd.f32 %v17266_v50, %v8510_v37  ;;  %v17268_v50 = vld [vmem:[#allocation69_spill] sm:$0xff] }
 0xb8e   :  { %17261 = vst [vmem:[#allocation25_spill] sm:$0xff] %v16128_v30  ;;  %v9026_v52 = vadd.f32 %v15966_v9, %v8866_v44 }
 0xb8f   :  { %v16130_v47 = vpop.permute.xlu1 %9503  ;;  %v16132_v14 = vpop.permute.xlu0 %9197 }
 0xb90   :  { %17262 = vst [vmem:[#allocation65_spill] sm:$0xff] %v16132_v14  ;;  %11509 = vset.pattern.permute.xlu1 %v17118_v63 }
 0xb91   :  { %9691 = vperm.xlu1 %11509, %v17180_v43   ;;  %v8865_v43 = vmul.f32 %v15860_v5, %v16044_v17 }
 0xb93   :  { %v9025_v34 = vadd.f32 %v15959_v61, %v8865_v43 }
 0xb94   :  { %v9154_v12 = vpop.permute.xlu1 %9153  ;;  %v16136_v35 = vpop.permute.xlu0 %9427 }
 0xb95   :  { %11511 = vset.pattern.permute.xlu1 %v17121_v27  ;;  %v9220_v5 = vmul.f32 %v9154_v12, %v16058_v21 }
 0xb96   :  { %9189 = vperm.xlu1 %11511, %v15505_v51   ;;  %v8703_v51 = vadd.f32 %v15765_v56, %v8511_v40  ;;  %v9057_v56 = vmul.f32 %v9025_v34, %v8702_v1 }
 0xb98   :  { %v16144_v53 = vpop.permute.xlu0 %9591  ;;  %v9058_v7 = vmul.f32 %v9026_v52, %v8703_v51  ;;  %v8867_v52 = vmul.f32 %v15866_v23, %v16044_v17  ;;  %v17270_v23 = vld [vmem:[#allocation5_spill] sm:$0xff] }
 0xb99   :  { %v16150_v13 = vpop.permute.xlu1 %9659 }
 0xb9a   :  { %11512 = vset.pattern.permute.xlu1 %v17118_v63 }
 0xb9b   :  { %9695 = vperm.xlu1 %11512, %v15447_v10  }
 0xb9c   :  { %v16156_v62 = vpop.permute.xlu0 %9595 }
 0xb9e   :  { %v9158_v3 = vpop.permute.xlu1 %9157 }
 0xb9f   :  { %9539 = vperm.xlu1 %11512, %v17147_v58   ;;  %v9221_v30 = vmul.f32 %v9158_v3, %v16058_v21 }
 0xba0   :  { %v16163_v14 = vpop.permute.xlu0 %9447 }
 0xba1   :  { %v9381_v9 = vadd.f32 %v16090_v45, %v9221_v30  ;;  %v17267_v45 = vld [vmem:[#allocation51_spill] sm:$0xff] }
 0xba2   :  { %v9314_v10 = vpop.permute.xlu1 %9313  ;;  %v8512_v30 = vmul.f32 %v17267_v45, %v16042_v46 }
 0xba3   :  { %11513 = vset.pattern.permute.xlu1 %v17121_v27  ;;  %v9380_v44 = vadd.f32 %v9314_v10, %v9220_v5  ;;  %v16167_v40 = vmul.f32 %v9381_v9, %v9058_v7 }
 0xba4   :  { %9349 = vperm.xlu1 %11513, %v15500_v11   ;;  %v16170_v61 = vpop.permute.xlu0 %9451  ;;  %v8704_v1 = vadd.f32 %v17268_v50, %v8512_v30 }
 0xba5   :  { %v9412_v58 = vmul.f32 %v9380_v44, %v9057_v56  ;;  %v17269_v56 = vld [vmem:[#allocation68_spill] sm:$0xff]  ;;  %v8862_v44 = vmul.f32 %v17270_v23, %v16044_v17  ;;  %v17274_v23 = vld [vmem:[#allocation9_spill] sm:$0xff] }
 0xba7   :  { %v9508_v37 = vpop.permute.xlu1 %9507 }
 0xba8   :  { %11514 = vset.pattern.permute.xlu1 %v17115_v54  ;;  %v16173_v12 = vpop.permute.xlu0 %9615  ;;  %v9574_v5 = vmul.f32 %v9508_v37, %v16065_v59  ;;  %v8863_v37 = vmul.f32 %v15854_v6, %v16044_v17  ;;  %v17276_v6 = vld [vmem:[#allocation66_spill] sm:$0xff] }
 0xba9   :  { %8998 = vperm.xlu1 %11514, %v17254_v20  }
 0xbab   :  { %v9512_v43 = vpop.permute.xlu1 %9511 }
 0xbac   :  { %v16178_v51 = vpop.permute.xlu0 %9619 }
 0xbad   :  { %11515 = vset.pattern.permute.xlu1 %v17121_v27 }
 0xbae   :  { %9193 = vperm.xlu1 %11515, %v17149_v29   ;;  %v17271_v29 = vld [vmem:[#allocation7_spill] sm:$0xff] }
 0xbaf   :  { %v8507_v45 = vmul.f32 %v17271_v29, %v16042_v46  ;;  %v8864_v29 = vmul.f32 %v17274_v23, %v16044_v17  ;;  %v9575_v23 = vmul.f32 %v9512_v43, %v16065_v59 }
 0xbb0   :  { %v8967_v34 = vpop.permute.xlu1 %8966  ;;  %v16185_v3 = vpop.permute.xlu0 %9471 }
 0xbb1   :  { %v9027_v7 = vadd.f32 %v8967_v34, %v8867_v52  ;;  %v17272_v52 = vld [vmem:[#allocation49_spill] sm:$0xff]  ;;  %v8699_v31 = vadd.f32 %v15753_v36, %v8507_v45 }
 0xbb2   :  { %11516 = vset.pattern.permute.xlu1 %v17115_v54  ;;  %v8508_v54 = vmul.f32 %v17272_v52, %v16042_v46  ;;  %v9022_v52 = vadd.f32 %v15751_v8, %v8862_v44  ;;  %v9024_v8 = vadd.f32 %v15758_v26, %v8864_v29  ;;  %v1259_v29 = vstv %s11305_s15 }
 0xbb3   :  { %9002 = vperm.xlu1 %11516, %v17269_v56   ;;  %v9059_v9 = vmul.f32 %v9027_v7, %v8704_v1 }
 0xbb4   :  { %v16190_v10 = vpop.permute.xlu0 %9475  ;;  %v9054_v36 = vmul.f32 %v9022_v52, %v8699_v31 }
 0xbb5   :  { %v9668_v30 = vpop.permute.xlu1 %9667  ;;  %v16197_v50 = vmul.f32 %v16103_v2, %v9059_v9  ;;  %v17275_v2 = vld [vmem:[#allocation31_spill] sm:$0xff] }
 0xbb6   :  { %v9734_v34 = vadd.f32 %v9668_v30, %v9574_v5  ;;  %v8509_v9 = vmul.f32 %v17275_v2, %v16042_v46  ;;  %v8700_v5 = vadd.f32 %v17276_v6, %v8508_v54  ;;  %v17277_v30 = vld [vmem:[#allocation15_spill] sm:$0xff]  ;;  %v9409_v43 = vmul.f32 %v16097_v22, %v9054_v36 }
 0xbb7   :  { %11518 = vset.pattern.permute.xlu1 %v17118_v63  ;;  %v8868_v19 = vmul.f32 %v17277_v30, %v16044_v17 }
 0xbb8   :  { %9703 = vperm.xlu1 %11518, %v15500_v11   ;;  %v16205_v1 = vmul.f32 %v9734_v34, %v9412_v58  ;;  %v16207_v7 = vpop.permute.xlu0 %9639  ;;  %v17278_v11 = vld [vmem:[#allocation17_spill] sm:$0xff]  ;;  %v9023_v34 = vadd.f32 %v15953_v60, %v8863_v37  ;;  %v8701_v44 = vadd.f32 %v15760_v24, %v8509_v9  ;;  %v9573_v9 = vmul.f32 %v16130_v47, %v16065_v59 }
 0xbb9   :  { %v8513_v58 = vmul.f32 %v17278_v11, %v16042_v46  ;;  %v9028_v6 = vadd.f32 %v15972_v49, %v8868_v19 }
 0xbba   :  { %17273 = vst [vmem:[#allocation56_spill] sm:$0xff] %v16205_v1  ;;  %v9166_v1 = vpop.permute.xlu1 %9165  ;;  %v9055_v54 = vmul.f32 %v9023_v34, %v8700_v5  ;;  %v11724_v5 = vld [vmem:[%s16821_s2 + $0x48] sm:$0xff] }
 0xbbb   :  { %v8705_v45 = vadd.f32 %v15773_v28, %v8513_v58  ;;  %v1252_v28 = vstv %s11303_s14  ;;  %v1349_v58 = vstv %s11307_s16  ;;  %v9223_v34 = vmul.f32 %v9166_v1, %v16058_v21  ;;  %v11725_v1 = vld [vmem:[%s16821_s2 + $0x50] sm:$0xff] }
 0xbbc   :  { %11519 = vset.pattern.permute.xlu1 %v17121_v27  ;;  %v16223_v2 = vpop.permute.xlu0 %9643  ;;  %v9056_v27 = vmul.f32 %v9024_v8, %v8701_v44  ;;  %v9410_v24 = vmul.f32 %v16120_v4, %v9055_v54  ;;  %v1254_v31 = vmul.f32 %v15730_v33, %v1252_v28  ;;  %v1255_v22 = vmul.f32 %v15736_v41, %v1252_v28  ;;  %v11723_v4 = vld [vmem:[%s16821_s2 + $0x40] sm:$0xff] }
 0xbbd   :  { %9353 = vperm.xlu1 %11519, %v17254_v20   ;;  %v9060_v26 = vmul.f32 %v9028_v6, %v8705_v45  ;;  %v1351_v47 = vmul.f32 %v15730_v33, %v1349_v58  ;;  %v1352_v45 = vmul.f32 %v15736_v41, %v1349_v58  ;;  %v1356_v54 = vstv %s11309_s21 }
 0xbbf   :  { %v9672_v60 = vpop.permute.xlu1 %9671 }
 0xbc0   :  { %v9735_v37 = vadd.f32 %v9672_v60, %v9575_v23  ;;  %v9496_v30 = vpop.permute.xlu0 %9495  ;;  %v9411_v60 = vmul.f32 %v16125_v15, %v9056_v27 }
 0xbc1   :  { %v9571_v11 = vmul.f32 %v9496_v30, %v16065_v59  ;;  %9357 = vperm.xlu1 %11519, %v17269_v56  }
 0xbc2   :  { %v16235_v20 = vmul.f32 %v9735_v37, %v16167_v40  ;;  %v1261_v40 = vmul.f32 %v11723_v4, %v1259_v29  ;;  %v1358_v37 = vmul.f32 %v11725_v1, %v1356_v54  ;;  %v17288_v1 = vld [vmem:[#allocation14_spill] sm:$0xff] }
 0xbc3   :  { %v9516_v49 = vpop.permute.xlu1 %9515  ;;  %v9731_v19 = vadd.f32 %v16112_v16, %v9571_v11  ;;  %v1262_v16 = vmul.f32 %v11724_v5, %v1259_v29  ;;  %v17283_v5 = vld [vmem:[#allocation52_spill] sm:$0xff] }
 0xbc4   :  { %17279 = vst [vmem:[#allocation11_spill] sm:$0xff] %v16235_v20  ;;  %v9500_v52 = vpop.permute.xlu0 %9499  ;;  %v1263_v36 = vadd.f32 %v1261_v40, %v1254_v31  ;;  %v9576_v29 = vmul.f32 %v9516_v49, %v16065_v59  ;;  %v17343_v20 = vld [vmem:[#allocation6_spill] sm:$0xff] }
 0xbc5   :  { %v16249_v23 = vmul.f32 %v9731_v19, %v9409_v43  ;;  %v9572_v8 = vmul.f32 %v9500_v52, %v16065_v59  ;;  %11520 = vset.pattern.permute.xlu1 %v17118_v63  ;;  %v1264_v44 = vadd.f32 %v1262_v16, %v1255_v22  ;;  %v11726_v63 = vld [vmem:[%s16821_s2 + $0x58] sm:$0xff]  ;;  %v8869_v16 = vmul.f32 %v15873_v55, %v16044_v17 }
 0xbc6   :  { %9551 = vperm.xlu1 %11520, %v15526_v32   ;;  %v1359_v33 = vmul.f32 %v11726_v63, %v1356_v54 }
 0xbc7   :  { %v9732_v6 = vadd.f32 %v16150_v13, %v9572_v8  ;;  %v11246_v43 = vpack.c.bf16 %v1264_v44, %v1263_v36  ;;  %v1360_v13 = vadd.f32 %v1358_v37, %v1351_v47  ;;  %v17285_v8 = vld [vmem:[#allocation19_spill] sm:$0xff]  ;;  %v17286_v36 = vld [vmem:[#allocation21_spill] sm:$0xff] }
 0xbc8   :  { %v9326_v32 = vpop.permute.xlu1 %9325  ;;  %v9664_v30 = vpop.permute.xlu0 %9663  ;;  %v1361_v15 = vadd.f32 %v1359_v33, %v1352_v45  ;;  %v8870_v47 = vmul.f32 %v17285_v8, %v16044_v17  ;;  %v8515_v44 = vmul.f32 %v17286_v36, %v16042_v46 }
 0xbc9   :  { %v9383_v11 = vadd.f32 %v9326_v32, %v9223_v34  ;;  %v16264_v41 = vmul.f32 %v9732_v6, %v9410_v24  ;;  %v9733_v28 = vadd.f32 %v9664_v30, %v9573_v9  ;;  %11247 = vmatprep.subr.bf16.mxu1 %v11246_v43  ;;  %v17284_v34 = vld [vmem:[#allocation70_spill] sm:$0xff]  ;;  %v9225_v32 = vmul.f32 %v16107_v18, %v16058_v21  ;;  %v17293_v18 = vld [vmem:[#allocation76_spill] sm:$0xff] }
 0xbca   :  { %9711 = vperm.xlu1 %11520, %v17269_v56   ;;  %11249 = vmatpush3.bf16.msra.mxu1 %v11246_v43  ;;  %v11250_v22 = vpack.c.bf16 %v1361_v15, %v1360_v13  ;;  %v8707_v37 = vadd.f32 %v17288_v1, %v8515_v44  ;;  %v17296_v44 = vld [vmem:[#allocation100_spill] sm:$0xff] }
 0xbcb   :  { %17280 = vst [vmem:[#allocation13_spill] sm:$0xff] %v16264_v41  ;;  %v9415_v27 = vmul.f32 %v9383_v11, %v9060_v26  ;;  %v16267_v19 = vmul.f32 %v9733_v28, %v9411_v60  ;;  %v8514_v26 = vmul.f32 %v17283_v5, %v16042_v46  ;;  %v17294_v5 = vld [vmem:[#allocation57_spill] sm:$0xff]  ;;  %v17365_v41 = vld [vmem:[#allocation106_spill] sm:$0xff] }
 0xbcc   :  { %v9520_v31 = vpop.permute.xlu0 %9519  ;;  %11251 = vmatprep.subr.bf16.mxu0 %v11250_v22 }
 0xbcd   :  { %17281 = vst [vmem:[#allocation50_spill] sm:$0xff] %v16267_v19  ;;  %v8975_v52 = vpop.permute.xlu1 %8974  ;;  %11253 = vmatpush3.bf16.msra.mxu0 %v11250_v22  ;;  %v9577_v58 = vmul.f32 %v9520_v31, %v16065_v59  ;;  %v8706_v49 = vadd.f32 %v17284_v34, %v8514_v26 }
 0xbce   :  { %v9029_v45 = vadd.f32 %v8975_v52, %v8869_v16 }
 0xbd0   :  { %v9676_v4 = vpop.permute.xlu0 %9675  ;;  %v9061_v55 = vmul.f32 %v9029_v45, %v8706_v49  ;;  %v17295_v49 = vld [vmem:[#allocation34_spill] sm:$0xff] }
 0xbd1   :  { %v9736_v24 = vadd.f32 %v9676_v4, %v9576_v29 }
 0xbd2   :  { %v9170_v40 = vpop.permute.xlu1 %9169 }
 0xbd3   :  { %v16271_v9 = vmul.f32 %v9736_v24, %v16197_v50  ;;  %v9224_v6 = vmul.f32 %v9170_v40, %v16058_v21  ;;  %v17292_v24 = vld [vmem:[#allocation74_spill] sm:$0xff] }
 0xbd4   :  { %v16291_v15 = vpop.permute.xlu0 %9523  ;;  %v8845_v40 = vmul.f32 %v17292_v24, %v16044_v17 }
 0xbd5   :  { %17282 = vst [vmem:[#allocation67_spill] sm:$0xff] %v16271_v9  ;;  %17290 = vst [vmem:[#allocation68_spill] sm:$0xff] %v16291_v15  ;;  %v17362_v15 = vld [vmem:[#allocation8_spill] sm:$0xff] }
 0xbd6   :  { %v9005_v16 = vadd.f32 %v15897_v48, %v8845_v40  ;;  %v17309_v40 = vld [vmem:[#allocation46_spill] sm:$0xff] }
 0xbd7   :  { %v8979_v56 = vpop.permute.xlu1 %8978 }
 0xbd8   :  { %v9030_v63 = vadd.f32 %v8979_v56, %v8870_v47  ;;  %v9688_v29 = vpop.permute.xlu0 %9687  ;;  %v8490_v56 = vmul.f32 %v17293_v18, %v16042_v46  ;;  %v9554_v47 = vmul.f32 %v16136_v35, %v16065_v59  ;;  %v8502_v18 = vmul.f32 %v17309_v40, %v16042_v46  ;;  %v17323_v40 = vld [vmem:[#allocation30_spill] sm:$0xff] }
 0xbda   :  { %v9062_v43 = vmul.f32 %v9030_v63, %v8707_v37  ;;  %v8682_v26 = vadd.f32 %v17294_v5, %v8490_v56  ;;  %v9714_v45 = vadd.f32 %v17296_v44, %v9554_v47  ;;  %v17310_v56 = vld [vmem:[#allocation47_spill] sm:$0xff]  ;;  %v17314_v47 = vld [vmem:[#allocation77_spill] sm:$0xff]  ;;  %v17315_v44 = vld [vmem:[#allocation60_spill] sm:$0xff] }
 0xbdb   :  { %v8504_v5 = vmul.f32 %v17310_v56, %v16042_v46  ;;  %v8846_v56 = vmul.f32 %v17323_v40, %v16044_v17 }
 0xbdc   :  { %v9680_v50 = vpop.permute.xlu1 %9679  ;;  %v9037_v34 = vmul.f32 %v9005_v16, %v8682_v26  ;;  %v17311_v26 = vld [vmem:[#allocation40_spill] sm:$0xff] }
 0xbdd   :  { %v9737_v54 = vadd.f32 %v9680_v50, %v9577_v58  ;;  %v9200_v58 = vmul.f32 %v15999_v42, %v16058_v21  ;;  %v8491_v16 = vmul.f32 %v17311_v26, %v16042_v46  ;;  %v17324_v26 = vld [vmem:[#allocation64_spill] sm:$0xff] }
 0xbdf   :  { %v16284_v60 = vmul.f32 %v9737_v54, %v9415_v27  ;;  %v9360_v8 = vadd.f32 %v17295_v49, %v9200_v58  ;;  %v17312_v58 = vld [vmem:[#allocation58_spill] sm:$0xff]  ;;  %v17313_v49 = vld [vmem:[#allocation59_spill] sm:$0xff] }
 0xbe1   :  { %17287 = vst [vmem:[#allocation51_spill] sm:$0xff] %v16284_v60  ;;  %v9330_v33 = vpop.permute.xlu1 %9329  ;;  %v9392_v36 = vmul.f32 %v9360_v8, %v9037_v34  ;;  %v17333_v60 = vld [vmem:[#allocation92_spill] sm:$0xff] }
 0xbe2   :  { %v9384_v30 = vadd.f32 %v9330_v33, %v9224_v6 }
 0xbe3   :  { %v9746_v6 = vmul.f32 %v9714_v45, %v9392_v36  ;;  %v8848_v36 = vmul.f32 %v17314_v47, %v16044_v17 }
 0xbe4   :  { %v16289_v11 = vmul.f32 %v9384_v30, %v9061_v55  ;;  %v17304_v30 = vld [vmem:[#allocation41_spill] sm:$0xff] }
 0xbe5   :  { %v9334_v28 = vpop.permute.xlu1 %9333 }
 0xbe6   :  { %17289 = vst [vmem:[#allocation69_spill] sm:$0xff] %v16289_v11  ;;  %v9385_v13 = vadd.f32 %v9334_v28, %v9225_v32  ;;  %v17305_v28 = vld [vmem:[#allocation42_spill] sm:$0xff] }
 0xbe8   :  { %v9417_v31 = vmul.f32 %v9385_v13, %v9062_v43  ;;  %v8492_v43 = vmul.f32 %v17304_v30, %v16042_v46  ;;  %v8494_v13 = vmul.f32 %v17305_v28, %v16042_v46 }
 0xbea   :  { %v9528_v22 = vpop.permute.xlu1 %9527  ;;  %v8684_v34 = vadd.f32 %v17312_v58, %v8492_v43  ;;  %v16345_v8 = vadd.f32 %v17313_v49, %v8494_v13  ;;  %v17320_v43 = vld [vmem:[#allocation61_spill] sm:$0xff]  ;;  %v16372_v58 = vadd.f32 %v17324_v26, %v8504_v5  ;;  %v17325_v49 = vld [vmem:[#allocation75_spill] sm:$0xff] }
 0xbeb   :  { %v9579_v27 = vmul.f32 %v9528_v22, %v16065_v59  ;;  %v8847_v47 = vmul.f32 %v17325_v49, %v16044_v17  ;;  %v17331_v5 = vld [vmem:[#allocation91_spill] sm:$0xff] }
 0xbec   :  { %v9008_v40 = vadd.f32 %v17331_v5, %v8848_v36  ;;  %v17338_v5 = vld [vmem:[#allocation90_spill] sm:$0xff] }
 0xbed   :  { %v9739_v52 = vadd.f32 %v9688_v29, %v9579_v27  ;;  %v17307_v27 = vld [vmem:[#allocation44_spill] sm:$0xff] }
 0xbee   :  { %v8498_v29 = vmul.f32 %v17307_v27, %v16042_v46 }
 0xbef   :  { %v16294_v4 = vmul.f32 %v9739_v52, %v9417_v31  ;;  %v16313_v1 = vpop.permute.xlu1 %9177  ;;  %v17306_v31 = vld [vmem:[#allocation43_spill] sm:$0xff]  ;;  %v17308_v52 = vld [vmem:[#allocation45_spill] sm:$0xff] }
 0xbf0   :  { %17297 = vst [vmem:[#allocation7_spill] sm:$0xff] %v16313_v1  ;;  %v8496_v22 = vmul.f32 %v17306_v31, %v16042_v46  ;;  %v8500_v24 = vmul.f32 %v17308_v52, %v16042_v46  ;;  %v16361_v13 = vadd.f32 %v17320_v43, %v8498_v29  ;;  %v17321_v31 = vld [vmem:[#allocation62_spill] sm:$0xff]  ;;  %v17322_v52 = vld [vmem:[#allocation63_spill] sm:$0xff] }
 0xbf1   :  { %17291 = vst [vmem:[#allocation5_spill] sm:$0xff] %v16294_v4  ;;  %v17327_v29 = vld [vmem:[#allocation83_spill] sm:$0xff]  ;;  %v17332_v4 = vld [vmem:[#allocation33_spill] sm:$0xff]  ;;  %v17363_v1 = vld [vmem:[#allocation110_spill] sm:$0xff] }
 0xbf2   :  { %v16350_v45 = vadd.f32 %v17315_v44, %v8496_v22  ;;  %v16364_v27 = vadd.f32 %v17321_v31, %v8500_v24  ;;  %v16367_v22 = vadd.f32 %v17322_v52, %v8502_v18  ;;  %v17326_v44 = vld [vmem:[#allocation81_spill] sm:$0xff]  ;;  %v17329_v18 = vld [vmem:[#allocation82_spill] sm:$0xff]  ;;  %v17330_v31 = vld [vmem:[#allocation84_spill] sm:$0xff] }
 0xbf3   :  { %v17328_v24 = vld [vmem:[#allocation85_spill] sm:$0xff]  ;;  %v8497_v43 = vmul.f32 %v17329_v18, %v16042_v46  ;;  %v8499_v52 = vmul.f32 %v17330_v31, %v16042_v46  ;;  %v17336_v18 = vld [vmem:[#allocation87_spill] sm:$0xff]  ;;  %v17337_v31 = vld [vmem:[#allocation86_spill] sm:$0xff] }
 0xbf4   :  { %v16315_v35 = vpop.permute.xlu1 %9683  ;;  %v16399_v36 = vmul.f32 %v17337_v31, %v16042_v46 }
 0xbf5   :  { %17298 = vst [vmem:[#allocation49_spill] sm:$0xff] %v16315_v35 }
 0xbf9   :  { %v16317_v37 = vpop.permute.xlu1 %9181 }
 0xbfa   :  { %17299 = vst [vmem:[#allocation9_spill] sm:$0xff] %v16317_v37 }
 0xbfd   :  { %v16319_v55 = vpop.permute.xlu1 %9337 }
 0xbfe   :  { %17300 = vst [vmem:[#allocation31_spill] sm:$0xff] %v16319_v55  ;;  %v17347_v55 = vld [vmem:[#allocation16_spill] sm:$0xff] }
 0xc02   :  { %v16321_v63 = vpop.permute.xlu1 %9531 }
 0xc03   :  { %17301 = vst [vmem:[#allocation66_spill] sm:$0xff] %v16321_v63  ;;  %v17346_v63 = vld [vmem:[#allocation96_spill] sm:$0xff] }
 0xc04   :  { %v8691_v35 = vadd.f32 %v17346_v63, %v8499_v52 }
 0xc06   :  { %v16323_v33 = vpop.permute.xlu1 %9535 }
 0xc07   :  { %17302 = vst [vmem:[#allocation15_spill] sm:$0xff] %v16323_v33  ;;  %v16395_v33 = vmul.f32 %v17336_v18, %v16044_v17  ;;  %v9202_v18 = vmul.f32 %v16005_v39, %v16058_v21 }
 0xc0b   :  { %v16325_v32 = vpop.permute.xlu1 %8990 }
 0xc0c   :  { %17303 = vst [vmem:[#allocation17_spill] sm:$0xff] %v16325_v32 }
 0xc10   :  { %v16358_v28 = vpop.permute.xlu1 %9691 }
 0xc11   :  { %17319 = vst [vmem:[#allocation52_spill] sm:$0xff] %v16358_v28 }
 0xc15   :  { %v16413_v31 = vpop.permute.xlu1 %9189 }
 0xc16   :  { %17342 = vst [vmem:[#allocation70_spill] sm:$0xff] %v16413_v31 }
 0xc4e   :  { %v11075_v50 = vpop.f32.mrb[12].mxu0 }
 0xc4f   :  { %v1240_v54 = vpop.f32.mrb[13].mxu0 }
 0xc50   :  { %11080 = vmatprep.mubr.msk.f32.mxu1 %vm23_vm0, %v1240_v54 }
 0xc51   :  { %11081 = vmatmul.mubr.msk.f32.vlgmr.msra.gmra.mrb[12].mxu1 %vm23_vm0, %v11075_v50  ;;  %v17316_v50 = vld [vmem:[#allocation79_spill] sm:$0xff] }
 0xc52   :  { %11094 = vmatprep.mubr.msk.f32.mxu1 %vm23_vm0, %v9746_v6  ;;  %v8850_v54 = vmul.f32 %v17316_v50, %v16044_v17  ;;  %v17317_v6 = vld [vmem:[#allocation78_spill] sm:$0xff]  ;;  %v8852_v50 = vmul.f32 %v17326_v44, %v16044_v17  ;;  %v17334_v44 = vld [vmem:[#allocation12_spill] sm:$0xff] }
 0xc53   :  { %v9201_v11 = vmul.f32 %v17334_v44, %v16058_v21 }
 0xc54   :  { %v9010_v49 = vadd.f32 %v17332_v4, %v8850_v54  ;;  %v8683_v4 = vadd.f32 %v17338_v5, %v8491_v16  ;;  %v17339_v54 = vld [vmem:[#allocation32_spill] sm:$0xff]  ;;  %v9012_v16 = vadd.f32 %v17343_v20, %v8852_v50  ;;  %v17344_v5 = vld [vmem:[#allocation95_spill] sm:$0xff]  ;;  %v9556_v20 = vmul.f32 %v15816_v25, %v16065_v59 }
 0xc55   :  { %v9361_v37 = vadd.f32 %v17347_v55, %v9201_v11  ;;  %v17352_v11 = vld [vmem:[#allocation103_spill] sm:$0xff] }
 0xc56   :  { %v9362_v55 = vadd.f32 %v17352_v11, %v9202_v18 }
 0xd24   :  { %v11082_v48 = vpop.f32.mrb[12].mxu1 }
 0xd25   :  { %v1337_v42 = vpop.f32.mrb[13].mxu1 }
 0xd26   :  { %11087 = vmatprep.mubr.msk.f32.mxu0 %vm23_vm0, %v1337_v42  ;;  %v17318_v42 = vld [vmem:[#allocation80_spill] sm:$0xff] }
 0xd27   :  { %11088 = vmatmul.mubr.msk.f32.vlgmr.msra.gmra.mrb[14].mxu0 %vm23_vm0, %v11082_v48  ;;  %v8493_v48 = vmul.f32 %v17317_v6, %v16042_v46  ;;  %v8495_v30 = vmul.f32 %v17318_v42, %v16042_v46  ;;  %v8854_v6 = vmul.f32 %v17327_v29, %v16044_v17  ;;  %v8856_v42 = vmul.f32 %v17328_v24, %v16044_v17  ;;  %v17335_v29 = vld [vmem:[#allocation93_spill] sm:$0xff] }
 0xd29   :  { %v8685_v28 = vadd.f32 %v17333_v60, %v8493_v48  ;;  %v8687_v9 = vadd.f32 %v17335_v29, %v8495_v30  ;;  %v9006_v60 = vadd.f32 %v17339_v54, %v8846_v56  ;;  %v17340_v48 = vld [vmem:[#allocation88_spill] sm:$0xff]  ;;  %v9007_v29 = vadd.f32 %v15903_v57, %v8847_v47  ;;  %v17345_v54 = vld [vmem:[#allocation94_spill] sm:$0xff] }
 0xd2a   :  { %v16406_v30 = vmul.f32 %v17340_v48, %v16042_v46  ;;  %v9014_v56 = vadd.f32 %v17344_v5, %v8854_v6  ;;  %v8851_v57 = vmul.f32 %v15818_v0, %v16044_v17  ;;  %v17348_v47 = vld [vmem:[#allocation24_spill] sm:$0xff]  ;;  %v17354_v5 = vld [vmem:[#allocation107_spill] sm:$0xff] }
 0xd2b   :  { %v9040_v48 = vmul.f32 %v9008_v40, %v8685_v28  ;;  %v9042_v32 = vmul.f32 %v9010_v49, %v8687_v9  ;;  %v9555_v39 = vmul.f32 %v17348_v47, %v16065_v59  ;;  %v9038_v50 = vmul.f32 %v9006_v60, %v8683_v4  ;;  %v17350_v6 = vld [vmem:[#allocation36_spill] sm:$0xff]  ;;  %v17353_v40 = vld [vmem:[#allocation35_spill] sm:$0xff]  ;;  %v17360_v47 = vld [vmem:[#allocation142_spill] sm:$0xff] }
 0xd2c   :  { %v9204_v63 = vmul.f32 %v17350_v6, %v16058_v21  ;;  %v9039_v28 = vmul.f32 %v9007_v29, %v8684_v34  ;;  %v17351_v9 = vld [vmem:[#allocation120_spill] sm:$0xff]  ;;  %v16434_v0 = vmul.f32 %v9014_v56, %v8691_v35  ;;  %v9557_v49 = vmul.f32 %v17353_v40, %v16065_v59  ;;  %v17355_v4 = vld [vmem:[#allocation111_spill] sm:$0xff]  ;;  %v17356_v34 = vld [vmem:[#allocation37_spill] sm:$0xff]  ;;  %v16447_v35 = vpop.permute.xlu1 %9695 }
 0xd2d   :  { %v9558_v60 = vmul.f32 %v17355_v4, %v16065_v59  ;;  %v9206_v29 = vmul.f32 %v17356_v34, %v16058_v21  ;;  %17359 = vst [vmem:[#allocation19_spill] sm:$0xff] %v16447_v35  ;;  %v9393_v6 = vmul.f32 %v9361_v37, %v9038_v50  ;;  %v9716_v34 = vadd.f32 %v16156_v62, %v9556_v20  ;;  %v17366_v37 = vld [vmem:[#allocation113_spill] sm:$0xff] }
 0xd2e   :  { %v9394_v19 = vmul.f32 %v9362_v55, %v9039_v28  ;;  %v9559_v20 = vmul.f32 %v16163_v14, %v16065_v59  ;;  %v17374_v14 = vld [vmem:[#allocation20_spill] sm:$0xff] }
 0xdfa   :  { %v11089_v26 = vpop.f32.mrb[14].mxu0 }
 0xdfb   :  { %1444 = vst.msk [vmem:[#allocation2 + $0x8] sm:$0xff] %vm23_vm0, %v11089_v26  ;;  %v1434_v24 = vpop.f32.mrb[15].mxu0  ;;  %v17341_v26 = vld [vmem:[#allocation104_spill] sm:$0xff] }
 0xdfc   :  { %1443 = vst.msk [vmem:[#allocation2] sm:$0xff] %vm23_vm0, %v1434_v24  ;;  %v8849_v44 = vmul.f32 %v17341_v26, %v16044_v17  ;;  %v8689_v24 = vadd.f32 %v17345_v54, %v8497_v43  ;;  %v17349_v26 = vld [vmem:[#allocation102_spill] sm:$0xff]  ;;  %v9205_v54 = vmul.f32 %v17354_v5, %v16058_v21  ;;  %v17361_v5 = vld [vmem:[#allocation144_spill] sm:$0xff] }
 0xdfd   :  { %v9203_v31 = vmul.f32 %v17349_v26, %v16058_v21  ;;  %v9364_v4 = vadd.f32 %v17361_v5, %v9204_v63  ;;  %v17368_v63 = vld [vmem:[#allocation26_spill] sm:$0xff] }
 0xdfe   :  { %v9009_v43 = vadd.f32 %v17351_v9, %v8849_v44  ;;  %v16432_v52 = vmul.f32 %v9012_v16, %v8689_v24  ;;  %v17357_v44 = vld [vmem:[#allocation105_spill] sm:$0xff]  ;;  %v17358_v16 = vld [vmem:[#allocation122_spill] sm:$0xff]  ;;  %v9715_v9 = vadd.f32 %v16144_v53, %v9555_v39  ;;  %v9718_v53 = vadd.f32 %v17366_v37, %v9558_v60  ;;  %v17367_v39 = vld [vmem:[#allocation115_spill] sm:$0xff] }
 0xdff   :  { %v8853_v18 = vmul.f32 %v17357_v44, %v16044_v17  ;;  %v9011_v24 = vadd.f32 %v17358_v16, %v8851_v57  ;;  %v9363_v26 = vadd.f32 %v17360_v47, %v9203_v31  ;;  %v9016_v44 = vadd.f32 %v17362_v15, %v8856_v42  ;;  %v17364_v16 = vld [vmem:[#allocation112_spill] sm:$0xff]  ;;  %v17369_v15 = vld [vmem:[#allocation22_spill] sm:$0xff] }
 0xe00   :  { %v9041_v40 = vmul.f32 %v9009_v43, %v16345_v8  ;;  %v9717_v57 = vadd.f32 %v17363_v1, %v9557_v49  ;;  %v9365_v35 = vadd.f32 %v17364_v16, %v9205_v54  ;;  %v8855_v31 = vmul.f32 %v17365_v41, %v16044_v17  ;;  %v17370_v41 = vld [vmem:[#allocation145_spill] sm:$0xff] }
 0xe01   :  { %v9366_v50 = vadd.f32 %v17367_v39, %v9206_v29  ;;  %v9043_v8 = vmul.f32 %v9011_v24, %v16350_v45  ;;  %v9013_v28 = vadd.f32 %v17368_v63, %v8853_v18  ;;  %v9395_v62 = vmul.f32 %v9363_v26, %v9040_v48  ;;  %v16471_v45 = vpop.permute.xlu1 %9539  ;;  %v17372_v29 = vld [vmem:[#allocation108_spill] sm:$0xff]  ;;  %v17373_v24 = vld [vmem:[#allocation125_spill] sm:$0xff]  ;;  %v17381_v39 = vld [vmem:[#allocation119_spill] sm:$0xff] }
 0xe02   :  { %v9779_v25 = vld [vmem:[#allocation2 + $0x8] sm:$0xff]  ;;  %v9207_v42 = vmul.f32 %v17369_v15, %v16058_v21  ;;  %v9747_v1 = vmul.f32 %v9715_v9, %v9393_v6  ;;  %v9396_v43 = vmul.f32 %v9364_v4, %v9041_v40  ;;  %v9208_v55 = vmul.f32 %v17370_v41, %v16058_v21  ;;  %v17377_v9 = vld [vmem:[#allocation117_spill] sm:$0xff]  ;;  %v17379_v4 = vld [vmem:[#allocation128_spill] sm:$0xff] }
 0xe03   :  { %v9778_v56 = vld [vmem:[#allocation2] sm:$0xff]  ;;  %v9748_v49 = vmul.f32 %v9716_v34, %v9394_v19  ;;  %v9560_v54 = vmul.f32 %v16170_v61, %v16065_v59  ;;  %v9397_v60 = vmul.f32 %v9365_v35, %v9042_v32  ;;  %v8857_v18 = vmul.f32 %v17372_v29, %v16044_v17  ;;  %v17376_v32 = vld [vmem:[#allocation124_spill] sm:$0xff]  ;;  %v17378_v40 = vld [vmem:[#allocation38_spill] sm:$0xff] }
 0xe04   :  { %v11254_v11 = vpack.c.bf16 %v9779_v25, %v9778_v56  ;;  %v17371_v25 = vld [vmem:[#allocation97_spill] sm:$0xff]  ;;  %v9015_v56 = vadd.f32 %v17373_v24, %v8855_v31  ;;  %v9561_v47 = vmul.f32 %v17374_v14, %v16065_v59  ;;  %v9398_v61 = vmul.f32 %v9366_v50, %v9043_v8  ;;  %v17380_v31 = vld [vmem:[#allocation123_spill] sm:$0xff] }
 0xe05   :  { %v8693_v48 = vadd.f32 %v17371_v25, %v16399_v36  ;;  %v17375_v19 = vld [vmem:[#allocation121_spill] sm:$0xff]  ;;  %v9045_v6 = vmul.f32 %v9013_v28, %v16361_v13  ;;  %v9562_v36 = vmul.f32 %v17376_v32, %v16065_v59  ;;  %v9749_v35 = vmul.f32 %v9717_v57, %v9395_v62  ;;  %v17383_v15 = vld [vmem:[#allocation127_spill] sm:$0xff]  ;;  %v17384_v62 = vld [vmem:[#allocation126_spill] sm:$0xff] }
 0xe06   :  { %11255 = vmatprep.subr.bf16.mxu1 %v11254_v11  ;;  %v9209_v26 = vmul.f32 %v17375_v19, %v16058_v21  ;;  %v9719_v5 = vadd.f32 %v17378_v40, %v9559_v20  ;;  %v9210_v34 = vmul.f32 %v17379_v4, %v16058_v21  ;;  %v9750_v16 = vmul.f32 %v9718_v53, %v9396_v43  ;;  %v17382_v13 = vld [vmem:[#allocation109_spill] sm:$0xff]  ;;  %v17386_v20 = vld [vmem:[#allocation131_spill] sm:$0xff]  ;;  %v17390_v19 = vld [vmem:[#allocation10_spill] sm:$0xff] }
 0xe07   :  { %11257 = vmatpush3.bf16.msra.mxu1 %v11254_v11  ;;  %v9367_v11 = vadd.f32 %v17377_v9, %v9207_v42  ;;  %v9368_v37 = vadd.f32 %v17380_v31, %v9208_v55  ;;  %v9720_v50 = vadd.f32 %v17381_v39, %v9560_v54  ;;  %v9048_v8 = vmul.f32 %v9016_v44, %v8693_v48  ;;  %v17387_v44 = vld [vmem:[#allocation133_spill] sm:$0xff]  ;;  %v16506_v55 = vpop.permute.xlu1 %9349 }
 0xe08   :  { %v8859_v63 = vmul.f32 %v17382_v13, %v16044_v17  ;;  %v9047_v28 = vmul.f32 %v9015_v56, %v16364_v27  ;;  %v9017_v57 = vadd.f32 %v17383_v15, %v8857_v18  ;;  %v9563_v42 = vmul.f32 %v17384_v62, %v16065_v59  ;;  %v17388_v27 = vld [vmem:[#allocation147_spill] sm:$0xff]  ;;  %v17389_v29 = vld [vmem:[#allocation149_spill] sm:$0xff]  ;;  %v17400_v62 = vld [vmem:[#allocation140_spill] sm:$0xff] }
 0xe09   :  { %v9564_v43 = vmul.f32 %v17386_v20, %v16065_v59  ;;  %v9212_v41 = vmul.f32 %v17387_v44, %v16058_v21  ;;  %v9751_v54 = vmul.f32 %v9719_v5, %v9397_v60  ;;  %v9399_v25 = vmul.f32 %v9367_v11, %v16432_v52  ;;  %v17393_v52 = vld [vmem:[#allocation39_spill] sm:$0xff]  ;;  %v17403_v44 = vld [vmem:[#allocation146_spill] sm:$0xff] }
 0xe0a   :  { %11095 = vmatmul.mubr.msk.f32.vlgmr.msra.gmra.mrb[14].mxu1 %vm23_vm0, %v9747_v1  ;;  %v17385_v1 = vld [vmem:[#allocation130_spill] sm:$0xff]  ;;  %v9721_v48 = vadd.f32 %v16173_v12, %v9561_v47  ;;  %v9370_v18 = vadd.f32 %v17389_v29, %v9210_v34  ;;  %v9752_v24 = vmul.f32 %v9720_v50, %v9398_v61  ;;  %v9400_v56 = vmul.f32 %v9368_v37, %v9045_v6  ;;  %v17394_v47 = vld [vmem:[#allocation132_spill] sm:$0xff]  ;;  %v17395_v61 = vld [vmem:[#allocation135_spill] sm:$0xff] }
 0xe0b   :  { %11097 = vmatprep.mubr.msk.f32.mxu1 %vm23_vm0, %v9748_v49  ;;  %v9211_v53 = vmul.f32 %v17385_v1, %v16058_v21  ;;  %v9369_v49 = vadd.f32 %v17388_v27, %v9209_v26  ;;  %v9722_v14 = vadd.f32 %v16178_v51, %v9562_v36  ;;  %v9018_v32 = vadd.f32 %v17390_v19, %v16395_v33  ;;  %v17392_v26 = vld [vmem:[#allocation129_spill] sm:$0xff]  ;;  %v17396_v5 = vld [vmem:[#allocation139_spill] sm:$0xff]  ;;  %v16535_v50 = vpop.permute.xlu1 %8998 }
 0xe0c   :  { %v9049_v40 = vmul.f32 %v9017_v57, %v16367_v22  ;;  %v9019_v60 = vadd.f32 %v17392_v26, %v8859_v63  ;;  %v9723_v12 = vadd.f32 %v17393_v52, %v9563_v42  ;;  %v9724_v6 = vadd.f32 %v17395_v61, %v9564_v43  ;;  %v17401_v1 = vld [vmem:[#allocation137_spill] sm:$0xff]  ;;  %v17408_v26 = vld [vmem:[#allocation54_spill] sm:$0xff]  ;;  %v17409_v52 = vld [vmem:[#allocation71_spill] sm:$0xff] }
 0xe0d   :  { %v9371_v11 = vadd.f32 %v17394_v47, %v9211_v53  ;;  %v9372_v51 = vadd.f32 %v17396_v5, %v9212_v41  ;;  %v9401_v33 = vmul.f32 %v9369_v49, %v16434_v0  ;;  %v9753_v22 = vmul.f32 %v9721_v48, %v9399_v25  ;;  %v17413_v5 = vld [vmem:[#allocation116_spill] sm:$0xff] }
 0xe0e   :  { %11098 = vmatmul.mubr.msk.f32.gmra.mrb[16].mxu1 %vm23_vm0, %v9749_v35  ;;  %v17391_v35 = vld [vmem:[#allocation98_spill] sm:$0xff]  ;;  %v9565_v4 = vmul.f32 %v16185_v3, %v16065_v59  ;;  %v9402_v34 = vmul.f32 %v9370_v18, %v9047_v28  ;;  %v9754_v37 = vmul.f32 %v9722_v14, %v9400_v56  ;;  %v9566_v39 = vmul.f32 %v16190_v10, %v16065_v59  ;;  %v17399_v3 = vld [vmem:[#allocation141_spill] sm:$0xff]  ;;  %v17402_v10 = vld [vmem:[#allocation148_spill] sm:$0xff] }
 0xe0f   :  { %11100 = vmatprep.mubr.msk.f32.mxu1 %vm23_vm0, %v9750_v16  ;;  %v8695_v9 = vadd.f32 %v17391_v35, %v16406_v30  ;;  %v17397_v30 = vld [vmem:[#allocation150_spill] sm:$0xff]  ;;  %v17398_v16 = vld [vmem:[#allocation151_spill] sm:$0xff]  ;;  %v9403_v13 = vmul.f32 %v9371_v11, %v9048_v8  ;;  %v9404_v63 = vmul.f32 %v9372_v51, %v9049_v40  ;;  %v9051_v15 = vmul.f32 %v9019_v60, %v16372_v58  ;;  %v16549_v58 = vpop.permute.xlu1 %9193  ;;  %v9544_v40 = vpop.permute.xlu0 %9543 }
 0xe10   :  { %v9213_v36 = vmul.f32 %v17397_v30, %v16058_v21  ;;  %v9214_v31 = vmul.f32 %v17398_v16, %v16058_v21  ;;  %v9567_v28 = vmul.f32 %v17399_v3, %v16065_v59  ;;  %v9755_v57 = vmul.f32 %v9723_v12, %v9401_v33  ;;  %v17404_v8 = vld [vmem:[#allocation143_spill] sm:$0xff]  ;;  %v17407_v35 = vld [vmem:[#allocation114_spill] sm:$0xff]  ;;  %v17421_v3 = vld [vmem:[#allocation72_spill] sm:$0xff] }
 0xe11   :  { %v9050_v0 = vmul.f32 %v9018_v32, %v8695_v9  ;;  %v9725_v53 = vadd.f32 %v17401_v1, %v9565_v4  ;;  %v9568_v20 = vmul.f32 %v17402_v10, %v16065_v59  ;;  %v9756_v43 = vmul.f32 %v9724_v6, %v9402_v34  ;;  %v17410_v12 = vld [vmem:[#allocation3_spill] sm:$0xff]  ;;  %v17412_v6 = vld [vmem:[#allocation13_spill] sm:$0xff]  ;;  %v17414_v33 = vld [vmem:[#allocation134_spill] sm:$0xff] }
 0xe12   :  { %11101 = vmatmul.mubr.msk.f32.gmra.mrb[18].mxu1 %vm23_vm0, %v9751_v54  ;;  %v9373_v42 = vadd.f32 %v17400_v62, %v9213_v36  ;;  %v9374_v41 = vadd.f32 %v17403_v44, %v9214_v31  ;;  %v9726_v27 = vadd.f32 %v17404_v8, %v9566_v39  ;;  %v9727_v25 = vadd.f32 %v16207_v7, %v9567_v28  ;;  %v17405_v7 = vld [vmem:[#allocation53_spill] sm:$0xff]  ;;  %v17411_v11 = vld [vmem:[#allocation23_spill] sm:$0xff] }
 0xe13   :  { %11103 = vmatprep.mubr.msk.f32.mxu1 %vm23_vm0, %v9752_v24  ;;  %v9757_v49 = vmul.f32 %v9725_v53, %v9403_v13  ;;  %v9728_v18 = vadd.f32 %v16223_v2, %v9568_v20  ;;  %v16556_v14 = vpop.permute.xlu1 %9002  ;;  %v8516_v19 = vmul.f32 %v17405_v7, %v16042_v46  ;;  %v17406_v2 = vld [vmem:[#allocation28_spill] sm:$0xff]  ;;  %v8871_v9 = vmul.f32 %v17407_v35, %v16044_v17  ;;  %v17417_v16 = vld [vmem:[#allocation55_spill] sm:$0xff]  ;;  %v17424_v53 = vld [vmem:[#allocation9_spill] sm:$0xff] }
 0xe14   :  { %v9405_v54 = vmul.f32 %v9373_v42, %v9050_v0  ;;  %v9758_v48 = vmul.f32 %v9726_v27, %v9404_v63  ;;  %v9406_v29 = vmul.f32 %v9374_v41, %v9051_v15  ;;  %v8518_v60 = vmul.f32 %v17408_v26, %v16042_v46  ;;  %v17419_v0 = vld [vmem:[#allocation27_spill] sm:$0xff]  ;;  %v9700_v63 = vpop.permute.xlu0 %9699  ;;  %v17420_v15 = vld [vmem:[#allocation50_spill] sm:$0xff]  ;;  %v17423_v42 = vld [vmem:[#allocation136_spill] sm:$0xff] }
 0xe15   :  { %v8872_v47 = vmul.f32 %v17410_v12, %v16044_v17  ;;  %v8517_v61 = vmul.f32 %v17411_v11, %v16042_v46  ;;  %v8873_v51 = vmul.f32 %v17413_v5, %v16044_v17  ;;  %v9031_v30 = vadd.f32 %v17414_v33, %v8871_v9  ;;  %v17425_v20 = vld [vmem:[#allocation56_spill] sm:$0xff]  ;;  %v17426_v44 = vld [vmem:[#allocation31_spill] sm:$0xff]  ;;  %v17427_v8 = vld [vmem:[#allocation17_spill] sm:$0xff] }
 0xe16   :  { %11104 = vmatmul.mubr.msk.f32.gmra.mrb[20].mxu1 %vm23_vm0, %v9753_v22  ;;  %v9759_v24 = vmul.f32 %v9727_v25, %v9405_v54  ;;  %v9760_v56 = vmul.f32 %v9728_v18, %v9406_v29  ;;  %v17416_v22 = vld [vmem:[#allocation68_spill] sm:$0xff]  ;;  %v8520_v31 = vmul.f32 %v17417_v16, %v16042_v46  ;;  %v8519_v13 = vmul.f32 %v17419_v0, %v16042_v46  ;;  %v17429_v25 = vld [vmem:[#allocation118_spill] sm:$0xff]  ;;  %v17433_v35 = vld [vmem:[#allocation99_spill] sm:$0xff] }
 0xe17   :  { %11106 = vmatprep.mubr.msk.f32.mxu1 %vm23_vm0, %v9754_v37  ;;  %v16564_v32 = vpop.permute.xlu1 %9703  ;;  %v9578_v4 = vmul.f32 %v17416_v22, %v16065_v59  ;;  %v17418_v37 = vld [vmem:[#allocation4_spill] sm:$0xff]  ;;  %v8710_v28 = vadd.f32 %v17421_v3, %v8518_v60  ;;  %v9032_v1 = vadd.f32 %v17423_v42, %v8872_v47  ;;  %v9227_v10 = vmul.f32 %v17424_v53, %v16058_v21  ;;  %v17430_v29 = vld [vmem:[#allocation66_spill] sm:$0xff]  ;;  %v17437_v11 = vld [vmem:[#allocation15_spill] sm:$0xff] }
 0xe18   :  { %v8874_v39 = vmul.f32 %v17418_v37, %v16044_v17  ;;  %v9033_v27 = vadd.f32 %v17427_v8, %v8873_v51  ;;  %v9580_v18 = vmul.f32 %v17430_v29, %v16065_v59  ;;  %v8711_v9 = vadd.f32 %v17433_v35, %v8519_v13  ;;  %v17434_v26 = vld [vmem:[#allocation138_spill] sm:$0xff]  ;;  %v17436_v12 = vld [vmem:[#allocation48_spill] sm:$0xff]  ;;  %v17439_v51 = vld [vmem:[#allocation67_spill] sm:$0xff] }
 0xe19   :  { %v9387_v47 = vadd.f32 %v17436_v12, %v9227_v10  ;;  %v17442_v16 = vld [vmem:[#allocation52_spill] sm:$0xff]  ;;  %v9582_v37 = vmul.f32 %v16471_v45, %v16065_v59  ;;  %v9230_v0 = vmul.f32 %v16549_v58, %v16058_v21  ;;  %v17443_v13 = vld [vmem:[#allocation101_spill] sm:$0xff]  ;;  %v17446_v42 = vld [vmem:[#allocation19_spill] sm:$0xff] }
 0xe1a   :  { %11107 = vmatmul.mubr.msk.f32.gmra.mrb[22].mxu1 %vm23_vm0, %v9755_v57  ;;  %v17422_v57 = vld [vmem:[#allocation18_spill] sm:$0xff]  ;;  %v9034_v60 = vadd.f32 %v17434_v26, %v8874_v39  ;;  %v17447_v10 = vld [vmem:[#allocation25_spill] sm:$0xff] }
 0xe1b   :  { %11109 = vmatprep.mubr.msk.f32.mxu1 %vm23_vm0, %v9756_v43  ;;  %v9354_v34 = vpop.permute.xlu1 %9353  ;;  %v8709_v62 = vadd.f32 %v17422_v57, %v8517_v61  ;;  %v9581_v61 = vmul.f32 %v17437_v11, %v16065_v59  ;;  %v17444_v57 = vld [vmem:[#allocation51_spill] sm:$0xff]  ;;  %v9742_v8 = vadd.f32 %v9700_v63, %v9582_v37 }
 0xe1c   :  { %v9066_v3 = vmul.f32 %v9034_v60, %v8711_v9 }
 0xe1e   :  { %11110 = vmatmul.mubr.msk.f32.gmra.mrb[24].mxu1 %vm23_vm0, %v9757_v49  ;;  %v17428_v49 = vld [vmem:[#allocation49_spill] sm:$0xff] }
 0xe1f   :  { %11112 = vmatprep.mubr.msk.f32.mxu1 %vm23_vm0, %v9758_v48  ;;  %v9738_v54 = vadd.f32 %v17428_v49, %v9578_v4  ;;  %v8875_v48 = vmul.f32 %v17429_v25, %v16044_v17  ;;  %v9548_v4 = vpop.permute.xlu0 %9547  ;;  %v17448_v49 = vld [vmem:[#allocation5_spill] sm:$0xff] }
 0xe21   :  { %v9035_v39 = vadd.f32 %v16535_v50, %v8875_v48  ;;  %v9583_v50 = vmul.f32 %v9544_v40, %v16065_v59 }
 0xe22   :  { %11113 = vmatmul.mubr.msk.f32.gmra.mrb[26].mxu1 %vm23_vm0, %v9759_v24  ;;  %v9358_v24 = vpop.permute.xlu1 %9357 }
 0xe23   :  { %11115 = vmatprep.mubr.msk.f32.mxu1 %vm23_vm0, %v9760_v56  ;;  %v17431_v56 = vld [vmem:[#allocation73_spill] sm:$0xff]  ;;  %v9743_v40 = vadd.f32 %v16564_v32, %v9583_v50 }
 0xe24   :  { %v8712_v7 = vadd.f32 %v17431_v56, %v8520_v31  ;;  %v9740_v31 = vadd.f32 %v17442_v16, %v9580_v18 }
 0xe26   :  { %11116 = vmatmul.mubr.msk.f32.gmra.mrb[28].mxu1 %vm23_vm0, %v16081_v38  ;;  %v8708_v38 = vadd.f32 %v17409_v52, %v8516_v19  ;;  %v17432_v19 = vld [vmem:[#allocation89_spill] sm:$0xff]  ;;  %v17435_v52 = vld [vmem:[#allocation11_spill] sm:$0xff]  ;;  %v9552_v45 = vpop.permute.xlu1 %9551 }
 0xe27   :  { %11118 = vmatprep.mubr.msk.f32.mxu1 %vm23_vm0, %v17406_v2  ;;  %v8521_v2 = vmul.f32 %v17432_v19, %v16042_v46  ;;  %v17440_v46 = vld [vmem:[#allocation29_spill] sm:$0xff]  ;;  %v9585_v48 = vmul.f32 %v9552_v45, %v16065_v59 }
 0xe28   :  { %v9063_v43 = vmul.f32 %v9031_v30, %v8708_v38  ;;  %v9064_v38 = vmul.f32 %v9032_v1, %v8709_v62  ;;  %v8876_v33 = vmul.f32 %v17440_v46, %v16044_v17  ;;  %v17445_v17 = vld [vmem:[#allocation65_spill] sm:$0xff]  ;;  %v9741_v1 = vadd.f32 %v17446_v42, %v9581_v61 }
 0xe2a   :  { %11119 = vmatmul.mubr.msk.f32.gmra.mrb[30].mxu1 %vm23_vm0, %v16249_v23  ;;  %v17415_v23 = vld [vmem:[#allocation7_spill] sm:$0xff]  ;;  %v9419_v62 = vmul.f32 %v9387_v47, %v9064_v38  ;;  %v9036_v58 = vadd.f32 %v16556_v14, %v8876_v33 }
 0xe2b   :  { %11121 = vmatprep.mubr.msk.f32.mxu1 %vm23_vm0, %v17412_v6  ;;  %v9226_v36 = vmul.f32 %v17415_v23, %v16058_v21  ;;  %v17438_v6 = vld [vmem:[#allocation70_spill] sm:$0xff]  ;;  %v9065_v23 = vmul.f32 %v9033_v27, %v8710_v28  ;;  %v9231_v28 = vmul.f32 %v17445_v17, %v16058_v21  ;;  %v9708_v27 = vpop.permute.xlu0 %9707 }
 0xe2c   :  { %v9229_v5 = vmul.f32 %v17438_v6, %v16058_v21  ;;  %v9390_v21 = vadd.f32 %v9354_v34, %v9230_v0 }
 0xe2d   :  { %v9386_v41 = vadd.f32 %v17426_v44, %v9226_v36  ;;  %v17441_v36 = vld [vmem:[#allocation69_spill] sm:$0xff]  ;;  %v9391_v14 = vadd.f32 %v9358_v24, %v9231_v28  ;;  %v10824_v24 = vld [vmem:[%s16821_s2 + $0x68] sm:$0xff] }
 0xe2e   :  { %11122 = vmatmul.mubr.msk.f32.gmra.mrb[32].mxu1 %vm23_vm0, %v17420_v15  ;;  %v9770_v22 = vmul.f32 %v9738_v54, %v17441_v36  ;;  %v8713_v15 = vadd.f32 %v17443_v13, %v8521_v2  ;;  %v9389_v53 = vadd.f32 %v16506_v55, %v9229_v5  ;;  %v9773_v55 = vmul.f32 %v9741_v1, %v9419_v62 }
 0xe2f   :  { %11124 = vmatprep.mubr.msk.f32.mxu1 %vm23_vm0, %v17425_v20  ;;  %v9418_v30 = vmul.f32 %v9386_v41, %v9063_v43  ;;  %v9420_v20 = vmul.f32 %v17447_v10, %v9065_v23  ;;  %v9584_v43 = vmul.f32 %v9548_v4, %v16065_v59  ;;  %v9067_v41 = vmul.f32 %v9035_v39, %v8712_v7  ;;  %v9712_v7 = vpop.permute.xlu1 %9711  ;;  %v10823_v59 = vld [vmem:[%s16821_s2 + $0x60] sm:$0xff] }
 0xe30   :  { %v9421_v54 = vmul.f32 %v9389_v53, %v9066_v3  ;;  %v9068_v25 = vmul.f32 %v9036_v58, %v8713_v15  ;;  %v9745_v19 = vadd.f32 %v9712_v7, %v9585_v48  ;;  %v11258_v35 = vpack.c.bf16 %v10824_v24, %v10823_v59 }
 0xe31   :  { %v9772_v44 = vmul.f32 %v9740_v31, %v9418_v30  ;;  %v9774_v29 = vmul.f32 %v9742_v8, %v9420_v20  ;;  %v9422_v18 = vmul.f32 %v9390_v21, %v9067_v41  ;;  %v9744_v56 = vadd.f32 %v9708_v27, %v9584_v43 }
 0xe32   :  { %11125 = vmatmul.mubr.msk.f32.gmra.mrb[34].mxu1 %vm23_vm0, %v17435_v52  ;;  %v9775_v34 = vmul.f32 %v9743_v40, %v9421_v54  ;;  %v9423_v63 = vmul.f32 %v9391_v14, %v9068_v25  ;;  %11259 = vmatprep.subr.bf16.mxu0 %v11258_v35 }
 0xe33   :  { %11127 = vmatprep.mubr.msk.f32.mxu1 %vm23_vm0, %v17439_v51  ;;  %v9776_v2 = vmul.f32 %v9744_v56, %v9422_v18  ;;  %11261 = vmatpush3.bf16.msra.mxu0 %v11258_v35 }
 0xe34   :  { %v9777_v32 = vmul.f32 %v9745_v19, %v9423_v63 }
 0xe36   :  { %11128 = vmatmul.mubr.msk.f32.gmra.mrb[36].mxu1 %vm23_vm0, %v17444_v57 }
 0xe37   :  { %11130 = vmatprep.mubr.msk.f32.mxu1 %vm23_vm0, %v9770_v22 }
 0xe3a   :  { %11131 = vmatmul.mubr.msk.f32.gmra.mrb[38].mxu1 %vm23_vm0, %v17448_v49 }
 0xe3b   :  { %11133 = vmatprep.mubr.msk.f32.mxu1 %vm23_vm0, %v9772_v44 }
 0xe3e   :  { %11134 = vmatmul.mubr.msk.f32.gmra.mrb[40].mxu1 %vm23_vm0, %v9773_v55 }
 0xe3f   :  { %11136 = vmatprep.mubr.msk.f32.mxu1 %vm23_vm0, %v9774_v29 }
 0xe42   :  { %11137 = vmatmul.mubr.msk.f32.gmra.mrb[42].mxu1 %vm23_vm0, %v9775_v34 }
 0xe43   :  { %11139 = vmatprep.mubr.msk.f32.mxu1 %vm23_vm0, %v9776_v2 }
 0xe46   :  { %11140 = vmatmul.mubr.msk.f32.gmra.mrb[44].mxu1 %vm23_vm0, %v9777_v32 }
 0xedd   :  { %v11096_v9 = vpop.f32.mrb[14].mxu1 }
 0xede   :  { %v9943_v26 = vpop.f32.mrb[15].mxu1  ;;  %v10103_v52 = vmul.f32 %v11096_v9, %v11096_v9 }
 0xedf   :  { %v10102_v60 = vmul.f32 %v9943_v26, %v9943_v26 }
 0xee1   :  { %v11099_v38 = vpop.f32.mrb[16].mxu1  ;;  %11146 = vmatprep.mubr.msk.f32.mxu0 %vm23_vm0, %v10102_v60 }
 0xee2   :  { %v9953_v12 = vpop.f32.mrb[17].mxu1  ;;  %11147 = vmatmul.mubr.msk.f32.vlgmr.msra.gmra.mrb[16].mxu0 %vm23_vm0, %v10103_v52  ;;  %v10105_v11 = vmul.f32 %v11099_v38, %v11099_v38 }
 0xee3   :  { %v10104_v47 = vmul.f32 %v9953_v12, %v9953_v12 }
 0xee5   :  { %v11102_v61 = vpop.f32.mrb[18].mxu1  ;;  %11149 = vmatprep.mubr.msk.f32.mxu0 %vm23_vm0, %v10104_v47 }
 0xee6   :  { %v9963_v6 = vpop.f32.mrb[19].mxu1  ;;  %11150 = vmatmul.mubr.msk.f32.gmra.mrb[18].mxu0 %vm23_vm0, %v10105_v11  ;;  %v10107_v51 = vmul.f32 %v11102_v61, %v11102_v61 }
 0xee7   :  { %v10106_v5 = vmul.f32 %v9963_v6, %v9963_v6 }
 0xee9   :  { %v11105_v46 = vpop.f32.mrb[20].mxu1  ;;  %11152 = vmatprep.mubr.msk.f32.mxu0 %vm23_vm0, %v10106_v5 }
 0xeea   :  { %v9973_v33 = vpop.f32.mrb[21].mxu1  ;;  %11153 = vmatmul.mubr.msk.f32.gmra.mrb[20].mxu0 %vm23_vm0, %v10107_v51  ;;  %v10109_v23 = vmul.f32 %v11105_v46, %v11105_v46 }
 0xeeb   :  { %v10108_v30 = vmul.f32 %v9973_v33, %v9973_v33 }
 0xeed   :  { %v11108_v36 = vpop.f32.mrb[22].mxu1  ;;  %11155 = vmatprep.mubr.msk.f32.mxu0 %vm23_vm0, %v10108_v30 }
 0xeee   :  { %v9983_v22 = vpop.f32.mrb[23].mxu1  ;;  %11156 = vmatmul.mubr.msk.f32.gmra.mrb[22].mxu0 %vm23_vm0, %v10109_v23  ;;  %v10111_v16 = vmul.f32 %v11108_v36, %v11108_v36 }
 0xeef   :  { %v10110_v4 = vmul.f32 %v9983_v22, %v9983_v22 }
 0xef1   :  { %v11111_v31 = vpop.f32.mrb[24].mxu1  ;;  %11158 = vmatprep.mubr.msk.f32.mxu0 %vm23_vm0, %v10110_v4 }
 0xef2   :  { %v9993_v37 = vpop.f32.mrb[25].mxu1  ;;  %11159 = vmatmul.mubr.msk.f32.gmra.mrb[24].mxu0 %vm23_vm0, %v10111_v16  ;;  %v10113_v0 = vmul.f32 %v11111_v31, %v11111_v31 }
 0xef3   :  { %v10112_v39 = vmul.f32 %v9993_v37, %v9993_v37 }
 0xef5   :  { %v11114_v13 = vpop.f32.mrb[26].mxu1  ;;  %11161 = vmatprep.mubr.msk.f32.mxu0 %vm23_vm0, %v10112_v39 }
 0xef6   :  { %v10003_v15 = vpop.f32.mrb[27].mxu1  ;;  %11162 = vmatmul.mubr.msk.f32.gmra.mrb[26].mxu0 %vm23_vm0, %v10113_v0  ;;  %v10115_v57 = vmul.f32 %v11114_v13, %v11114_v13 }
 0xef7   :  { %v10114_v3 = vmul.f32 %v10003_v15, %v10003_v15 }
 0xef9   :  { %v11117_v17 = vpop.f32.mrb[28].mxu1  ;;  %11164 = vmatprep.mubr.msk.f32.mxu0 %vm23_vm0, %v10114_v3 }
 0xefa   :  { %v10013_v28 = vpop.f32.mrb[29].mxu1  ;;  %11165 = vmatmul.mubr.msk.f32.gmra.mrb[28].mxu0 %vm23_vm0, %v10115_v57  ;;  %v10117_v42 = vmul.f32 %v11117_v17, %v11117_v17 }
 0xefb   :  { %v10116_v62 = vmul.f32 %v10013_v28, %v10013_v28 }
 0xefd   :  { %v11120_v1 = vpop.f32.mrb[30].mxu1  ;;  %11167 = vmatprep.mubr.msk.f32.mxu0 %vm23_vm0, %v10116_v62 }
 0xefe   :  { %v10023_v53 = vpop.f32.mrb[31].mxu1  ;;  %11168 = vmatmul.mubr.msk.f32.gmra.mrb[30].mxu0 %vm23_vm0, %v10117_v42  ;;  %v10119_v50 = vmul.f32 %v11120_v1, %v11120_v1 }
 0xeff   :  { %v10118_v45 = vmul.f32 %v10023_v53, %v10023_v53 }
 0xf01   :  { %v11123_v58 = vpop.f32.mrb[32].mxu1  ;;  %11170 = vmatprep.mubr.msk.f32.mxu0 %vm23_vm0, %v10118_v45 }
 0xf02   :  { %v10033_v10 = vpop.f32.mrb[33].mxu1  ;;  %11171 = vmatmul.mubr.msk.f32.gmra.mrb[32].mxu0 %vm23_vm0, %v10119_v50  ;;  %v10121_v43 = vmul.f32 %v11123_v58, %v11123_v58 }
 0xf03   :  { %v10120_v20 = vmul.f32 %v10033_v10, %v10033_v10 }
 0xf05   :  { %v11126_v44 = vpop.f32.mrb[34].mxu1  ;;  %11173 = vmatprep.mubr.msk.f32.mxu0 %vm23_vm0, %v10120_v20 }
 0xf06   :  { %v10043_v41 = vpop.f32.mrb[35].mxu1  ;;  %11174 = vmatmul.mubr.msk.f32.gmra.mrb[34].mxu0 %vm23_vm0, %v10121_v43  ;;  %v10123_v21 = vmul.f32 %v11126_v44, %v11126_v44 }
 0xf07   :  { %v10122_v8 = vmul.f32 %v10043_v41, %v10043_v41 }
 0xf09   :  { %v11129_v27 = vpop.f32.mrb[36].mxu1  ;;  %11176 = vmatprep.mubr.msk.f32.mxu0 %vm23_vm0, %v10122_v8 }
 0xf0a   :  { %v10053_v49 = vpop.f32.mrb[37].mxu1  ;;  %11177 = vmatmul.mubr.msk.f32.gmra.mrb[36].mxu0 %vm23_vm0, %v10123_v21  ;;  %v10125_v54 = vmul.f32 %v11129_v27, %v11129_v27 }
 0xf0b   :  { %v10124_v55 = vmul.f32 %v10053_v49, %v10053_v49 }
 0xf0d   :  { %v11132_v25 = vpop.f32.mrb[38].mxu1  ;;  %11179 = vmatprep.mubr.msk.f32.mxu0 %vm23_vm0, %v10124_v55 }
 0xf0e   :  { %v10063_v40 = vpop.f32.mrb[39].mxu1  ;;  %11180 = vmatmul.mubr.msk.f32.gmra.mrb[38].mxu0 %vm23_vm0, %v10125_v54  ;;  %v10127_v48 = vmul.f32 %v11132_v25, %v11132_v25 }
 0xf0f   :  { %v10126_v14 = vmul.f32 %v10063_v40, %v10063_v40 }
 0xf11   :  { %v11135_v29 = vpop.f32.mrb[40].mxu1  ;;  %11182 = vmatprep.mubr.msk.f32.mxu0 %vm23_vm0, %v10126_v14 }
 0xf12   :  { %v10073_v18 = vpop.f32.mrb[41].mxu1  ;;  %11183 = vmatmul.mubr.msk.f32.gmra.mrb[40].mxu0 %vm23_vm0, %v10127_v48  ;;  %v10129_v7 = vmul.f32 %v11135_v29, %v11135_v29 }
 0xf13   :  { %v10128_v56 = vmul.f32 %v10073_v18, %v10073_v18 }
 0xf15   :  { %v11138_v34 = vpop.f32.mrb[42].mxu1  ;;  %11185 = vmatprep.mubr.msk.f32.mxu0 %vm23_vm0, %v10128_v56 }
 0xf16   :  { %v10083_v63 = vpop.f32.mrb[43].mxu1  ;;  %11186 = vmatmul.mubr.msk.f32.gmra.mrb[42].mxu0 %vm23_vm0, %v10129_v7  ;;  %v10131_v2 = vmul.f32 %v11138_v34, %v11138_v34 }
 0xf17   :  { %v10130_v19 = vmul.f32 %v10083_v63, %v10083_v63 }
 0xf19   :  { %v11141_v32 = vpop.f32.mrb[44].mxu1  ;;  %11188 = vmatprep.mubr.msk.f32.mxu0 %vm23_vm0, %v10130_v19 }
 0xf1a   :  { %v10093_v59 = vpop.f32.mrb[45].mxu1  ;;  %11189 = vmatmul.mubr.msk.f32.gmra.mrb[44].mxu0 %vm23_vm0, %v10131_v2  ;;  %v10133_v35 = vmul.f32 %v11141_v32, %v11141_v32 }
 0xf1b   :  { %v10132_v24 = vmul.f32 %v10093_v59, %v10093_v59 }
 0xf1d   :  { %11191 = vmatprep.mubr.msk.f32.mxu0 %vm23_vm0, %v10132_v24 }
 0xf1e   :  { %11192 = vmatmul.mubr.msk.f32.gmra.mrb[46].mxu0 %vm23_vm0, %v10133_v35 }
 0xfb5   :  { %v11148_v9 = vpop.f32.mrb[16].mxu0 }
 0xfb6   :  { %10460 = vst.msk [vmem:[%s16824_s3 + $0x8] sm:$0xff] %vm10458_vm2, %v11148_v9  ;;  %v10299_v26 = vpop.f32.mrb[17].mxu0 }
 0xfb7   :  { %10459 = vst.msk [vmem:[%s16824_s3] sm:$0xff] %vm10458_vm2, %v10299_v26 }
 0xfb9   :  { %v11151_v60 = vpop.f32.mrb[18].mxu0 }
 0xfba   :  { %10462 = vst.msk [vmem:[%s16824_s3 + $0x18] sm:$0xff] %vm10458_vm2, %v11151_v60  ;;  %v10309_v52 = vpop.f32.mrb[19].mxu0 }
 0xfbb   :  { %10461 = vst.msk [vmem:[%s16824_s3 + $0x10] sm:$0xff] %vm10458_vm2, %v10309_v52 }
 0xfbd   :  { %v11154_v38 = vpop.f32.mrb[20].mxu0 }
 0xfbe   :  { %10464 = vst.msk [vmem:[%s16824_s3 + $0x28] sm:$0xff] %vm10458_vm2, %v11154_v38  ;;  %v10319_v12 = vpop.f32.mrb[21].mxu0 }
 0xfbf   :  { %10463 = vst.msk [vmem:[%s16824_s3 + $0x20] sm:$0xff] %vm10458_vm2, %v10319_v12 }
 0xfc1   :  { %v11157_v47 = vpop.f32.mrb[22].mxu0 }
 0xfc2   :  { %10466 = vst.msk [vmem:[%s16824_s3 + $0x38] sm:$0xff] %vm10458_vm2, %v11157_v47  ;;  %v10329_v11 = vpop.f32.mrb[23].mxu0 }
 0xfc3   :  { %10465 = vst.msk [vmem:[%s16824_s3 + $0x30] sm:$0xff] %vm10458_vm2, %v10329_v11 }
 0xfc5   :  { %v11160_v61 = vpop.f32.mrb[24].mxu0 }
 0xfc6   :  { %10468 = vst.msk [vmem:[%s16824_s3 + $0x48] sm:$0xff] %vm10458_vm2, %v11160_v61  ;;  %v10339_v6 = vpop.f32.mrb[25].mxu0 }
 0xfc7   :  { %10467 = vst.msk [vmem:[%s16824_s3 + $0x40] sm:$0xff] %vm10458_vm2, %v10339_v6 }
 0xfc9   :  { %v11163_v5 = vpop.f32.mrb[26].mxu0 }
 0xfca   :  { %10470 = vst.msk [vmem:[%s16824_s3 + $0x58] sm:$0xff] %vm10458_vm2, %v11163_v5  ;;  %v10349_v51 = vpop.f32.mrb[27].mxu0 }
 0xfcb   :  { %10469 = vst.msk [vmem:[%s16824_s3 + $0x50] sm:$0xff] %vm10458_vm2, %v10349_v51 }
 0xfcd   :  { %v11166_v46 = vpop.f32.mrb[28].mxu0 }
 0xfce   :  { %10472 = vst.msk [vmem:[%s16824_s3 + $0x68] sm:$0xff] %vm10458_vm2, %v11166_v46  ;;  %v10359_v33 = vpop.f32.mrb[29].mxu0 }
 0xfcf   :  { %10471 = vst.msk [vmem:[%s16824_s3 + $0x60] sm:$0xff] %vm10458_vm2, %v10359_v33 }
 0xfd1   :  { %v11169_v30 = vpop.f32.mrb[30].mxu0 }
 0xfd2   :  { %10474 = vst.msk [vmem:[%s16824_s3 + $0x78] sm:$0xff] %vm10458_vm2, %v11169_v30  ;;  %v10369_v23 = vpop.f32.mrb[31].mxu0 }
 0xfd3   :  { %10473 = vst.msk [vmem:[%s16824_s3 + $0x70] sm:$0xff] %vm10458_vm2, %v10369_v23 }
 0xfd5   :  { %v11172_v36 = vpop.f32.mrb[32].mxu0 }
 0xfd6   :  { %10476 = vst.msk [vmem:[%s16824_s3 + $0x88] sm:$0xff] %vm10458_vm2, %v11172_v36  ;;  %v10379_v22 = vpop.f32.mrb[33].mxu0 }
 0xfd7   :  { %10475 = vst.msk [vmem:[%s16824_s3 + $0x80] sm:$0xff] %vm10458_vm2, %v10379_v22 }
 0xfd9   :  { %v11175_v4 = vpop.f32.mrb[34].mxu0 }
 0xfda   :  { %10478 = vst.msk [vmem:[%s16824_s3 + $0x98] sm:$0xff] %vm10458_vm2, %v11175_v4  ;;  %v10389_v16 = vpop.f32.mrb[35].mxu0 }
 0xfdb   :  { %10477 = vst.msk [vmem:[%s16824_s3 + $0x90] sm:$0xff] %vm10458_vm2, %v10389_v16 }
 0xfdd   :  { %v11178_v31 = vpop.f32.mrb[36].mxu0 }
 0xfde   :  { %10480 = vst.msk [vmem:[%s16824_s3 + $0xa8] sm:$0xff] %vm10458_vm2, %v11178_v31  ;;  %v10399_v37 = vpop.f32.mrb[37].mxu0 }
 0xfdf   :  { %10479 = vst.msk [vmem:[%s16824_s3 + $0xa0] sm:$0xff] %vm10458_vm2, %v10399_v37 }
 0xfe1   :  { %v11181_v39 = vpop.f32.mrb[38].mxu0 }
 0xfe2   :  { %10482 = vst.msk [vmem:[%s16824_s3 + $0xb8] sm:$0xff] %vm10458_vm2, %v11181_v39  ;;  %v10409_v0 = vpop.f32.mrb[39].mxu0 }
 0xfe3   :  { %10481 = vst.msk [vmem:[%s16824_s3 + $0xb0] sm:$0xff] %vm10458_vm2, %v10409_v0 }
 0xfe5   :  { %v11184_v13 = vpop.f32.mrb[40].mxu0 }
 0xfe6   :  { %10484 = vst.msk [vmem:[%s16824_s3 + $0xc8] sm:$0xff] %vm10458_vm2, %v11184_v13  ;;  %v10419_v15 = vpop.f32.mrb[41].mxu0 }
 0xfe7   :  { %10483 = vst.msk [vmem:[%s16824_s3 + $0xc0] sm:$0xff] %vm10458_vm2, %v10419_v15 }
 0xfe9   :  { %v11187_v3 = vpop.f32.mrb[42].mxu0 }
 0xfea   :  { %10486 = vst.msk [vmem:[%s16824_s3 + $0xd8] sm:$0xff] %vm10458_vm2, %v11187_v3  ;;  %v10429_v57 = vpop.f32.mrb[43].mxu0 }
 0xfeb   :  { %10485 = vst.msk [vmem:[%s16824_s3 + $0xd0] sm:$0xff] %vm10458_vm2, %v10429_v57 }
 0xfed   :  { %v11190_v17 = vpop.f32.mrb[44].mxu0 }
 0xfee   :  { %10488 = vst.msk [vmem:[%s16824_s3 + $0xe8] sm:$0xff] %vm10458_vm2, %v11190_v17  ;;  %v10439_v28 = vpop.f32.mrb[45].mxu0 }
 0xfef   :  { %10487 = vst.msk [vmem:[%s16824_s3 + $0xe0] sm:$0xff] %vm10458_vm2, %v10439_v28 }
 0xff1   :  { %v11193_v62 = vpop.f32.mrb[46].mxu0 }
 0xff2   :  { %10490 = vst.msk [vmem:[%s16824_s3 + $0xf8] sm:$0xff] %vm10458_vm2, %v11193_v62  ;;  %v10449_v42 = vpop.f32.mrb[47].mxu0 }
 0xff3   :  { %10489 = vst.msk [vmem:[%s16824_s3 + $0xf0] sm:$0xff] %vm10458_vm2, %v10449_v42 }

</bundles_post_ra>
